<compile_context>
chip_gen: v7x
topology: tpu7x:2x2x1
jax: 0.10.0
libtpu: 0.0.40
codegen_flags: <defaults>
</compile_context>

<pallas_src>
import functools

import jax
import jax.numpy as jnp
from jax.experimental import pallas as pl
from jax.experimental.pallas import tpu as pltpu

GL = 128   # lanes per gate block (i, f, g, o each get one full 128-lane block)
BP = 8     # sublane-padded batch


# ----------------------------------------------------------------------------
# Fused kernel: both layers, both directions, full time loop.
# ----------------------------------------------------------------------------
def _bilstm_fused_kernel(x_ref, w1ih_ref, w1hh_ref, b1_ref,
                         w2ih_ref, w2hh_ref, b2_ref,
                         out_ref, mid_ref, proj_ref):
    """Shapes (TB = T * BP):
      x_ref    (TB, GL)       layer-1 input, features zero-padded to GL lanes
      w1ih_ref (2, GL, 4*GL)  layer-1 input weights   [fwd, bwd], gate-blocked
      w1hh_ref (2, GL, 4*GL)  layer-1 recurrent weights
      b1_ref   (2, 1, 4*GL)   layer-1 combined biases (b_ih + b_hh)
      w2ih_ref (4, GL, 4*GL)  layer-2 input weights [dir x {from-fwd, from-bwd}]
      w2hh_ref (2, GL, 4*GL)
      b2_ref   (2, 1, 4*GL)
      out_ref  (2, TB, GL)    layer-2 hidden states per direction
      mid_ref  (2, TB, GL)    scratch: layer-1 hidden states per direction
      proj_ref (TB, 4*GL)     scratch: hoisted input projection of current dir
    Padded lanes stay exactly zero through the recurrence (zero weights/bias
    -> gates 0 -> c,h stay 0), so they never contaminate real lanes.
    """
    TB = x_ref.shape[0]
    T = TB // BP

    def recurrence(whh_ref, d, dst_ref):
        reverse = (d == 1)
        h = jnp.zeros((BP, GL), jnp.float32)
        c = jnp.zeros((BP, GL), jnp.float32)
        for s in range(T):                       # static unroll (T is small)
            t = (T - 1 - s) if reverse else s
            row = t * BP
            gates = (proj_ref[row:row + BP, :]
                     + jnp.dot(h, whh_ref[d],
                               preferred_element_type=jnp.float32))
            i = jax.nn.sigmoid(gates[:, 0 * GL:1 * GL])   # 128-aligned vreg slices
            f = jax.nn.sigmoid(gates[:, 1 * GL:2 * GL])
            g = jnp.tanh(gates[:, 2 * GL:3 * GL])
            o = jax.nn.sigmoid(gates[:, 3 * GL:4 * GL])
            c = f * c + i * g
            h = o * jnp.tanh(c)
            dst_ref[d, row:row + BP, :] = h               # lane-dense (8,128) store

    # ---------------- layer 1 ----------------
    for d in range(2):                           # 0 = forward, 1 = backward
        proj_ref[...] = (jnp.dot(x_ref[...], w1ih_ref[d],
                                 preferred_element_type=jnp.float32)
                         + b1_ref[d])
        recurrence(w1hh_ref, d, mid_ref)

    # ---------------- layer 2 ----------------
    # Input = concat(fwd_h1, bwd_h1); the concat is folded into w2ih row blocks,
    # so it is just a sum of two matmuls over the layer-1 scratch buffers.
    for d in range(2):
        proj_ref[...] = (jnp.dot(mid_ref[0], w2ih_ref[2 * d + 0],
                                 preferred_element_type=jnp.float32)
                         + jnp.dot(mid_ref[1], w2ih_ref[2 * d + 1],
                                   preferred_element_type=jnp.float32)
                         + b2_ref[d])
        recurrence(w2hh_ref, d, out_ref)


# ----------------------------------------------------------------------------
# Parameter init (matches torch.nn.LSTM default: U(-1/sqrt(H), 1/sqrt(H)))
# and host-side packing into the padded gate-blocked layout.
# ----------------------------------------------------------------------------
def init_bilstm_params(key, input_size, hidden_size):
    k = 1.0 / float(hidden_size) ** 0.5
    keys = jax.random.split(key, 8)

    def u(kk, shape):
        return jax.random.uniform(kk, shape, jnp.float32, -k, k)

    p = {"hidden": hidden_size, "input": input_size}
    for tag, off in (("f", 0), ("b", 4)):        # forward / backward direction
        p[f"wih_{tag}"] = u(keys[off + 0], (4 * hidden_size, input_size))
        p[f"whh_{tag}"] = u(keys[off + 1], (4 * hidden_size, hidden_size))
        p[f"bih_{tag}"] = u(keys[off + 2], (4 * hidden_size,))
        p[f"bhh_{tag}"] = u(keys[off + 3], (4 * hidden_size,))
    return p


def pack_params(p1, p2):
    """Pad/remap PyTorch-layout LSTM weights into the kernel's gate-blocked layout."""
    H1, H2 = p1["hidden"], p2["hidden"]
    assert p1["input"] <= GL and 2 * H1 == p2["input"] and H1 <= GL and H2 <= GL

    def gate_cols(w_t, H):
        # (R, 4H) -> (R, 4*GL): gate g's H columns land at the start of block g.
        out = jnp.zeros((w_t.shape[0], 4 * GL), jnp.float32)
        for g in range(4):
            out = out.at[:, g * GL:g * GL + H].set(w_t[:, g * H:(g + 1) * H])
        return out

    def pad_rows(w):
        return jnp.pad(w, ((0, GL - w.shape[0]), (0, 0)))

    w1ih, w1hh, b1, w2ih, w2hh, b2 = [], [], [], [], [], []
    for tag in ("f", "b"):
        w1ih.append(pad_rows(gate_cols(p1[f"wih_{tag}"].T, H1)))
        w1hh.append(pad_rows(gate_cols(p1[f"whh_{tag}"].T, H1)))
        b1.append(gate_cols((p1[f"bih_{tag}"] + p1[f"bhh_{tag}"])[None, :], H1))

        wt = p2[f"wih_{tag}"].T                       # (2*H1, 4*H2)
        w2ih.append(pad_rows(gate_cols(wt[:H1], H2)))  # rows fed by layer-1 fwd h
        w2ih.append(pad_rows(gate_cols(wt[H1:], H2)))  # rows fed by layer-1 bwd h
        w2hh.append(pad_rows(gate_cols(p2[f"whh_{tag}"].T, H2)))
        b2.append(gate_cols((p2[f"bih_{tag}"] + p2[f"bhh_{tag}"])[None, :], H2))

    return dict(w1ih=jnp.stack(w1ih), w1hh=jnp.stack(w1hh), b1=jnp.stack(b1),
                w2ih=jnp.stack(w2ih), w2hh=jnp.stack(w2hh), b2=jnp.stack(b2))


# ----------------------------------------------------------------------------
# Forward wrapper (single pallas_call, everything VMEM resident).
# ----------------------------------------------------------------------------
@functools.partial(jax.jit, static_argnames=("h2",))
def bilstm_forward(x, packed, *, h2):
    T, B, F = x.shape
    x_pad = jnp.zeros((T, BP, GL), jnp.float32).at[:, :B, :F].set(x)
    x_flat = x_pad.reshape(T * BP, GL)

    res = pl.pallas_call(
        _bilstm_fused_kernel,
        out_shape=jax.ShapeDtypeStruct((2, T * BP, GL), jnp.float32),
        in_specs=[pl.BlockSpec(memory_space=pltpu.MemorySpace.VMEM)] * 7,
        out_specs=pl.BlockSpec(memory_space=pltpu.MemorySpace.VMEM),
        scratch_shapes=[pltpu.VMEM((2, T * BP, GL), jnp.float32),    # layer-1 h's
                        pltpu.VMEM((T * BP, 4 * GL), jnp.float32)],  # hoisted x-proj
    )(x_flat, packed["w1ih"], packed["w1hh"], packed["b1"],
      packed["w2ih"], packed["w2hh"], packed["b2"])

    res = res.reshape(2, T, BP, GL)
    # Un-pad: real batch rows and per-direction hidden lanes; PyTorch output is
    # concat(forward, backward) along features, time-major.
    out = jnp.concatenate([res[0, :, :B, :h2], res[1, :, :B, :h2]], axis=-1)
    # TODO(synk): the PyTorch module's `if self.BR:` BatchNorm1d+PReLU tail is
    # unreachable (self.BR is never set -> AttributeError), so it is omitted.
    return out


# ----------------------------------------------------------------------------
# Plain-JAX reference (lax.scan) used only for an in-script sanity check.
# ----------------------------------------------------------------------------
def _lstm_dir_reference(x, wih, whh, bias, reverse):
    H = whh.shape[1]
    B = x.shape[1]
    xs = x[::-1] if reverse else x

    def step(carry, x_t):
        h, c = carry
        gates = x_t @ wih.T + h @ whh.T + bias
        i = jax.nn.sigmoid(gates[:, 0 * H:1 * H])
        f = jax.nn.sigmoid(gates[:, 1 * H:2 * H])
        g = jnp.tanh(gates[:, 2 * H:3 * H])
        o = jax.nn.sigmoid(gates[:, 3 * H:4 * H])
        c = f * c + i * g
        h = o * jnp.tanh(c)
        return (h, c), h

    init = (jnp.zeros((B, H), jnp.float32), jnp.zeros((B, H), jnp.float32))
    _, hs = jax.lax.scan(step, init, xs)
    return hs[::-1] if reverse else hs


def bilstm_reference(x, p1, p2):
    def layer(inp, p):
        fwd = _lstm_dir_reference(inp, p["wih_f"], p["whh_f"],
                                  p["bih_f"] + p["bhh_f"], False)
        bwd = _lstm_dir_reference(inp, p["wih_b"], p["whh_b"],
                                  p["bih_b"] + p["bhh_b"], True)
        return jnp.concatenate([fwd, bwd], axis=-1)
    return layer(layer(x, p1), p2)


if __name__ == "__main__":
    frequency = 40
    hidden_size = 20
    T, B = 8, 2

    key = jax.random.PRNGKey(0)
    kx, k1, k2 = jax.random.split(key, 3)

    x = jax.random.normal(kx, (T, B, frequency), jnp.float32)
    p1 = init_bilstm_params(k1, frequency, hidden_size)              # BiLSTM1
    p2 = init_bilstm_params(k2, 2 * hidden_size, hidden_size // 2)   # BiLSTM2
    packed = pack_params(p1, p2)

    out = bilstm_forward(x, packed, h2=hidden_size // 2)
    jax.block_until_ready(out)

    assert out.shape == (T, B, 2 * (hidden_size // 2)), out.shape
    assert out.dtype == jnp.float32

    # Sanity check against the plain-JAX reference (loose tol covers MXU precision).
    ref = bilstm_reference(x, p1, p2)
    max_err = float(jnp.max(jnp.abs(out - ref)))
    assert max_err < 1e-2, f"mismatch vs reference: {max_err}"

    print("KERNEL_OK")
</pallas_src>

<mosaic_0001>
module attributes {stable_mosaic.version = 11 : i64} {
  func.func @_bilstm_fused_kernel(%arg0: memref<64x128xf32, #tpu.memory_space<vmem>>, %arg1: memref<2x128x512xf32, #tpu.memory_space<vmem>>, %arg2: memref<2x128x512xf32, #tpu.memory_space<vmem>>, %arg3: memref<2x1x512xf32, #tpu.memory_space<vmem>>, %arg4: memref<4x128x512xf32, #tpu.memory_space<vmem>>, %arg5: memref<2x128x512xf32, #tpu.memory_space<vmem>>, %arg6: memref<2x1x512xf32, #tpu.memory_space<vmem>>, %arg7: memref<2x64x128xf32, #tpu.memory_space<vmem>>, %arg8: memref<2x64x128xf32, #tpu.memory_space<vmem>>, %arg9: memref<64x512xf32, #tpu.memory_space<vmem>>) attributes {dimension_semantics = [], scalar_prefetch = 0 : i64, scratch_operands = 2 : i64, tpu.core_type = #tpu.core_type<tc>} {
    %c0 = arith.constant 0 : index
    %c0_0 = arith.constant 0 : index
    %0 = vector.load %arg0[%c0, %c0_0] : memref<64x128xf32, #tpu.memory_space<vmem>>, vector<64x128xf32>
    %c0_1 = arith.constant 0 : index
    %c0_2 = arith.constant 0 : index
    %c0_3 = arith.constant 0 : index
    %1 = vector.load %arg1[%c0_1, %c0_2, %c0_3] : memref<2x128x512xf32, #tpu.memory_space<vmem>>, vector<1x128x512xf32>
    %2 = vector.shape_cast %1 : vector<1x128x512xf32> to vector<128x512xf32>
    %cst = arith.constant dense<0.000000e+00> : vector<64x512xf32>
    %3 = tpu.matmul %0, %2, %cst {dimension_numbers = #tpu.dot_dimension_numbers<[1], [0], [0], [1], [0, 0, 1, 1], [], []>} : vector<64x128xf32>, vector<128x512xf32>, vector<64x512xf32> -> vector<64x512xf32>
    %c0_4 = arith.constant 0 : index
    %c0_5 = arith.constant 0 : index
    %c0_6 = arith.constant 0 : index
    %4 = vector.load %arg3[%c0_4, %c0_5, %c0_6] : memref<2x1x512xf32, #tpu.memory_space<vmem>>, vector<1x1x512xf32>
    %5 = vector.shape_cast %4 : vector<1x1x512xf32> to vector<1x512xf32>
    %6 = vector.broadcast %5 : vector<1x512xf32> to vector<64x512xf32>
    %7 = arith.addf %3, %6 : vector<64x512xf32>
    %c0_7 = arith.constant 0 : index
    %c0_8 = arith.constant 0 : index
    %8 = vector.load %arg9[%c0_7, %c0_8] : memref<64x512xf32, #tpu.memory_space<vmem>>, vector<64x512xf32>
    tpu.vector_store %arg9[%c0_7, %c0_8], %7 {strides = array<i32>} : memref<64x512xf32, #tpu.memory_space<vmem>>, vector<64x512xf32>,
    %cst_9 = arith.constant 0.000000e+00 : f32
    %9 = vector.broadcast %cst_9 : f32 to vector<8x128xf32>
    %cst_10 = arith.constant 0.000000e+00 : f32
    %10 = vector.broadcast %cst_10 : f32 to vector<8x128xf32>
    %c0_11 = arith.constant 0 : index
    %c0_12 = arith.constant 0 : index
    %11 = vector.load %arg9[%c0_11, %c0_12] : memref<64x512xf32, #tpu.memory_space<vmem>>, vector<8x512xf32>
    %c0_13 = arith.constant 0 : index
    %c0_14 = arith.constant 0 : index
    %c0_15 = arith.constant 0 : index
    %12 = vector.load %arg2[%c0_13, %c0_14, %c0_15] : memref<2x128x512xf32, #tpu.memory_space<vmem>>, vector<1x128x512xf32>
    %13 = vector.shape_cast %12 : vector<1x128x512xf32> to vector<128x512xf32>
    %cst_16 = arith.constant dense<0.000000e+00> : vector<8x512xf32>
    %14 = tpu.matmul %9, %13, %cst_16 {dimension_numbers = #tpu.dot_dimension_numbers<[1], [0], [0], [1], [0, 0, 1, 1], [], []>} : vector<8x128xf32>, vector<128x512xf32>, vector<8x512xf32> -> vector<8x512xf32>
    %15 = arith.addf %11, %14 : vector<8x512xf32>
    %16 = vector.extract_strided_slice %15 {offsets = [0, 0], sizes = [8, 128], strides = [1, 1]} : vector<8x512xf32> to vector<8x128xf32>
    %17 = arith.negf %16 : vector<8x128xf32>
    %18 = math.exp %17 : vector<8x128xf32>
    %cst_17 = arith.constant 1.000000e+00 : f32
    %19 = vector.broadcast %cst_17 : f32 to vector<8x128xf32>
    %20 = arith.addf %19, %18 : vector<8x128xf32>
    %21 = arith.divf %19, %20 : vector<8x128xf32>
    %22 = vector.extract_strided_slice %15 {offsets = [0, 128], sizes = [8, 128], strides = [1, 1]} : vector<8x512xf32> to vector<8x128xf32>
    %23 = arith.negf %22 : vector<8x128xf32>
    %24 = math.exp %23 : vector<8x128xf32>
    %cst_18 = arith.constant 1.000000e+00 : f32
    %25 = vector.broadcast %cst_18 : f32 to vector<8x128xf32>
    %26 = arith.addf %25, %24 : vector<8x128xf32>
    %27 = arith.divf %25, %26 : vector<8x128xf32>
    %28 = vector.extract_strided_slice %15 {offsets = [0, 256], sizes = [8, 128], strides = [1, 1]} : vector<8x512xf32> to vector<8x128xf32>
    %29 = math.tanh %28 : vector<8x128xf32>
    %30 = vector.extract_strided_slice %15 {offsets = [0, 384], sizes = [8, 128], strides = [1, 1]} : vector<8x512xf32> to vector<8x128xf32>
    %31 = arith.negf %30 : vector<8x128xf32>
    %32 = math.exp %31 : vector<8x128xf32>
    %cst_19 = arith.constant 1.000000e+00 : f32
    %33 = vector.broadcast %cst_19 : f32 to vector<8x128xf32>
    %34 = arith.addf %33, %32 : vector<8x128xf32>
    %35 = arith.divf %33, %34 : vector<8x128xf32>
    %36 = arith.mulf %27, %10 : vector<8x128xf32>
    %37 = arith.mulf %21, %29 : vector<8x128xf32>
    %38 = arith.addf %36, %37 : vector<8x128xf32>
    %39 = math.tanh %38 : vector<8x128xf32>
    %40 = arith.mulf %35, %39 : vector<8x128xf32>
    %c0_20 = arith.constant 0 : index
    %c0_21 = arith.constant 0 : index
    %c0_22 = arith.constant 0 : index
    %41 = vector.load %arg8[%c0_20, %c0_21, %c0_22] : memref<2x64x128xf32, #tpu.memory_space<vmem>>, vector<1x8x128xf32>
    %42 = vector.shape_cast %41 : vector<1x8x128xf32> to vector<8x128xf32>
    %43 = vector.shape_cast %40 : vector<8x128xf32> to vector<1x8x128xf32>
    tpu.vector_store %arg8[%c0_20, %c0_21, %c0_22], %43 {strides = array<i32>} : memref<2x64x128xf32, #tpu.memory_space<vmem>>, vector<1x8x128xf32>,
    %c8 = arith.constant 8 : index
    %c0_23 = arith.constant 0 : index
    %44 = vector.load %arg9[%c8, %c0_23] : memref<64x512xf32, #tpu.memory_space<vmem>>, vector<8x512xf32>
    %c0_24 = arith.constant 0 : index
    %c0_25 = arith.constant 0 : index
    %c0_26 = arith.constant 0 : index
    %45 = vector.load %arg2[%c0_24, %c0_25, %c0_26] : memref<2x128x512xf32, #tpu.memory_space<vmem>>, vector<1x128x512xf32>
    %46 = vector.shape_cast %45 : vector<1x128x512xf32> to vector<128x512xf32>
    %cst_27 = arith.constant dense<0.000000e+00> : vector<8x512xf32>
    %47 = tpu.matmul %40, %46, %cst_27 {dimension_numbers = #tpu.dot_dimension_numbers<[1], [0], [0], [1], [0, 0, 1, 1], [], []>} : vector<8x128xf32>, vector<128x512xf32>, vector<8x512xf32> -> vector<8x512xf32>
    %48 = arith.addf %44, %47 : vector<8x512xf32>
    %49 = vector.extract_strided_slice %48 {offsets = [0, 0], sizes = [8, 128], strides = [1, 1]} : vector<8x512xf32> to vector<8x128xf32>
    %50 = arith.negf %49 : vector<8x128xf32>
    %51 = math.exp %50 : vector<8x128xf32>
    %cst_28 = arith.constant 1.000000e+00 : f32
    %52 = vector.broadcast %cst_28 : f32 to vector<8x128xf32>
    %53 = arith.addf %52, %51 : vector<8x128xf32>
    %54 = arith.divf %52, %53 : vector<8x128xf32>
    %55 = vector.extract_strided_slice %48 {offsets = [0, 128], sizes = [8, 128], strides = [1, 1]} : vector<8x512xf32> to vector<8x128xf32>
    %56 = arith.negf %55 : vector<8x128xf32>
    %57 = math.exp %56 : vector<8x128xf32>
    %cst_29 = arith.constant 1.000000e+00 : f32
    %58 = vector.broadcast %cst_29 : f32 to vector<8x128xf32>
    %59 = arith.addf %58, %57 : vector<8x128xf32>
    %60 = arith.divf %58, %59 : vector<8x128xf32>
    %61 = vector.extract_strided_slice %48 {offsets = [0, 256], sizes = [8, 128], strides = [1, 1]} : vector<8x512xf32> to vector<8x128xf32>
    %62 = math.tanh %61 : vector<8x128xf32>
    %63 = vector.extract_strided_slice %48 {offsets = [0, 384], sizes = [8, 128], strides = [1, 1]} : vector<8x512xf32> to vector<8x128xf32>
    %64 = arith.negf %63 : vector<8x128xf32>
    %65 = math.exp %64 : vector<8x128xf32>
    %cst_30 = arith.constant 1.000000e+00 : f32
    %66 = vector.broadcast %cst_30 : f32 to vector<8x128xf32>
    %67 = arith.addf %66, %65 : vector<8x128xf32>
    %68 = arith.divf %66, %67 : vector<8x128xf32>
    %69 = arith.mulf %60, %38 : vector<8x128xf32>
    %70 = arith.mulf %54, %62 : vector<8x128xf32>
    %71 = arith.addf %69, %70 : vector<8x128xf32>
    %72 = math.tanh %71 : vector<8x128xf32>
    %73 = arith.mulf %68, %72 : vector<8x128xf32>
    %c0_31 = arith.constant 0 : index
    %c8_32 = arith.constant 8 : index
    %c0_33 = arith.constant 0 : index
    %74 = vector.load %arg8[%c0_31, %c8_32, %c0_33] : memref<2x64x128xf32, #tpu.memory_space<vmem>>, vector<1x8x128xf32>
    %75 = vector.shape_cast %74 : vector<1x8x128xf32> to vector<8x128xf32>
    %76 = vector.shape_cast %73 : vector<8x128xf32> to vector<1x8x128xf32>
    tpu.vector_store %arg8[%c0_31, %c8_32, %c0_33], %76 {strides = array<i32>} : memref<2x64x128xf32, #tpu.memory_space<vmem>>, vector<1x8x128xf32>,
    %c16 = arith.constant 16 : index
    %c0_34 = arith.constant 0 : index
    %77 = vector.load %arg9[%c16, %c0_34] : memref<64x512xf32, #tpu.memory_space<vmem>>, vector<8x512xf32>
    %c0_35 = arith.constant 0 : index
    %c0_36 = arith.constant 0 : index
    %c0_37 = arith.constant 0 : index
    %78 = vector.load %arg2[%c0_35, %c0_36, %c0_37] : memref<2x128x512xf32, #tpu.memory_space<vmem>>, vector<1x128x512xf32>
    %79 = vector.shape_cast %78 : vector<1x128x512xf32> to vector<128x512xf32>
    %cst_38 = arith.constant dense<0.000000e+00> : vector<8x512xf32>
    %80 = tpu.matmul %73, %79, %cst_38 {dimension_numbers = #tpu.dot_dimension_numbers<[1], [0], [0], [1], [0, 0, 1, 1], [], []>} : vector<8x128xf32>, vector<128x512xf32>, vector<8x512xf32> -> vector<8x512xf32>
    %81 = arith.addf %77, %80 : vector<8x512xf32>
    %82 = vector.extract_strided_slice %81 {offsets = [0, 0], sizes = [8, 128], strides = [1, 1]} : vector<8x512xf32> to vector<8x128xf32>
    %83 = arith.negf %82 : vector<8x128xf32>
    %84 = math.exp %83 : vector<8x128xf32>
    %cst_39 = arith.constant 1.000000e+00 : f32
    %85 = vector.broadcast %cst_39 : f32 to vector<8x128xf32>
    %86 = arith.addf %85, %84 : vector<8x128xf32>
    %87 = arith.divf %85, %86 : vector<8x128xf32>
    %88 = vector.extract_strided_slice %81 {offsets = [0, 128], sizes = [8, 128], strides = [1, 1]} : vector<8x512xf32> to vector<8x128xf32>
    %89 = arith.negf %88 : vector<8x128xf32>
    %90 = math.exp %89 : vector<8x128xf32>
    %cst_40 = arith.constant 1.000000e+00 : f32
    %91 = vector.broadcast %cst_40 : f32 to vector<8x128xf32>
    %92 = arith.addf %91, %90 : vector<8x128xf32>
    %93 = arith.divf %91, %92 : vector<8x128xf32>
    %94 = vector.extract_strided_slice %81 {offsets = [0, 256], sizes = [8, 128], strides = [1, 1]} : vector<8x512xf32> to vector<8x128xf32>
    %95 = math.tanh %94 : vector<8x128xf32>
    %96 = vector.extract_strided_slice %81 {offsets = [0, 384], sizes = [8, 128], strides = [1, 1]} : vector<8x512xf32> to vector<8x128xf32>
    %97 = arith.negf %96 : vector<8x128xf32>
    %98 = math.exp %97 : vector<8x128xf32>
    %cst_41 = arith.constant 1.000000e+00 : f32
    %99 = vector.broadcast %cst_41 : f32 to vector<8x128xf32>
    %100 = arith.addf %99, %98 : vector<8x128xf32>
    %101 = arith.divf %99, %100 : vector<8x128xf32>
    %102 = arith.mulf %93, %71 : vector<8x128xf32>
    %103 = arith.mulf %87, %95 : vector<8x128xf32>
    %104 = arith.addf %102, %103 : vector<8x128xf32>
    %105 = math.tanh %104 : vector<8x128xf32>
    %106 = arith.mulf %101, %105 : vector<8x128xf32>
    %c0_42 = arith.constant 0 : index
    %c16_43 = arith.constant 16 : index
    %c0_44 = arith.constant 0 : index
    %107 = vector.load %arg8[%c0_42, %c16_43, %c0_44] : memref<2x64x128xf32, #tpu.memory_space<vmem>>, vector<1x8x128xf32>
    %108 = vector.shape_cast %107 : vector<1x8x128xf32> to vector<8x128xf32>
    %109 = vector.shape_cast %106 : vector<8x128xf32> to vector<1x8x128xf32>
    tpu.vector_store %arg8[%c0_42, %c16_43, %c0_44], %109 {strides = array<i32>} : memref<2x64x128xf32, #tpu.memory_space<vmem>>, vector<1x8x128xf32>,
    %c24 = arith.constant 24 : index
    %c0_45 = arith.constant 0 : index
    %110 = vector.load %arg9[%c24, %c0_45] : memref<64x512xf32, #tpu.memory_space<vmem>>, vector<8x512xf32>
    %c0_46 = arith.constant 0 : index
    %c0_47 = arith.constant 0 : index
    %c0_48 = arith.constant 0 : index
    %111 = vector.load %arg2[%c0_46, %c0_47, %c0_48] : memref<2x128x512xf32, #tpu.memory_space<vmem>>, vector<1x128x512xf32>
    %112 = vector.shape_cast %111 : vector<1x128x512xf32> to vector<128x512xf32>
    %cst_49 = arith.constant dense<0.000000e+00> : vector<8x512xf32>
    %113 = tpu.matmul %106, %112, %cst_49 {dimension_numbers = #tpu.dot_dimension_numbers<[1], [0], [0], [1], [0, 0, 1, 1], [], []>} : vector<8x128xf32>, vector<128x512xf32>, vector<8x512xf32> -> vector<8x512xf32>
    %114 = arith.addf %110, %113 : vector<8x512xf32>
    %115 = vector.extract_strided_slice %114 {offsets = [0, 0], sizes = [8, 128], strides = [1, 1]} : vector<8x512xf32> to vector<8x128xf32>
    %116 = arith.negf %115 : vector<8x128xf32>
    %117 = math.exp %116 : vector<8x128xf32>
    %cst_50 = arith.constant 1.000000e+00 : f32
    %118 = vector.broadcast %cst_50 : f32 to vector<8x128xf32>
    %119 = arith.addf %118, %117 : vector<8x128xf32>
    %120 = arith.divf %118, %119 : vector<8x128xf32>
    %121 = vector.extract_strided_slice %114 {offsets = [0, 128], sizes = [8, 128], strides = [1, 1]} : vector<8x512xf32> to vector<8x128xf32>
    %122 = arith.negf %121 : vector<8x128xf32>
    %123 = math.exp %122 : vector<8x128xf32>
    %cst_51 = arith.constant 1.000000e+00 : f32
    %124 = vector.broadcast %cst_51 : f32 to vector<8x128xf32>
    %125 = arith.addf %124, %123 : vector<8x128xf32>
    %126 = arith.divf %124, %125 : vector<8x128xf32>
    %127 = vector.extract_strided_slice %114 {offsets = [0, 256], sizes = [8, 128], strides = [1, 1]} : vector<8x512xf32> to vector<8x128xf32>
    %128 = math.tanh %127 : vector<8x128xf32>
    %129 = vector.extract_strided_slice %114 {offsets = [0, 384], sizes = [8, 128], strides = [1, 1]} : vector<8x512xf32> to vector<8x128xf32>
    %130 = arith.negf %129 : vector<8x128xf32>
    %131 = math.exp %130 : vector<8x128xf32>
    %cst_52 = arith.constant 1.000000e+00 : f32
    %132 = vector.broadcast %cst_52 : f32 to vector<8x128xf32>
    %133 = arith.addf %132, %131 : vector<8x128xf32>
    %134 = arith.divf %132, %133 : vector<8x128xf32>
    %135 = arith.mulf %126, %104 : vector<8x128xf32>
    %136 = arith.mulf %120, %128 : vector<8x128xf32>
    %137 = arith.addf %135, %136 : vector<8x128xf32>
    %138 = math.tanh %137 : vector<8x128xf32>
    %139 = arith.mulf %134, %138 : vector<8x128xf32>
    %c0_53 = arith.constant 0 : index
    %c24_54 = arith.constant 24 : index
    %c0_55 = arith.constant 0 : index
    %140 = vector.load %arg8[%c0_53, %c24_54, %c0_55] : memref<2x64x128xf32, #tpu.memory_space<vmem>>, vector<1x8x128xf32>
    %141 = vector.shape_cast %140 : vector<1x8x128xf32> to vector<8x128xf32>
    %142 = vector.shape_cast %139 : vector<8x128xf32> to vector<1x8x128xf32>
    tpu.vector_store %arg8[%c0_53, %c24_54, %c0_55], %142 {strides = array<i32>} : memref<2x64x128xf32, #tpu.memory_space<vmem>>, vector<1x8x128xf32>,
    %c32 = arith.constant 32 : index
    %c0_56 = arith.constant 0 : index
    %143 = vector.load %arg9[%c32, %c0_56] : memref<64x512xf32, #tpu.memory_space<vmem>>, vector<8x512xf32>
    %c0_57 = arith.constant 0 : index
    %c0_58 = arith.constant 0 : index
    %c0_59 = arith.constant 0 : index
    %144 = vector.load %arg2[%c0_57, %c0_58, %c0_59] : memref<2x128x512xf32, #tpu.memory_space<vmem>>, vector<1x128x512xf32>
    %145 = vector.shape_cast %144 : vector<1x128x512xf32> to vector<128x512xf32>
    %cst_60 = arith.constant dense<0.000000e+00> : vector<8x512xf32>
    %146 = tpu.matmul %139, %145, %cst_60 {dimension_numbers = #tpu.dot_dimension_numbers<[1], [0], [0], [1], [0, 0, 1, 1], [], []>} : vector<8x128xf32>, vector<128x512xf32>, vector<8x512xf32> -> vector<8x512xf32>
    %147 = arith.addf %143, %146 : vector<8x512xf32>
    %148 = vector.extract_strided_slice %147 {offsets = [0, 0], sizes = [8, 128], strides = [1, 1]} : vector<8x512xf32> to vector<8x128xf32>
    %149 = arith.negf %148 : vector<8x128xf32>
    %150 = math.exp %149 : vector<8x128xf32>
    %cst_61 = arith.constant 1.000000e+00 : f32
    %151 = vector.broadcast %cst_61 : f32 to vector<8x128xf32>
    %152 = arith.addf %151, %150 : vector<8x128xf32>
    %153 = arith.divf %151, %152 : vector<8x128xf32>
    %154 = vector.extract_strided_slice %147 {offsets = [0, 128], sizes = [8, 128], strides = [1, 1]} : vector<8x512xf32> to vector<8x128xf32>
    %155 = arith.negf %154 : vector<8x128xf32>
    %156 = math.exp %155 : vector<8x128xf32>
    %cst_62 = arith.constant 1.000000e+00 : f32
    %157 = vector.broadcast %cst_62 : f32 to vector<8x128xf32>
    %158 = arith.addf %157, %156 : vector<8x128xf32>
    %159 = arith.divf %157, %158 : vector<8x128xf32>
    %160 = vector.extract_strided_slice %147 {offsets = [0, 256], sizes = [8, 128], strides = [1, 1]} : vector<8x512xf32> to vector<8x128xf32>
    %161 = math.tanh %160 : vector<8x128xf32>
    %162 = vector.extract_strided_slice %147 {offsets = [0, 384], sizes = [8, 128], strides = [1, 1]} : vector<8x512xf32> to vector<8x128xf32>
    %163 = arith.negf %162 : vector<8x128xf32>
    %164 = math.exp %163 : vector<8x128xf32>
    %cst_63 = arith.constant 1.000000e+00 : f32
    %165 = vector.broadcast %cst_63 : f32 to vector<8x128xf32>
    %166 = arith.addf %165, %164 : vector<8x128xf32>
    %167 = arith.divf %165, %166 : vector<8x128xf32>
    %168 = arith.mulf %159, %137 : vector<8x128xf32>
    %169 = arith.mulf %153, %161 : vector<8x128xf32>
    %170 = arith.addf %168, %169 : vector<8x128xf32>
    %171 = math.tanh %170 : vector<8x128xf32>
    %172 = arith.mulf %167, %171 : vector<8x128xf32>
    %c0_64 = arith.constant 0 : index
    %c32_65 = arith.constant 32 : index
    %c0_66 = arith.constant 0 : index
    %173 = vector.load %arg8[%c0_64, %c32_65, %c0_66] : memref<2x64x128xf32, #tpu.memory_space<vmem>>, vector<1x8x128xf32>
    %174 = vector.shape_cast %173 : vector<1x8x128xf32> to vector<8x128xf32>
    %175 = vector.shape_cast %172 : vector<8x128xf32> to vector<1x8x128xf32>
    tpu.vector_store %arg8[%c0_64, %c32_65, %c0_66], %175 {strides = array<i32>} : memref<2x64x128xf32, #tpu.memory_space<vmem>>, vector<1x8x128xf32>,
    %c40 = arith.constant 40 : index
    %c0_67 = arith.constant 0 : index
    %176 = vector.load %arg9[%c40, %c0_67] : memref<64x512xf32, #tpu.memory_space<vmem>>, vector<8x512xf32>
    %c0_68 = arith.constant 0 : index
    %c0_69 = arith.constant 0 : index
    %c0_70 = arith.constant 0 : index
    %177 = vector.load %arg2[%c0_68, %c0_69, %c0_70] : memref<2x128x512xf32, #tpu.memory_space<vmem>>, vector<1x128x512xf32>
    %178 = vector.shape_cast %177 : vector<1x128x512xf32> to vector<128x512xf32>
    %cst_71 = arith.constant dense<0.000000e+00> : vector<8x512xf32>
    %179 = tpu.matmul %172, %178, %cst_71 {dimension_numbers = #tpu.dot_dimension_numbers<[1], [0], [0], [1], [0, 0, 1, 1], [], []>} : vector<8x128xf32>, vector<128x512xf32>, vector<8x512xf32> -> vector<8x512xf32>
    %180 = arith.addf %176, %179 : vector<8x512xf32>
    %181 = vector.extract_strided_slice %180 {offsets = [0, 0], sizes = [8, 128], strides = [1, 1]} : vector<8x512xf32> to vector<8x128xf32>
    %182 = arith.negf %181 : vector<8x128xf32>
    %183 = math.exp %182 : vector<8x128xf32>
    %cst_72 = arith.constant 1.000000e+00 : f32
    %184 = vector.broadcast %cst_72 : f32 to vector<8x128xf32>
    %185 = arith.addf %184, %183 : vector<8x128xf32>
    %186 = arith.divf %184, %185 : vector<8x128xf32>
    %187 = vector.extract_strided_slice %180 {offsets = [0, 128], sizes = [8, 128], strides = [1, 1]} : vector<8x512xf32> to vector<8x128xf32>
    %188 = arith.negf %187 : vector<8x128xf32>
    %189 = math.exp %188 : vector<8x128xf32>
    %cst_73 = arith.constant 1.000000e+00 : f32
    %190 = vector.broadcast %cst_73 : f32 to vector<8x128xf32>
    %191 = arith.addf %190, %189 : vector<8x128xf32>
    %192 = arith.divf %190, %191 : vector<8x128xf32>
    %193 = vector.extract_strided_slice %180 {offsets = [0, 256], sizes = [8, 128], strides = [1, 1]} : vector<8x512xf32> to vector<8x128xf32>
    %194 = math.tanh %193 : vector<8x128xf32>
    %195 = vector.extract_strided_slice %180 {offsets = [0, 384], sizes = [8, 128], strides = [1, 1]} : vector<8x512xf32> to vector<8x128xf32>
    %196 = arith.negf %195 : vector<8x128xf32>
    %197 = math.exp %196 : vector<8x128xf32>
    %cst_74 = arith.constant 1.000000e+00 : f32
    %198 = vector.broadcast %cst_74 : f32 to vector<8x128xf32>
    %199 = arith.addf %198, %197 : vector<8x128xf32>
    %200 = arith.divf %198, %199 : vector<8x128xf32>
    %201 = arith.mulf %192, %170 : vector<8x128xf32>
    %202 = arith.mulf %186, %194 : vector<8x128xf32>
    %203 = arith.addf %201, %202 : vector<8x128xf32>
    %204 = math.tanh %203 : vector<8x128xf32>
    %205 = arith.mulf %200, %204 : vector<8x128xf32>
    %c0_75 = arith.constant 0 : index
    %c40_76 = arith.constant 40 : index
    %c0_77 = arith.constant 0 : index
    %206 = vector.load %arg8[%c0_75, %c40_76, %c0_77] : memref<2x64x128xf32, #tpu.memory_space<vmem>>, vector<1x8x128xf32>
    %207 = vector.shape_cast %206 : vector<1x8x128xf32> to vector<8x128xf32>
    %208 = vector.shape_cast %205 : vector<8x128xf32> to vector<1x8x128xf32>
    tpu.vector_store %arg8[%c0_75, %c40_76, %c0_77], %208 {strides = array<i32>} : memref<2x64x128xf32, #tpu.memory_space<vmem>>, vector<1x8x128xf32>,
    %c48 = arith.constant 48 : index
    %c0_78 = arith.constant 0 : index
    %209 = vector.load %arg9[%c48, %c0_78] : memref<64x512xf32, #tpu.memory_space<vmem>>, vector<8x512xf32>
    %c0_79 = arith.constant 0 : index
    %c0_80 = arith.constant 0 : index
    %c0_81 = arith.constant 0 : index
    %210 = vector.load %arg2[%c0_79, %c0_80, %c0_81] : memref<2x128x512xf32, #tpu.memory_space<vmem>>, vector<1x128x512xf32>
    %211 = vector.shape_cast %210 : vector<1x128x512xf32> to vector<128x512xf32>
    %cst_82 = arith.constant dense<0.000000e+00> : vector<8x512xf32>
    %212 = tpu.matmul %205, %211, %cst_82 {dimension_numbers = #tpu.dot_dimension_numbers<[1], [0], [0], [1], [0, 0, 1, 1], [], []>} : vector<8x128xf32>, vector<128x512xf32>, vector<8x512xf32> -> vector<8x512xf32>
    %213 = arith.addf %209, %212 : vector<8x512xf32>
    %214 = vector.extract_strided_slice %213 {offsets = [0, 0], sizes = [8, 128], strides = [1, 1]} : vector<8x512xf32> to vector<8x128xf32>
    %215 = arith.negf %214 : vector<8x128xf32>
    %216 = math.exp %215 : vector<8x128xf32>
    %cst_83 = arith.constant 1.000000e+00 : f32
    %217 = vector.broadcast %cst_83 : f32 to vector<8x128xf32>
    %218 = arith.addf %217, %216 : vector<8x128xf32>
    %219 = arith.divf %217, %218 : vector<8x128xf32>
    %220 = vector.extract_strided_slice %213 {offsets = [0, 128], sizes = [8, 128], strides = [1, 1]} : vector<8x512xf32> to vector<8x128xf32>
    %221 = arith.negf %220 : vector<8x128xf32>
    %222 = math.exp %221 : vector<8x128xf32>
    %cst_84 = arith.constant 1.000000e+00 : f32
    %223 = vector.broadcast %cst_84 : f32 to vector<8x128xf32>
    %224 = arith.addf %223, %222 : vector<8x128xf32>
    %225 = arith.divf %223, %224 : vector<8x128xf32>
    %226 = vector.extract_strided_slice %213 {offsets = [0, 256], sizes = [8, 128], strides = [1, 1]} : vector<8x512xf32> to vector<8x128xf32>
    %227 = math.tanh %226 : vector<8x128xf32>
    %228 = vector.extract_strided_slice %213 {offsets = [0, 384], sizes = [8, 128], strides = [1, 1]} : vector<8x512xf32> to vector<8x128xf32>
    %229 = arith.negf %228 : vector<8x128xf32>
    %230 = math.exp %229 : vector<8x128xf32>
    %cst_85 = arith.constant 1.000000e+00 : f32
    %231 = vector.broadcast %cst_85 : f32 to vector<8x128xf32>
    %232 = arith.addf %231, %230 : vector<8x128xf32>
    %233 = arith.divf %231, %232 : vector<8x128xf32>
    %234 = arith.mulf %225, %203 : vector<8x128xf32>
    %235 = arith.mulf %219, %227 : vector<8x128xf32>
    %236 = arith.addf %234, %235 : vector<8x128xf32>
    %237 = math.tanh %236 : vector<8x128xf32>
    %238 = arith.mulf %233, %237 : vector<8x128xf32>
    %c0_86 = arith.constant 0 : index
    %c48_87 = arith.constant 48 : index
    %c0_88 = arith.constant 0 : index
    %239 = vector.load %arg8[%c0_86, %c48_87, %c0_88] : memref<2x64x128xf32, #tpu.memory_space<vmem>>, vector<1x8x128xf32>
    %240 = vector.shape_cast %239 : vector<1x8x128xf32> to vector<8x128xf32>
    %241 = vector.shape_cast %238 : vector<8x128xf32> to vector<1x8x128xf32>
    tpu.vector_store %arg8[%c0_86, %c48_87, %c0_88], %241 {strides = array<i32>} : memref<2x64x128xf32, #tpu.memory_space<vmem>>, vector<1x8x128xf32>,
    %c56 = arith.constant 56 : index
    %c0_89 = arith.constant 0 : index
    %242 = vector.load %arg9[%c56, %c0_89] : memref<64x512xf32, #tpu.memory_space<vmem>>, vector<8x512xf32>
    %c0_90 = arith.constant 0 : index
    %c0_91 = arith.constant 0 : index
    %c0_92 = arith.constant 0 : index
    %243 = vector.load %arg2[%c0_90, %c0_91, %c0_92] : memref<2x128x512xf32, #tpu.memory_space<vmem>>, vector<1x128x512xf32>
    %244 = vector.shape_cast %243 : vector<1x128x512xf32> to vector<128x512xf32>
    %cst_93 = arith.constant dense<0.000000e+00> : vector<8x512xf32>
    %245 = tpu.matmul %238, %244, %cst_93 {dimension_numbers = #tpu.dot_dimension_numbers<[1], [0], [0], [1], [0, 0, 1, 1], [], []>} : vector<8x128xf32>, vector<128x512xf32>, vector<8x512xf32> -> vector<8x512xf32>
    %246 = arith.addf %242, %245 : vector<8x512xf32>
    %247 = vector.extract_strided_slice %246 {offsets = [0, 0], sizes = [8, 128], strides = [1, 1]} : vector<8x512xf32> to vector<8x128xf32>
    %248 = arith.negf %247 : vector<8x128xf32>
    %249 = math.exp %248 : vector<8x128xf32>
    %cst_94 = arith.constant 1.000000e+00 : f32
    %250 = vector.broadcast %cst_94 : f32 to vector<8x128xf32>
    %251 = arith.addf %250, %249 : vector<8x128xf32>
    %252 = arith.divf %250, %251 : vector<8x128xf32>
    %253 = vector.extract_strided_slice %246 {offsets = [0, 128], sizes = [8, 128], strides = [1, 1]} : vector<8x512xf32> to vector<8x128xf32>
    %254 = arith.negf %253 : vector<8x128xf32>
    %255 = math.exp %254 : vector<8x128xf32>
    %cst_95 = arith.constant 1.000000e+00 : f32
    %256 = vector.broadcast %cst_95 : f32 to vector<8x128xf32>
    %257 = arith.addf %256, %255 : vector<8x128xf32>
    %258 = arith.divf %256, %257 : vector<8x128xf32>
    %259 = vector.extract_strided_slice %246 {offsets = [0, 256], sizes = [8, 128], strides = [1, 1]} : vector<8x512xf32> to vector<8x128xf32>
    %260 = math.tanh %259 : vector<8x128xf32>
    %261 = vector.extract_strided_slice %246 {offsets = [0, 384], sizes = [8, 128], strides = [1, 1]} : vector<8x512xf32> to vector<8x128xf32>
    %262 = arith.negf %261 : vector<8x128xf32>
    %263 = math.exp %262 : vector<8x128xf32>
    %cst_96 = arith.constant 1.000000e+00 : f32
    %264 = vector.broadcast %cst_96 : f32 to vector<8x128xf32>
    %265 = arith.addf %264, %263 : vector<8x128xf32>
    %266 = arith.divf %264, %265 : vector<8x128xf32>
    %267 = arith.mulf %258, %236 : vector<8x128xf32>
    %268 = arith.mulf %252, %260 : vector<8x128xf32>
    %269 = arith.addf %267, %268 : vector<8x128xf32>
    %270 = math.tanh %269 : vector<8x128xf32>
    %271 = arith.mulf %266, %270 : vector<8x128xf32>
    %c0_97 = arith.constant 0 : index
    %c56_98 = arith.constant 56 : index
    %c0_99 = arith.constant 0 : index
    %272 = vector.load %arg8[%c0_97, %c56_98, %c0_99] : memref<2x64x128xf32, #tpu.memory_space<vmem>>, vector<1x8x128xf32>
    %273 = vector.shape_cast %272 : vector<1x8x128xf32> to vector<8x128xf32>
    %274 = vector.shape_cast %271 : vector<8x128xf32> to vector<1x8x128xf32>
    tpu.vector_store %arg8[%c0_97, %c56_98, %c0_99], %274 {strides = array<i32>} : memref<2x64x128xf32, #tpu.memory_space<vmem>>, vector<1x8x128xf32>,
    %c0_100 = arith.constant 0 : index
    %c0_101 = arith.constant 0 : index
    %275 = vector.load %arg0[%c0_100, %c0_101] : memref<64x128xf32, #tpu.memory_space<vmem>>, vector<64x128xf32>
    %c1 = arith.constant 1 : index
    %c0_102 = arith.constant 0 : index
    %c0_103 = arith.constant 0 : index
    %276 = vector.load %arg1[%c1, %c0_102, %c0_103] : memref<2x128x512xf32, #tpu.memory_space<vmem>>, vector<1x128x512xf32>
    %277 = vector.shape_cast %276 : vector<1x128x512xf32> to vector<128x512xf32>
    %cst_104 = arith.constant dense<0.000000e+00> : vector<64x512xf32>
    %278 = tpu.matmul %275, %277, %cst_104 {dimension_numbers = #tpu.dot_dimension_numbers<[1], [0], [0], [1], [0, 0, 1, 1], [], []>} : vector<64x128xf32>, vector<128x512xf32>, vector<64x512xf32> -> vector<64x512xf32>
    %c1_105 = arith.constant 1 : index
    %c0_106 = arith.constant 0 : index
    %c0_107 = arith.constant 0 : index
    %279 = vector.load %arg3[%c1_105, %c0_106, %c0_107] : memref<2x1x512xf32, #tpu.memory_space<vmem>>, vector<1x1x512xf32>
    %280 = vector.shape_cast %279 : vector<1x1x512xf32> to vector<1x512xf32>
    %281 = vector.broadcast %280 : vector<1x512xf32> to vector<64x512xf32>
    %282 = arith.addf %278, %281 : vector<64x512xf32>
    %c0_108 = arith.constant 0 : index
    %c0_109 = arith.constant 0 : index
    %283 = vector.load %arg9[%c0_108, %c0_109] : memref<64x512xf32, #tpu.memory_space<vmem>>, vector<64x512xf32>
    tpu.vector_store %arg9[%c0_108, %c0_109], %282 {strides = array<i32>} : memref<64x512xf32, #tpu.memory_space<vmem>>, vector<64x512xf32>,
    %cst_110 = arith.constant 0.000000e+00 : f32
    %284 = vector.broadcast %cst_110 : f32 to vector<8x128xf32>
    %cst_111 = arith.constant 0.000000e+00 : f32
    %285 = vector.broadcast %cst_111 : f32 to vector<8x128xf32>
    %c56_112 = arith.constant 56 : index
    %c0_113 = arith.constant 0 : index
    %286 = vector.load %arg9[%c56_112, %c0_113] : memref<64x512xf32, #tpu.memory_space<vmem>>, vector<8x512xf32>
    %c1_114 = arith.constant 1 : index
    %c0_115 = arith.constant 0 : index
    %c0_116 = arith.constant 0 : index
    %287 = vector.load %arg2[%c1_114, %c0_115, %c0_116] : memref<2x128x512xf32, #tpu.memory_space<vmem>>, vector<1x128x512xf32>
    %288 = vector.shape_cast %287 : vector<1x128x512xf32> to vector<128x512xf32>
    %cst_117 = arith.constant dense<0.000000e+00> : vector<8x512xf32>
    %289 = tpu.matmul %284, %288, %cst_117 {dimension_numbers = #tpu.dot_dimension_numbers<[1], [0], [0], [1], [0, 0, 1, 1], [], []>} : vector<8x128xf32>, vector<128x512xf32>, vector<8x512xf32> -> vector<8x512xf32>
    %290 = arith.addf %286, %289 : vector<8x512xf32>
    %291 = vector.extract_strided_slice %290 {offsets = [0, 0], sizes = [8, 128], strides = [1, 1]} : vector<8x512xf32> to vector<8x128xf32>
    %292 = arith.negf %291 : vector<8x128xf32>
    %293 = math.exp %292 : vector<8x128xf32>
    %cst_118 = arith.constant 1.000000e+00 : f32
    %294 = vector.broadcast %cst_118 : f32 to vector<8x128xf32>
    %295 = arith.addf %294, %293 : vector<8x128xf32>
    %296 = arith.divf %294, %295 : vector<8x128xf32>
    %297 = vector.extract_strided_slice %290 {offsets = [0, 128], sizes = [8, 128], strides = [1, 1]} : vector<8x512xf32> to vector<8x128xf32>
    %298 = arith.negf %297 : vector<8x128xf32>
    %299 = math.exp %298 : vector<8x128xf32>
    %cst_119 = arith.constant 1.000000e+00 : f32
    %300 = vector.broadcast %cst_119 : f32 to vector<8x128xf32>
    %301 = arith.addf %300, %299 : vector<8x128xf32>
    %302 = arith.divf %300, %301 : vector<8x128xf32>
    %303 = vector.extract_strided_slice %290 {offsets = [0, 256], sizes = [8, 128], strides = [1, 1]} : vector<8x512xf32> to vector<8x128xf32>
    %304 = math.tanh %303 : vector<8x128xf32>
    %305 = vector.extract_strided_slice %290 {offsets = [0, 384], sizes = [8, 128], strides = [1, 1]} : vector<8x512xf32> to vector<8x128xf32>
    %306 = arith.negf %305 : vector<8x128xf32>
    %307 = math.exp %306 : vector<8x128xf32>
    %cst_120 = arith.constant 1.000000e+00 : f32
    %308 = vector.broadcast %cst_120 : f32 to vector<8x128xf32>
    %309 = arith.addf %308, %307 : vector<8x128xf32>
    %310 = arith.divf %308, %309 : vector<8x128xf32>
    %311 = arith.mulf %302, %285 : vector<8x128xf32>
    %312 = arith.mulf %296, %304 : vector<8x128xf32>
    %313 = arith.addf %311, %312 : vector<8x128xf32>
    %314 = math.tanh %313 : vector<8x128xf32>
    %315 = arith.mulf %310, %314 : vector<8x128xf32>
    %c1_121 = arith.constant 1 : index
    %c56_122 = arith.constant 56 : index
    %c0_123 = arith.constant 0 : index
    %316 = vector.load %arg8[%c1_121, %c56_122, %c0_123] : memref<2x64x128xf32, #tpu.memory_space<vmem>>, vector<1x8x128xf32>
    %317 = vector.shape_cast %316 : vector<1x8x128xf32> to vector<8x128xf32>
    %318 = vector.shape_cast %315 : vector<8x128xf32> to vector<1x8x128xf32>
    tpu.vector_store %arg8[%c1_121, %c56_122, %c0_123], %318 {strides = array<i32>} : memref<2x64x128xf32, #tpu.memory_space<vmem>>, vector<1x8x128xf32>,
    %c48_124 = arith.constant 48 : index
    %c0_125 = arith.constant 0 : index
    %319 = vector.load %arg9[%c48_124, %c0_125] : memref<64x512xf32, #tpu.memory_space<vmem>>, vector<8x512xf32>
    %c1_126 = arith.constant 1 : index
    %c0_127 = arith.constant 0 : index
    %c0_128 = arith.constant 0 : index
    %320 = vector.load %arg2[%c1_126, %c0_127, %c0_128] : memref<2x128x512xf32, #tpu.memory_space<vmem>>, vector<1x128x512xf32>
    %321 = vector.shape_cast %320 : vector<1x128x512xf32> to vector<128x512xf32>
    %cst_129 = arith.constant dense<0.000000e+00> : vector<8x512xf32>
    %322 = tpu.matmul %315, %321, %cst_129 {dimension_numbers = #tpu.dot_dimension_numbers<[1], [0], [0], [1], [0, 0, 1, 1], [], []>} : vector<8x128xf32>, vector<128x512xf32>, vector<8x512xf32> -> vector<8x512xf32>
    %323 = arith.addf %319, %322 : vector<8x512xf32>
    %324 = vector.extract_strided_slice %323 {offsets = [0, 0], sizes = [8, 128], strides = [1, 1]} : vector<8x512xf32> to vector<8x128xf32>
    %325 = arith.negf %324 : vector<8x128xf32>
    %326 = math.exp %325 : vector<8x128xf32>
    %cst_130 = arith.constant 1.000000e+00 : f32
    %327 = vector.broadcast %cst_130 : f32 to vector<8x128xf32>
    %328 = arith.addf %327, %326 : vector<8x128xf32>
    %329 = arith.divf %327, %328 : vector<8x128xf32>
    %330 = vector.extract_strided_slice %323 {offsets = [0, 128], sizes = [8, 128], strides = [1, 1]} : vector<8x512xf32> to vector<8x128xf32>
    %331 = arith.negf %330 : vector<8x128xf32>
    %332 = math.exp %331 : vector<8x128xf32>
    %cst_131 = arith.constant 1.000000e+00 : f32
    %333 = vector.broadcast %cst_131 : f32 to vector<8x128xf32>
    %334 = arith.addf %333, %332 : vector<8x128xf32>
    %335 = arith.divf %333, %334 : vector<8x128xf32>
    %336 = vector.extract_strided_slice %323 {offsets = [0, 256], sizes = [8, 128], strides = [1, 1]} : vector<8x512xf32> to vector<8x128xf32>
    %337 = math.tanh %336 : vector<8x128xf32>
    %338 = vector.extract_strided_slice %323 {offsets = [0, 384], sizes = [8, 128], strides = [1, 1]} : vector<8x512xf32> to vector<8x128xf32>
    %339 = arith.negf %338 : vector<8x128xf32>
    %340 = math.exp %339 : vector<8x128xf32>
    %cst_132 = arith.constant 1.000000e+00 : f32
    %341 = vector.broadcast %cst_132 : f32 to vector<8x128xf32>
    %342 = arith.addf %341, %340 : vector<8x128xf32>
    %343 = arith.divf %341, %342 : vector<8x128xf32>
    %344 = arith.mulf %335, %313 : vector<8x128xf32>
    %345 = arith.mulf %329, %337 : vector<8x128xf32>
    %346 = arith.addf %344, %345 : vector<8x128xf32>
    %347 = math.tanh %346 : vector<8x128xf32>
    %348 = arith.mulf %343, %347 : vector<8x128xf32>
    %c1_133 = arith.constant 1 : index
    %c48_134 = arith.constant 48 : index
    %c0_135 = arith.constant 0 : index
    %349 = vector.load %arg8[%c1_133, %c48_134, %c0_135] : memref<2x64x128xf32, #tpu.memory_space<vmem>>, vector<1x8x128xf32>
    %350 = vector.shape_cast %349 : vector<1x8x128xf32> to vector<8x128xf32>
    %351 = vector.shape_cast %348 : vector<8x128xf32> to vector<1x8x128xf32>
    tpu.vector_store %arg8[%c1_133, %c48_134, %c0_135], %351 {strides = array<i32>} : memref<2x64x128xf32, #tpu.memory_space<vmem>>, vector<1x8x128xf32>,
    %c40_136 = arith.constant 40 : index
    %c0_137 = arith.constant 0 : index
    %352 = vector.load %arg9[%c40_136, %c0_137] : memref<64x512xf32, #tpu.memory_space<vmem>>, vector<8x512xf32>
    %c1_138 = arith.constant 1 : index
    %c0_139 = arith.constant 0 : index
    %c0_140 = arith.constant 0 : index
    %353 = vector.load %arg2[%c1_138, %c0_139, %c0_140] : memref<2x128x512xf32, #tpu.memory_space<vmem>>, vector<1x128x512xf32>
    %354 = vector.shape_cast %353 : vector<1x128x512xf32> to vector<128x512xf32>
    %cst_141 = arith.constant dense<0.000000e+00> : vector<8x512xf32>
    %355 = tpu.matmul %348, %354, %cst_141 {dimension_numbers = #tpu.dot_dimension_numbers<[1], [0], [0], [1], [0, 0, 1, 1], [], []>} : vector<8x128xf32>, vector<128x512xf32>, vector<8x512xf32> -> vector<8x512xf32>
    %356 = arith.addf %352, %355 : vector<8x512xf32>
    %357 = vector.extract_strided_slice %356 {offsets = [0, 0], sizes = [8, 128], strides = [1, 1]} : vector<8x512xf32> to vector<8x128xf32>
    %358 = arith.negf %357 : vector<8x128xf32>
    %359 = math.exp %358 : vector<8x128xf32>
    %cst_142 = arith.constant 1.000000e+00 : f32
    %360 = vector.broadcast %cst_142 : f32 to vector<8x128xf32>
    %361 = arith.addf %360, %359 : vector<8x128xf32>
    %362 = arith.divf %360, %361 : vector<8x128xf32>
    %363 = vector.extract_strided_slice %356 {offsets = [0, 128], sizes = [8, 128], strides = [1, 1]} : vector<8x512xf32> to vector<8x128xf32>
    %364 = arith.negf %363 : vector<8x128xf32>
    %365 = math.exp %364 : vector<8x128xf32>
    %cst_143 = arith.constant 1.000000e+00 : f32
    %366 = vector.broadcast %cst_143 : f32 to vector<8x128xf32>
    %367 = arith.addf %366, %365 : vector<8x128xf32>
    %368 = arith.divf %366, %367 : vector<8x128xf32>
    %369 = vector.extract_strided_slice %356 {offsets = [0, 256], sizes = [8, 128], strides = [1, 1]} : vector<8x512xf32> to vector<8x128xf32>
    %370 = math.tanh %369 : vector<8x128xf32>
    %371 = vector.extract_strided_slice %356 {offsets = [0, 384], sizes = [8, 128], strides = [1, 1]} : vector<8x512xf32> to vector<8x128xf32>
    %372 = arith.negf %371 : vector<8x128xf32>
    %373 = math.exp %372 : vector<8x128xf32>
    %cst_144 = arith.constant 1.000000e+00 : f32
    %374 = vector.broadcast %cst_144 : f32 to vector<8x128xf32>
    %375 = arith.addf %374, %373 : vector<8x128xf32>
    %376 = arith.divf %374, %375 : vector<8x128xf32>
    %377 = arith.mulf %368, %346 : vector<8x128xf32>
    %378 = arith.mulf %362, %370 : vector<8x128xf32>
    %379 = arith.addf %377, %378 : vector<8x128xf32>
    %380 = math.tanh %379 : vector<8x128xf32>
    %381 = arith.mulf %376, %380 : vector<8x128xf32>
    %c1_145 = arith.constant 1 : index
    %c40_146 = arith.constant 40 : index
    %c0_147 = arith.constant 0 : index
    %382 = vector.load %arg8[%c1_145, %c40_146, %c0_147] : memref<2x64x128xf32, #tpu.memory_space<vmem>>, vector<1x8x128xf32>
    %383 = vector.shape_cast %382 : vector<1x8x128xf32> to vector<8x128xf32>
    %384 = vector.shape_cast %381 : vector<8x128xf32> to vector<1x8x128xf32>
    tpu.vector_store %arg8[%c1_145, %c40_146, %c0_147], %384 {strides = array<i32>} : memref<2x64x128xf32, #tpu.memory_space<vmem>>, vector<1x8x128xf32>,
    %c32_148 = arith.constant 32 : index
    %c0_149 = arith.constant 0 : index
    %385 = vector.load %arg9[%c32_148, %c0_149] : memref<64x512xf32, #tpu.memory_space<vmem>>, vector<8x512xf32>
    %c1_150 = arith.constant 1 : index
    %c0_151 = arith.constant 0 : index
    %c0_152 = arith.constant 0 : index
    %386 = vector.load %arg2[%c1_150, %c0_151, %c0_152] : memref<2x128x512xf32, #tpu.memory_space<vmem>>, vector<1x128x512xf32>
    %387 = vector.shape_cast %386 : vector<1x128x512xf32> to vector<128x512xf32>
    %cst_153 = arith.constant dense<0.000000e+00> : vector<8x512xf32>
    %388 = tpu.matmul %381, %387, %cst_153 {dimension_numbers = #tpu.dot_dimension_numbers<[1], [0], [0], [1], [0, 0, 1, 1], [], []>} : vector<8x128xf32>, vector<128x512xf32>, vector<8x512xf32> -> vector<8x512xf32>
    %389 = arith.addf %385, %388 : vector<8x512xf32>
    %390 = vector.extract_strided_slice %389 {offsets = [0, 0], sizes = [8, 128], strides = [1, 1]} : vector<8x512xf32> to vector<8x128xf32>
    %391 = arith.negf %390 : vector<8x128xf32>
    %392 = math.exp %391 : vector<8x128xf32>
    %cst_154 = arith.constant 1.000000e+00 : f32
    %393 = vector.broadcast %cst_154 : f32 to vector<8x128xf32>
    %394 = arith.addf %393, %392 : vector<8x128xf32>
    %395 = arith.divf %393, %394 : vector<8x128xf32>
    %396 = vector.extract_strided_slice %389 {offsets = [0, 128], sizes = [8, 128], strides = [1, 1]} : vector<8x512xf32> to vector<8x128xf32>
    %397 = arith.negf %396 : vector<8x128xf32>
    %398 = math.exp %397 : vector<8x128xf32>
    %cst_155 = arith.constant 1.000000e+00 : f32
    %399 = vector.broadcast %cst_155 : f32 to vector<8x128xf32>
    %400 = arith.addf %399, %398 : vector<8x128xf32>
    %401 = arith.divf %399, %400 : vector<8x128xf32>
    %402 = vector.extract_strided_slice %389 {offsets = [0, 256], sizes = [8, 128], strides = [1, 1]} : vector<8x512xf32> to vector<8x128xf32>
    %403 = math.tanh %402 : vector<8x128xf32>
    %404 = vector.extract_strided_slice %389 {offsets = [0, 384], sizes = [8, 128], strides = [1, 1]} : vector<8x512xf32> to vector<8x128xf32>
    %405 = arith.negf %404 : vector<8x128xf32>
    %406 = math.exp %405 : vector<8x128xf32>
    %cst_156 = arith.constant 1.000000e+00 : f32
    %407 = vector.broadcast %cst_156 : f32 to vector<8x128xf32>
    %408 = arith.addf %407, %406 : vector<8x128xf32>
    %409 = arith.divf %407, %408 : vector<8x128xf32>
    %410 = arith.mulf %401, %379 : vector<8x128xf32>
    %411 = arith.mulf %395, %403 : vector<8x128xf32>
    %412 = arith.addf %410, %411 : vector<8x128xf32>
    %413 = math.tanh %412 : vector<8x128xf32>
    %414 = arith.mulf %409, %413 : vector<8x128xf32>
    %c1_157 = arith.constant 1 : index
    %c32_158 = arith.constant 32 : index
    %c0_159 = arith.constant 0 : index
    %415 = vector.load %arg8[%c1_157, %c32_158, %c0_159] : memref<2x64x128xf32, #tpu.memory_space<vmem>>, vector<1x8x128xf32>
    %416 = vector.shape_cast %415 : vector<1x8x128xf32> to vector<8x128xf32>
    %417 = vector.shape_cast %414 : vector<8x128xf32> to vector<1x8x128xf32>
    tpu.vector_store %arg8[%c1_157, %c32_158, %c0_159], %417 {strides = array<i32>} : memref<2x64x128xf32, #tpu.memory_space<vmem>>, vector<1x8x128xf32>,
    %c24_160 = arith.constant 24 : index
    %c0_161 = arith.constant 0 : index
    %418 = vector.load %arg9[%c24_160, %c0_161] : memref<64x512xf32, #tpu.memory_space<vmem>>, vector<8x512xf32>
    %c1_162 = arith.constant 1 : index
    %c0_163 = arith.constant 0 : index
    %c0_164 = arith.constant 0 : index
    %419 = vector.load %arg2[%c1_162, %c0_163, %c0_164] : memref<2x128x512xf32, #tpu.memory_space<vmem>>, vector<1x128x512xf32>
    %420 = vector.shape_cast %419 : vector<1x128x512xf32> to vector<128x512xf32>
    %cst_165 = arith.constant dense<0.000000e+00> : vector<8x512xf32>
    %421 = tpu.matmul %414, %420, %cst_165 {dimension_numbers = #tpu.dot_dimension_numbers<[1], [0], [0], [1], [0, 0, 1, 1], [], []>} : vector<8x128xf32>, vector<128x512xf32>, vector<8x512xf32> -> vector<8x512xf32>
    %422 = arith.addf %418, %421 : vector<8x512xf32>
    %423 = vector.extract_strided_slice %422 {offsets = [0, 0], sizes = [8, 128], strides = [1, 1]} : vector<8x512xf32> to vector<8x128xf32>
    %424 = arith.negf %423 : vector<8x128xf32>
    %425 = math.exp %424 : vector<8x128xf32>
    %cst_166 = arith.constant 1.000000e+00 : f32
    %426 = vector.broadcast %cst_166 : f32 to vector<8x128xf32>
    %427 = arith.addf %426, %425 : vector<8x128xf32>
    %428 = arith.divf %426, %427 : vector<8x128xf32>
    %429 = vector.extract_strided_slice %422 {offsets = [0, 128], sizes = [8, 128], strides = [1, 1]} : vector<8x512xf32> to vector<8x128xf32>
    %430 = arith.negf %429 : vector<8x128xf32>
    %431 = math.exp %430 : vector<8x128xf32>
    %cst_167 = arith.constant 1.000000e+00 : f32
    %432 = vector.broadcast %cst_167 : f32 to vector<8x128xf32>
    %433 = arith.addf %432, %431 : vector<8x128xf32>
    %434 = arith.divf %432, %433 : vector<8x128xf32>
    %435 = vector.extract_strided_slice %422 {offsets = [0, 256], sizes = [8, 128], strides = [1, 1]} : vector<8x512xf32> to vector<8x128xf32>
    %436 = math.tanh %435 : vector<8x128xf32>
    %437 = vector.extract_strided_slice %422 {offsets = [0, 384], sizes = [8, 128], strides = [1, 1]} : vector<8x512xf32> to vector<8x128xf32>
    %438 = arith.negf %437 : vector<8x128xf32>
    %439 = math.exp %438 : vector<8x128xf32>
    %cst_168 = arith.constant 1.000000e+00 : f32
    %440 = vector.broadcast %cst_168 : f32 to vector<8x128xf32>
    %441 = arith.addf %440, %439 : vector<8x128xf32>
    %442 = arith.divf %440, %441 : vector<8x128xf32>
    %443 = arith.mulf %434, %412 : vector<8x128xf32>
    %444 = arith.mulf %428, %436 : vector<8x128xf32>
    %445 = arith.addf %443, %444 : vector<8x128xf32>
    %446 = math.tanh %445 : vector<8x128xf32>
    %447 = arith.mulf %442, %446 : vector<8x128xf32>
    %c1_169 = arith.constant 1 : index
    %c24_170 = arith.constant 24 : index
    %c0_171 = arith.constant 0 : index
    %448 = vector.load %arg8[%c1_169, %c24_170, %c0_171] : memref<2x64x128xf32, #tpu.memory_space<vmem>>, vector<1x8x128xf32>
    %449 = vector.shape_cast %448 : vector<1x8x128xf32> to vector<8x128xf32>
    %450 = vector.shape_cast %447 : vector<8x128xf32> to vector<1x8x128xf32>
    tpu.vector_store %arg8[%c1_169, %c24_170, %c0_171], %450 {strides = array<i32>} : memref<2x64x128xf32, #tpu.memory_space<vmem>>, vector<1x8x128xf32>,
    %c16_172 = arith.constant 16 : index
    %c0_173 = arith.constant 0 : index
    %451 = vector.load %arg9[%c16_172, %c0_173] : memref<64x512xf32, #tpu.memory_space<vmem>>, vector<8x512xf32>
    %c1_174 = arith.constant 1 : index
    %c0_175 = arith.constant 0 : index
    %c0_176 = arith.constant 0 : index
    %452 = vector.load %arg2[%c1_174, %c0_175, %c0_176] : memref<2x128x512xf32, #tpu.memory_space<vmem>>, vector<1x128x512xf32>
    %453 = vector.shape_cast %452 : vector<1x128x512xf32> to vector<128x512xf32>
    %cst_177 = arith.constant dense<0.000000e+00> : vector<8x512xf32>
    %454 = tpu.matmul %447, %453, %cst_177 {dimension_numbers = #tpu.dot_dimension_numbers<[1], [0], [0], [1], [0, 0, 1, 1], [], []>} : vector<8x128xf32>, vector<128x512xf32>, vector<8x512xf32> -> vector<8x512xf32>
    %455 = arith.addf %451, %454 : vector<8x512xf32>
    %456 = vector.extract_strided_slice %455 {offsets = [0, 0], sizes = [8, 128], strides = [1, 1]} : vector<8x512xf32> to vector<8x128xf32>
    %457 = arith.negf %456 : vector<8x128xf32>
    %458 = math.exp %457 : vector<8x128xf32>
    %cst_178 = arith.constant 1.000000e+00 : f32
    %459 = vector.broadcast %cst_178 : f32 to vector<8x128xf32>
    %460 = arith.addf %459, %458 : vector<8x128xf32>
    %461 = arith.divf %459, %460 : vector<8x128xf32>
    %462 = vector.extract_strided_slice %455 {offsets = [0, 128], sizes = [8, 128], strides = [1, 1]} : vector<8x512xf32> to vector<8x128xf32>
    %463 = arith.negf %462 : vector<8x128xf32>
    %464 = math.exp %463 : vector<8x128xf32>
    %cst_179 = arith.constant 1.000000e+00 : f32
    %465 = vector.broadcast %cst_179 : f32 to vector<8x128xf32>
    %466 = arith.addf %465, %464 : vector<8x128xf32>
    %467 = arith.divf %465, %466 : vector<8x128xf32>
    %468 = vector.extract_strided_slice %455 {offsets = [0, 256], sizes = [8, 128], strides = [1, 1]} : vector<8x512xf32> to vector<8x128xf32>
    %469 = math.tanh %468 : vector<8x128xf32>
    %470 = vector.extract_strided_slice %455 {offsets = [0, 384], sizes = [8, 128], strides = [1, 1]} : vector<8x512xf32> to vector<8x128xf32>
    %471 = arith.negf %470 : vector<8x128xf32>
    %472 = math.exp %471 : vector<8x128xf32>
    %cst_180 = arith.constant 1.000000e+00 : f32
    %473 = vector.broadcast %cst_180 : f32 to vector<8x128xf32>
    %474 = arith.addf %473, %472 : vector<8x128xf32>
    %475 = arith.divf %473, %474 : vector<8x128xf32>
    %476 = arith.mulf %467, %445 : vector<8x128xf32>
    %477 = arith.mulf %461, %469 : vector<8x128xf32>
    %478 = arith.addf %476, %477 : vector<8x128xf32>
    %479 = math.tanh %478 : vector<8x128xf32>
    %480 = arith.mulf %475, %479 : vector<8x128xf32>
    %c1_181 = arith.constant 1 : index
    %c16_182 = arith.constant 16 : index
    %c0_183 = arith.constant 0 : index
    %481 = vector.load %arg8[%c1_181, %c16_182, %c0_183] : memref<2x64x128xf32, #tpu.memory_space<vmem>>, vector<1x8x128xf32>
    %482 = vector.shape_cast %481 : vector<1x8x128xf32> to vector<8x128xf32>
    %483 = vector.shape_cast %480 : vector<8x128xf32> to vector<1x8x128xf32>
    tpu.vector_store %arg8[%c1_181, %c16_182, %c0_183], %483 {strides = array<i32>} : memref<2x64x128xf32, #tpu.memory_space<vmem>>, vector<1x8x128xf32>,
    %c8_184 = arith.constant 8 : index
    %c0_185 = arith.constant 0 : index
    %484 = vector.load %arg9[%c8_184, %c0_185] : memref<64x512xf32, #tpu.memory_space<vmem>>, vector<8x512xf32>
    %c1_186 = arith.constant 1 : index
    %c0_187 = arith.constant 0 : index
    %c0_188 = arith.constant 0 : index
    %485 = vector.load %arg2[%c1_186, %c0_187, %c0_188] : memref<2x128x512xf32, #tpu.memory_space<vmem>>, vector<1x128x512xf32>
    %486 = vector.shape_cast %485 : vector<1x128x512xf32> to vector<128x512xf32>
    %cst_189 = arith.constant dense<0.000000e+00> : vector<8x512xf32>
    %487 = tpu.matmul %480, %486, %cst_189 {dimension_numbers = #tpu.dot_dimension_numbers<[1], [0], [0], [1], [0, 0, 1, 1], [], []>} : vector<8x128xf32>, vector<128x512xf32>, vector<8x512xf32> -> vector<8x512xf32>
    %488 = arith.addf %484, %487 : vector<8x512xf32>
    %489 = vector.extract_strided_slice %488 {offsets = [0, 0], sizes = [8, 128], strides = [1, 1]} : vector<8x512xf32> to vector<8x128xf32>
    %490 = arith.negf %489 : vector<8x128xf32>
    %491 = math.exp %490 : vector<8x128xf32>
    %cst_190 = arith.constant 1.000000e+00 : f32
    %492 = vector.broadcast %cst_190 : f32 to vector<8x128xf32>
    %493 = arith.addf %492, %491 : vector<8x128xf32>
    %494 = arith.divf %492, %493 : vector<8x128xf32>
    %495 = vector.extract_strided_slice %488 {offsets = [0, 128], sizes = [8, 128], strides = [1, 1]} : vector<8x512xf32> to vector<8x128xf32>
    %496 = arith.negf %495 : vector<8x128xf32>
    %497 = math.exp %496 : vector<8x128xf32>
    %cst_191 = arith.constant 1.000000e+00 : f32
    %498 = vector.broadcast %cst_191 : f32 to vector<8x128xf32>
    %499 = arith.addf %498, %497 : vector<8x128xf32>
    %500 = arith.divf %498, %499 : vector<8x128xf32>
    %501 = vector.extract_strided_slice %488 {offsets = [0, 256], sizes = [8, 128], strides = [1, 1]} : vector<8x512xf32> to vector<8x128xf32>
    %502 = math.tanh %501 : vector<8x128xf32>
    %503 = vector.extract_strided_slice %488 {offsets = [0, 384], sizes = [8, 128], strides = [1, 1]} : vector<8x512xf32> to vector<8x128xf32>
    %504 = arith.negf %503 : vector<8x128xf32>
    %505 = math.exp %504 : vector<8x128xf32>
    %cst_192 = arith.constant 1.000000e+00 : f32
    %506 = vector.broadcast %cst_192 : f32 to vector<8x128xf32>
    %507 = arith.addf %506, %505 : vector<8x128xf32>
    %508 = arith.divf %506, %507 : vector<8x128xf32>
    %509 = arith.mulf %500, %478 : vector<8x128xf32>
    %510 = arith.mulf %494, %502 : vector<8x128xf32>
    %511 = arith.addf %509, %510 : vector<8x128xf32>
    %512 = math.tanh %511 : vector<8x128xf32>
    %513 = arith.mulf %508, %512 : vector<8x128xf32>
    %c1_193 = arith.constant 1 : index
    %c8_194 = arith.constant 8 : index
    %c0_195 = arith.constant 0 : index
    %514 = vector.load %arg8[%c1_193, %c8_194, %c0_195] : memref<2x64x128xf32, #tpu.memory_space<vmem>>, vector<1x8x128xf32>
    %515 = vector.shape_cast %514 : vector<1x8x128xf32> to vector<8x128xf32>
    %516 = vector.shape_cast %513 : vector<8x128xf32> to vector<1x8x128xf32>
    tpu.vector_store %arg8[%c1_193, %c8_194, %c0_195], %516 {strides = array<i32>} : memref<2x64x128xf32, #tpu.memory_space<vmem>>, vector<1x8x128xf32>,
    %c0_196 = arith.constant 0 : index
    %c0_197 = arith.constant 0 : index
    %517 = vector.load %arg9[%c0_196, %c0_197] : memref<64x512xf32, #tpu.memory_space<vmem>>, vector<8x512xf32>
    %c1_198 = arith.constant 1 : index
    %c0_199 = arith.constant 0 : index
    %c0_200 = arith.constant 0 : index
    %518 = vector.load %arg2[%c1_198, %c0_199, %c0_200] : memref<2x128x512xf32, #tpu.memory_space<vmem>>, vector<1x128x512xf32>
    %519 = vector.shape_cast %518 : vector<1x128x512xf32> to vector<128x512xf32>
    %cst_201 = arith.constant dense<0.000000e+00> : vector<8x512xf32>
    %520 = tpu.matmul %513, %519, %cst_201 {dimension_numbers = #tpu.dot_dimension_numbers<[1], [0], [0], [1], [0, 0, 1, 1], [], []>} : vector<8x128xf32>, vector<128x512xf32>, vector<8x512xf32> -> vector<8x512xf32>
    %521 = arith.addf %517, %520 : vector<8x512xf32>
    %522 = vector.extract_strided_slice %521 {offsets = [0, 0], sizes = [8, 128], strides = [1, 1]} : vector<8x512xf32> to vector<8x128xf32>
    %523 = arith.negf %522 : vector<8x128xf32>
    %524 = math.exp %523 : vector<8x128xf32>
    %cst_202 = arith.constant 1.000000e+00 : f32
    %525 = vector.broadcast %cst_202 : f32 to vector<8x128xf32>
    %526 = arith.addf %525, %524 : vector<8x128xf32>
    %527 = arith.divf %525, %526 : vector<8x128xf32>
    %528 = vector.extract_strided_slice %521 {offsets = [0, 128], sizes = [8, 128], strides = [1, 1]} : vector<8x512xf32> to vector<8x128xf32>
    %529 = arith.negf %528 : vector<8x128xf32>
    %530 = math.exp %529 : vector<8x128xf32>
    %cst_203 = arith.constant 1.000000e+00 : f32
    %531 = vector.broadcast %cst_203 : f32 to vector<8x128xf32>
    %532 = arith.addf %531, %530 : vector<8x128xf32>
    %533 = arith.divf %531, %532 : vector<8x128xf32>
    %534 = vector.extract_strided_slice %521 {offsets = [0, 256], sizes = [8, 128], strides = [1, 1]} : vector<8x512xf32> to vector<8x128xf32>
    %535 = math.tanh %534 : vector<8x128xf32>
    %536 = vector.extract_strided_slice %521 {offsets = [0, 384], sizes = [8, 128], strides = [1, 1]} : vector<8x512xf32> to vector<8x128xf32>
    %537 = arith.negf %536 : vector<8x128xf32>
    %538 = math.exp %537 : vector<8x128xf32>
    %cst_204 = arith.constant 1.000000e+00 : f32
    %539 = vector.broadcast %cst_204 : f32 to vector<8x128xf32>
    %540 = arith.addf %539, %538 : vector<8x128xf32>
    %541 = arith.divf %539, %540 : vector<8x128xf32>
    %542 = arith.mulf %533, %511 : vector<8x128xf32>
    %543 = arith.mulf %527, %535 : vector<8x128xf32>
    %544 = arith.addf %542, %543 : vector<8x128xf32>
    %545 = math.tanh %544 : vector<8x128xf32>
    %546 = arith.mulf %541, %545 : vector<8x128xf32>
    %c1_205 = arith.constant 1 : index
    %c0_206 = arith.constant 0 : index
    %c0_207 = arith.constant 0 : index
    %547 = vector.load %arg8[%c1_205, %c0_206, %c0_207] : memref<2x64x128xf32, #tpu.memory_space<vmem>>, vector<1x8x128xf32>
    %548 = vector.shape_cast %547 : vector<1x8x128xf32> to vector<8x128xf32>
    %549 = vector.shape_cast %546 : vector<8x128xf32> to vector<1x8x128xf32>
    tpu.vector_store %arg8[%c1_205, %c0_206, %c0_207], %549 {strides = array<i32>} : memref<2x64x128xf32, #tpu.memory_space<vmem>>, vector<1x8x128xf32>,
    %c0_208 = arith.constant 0 : index
    %c0_209 = arith.constant 0 : index
    %c0_210 = arith.constant 0 : index
    %550 = vector.load %arg8[%c0_208, %c0_209, %c0_210] : memref<2x64x128xf32, #tpu.memory_space<vmem>>, vector<1x64x128xf32>
    %551 = vector.shape_cast %550 : vector<1x64x128xf32> to vector<64x128xf32>
    %c0_211 = arith.constant 0 : index
    %c0_212 = arith.constant 0 : index
    %c0_213 = arith.constant 0 : index
    %552 = vector.load %arg4[%c0_211, %c0_212, %c0_213] : memref<4x128x512xf32, #tpu.memory_space<vmem>>, vector<1x128x512xf32>
    %553 = vector.shape_cast %552 : vector<1x128x512xf32> to vector<128x512xf32>
    %cst_214 = arith.constant dense<0.000000e+00> : vector<64x512xf32>
    %554 = tpu.matmul %551, %553, %cst_214 {dimension_numbers = #tpu.dot_dimension_numbers<[1], [0], [0], [1], [0, 0, 1, 1], [], []>} : vector<64x128xf32>, vector<128x512xf32>, vector<64x512xf32> -> vector<64x512xf32>
    %c1_215 = arith.constant 1 : index
    %c0_216 = arith.constant 0 : index
    %c0_217 = arith.constant 0 : index
    %555 = vector.load %arg8[%c1_215, %c0_216, %c0_217] : memref<2x64x128xf32, #tpu.memory_space<vmem>>, vector<1x64x128xf32>
    %556 = vector.shape_cast %555 : vector<1x64x128xf32> to vector<64x128xf32>
    %c1_218 = arith.constant 1 : index
    %c0_219 = arith.constant 0 : index
    %c0_220 = arith.constant 0 : index
    %557 = vector.load %arg4[%c1_218, %c0_219, %c0_220] : memref<4x128x512xf32, #tpu.memory_space<vmem>>, vector<1x128x512xf32>
    %558 = vector.shape_cast %557 : vector<1x128x512xf32> to vector<128x512xf32>
    %cst_221 = arith.constant dense<0.000000e+00> : vector<64x512xf32>
    %559 = tpu.matmul %556, %558, %cst_221 {dimension_numbers = #tpu.dot_dimension_numbers<[1], [0], [0], [1], [0, 0, 1, 1], [], []>} : vector<64x128xf32>, vector<128x512xf32>, vector<64x512xf32> -> vector<64x512xf32>
    %560 = arith.addf %554, %559 : vector<64x512xf32>
    %c0_222 = arith.constant 0 : index
    %c0_223 = arith.constant 0 : index
    %c0_224 = arith.constant 0 : index
    %561 = vector.load %arg6[%c0_222, %c0_223, %c0_224] : memref<2x1x512xf32, #tpu.memory_space<vmem>>, vector<1x1x512xf32>
    %562 = vector.shape_cast %561 : vector<1x1x512xf32> to vector<1x512xf32>
    %563 = vector.broadcast %562 : vector<1x512xf32> to vector<64x512xf32>
    %564 = arith.addf %560, %563 : vector<64x512xf32>
    %c0_225 = arith.constant 0 : index
    %c0_226 = arith.constant 0 : index
    %565 = vector.load %arg9[%c0_225, %c0_226] : memref<64x512xf32, #tpu.memory_space<vmem>>, vector<64x512xf32>
    tpu.vector_store %arg9[%c0_225, %c0_226], %564 {strides = array<i32>} : memref<64x512xf32, #tpu.memory_space<vmem>>, vector<64x512xf32>,
    %cst_227 = arith.constant 0.000000e+00 : f32
    %566 = vector.broadcast %cst_227 : f32 to vector<8x128xf32>
    %cst_228 = arith.constant 0.000000e+00 : f32
    %567 = vector.broadcast %cst_228 : f32 to vector<8x128xf32>
    %c0_229 = arith.constant 0 : index
    %c0_230 = arith.constant 0 : index
    %568 = vector.load %arg9[%c0_229, %c0_230] : memref<64x512xf32, #tpu.memory_space<vmem>>, vector<8x512xf32>
    %c0_231 = arith.constant 0 : index
    %c0_232 = arith.constant 0 : index
    %c0_233 = arith.constant 0 : index
    %569 = vector.load %arg5[%c0_231, %c0_232, %c0_233] : memref<2x128x512xf32, #tpu.memory_space<vmem>>, vector<1x128x512xf32>
    %570 = vector.shape_cast %569 : vector<1x128x512xf32> to vector<128x512xf32>
    %cst_234 = arith.constant dense<0.000000e+00> : vector<8x512xf32>
    %571 = tpu.matmul %566, %570, %cst_234 {dimension_numbers = #tpu.dot_dimension_numbers<[1], [0], [0], [1], [0, 0, 1, 1], [], []>} : vector<8x128xf32>, vector<128x512xf32>, vector<8x512xf32> -> vector<8x512xf32>
    %572 = arith.addf %568, %571 : vector<8x512xf32>
    %573 = vector.extract_strided_slice %572 {offsets = [0, 0], sizes = [8, 128], strides = [1, 1]} : vector<8x512xf32> to vector<8x128xf32>
    %574 = arith.negf %573 : vector<8x128xf32>
    %575 = math.exp %574 : vector<8x128xf32>
    %cst_235 = arith.constant 1.000000e+00 : f32
    %576 = vector.broadcast %cst_235 : f32 to vector<8x128xf32>
    %577 = arith.addf %576, %575 : vector<8x128xf32>
    %578 = arith.divf %576, %577 : vector<8x128xf32>
    %579 = vector.extract_strided_slice %572 {offsets = [0, 128], sizes = [8, 128], strides = [1, 1]} : vector<8x512xf32> to vector<8x128xf32>
    %580 = arith.negf %579 : vector<8x128xf32>
    %581 = math.exp %580 : vector<8x128xf32>
    %cst_236 = arith.constant 1.000000e+00 : f32
    %582 = vector.broadcast %cst_236 : f32 to vector<8x128xf32>
    %583 = arith.addf %582, %581 : vector<8x128xf32>
    %584 = arith.divf %582, %583 : vector<8x128xf32>
    %585 = vector.extract_strided_slice %572 {offsets = [0, 256], sizes = [8, 128], strides = [1, 1]} : vector<8x512xf32> to vector<8x128xf32>
    %586 = math.tanh %585 : vector<8x128xf32>
    %587 = vector.extract_strided_slice %572 {offsets = [0, 384], sizes = [8, 128], strides = [1, 1]} : vector<8x512xf32> to vector<8x128xf32>
    %588 = arith.negf %587 : vector<8x128xf32>
    %589 = math.exp %588 : vector<8x128xf32>
    %cst_237 = arith.constant 1.000000e+00 : f32
    %590 = vector.broadcast %cst_237 : f32 to vector<8x128xf32>
    %591 = arith.addf %590, %589 : vector<8x128xf32>
    %592 = arith.divf %590, %591 : vector<8x128xf32>
    %593 = arith.mulf %584, %567 : vector<8x128xf32>
    %594 = arith.mulf %578, %586 : vector<8x128xf32>
    %595 = arith.addf %593, %594 : vector<8x128xf32>
    %596 = math.tanh %595 : vector<8x128xf32>
    %597 = arith.mulf %592, %596 : vector<8x128xf32>
    %c0_238 = arith.constant 0 : index
    %c0_239 = arith.constant 0 : index
    %c0_240 = arith.constant 0 : index
    %598 = vector.load %arg7[%c0_238, %c0_239, %c0_240] : memref<2x64x128xf32, #tpu.memory_space<vmem>>, vector<1x8x128xf32>
    %599 = vector.shape_cast %598 : vector<1x8x128xf32> to vector<8x128xf32>
    %600 = vector.shape_cast %597 : vector<8x128xf32> to vector<1x8x128xf32>
    tpu.vector_store %arg7[%c0_238, %c0_239, %c0_240], %600 {strides = array<i32>} : memref<2x64x128xf32, #tpu.memory_space<vmem>>, vector<1x8x128xf32>,
    %c8_241 = arith.constant 8 : index
    %c0_242 = arith.constant 0 : index
    %601 = vector.load %arg9[%c8_241, %c0_242] : memref<64x512xf32, #tpu.memory_space<vmem>>, vector<8x512xf32>
    %c0_243 = arith.constant 0 : index
    %c0_244 = arith.constant 0 : index
    %c0_245 = arith.constant 0 : index
    %602 = vector.load %arg5[%c0_243, %c0_244, %c0_245] : memref<2x128x512xf32, #tpu.memory_space<vmem>>, vector<1x128x512xf32>
    %603 = vector.shape_cast %602 : vector<1x128x512xf32> to vector<128x512xf32>
    %cst_246 = arith.constant dense<0.000000e+00> : vector<8x512xf32>
    %604 = tpu.matmul %597, %603, %cst_246 {dimension_numbers = #tpu.dot_dimension_numbers<[1], [0], [0], [1], [0, 0, 1, 1], [], []>} : vector<8x128xf32>, vector<128x512xf32>, vector<8x512xf32> -> vector<8x512xf32>
    %605 = arith.addf %601, %604 : vector<8x512xf32>
    %606 = vector.extract_strided_slice %605 {offsets = [0, 0], sizes = [8, 128], strides = [1, 1]} : vector<8x512xf32> to vector<8x128xf32>
    %607 = arith.negf %606 : vector<8x128xf32>
    %608 = math.exp %607 : vector<8x128xf32>
    %cst_247 = arith.constant 1.000000e+00 : f32
    %609 = vector.broadcast %cst_247 : f32 to vector<8x128xf32>
    %610 = arith.addf %609, %608 : vector<8x128xf32>
    %611 = arith.divf %609, %610 : vector<8x128xf32>
    %612 = vector.extract_strided_slice %605 {offsets = [0, 128], sizes = [8, 128], strides = [1, 1]} : vector<8x512xf32> to vector<8x128xf32>
    %613 = arith.negf %612 : vector<8x128xf32>
    %614 = math.exp %613 : vector<8x128xf32>
    %cst_248 = arith.constant 1.000000e+00 : f32
    %615 = vector.broadcast %cst_248 : f32 to vector<8x128xf32>
    %616 = arith.addf %615, %614 : vector<8x128xf32>
    %617 = arith.divf %615, %616 : vector<8x128xf32>
    %618 = vector.extract_strided_slice %605 {offsets = [0, 256], sizes = [8, 128], strides = [1, 1]} : vector<8x512xf32> to vector<8x128xf32>
    %619 = math.tanh %618 : vector<8x128xf32>
    %620 = vector.extract_strided_slice %605 {offsets = [0, 384], sizes = [8, 128], strides = [1, 1]} : vector<8x512xf32> to vector<8x128xf32>
    %621 = arith.negf %620 : vector<8x128xf32>
    %622 = math.exp %621 : vector<8x128xf32>
    %cst_249 = arith.constant 1.000000e+00 : f32
    %623 = vector.broadcast %cst_249 : f32 to vector<8x128xf32>
    %624 = arith.addf %623, %622 : vector<8x128xf32>
    %625 = arith.divf %623, %624 : vector<8x128xf32>
    %626 = arith.mulf %617, %595 : vector<8x128xf32>
    %627 = arith.mulf %611, %619 : vector<8x128xf32>
    %628 = arith.addf %626, %627 : vector<8x128xf32>
    %629 = math.tanh %628 : vector<8x128xf32>
    %630 = arith.mulf %625, %629 : vector<8x128xf32>
    %c0_250 = arith.constant 0 : index
    %c8_251 = arith.constant 8 : index
    %c0_252 = arith.constant 0 : index
    %631 = vector.load %arg7[%c0_250, %c8_251, %c0_252] : memref<2x64x128xf32, #tpu.memory_space<vmem>>, vector<1x8x128xf32>
    %632 = vector.shape_cast %631 : vector<1x8x128xf32> to vector<8x128xf32>
    %633 = vector.shape_cast %630 : vector<8x128xf32> to vector<1x8x128xf32>
    tpu.vector_store %arg7[%c0_250, %c8_251, %c0_252], %633 {strides = array<i32>} : memref<2x64x128xf32, #tpu.memory_space<vmem>>, vector<1x8x128xf32>,
    %c16_253 = arith.constant 16 : index
    %c0_254 = arith.constant 0 : index
    %634 = vector.load %arg9[%c16_253, %c0_254] : memref<64x512xf32, #tpu.memory_space<vmem>>, vector<8x512xf32>
    %c0_255 = arith.constant 0 : index
    %c0_256 = arith.constant 0 : index
    %c0_257 = arith.constant 0 : index
    %635 = vector.load %arg5[%c0_255, %c0_256, %c0_257] : memref<2x128x512xf32, #tpu.memory_space<vmem>>, vector<1x128x512xf32>
    %636 = vector.shape_cast %635 : vector<1x128x512xf32> to vector<128x512xf32>
    %cst_258 = arith.constant dense<0.000000e+00> : vector<8x512xf32>
    %637 = tpu.matmul %630, %636, %cst_258 {dimension_numbers = #tpu.dot_dimension_numbers<[1], [0], [0], [1], [0, 0, 1, 1], [], []>} : vector<8x128xf32>, vector<128x512xf32>, vector<8x512xf32> -> vector<8x512xf32>
    %638 = arith.addf %634, %637 : vector<8x512xf32>
    %639 = vector.extract_strided_slice %638 {offsets = [0, 0], sizes = [8, 128], strides = [1, 1]} : vector<8x512xf32> to vector<8x128xf32>
    %640 = arith.negf %639 : vector<8x128xf32>
    %641 = math.exp %640 : vector<8x128xf32>
    %cst_259 = arith.constant 1.000000e+00 : f32
    %642 = vector.broadcast %cst_259 : f32 to vector<8x128xf32>
    %643 = arith.addf %642, %641 : vector<8x128xf32>
    %644 = arith.divf %642, %643 : vector<8x128xf32>
    %645 = vector.extract_strided_slice %638 {offsets = [0, 128], sizes = [8, 128], strides = [1, 1]} : vector<8x512xf32> to vector<8x128xf32>
    %646 = arith.negf %645 : vector<8x128xf32>
    %647 = math.exp %646 : vector<8x128xf32>
    %cst_260 = arith.constant 1.000000e+00 : f32
    %648 = vector.broadcast %cst_260 : f32 to vector<8x128xf32>
    %649 = arith.addf %648, %647 : vector<8x128xf32>
    %650 = arith.divf %648, %649 : vector<8x128xf32>
    %651 = vector.extract_strided_slice %638 {offsets = [0, 256], sizes = [8, 128], strides = [1, 1]} : vector<8x512xf32> to vector<8x128xf32>
    %652 = math.tanh %651 : vector<8x128xf32>
    %653 = vector.extract_strided_slice %638 {offsets = [0, 384], sizes = [8, 128], strides = [1, 1]} : vector<8x512xf32> to vector<8x128xf32>
    %654 = arith.negf %653 : vector<8x128xf32>
    %655 = math.exp %654 : vector<8x128xf32>
    %cst_261 = arith.constant 1.000000e+00 : f32
    %656 = vector.broadcast %cst_261 : f32 to vector<8x128xf32>
    %657 = arith.addf %656, %655 : vector<8x128xf32>
    %658 = arith.divf %656, %657 : vector<8x128xf32>
    %659 = arith.mulf %650, %628 : vector<8x128xf32>
    %660 = arith.mulf %644, %652 : vector<8x128xf32>
    %661 = arith.addf %659, %660 : vector<8x128xf32>
    %662 = math.tanh %661 : vector<8x128xf32>
    %663 = arith.mulf %658, %662 : vector<8x128xf32>
    %c0_262 = arith.constant 0 : index
    %c16_263 = arith.constant 16 : index
    %c0_264 = arith.constant 0 : index
    %664 = vector.load %arg7[%c0_262, %c16_263, %c0_264] : memref<2x64x128xf32, #tpu.memory_space<vmem>>, vector<1x8x128xf32>
    %665 = vector.shape_cast %664 : vector<1x8x128xf32> to vector<8x128xf32>
    %666 = vector.shape_cast %663 : vector<8x128xf32> to vector<1x8x128xf32>
    tpu.vector_store %arg7[%c0_262, %c16_263, %c0_264], %666 {strides = array<i32>} : memref<2x64x128xf32, #tpu.memory_space<vmem>>, vector<1x8x128xf32>,
    %c24_265 = arith.constant 24 : index
    %c0_266 = arith.constant 0 : index
    %667 = vector.load %arg9[%c24_265, %c0_266] : memref<64x512xf32, #tpu.memory_space<vmem>>, vector<8x512xf32>
    %c0_267 = arith.constant 0 : index
    %c0_268 = arith.constant 0 : index
    %c0_269 = arith.constant 0 : index
    %668 = vector.load %arg5[%c0_267, %c0_268, %c0_269] : memref<2x128x512xf32, #tpu.memory_space<vmem>>, vector<1x128x512xf32>
    %669 = vector.shape_cast %668 : vector<1x128x512xf32> to vector<128x512xf32>
    %cst_270 = arith.constant dense<0.000000e+00> : vector<8x512xf32>
    %670 = tpu.matmul %663, %669, %cst_270 {dimension_numbers = #tpu.dot_dimension_numbers<[1], [0], [0], [1], [0, 0, 1, 1], [], []>} : vector<8x128xf32>, vector<128x512xf32>, vector<8x512xf32> -> vector<8x512xf32>
    %671 = arith.addf %667, %670 : vector<8x512xf32>
    %672 = vector.extract_strided_slice %671 {offsets = [0, 0], sizes = [8, 128], strides = [1, 1]} : vector<8x512xf32> to vector<8x128xf32>
    %673 = arith.negf %672 : vector<8x128xf32>
    %674 = math.exp %673 : vector<8x128xf32>
    %cst_271 = arith.constant 1.000000e+00 : f32
    %675 = vector.broadcast %cst_271 : f32 to vector<8x128xf32>
    %676 = arith.addf %675, %674 : vector<8x128xf32>
    %677 = arith.divf %675, %676 : vector<8x128xf32>
    %678 = vector.extract_strided_slice %671 {offsets = [0, 128], sizes = [8, 128], strides = [1, 1]} : vector<8x512xf32> to vector<8x128xf32>
    %679 = arith.negf %678 : vector<8x128xf32>
    %680 = math.exp %679 : vector<8x128xf32>
    %cst_272 = arith.constant 1.000000e+00 : f32
    %681 = vector.broadcast %cst_272 : f32 to vector<8x128xf32>
    %682 = arith.addf %681, %680 : vector<8x128xf32>
    %683 = arith.divf %681, %682 : vector<8x128xf32>
    %684 = vector.extract_strided_slice %671 {offsets = [0, 256], sizes = [8, 128], strides = [1, 1]} : vector<8x512xf32> to vector<8x128xf32>
    %685 = math.tanh %684 : vector<8x128xf32>
    %686 = vector.extract_strided_slice %671 {offsets = [0, 384], sizes = [8, 128], strides = [1, 1]} : vector<8x512xf32> to vector<8x128xf32>
    %687 = arith.negf %686 : vector<8x128xf32>
    %688 = math.exp %687 : vector<8x128xf32>
    %cst_273 = arith.constant 1.000000e+00 : f32
    %689 = vector.broadcast %cst_273 : f32 to vector<8x128xf32>
    %690 = arith.addf %689, %688 : vector<8x128xf32>
    %691 = arith.divf %689, %690 : vector<8x128xf32>
    %692 = arith.mulf %683, %661 : vector<8x128xf32>
    %693 = arith.mulf %677, %685 : vector<8x128xf32>
    %694 = arith.addf %692, %693 : vector<8x128xf32>
    %695 = math.tanh %694 : vector<8x128xf32>
    %696 = arith.mulf %691, %695 : vector<8x128xf32>
    %c0_274 = arith.constant 0 : index
    %c24_275 = arith.constant 24 : index
    %c0_276 = arith.constant 0 : index
    %697 = vector.load %arg7[%c0_274, %c24_275, %c0_276] : memref<2x64x128xf32, #tpu.memory_space<vmem>>, vector<1x8x128xf32>
    %698 = vector.shape_cast %697 : vector<1x8x128xf32> to vector<8x128xf32>
    %699 = vector.shape_cast %696 : vector<8x128xf32> to vector<1x8x128xf32>
    tpu.vector_store %arg7[%c0_274, %c24_275, %c0_276], %699 {strides = array<i32>} : memref<2x64x128xf32, #tpu.memory_space<vmem>>, vector<1x8x128xf32>,
    %c32_277 = arith.constant 32 : index
    %c0_278 = arith.constant 0 : index
    %700 = vector.load %arg9[%c32_277, %c0_278] : memref<64x512xf32, #tpu.memory_space<vmem>>, vector<8x512xf32>
    %c0_279 = arith.constant 0 : index
    %c0_280 = arith.constant 0 : index
    %c0_281 = arith.constant 0 : index
    %701 = vector.load %arg5[%c0_279, %c0_280, %c0_281] : memref<2x128x512xf32, #tpu.memory_space<vmem>>, vector<1x128x512xf32>
    %702 = vector.shape_cast %701 : vector<1x128x512xf32> to vector<128x512xf32>
    %cst_282 = arith.constant dense<0.000000e+00> : vector<8x512xf32>
    %703 = tpu.matmul %696, %702, %cst_282 {dimension_numbers = #tpu.dot_dimension_numbers<[1], [0], [0], [1], [0, 0, 1, 1], [], []>} : vector<8x128xf32>, vector<128x512xf32>, vector<8x512xf32> -> vector<8x512xf32>
    %704 = arith.addf %700, %703 : vector<8x512xf32>
    %705 = vector.extract_strided_slice %704 {offsets = [0, 0], sizes = [8, 128], strides = [1, 1]} : vector<8x512xf32> to vector<8x128xf32>
    %706 = arith.negf %705 : vector<8x128xf32>
    %707 = math.exp %706 : vector<8x128xf32>
    %cst_283 = arith.constant 1.000000e+00 : f32
    %708 = vector.broadcast %cst_283 : f32 to vector<8x128xf32>
    %709 = arith.addf %708, %707 : vector<8x128xf32>
    %710 = arith.divf %708, %709 : vector<8x128xf32>
    %711 = vector.extract_strided_slice %704 {offsets = [0, 128], sizes = [8, 128], strides = [1, 1]} : vector<8x512xf32> to vector<8x128xf32>
    %712 = arith.negf %711 : vector<8x128xf32>
    %713 = math.exp %712 : vector<8x128xf32>
    %cst_284 = arith.constant 1.000000e+00 : f32
    %714 = vector.broadcast %cst_284 : f32 to vector<8x128xf32>
    %715 = arith.addf %714, %713 : vector<8x128xf32>
    %716 = arith.divf %714, %715 : vector<8x128xf32>
    %717 = vector.extract_strided_slice %704 {offsets = [0, 256], sizes = [8, 128], strides = [1, 1]} : vector<8x512xf32> to vector<8x128xf32>
    %718 = math.tanh %717 : vector<8x128xf32>
    %719 = vector.extract_strided_slice %704 {offsets = [0, 384], sizes = [8, 128], strides = [1, 1]} : vector<8x512xf32> to vector<8x128xf32>
    %720 = arith.negf %719 : vector<8x128xf32>
    %721 = math.exp %720 : vector<8x128xf32>
    %cst_285 = arith.constant 1.000000e+00 : f32
    %722 = vector.broadcast %cst_285 : f32 to vector<8x128xf32>
    %723 = arith.addf %722, %721 : vector<8x128xf32>
    %724 = arith.divf %722, %723 : vector<8x128xf32>
    %725 = arith.mulf %716, %694 : vector<8x128xf32>
    %726 = arith.mulf %710, %718 : vector<8x128xf32>
    %727 = arith.addf %725, %726 : vector<8x128xf32>
    %728 = math.tanh %727 : vector<8x128xf32>
    %729 = arith.mulf %724, %728 : vector<8x128xf32>
    %c0_286 = arith.constant 0 : index
    %c32_287 = arith.constant 32 : index
    %c0_288 = arith.constant 0 : index
    %730 = vector.load %arg7[%c0_286, %c32_287, %c0_288] : memref<2x64x128xf32, #tpu.memory_space<vmem>>, vector<1x8x128xf32>
    %731 = vector.shape_cast %730 : vector<1x8x128xf32> to vector<8x128xf32>
    %732 = vector.shape_cast %729 : vector<8x128xf32> to vector<1x8x128xf32>
    tpu.vector_store %arg7[%c0_286, %c32_287, %c0_288], %732 {strides = array<i32>} : memref<2x64x128xf32, #tpu.memory_space<vmem>>, vector<1x8x128xf32>,
    %c40_289 = arith.constant 40 : index
    %c0_290 = arith.constant 0 : index
    %733 = vector.load %arg9[%c40_289, %c0_290] : memref<64x512xf32, #tpu.memory_space<vmem>>, vector<8x512xf32>
    %c0_291 = arith.constant 0 : index
    %c0_292 = arith.constant 0 : index
    %c0_293 = arith.constant 0 : index
    %734 = vector.load %arg5[%c0_291, %c0_292, %c0_293] : memref<2x128x512xf32, #tpu.memory_space<vmem>>, vector<1x128x512xf32>
    %735 = vector.shape_cast %734 : vector<1x128x512xf32> to vector<128x512xf32>
    %cst_294 = arith.constant dense<0.000000e+00> : vector<8x512xf32>
    %736 = tpu.matmul %729, %735, %cst_294 {dimension_numbers = #tpu.dot_dimension_numbers<[1], [0], [0], [1], [0, 0, 1, 1], [], []>} : vector<8x128xf32>, vector<128x512xf32>, vector<8x512xf32> -> vector<8x512xf32>
    %737 = arith.addf %733, %736 : vector<8x512xf32>
    %738 = vector.extract_strided_slice %737 {offsets = [0, 0], sizes = [8, 128], strides = [1, 1]} : vector<8x512xf32> to vector<8x128xf32>
    %739 = arith.negf %738 : vector<8x128xf32>
    %740 = math.exp %739 : vector<8x128xf32>
    %cst_295 = arith.constant 1.000000e+00 : f32
    %741 = vector.broadcast %cst_295 : f32 to vector<8x128xf32>
    %742 = arith.addf %741, %740 : vector<8x128xf32>
    %743 = arith.divf %741, %742 : vector<8x128xf32>
    %744 = vector.extract_strided_slice %737 {offsets = [0, 128], sizes = [8, 128], strides = [1, 1]} : vector<8x512xf32> to vector<8x128xf32>
    %745 = arith.negf %744 : vector<8x128xf32>
    %746 = math.exp %745 : vector<8x128xf32>
    %cst_296 = arith.constant 1.000000e+00 : f32
    %747 = vector.broadcast %cst_296 : f32 to vector<8x128xf32>
    %748 = arith.addf %747, %746 : vector<8x128xf32>
    %749 = arith.divf %747, %748 : vector<8x128xf32>
    %750 = vector.extract_strided_slice %737 {offsets = [0, 256], sizes = [8, 128], strides = [1, 1]} : vector<8x512xf32> to vector<8x128xf32>
    %751 = math.tanh %750 : vector<8x128xf32>
    %752 = vector.extract_strided_slice %737 {offsets = [0, 384], sizes = [8, 128], strides = [1, 1]} : vector<8x512xf32> to vector<8x128xf32>
    %753 = arith.negf %752 : vector<8x128xf32>
    %754 = math.exp %753 : vector<8x128xf32>
    %cst_297 = arith.constant 1.000000e+00 : f32
    %755 = vector.broadcast %cst_297 : f32 to vector<8x128xf32>
    %756 = arith.addf %755, %754 : vector<8x128xf32>
    %757 = arith.divf %755, %756 : vector<8x128xf32>
    %758 = arith.mulf %749, %727 : vector<8x128xf32>
    %759 = arith.mulf %743, %751 : vector<8x128xf32>
    %760 = arith.addf %758, %759 : vector<8x128xf32>
    %761 = math.tanh %760 : vector<8x128xf32>
    %762 = arith.mulf %757, %761 : vector<8x128xf32>
    %c0_298 = arith.constant 0 : index
    %c40_299 = arith.constant 40 : index
    %c0_300 = arith.constant 0 : index
    %763 = vector.load %arg7[%c0_298, %c40_299, %c0_300] : memref<2x64x128xf32, #tpu.memory_space<vmem>>, vector<1x8x128xf32>
    %764 = vector.shape_cast %763 : vector<1x8x128xf32> to vector<8x128xf32>
    %765 = vector.shape_cast %762 : vector<8x128xf32> to vector<1x8x128xf32>
    tpu.vector_store %arg7[%c0_298, %c40_299, %c0_300], %765 {strides = array<i32>} : memref<2x64x128xf32, #tpu.memory_space<vmem>>, vector<1x8x128xf32>,
    %c48_301 = arith.constant 48 : index
    %c0_302 = arith.constant 0 : index
    %766 = vector.load %arg9[%c48_301, %c0_302] : memref<64x512xf32, #tpu.memory_space<vmem>>, vector<8x512xf32>
    %c0_303 = arith.constant 0 : index
    %c0_304 = arith.constant 0 : index
    %c0_305 = arith.constant 0 : index
    %767 = vector.load %arg5[%c0_303, %c0_304, %c0_305] : memref<2x128x512xf32, #tpu.memory_space<vmem>>, vector<1x128x512xf32>
    %768 = vector.shape_cast %767 : vector<1x128x512xf32> to vector<128x512xf32>
    %cst_306 = arith.constant dense<0.000000e+00> : vector<8x512xf32>
    %769 = tpu.matmul %762, %768, %cst_306 {dimension_numbers = #tpu.dot_dimension_numbers<[1], [0], [0], [1], [0, 0, 1, 1], [], []>} : vector<8x128xf32>, vector<128x512xf32>, vector<8x512xf32> -> vector<8x512xf32>
    %770 = arith.addf %766, %769 : vector<8x512xf32>
    %771 = vector.extract_strided_slice %770 {offsets = [0, 0], sizes = [8, 128], strides = [1, 1]} : vector<8x512xf32> to vector<8x128xf32>
    %772 = arith.negf %771 : vector<8x128xf32>
    %773 = math.exp %772 : vector<8x128xf32>
    %cst_307 = arith.constant 1.000000e+00 : f32
    %774 = vector.broadcast %cst_307 : f32 to vector<8x128xf32>
    %775 = arith.addf %774, %773 : vector<8x128xf32>
    %776 = arith.divf %774, %775 : vector<8x128xf32>
    %777 = vector.extract_strided_slice %770 {offsets = [0, 128], sizes = [8, 128], strides = [1, 1]} : vector<8x512xf32> to vector<8x128xf32>
    %778 = arith.negf %777 : vector<8x128xf32>
    %779 = math.exp %778 : vector<8x128xf32>
    %cst_308 = arith.constant 1.000000e+00 : f32
    %780 = vector.broadcast %cst_308 : f32 to vector<8x128xf32>
    %781 = arith.addf %780, %779 : vector<8x128xf32>
    %782 = arith.divf %780, %781 : vector<8x128xf32>
    %783 = vector.extract_strided_slice %770 {offsets = [0, 256], sizes = [8, 128], strides = [1, 1]} : vector<8x512xf32> to vector<8x128xf32>
    %784 = math.tanh %783 : vector<8x128xf32>
    %785 = vector.extract_strided_slice %770 {offsets = [0, 384], sizes = [8, 128], strides = [1, 1]} : vector<8x512xf32> to vector<8x128xf32>
    %786 = arith.negf %785 : vector<8x128xf32>
    %787 = math.exp %786 : vector<8x128xf32>
    %cst_309 = arith.constant 1.000000e+00 : f32
    %788 = vector.broadcast %cst_309 : f32 to vector<8x128xf32>
    %789 = arith.addf %788, %787 : vector<8x128xf32>
    %790 = arith.divf %788, %789 : vector<8x128xf32>
    %791 = arith.mulf %782, %760 : vector<8x128xf32>
    %792 = arith.mulf %776, %784 : vector<8x128xf32>
    %793 = arith.addf %791, %792 : vector<8x128xf32>
    %794 = math.tanh %793 : vector<8x128xf32>
    %795 = arith.mulf %790, %794 : vector<8x128xf32>
    %c0_310 = arith.constant 0 : index
    %c48_311 = arith.constant 48 : index
    %c0_312 = arith.constant 0 : index
    %796 = vector.load %arg7[%c0_310, %c48_311, %c0_312] : memref<2x64x128xf32, #tpu.memory_space<vmem>>, vector<1x8x128xf32>
    %797 = vector.shape_cast %796 : vector<1x8x128xf32> to vector<8x128xf32>
    %798 = vector.shape_cast %795 : vector<8x128xf32> to vector<1x8x128xf32>
    tpu.vector_store %arg7[%c0_310, %c48_311, %c0_312], %798 {strides = array<i32>} : memref<2x64x128xf32, #tpu.memory_space<vmem>>, vector<1x8x128xf32>,
    %c56_313 = arith.constant 56 : index
    %c0_314 = arith.constant 0 : index
    %799 = vector.load %arg9[%c56_313, %c0_314] : memref<64x512xf32, #tpu.memory_space<vmem>>, vector<8x512xf32>
    %c0_315 = arith.constant 0 : index
    %c0_316 = arith.constant 0 : index
    %c0_317 = arith.constant 0 : index
    %800 = vector.load %arg5[%c0_315, %c0_316, %c0_317] : memref<2x128x512xf32, #tpu.memory_space<vmem>>, vector<1x128x512xf32>
    %801 = vector.shape_cast %800 : vector<1x128x512xf32> to vector<128x512xf32>
    %cst_318 = arith.constant dense<0.000000e+00> : vector<8x512xf32>
    %802 = tpu.matmul %795, %801, %cst_318 {dimension_numbers = #tpu.dot_dimension_numbers<[1], [0], [0], [1], [0, 0, 1, 1], [], []>} : vector<8x128xf32>, vector<128x512xf32>, vector<8x512xf32> -> vector<8x512xf32>
    %803 = arith.addf %799, %802 : vector<8x512xf32>
    %804 = vector.extract_strided_slice %803 {offsets = [0, 0], sizes = [8, 128], strides = [1, 1]} : vector<8x512xf32> to vector<8x128xf32>
    %805 = arith.negf %804 : vector<8x128xf32>
    %806 = math.exp %805 : vector<8x128xf32>
    %cst_319 = arith.constant 1.000000e+00 : f32
    %807 = vector.broadcast %cst_319 : f32 to vector<8x128xf32>
    %808 = arith.addf %807, %806 : vector<8x128xf32>
    %809 = arith.divf %807, %808 : vector<8x128xf32>
    %810 = vector.extract_strided_slice %803 {offsets = [0, 128], sizes = [8, 128], strides = [1, 1]} : vector<8x512xf32> to vector<8x128xf32>
    %811 = arith.negf %810 : vector<8x128xf32>
    %812 = math.exp %811 : vector<8x128xf32>
    %cst_320 = arith.constant 1.000000e+00 : f32
    %813 = vector.broadcast %cst_320 : f32 to vector<8x128xf32>
    %814 = arith.addf %813, %812 : vector<8x128xf32>
    %815 = arith.divf %813, %814 : vector<8x128xf32>
    %816 = vector.extract_strided_slice %803 {offsets = [0, 256], sizes = [8, 128], strides = [1, 1]} : vector<8x512xf32> to vector<8x128xf32>
    %817 = math.tanh %816 : vector<8x128xf32>
    %818 = vector.extract_strided_slice %803 {offsets = [0, 384], sizes = [8, 128], strides = [1, 1]} : vector<8x512xf32> to vector<8x128xf32>
    %819 = arith.negf %818 : vector<8x128xf32>
    %820 = math.exp %819 : vector<8x128xf32>
    %cst_321 = arith.constant 1.000000e+00 : f32
    %821 = vector.broadcast %cst_321 : f32 to vector<8x128xf32>
    %822 = arith.addf %821, %820 : vector<8x128xf32>
    %823 = arith.divf %821, %822 : vector<8x128xf32>
    %824 = arith.mulf %815, %793 : vector<8x128xf32>
    %825 = arith.mulf %809, %817 : vector<8x128xf32>
    %826 = arith.addf %824, %825 : vector<8x128xf32>
    %827 = math.tanh %826 : vector<8x128xf32>
    %828 = arith.mulf %823, %827 : vector<8x128xf32>
    %c0_322 = arith.constant 0 : index
    %c56_323 = arith.constant 56 : index
    %c0_324 = arith.constant 0 : index
    %829 = vector.load %arg7[%c0_322, %c56_323, %c0_324] : memref<2x64x128xf32, #tpu.memory_space<vmem>>, vector<1x8x128xf32>
    %830 = vector.shape_cast %829 : vector<1x8x128xf32> to vector<8x128xf32>
    %831 = vector.shape_cast %828 : vector<8x128xf32> to vector<1x8x128xf32>
    tpu.vector_store %arg7[%c0_322, %c56_323, %c0_324], %831 {strides = array<i32>} : memref<2x64x128xf32, #tpu.memory_space<vmem>>, vector<1x8x128xf32>,
    %c0_325 = arith.constant 0 : index
    %c0_326 = arith.constant 0 : index
    %c0_327 = arith.constant 0 : index
    %832 = vector.load %arg8[%c0_325, %c0_326, %c0_327] : memref<2x64x128xf32, #tpu.memory_space<vmem>>, vector<1x64x128xf32>
    %833 = vector.shape_cast %832 : vector<1x64x128xf32> to vector<64x128xf32>
    %c2 = arith.constant 2 : index
    %c0_328 = arith.constant 0 : index
    %c0_329 = arith.constant 0 : index
    %834 = vector.load %arg4[%c2, %c0_328, %c0_329] : memref<4x128x512xf32, #tpu.memory_space<vmem>>, vector<1x128x512xf32>
    %835 = vector.shape_cast %834 : vector<1x128x512xf32> to vector<128x512xf32>
    %cst_330 = arith.constant dense<0.000000e+00> : vector<64x512xf32>
    %836 = tpu.matmul %833, %835, %cst_330 {dimension_numbers = #tpu.dot_dimension_numbers<[1], [0], [0], [1], [0, 0, 1, 1], [], []>} : vector<64x128xf32>, vector<128x512xf32>, vector<64x512xf32> -> vector<64x512xf32>
    %c1_331 = arith.constant 1 : index
    %c0_332 = arith.constant 0 : index
    %c0_333 = arith.constant 0 : index
    %837 = vector.load %arg8[%c1_331, %c0_332, %c0_333] : memref<2x64x128xf32, #tpu.memory_space<vmem>>, vector<1x64x128xf32>
    %838 = vector.shape_cast %837 : vector<1x64x128xf32> to vector<64x128xf32>
    %c3 = arith.constant 3 : index
    %c0_334 = arith.constant 0 : index
    %c0_335 = arith.constant 0 : index
    %839 = vector.load %arg4[%c3, %c0_334, %c0_335] : memref<4x128x512xf32, #tpu.memory_space<vmem>>, vector<1x128x512xf32>
    %840 = vector.shape_cast %839 : vector<1x128x512xf32> to vector<128x512xf32>
    %cst_336 = arith.constant dense<0.000000e+00> : vector<64x512xf32>
    %841 = tpu.matmul %838, %840, %cst_336 {dimension_numbers = #tpu.dot_dimension_numbers<[1], [0], [0], [1], [0, 0, 1, 1], [], []>} : vector<64x128xf32>, vector<128x512xf32>, vector<64x512xf32> -> vector<64x512xf32>
    %842 = arith.addf %836, %841 : vector<64x512xf32>
    %c1_337 = arith.constant 1 : index
    %c0_338 = arith.constant 0 : index
    %c0_339 = arith.constant 0 : index
    %843 = vector.load %arg6[%c1_337, %c0_338, %c0_339] : memref<2x1x512xf32, #tpu.memory_space<vmem>>, vector<1x1x512xf32>
    %844 = vector.shape_cast %843 : vector<1x1x512xf32> to vector<1x512xf32>
    %845 = vector.broadcast %844 : vector<1x512xf32> to vector<64x512xf32>
    %846 = arith.addf %842, %845 : vector<64x512xf32>
    %c0_340 = arith.constant 0 : index
    %c0_341 = arith.constant 0 : index
    %847 = vector.load %arg9[%c0_340, %c0_341] : memref<64x512xf32, #tpu.memory_space<vmem>>, vector<64x512xf32>
    tpu.vector_store %arg9[%c0_340, %c0_341], %846 {strides = array<i32>} : memref<64x512xf32, #tpu.memory_space<vmem>>, vector<64x512xf32>,
    %cst_342 = arith.constant 0.000000e+00 : f32
    %848 = vector.broadcast %cst_342 : f32 to vector<8x128xf32>
    %cst_343 = arith.constant 0.000000e+00 : f32
    %849 = vector.broadcast %cst_343 : f32 to vector<8x128xf32>
    %c56_344 = arith.constant 56 : index
    %c0_345 = arith.constant 0 : index
    %850 = vector.load %arg9[%c56_344, %c0_345] : memref<64x512xf32, #tpu.memory_space<vmem>>, vector<8x512xf32>
    %c1_346 = arith.constant 1 : index
    %c0_347 = arith.constant 0 : index
    %c0_348 = arith.constant 0 : index
    %851 = vector.load %arg5[%c1_346, %c0_347, %c0_348] : memref<2x128x512xf32, #tpu.memory_space<vmem>>, vector<1x128x512xf32>
    %852 = vector.shape_cast %851 : vector<1x128x512xf32> to vector<128x512xf32>
    %cst_349 = arith.constant dense<0.000000e+00> : vector<8x512xf32>
    %853 = tpu.matmul %848, %852, %cst_349 {dimension_numbers = #tpu.dot_dimension_numbers<[1], [0], [0], [1], [0, 0, 1, 1], [], []>} : vector<8x128xf32>, vector<128x512xf32>, vector<8x512xf32> -> vector<8x512xf32>
    %854 = arith.addf %850, %853 : vector<8x512xf32>
    %855 = vector.extract_strided_slice %854 {offsets = [0, 0], sizes = [8, 128], strides = [1, 1]} : vector<8x512xf32> to vector<8x128xf32>
    %856 = arith.negf %855 : vector<8x128xf32>
    %857 = math.exp %856 : vector<8x128xf32>
    %cst_350 = arith.constant 1.000000e+00 : f32
    %858 = vector.broadcast %cst_350 : f32 to vector<8x128xf32>
    %859 = arith.addf %858, %857 : vector<8x128xf32>
    %860 = arith.divf %858, %859 : vector<8x128xf32>
    %861 = vector.extract_strided_slice %854 {offsets = [0, 128], sizes = [8, 128], strides = [1, 1]} : vector<8x512xf32> to vector<8x128xf32>
    %862 = arith.negf %861 : vector<8x128xf32>
    %863 = math.exp %862 : vector<8x128xf32>
    %cst_351 = arith.constant 1.000000e+00 : f32
    %864 = vector.broadcast %cst_351 : f32 to vector<8x128xf32>
    %865 = arith.addf %864, %863 : vector<8x128xf32>
    %866 = arith.divf %864, %865 : vector<8x128xf32>
    %867 = vector.extract_strided_slice %854 {offsets = [0, 256], sizes = [8, 128], strides = [1, 1]} : vector<8x512xf32> to vector<8x128xf32>
    %868 = math.tanh %867 : vector<8x128xf32>
    %869 = vector.extract_strided_slice %854 {offsets = [0, 384], sizes = [8, 128], strides = [1, 1]} : vector<8x512xf32> to vector<8x128xf32>
    %870 = arith.negf %869 : vector<8x128xf32>
    %871 = math.exp %870 : vector<8x128xf32>
    %cst_352 = arith.constant 1.000000e+00 : f32
    %872 = vector.broadcast %cst_352 : f32 to vector<8x128xf32>
    %873 = arith.addf %872, %871 : vector<8x128xf32>
    %874 = arith.divf %872, %873 : vector<8x128xf32>
    %875 = arith.mulf %866, %849 : vector<8x128xf32>
    %876 = arith.mulf %860, %868 : vector<8x128xf32>
    %877 = arith.addf %875, %876 : vector<8x128xf32>
    %878 = math.tanh %877 : vector<8x128xf32>
    %879 = arith.mulf %874, %878 : vector<8x128xf32>
    %c1_353 = arith.constant 1 : index
    %c56_354 = arith.constant 56 : index
    %c0_355 = arith.constant 0 : index
    %880 = vector.load %arg7[%c1_353, %c56_354, %c0_355] : memref<2x64x128xf32, #tpu.memory_space<vmem>>, vector<1x8x128xf32>
    %881 = vector.shape_cast %880 : vector<1x8x128xf32> to vector<8x128xf32>
    %882 = vector.shape_cast %879 : vector<8x128xf32> to vector<1x8x128xf32>
    tpu.vector_store %arg7[%c1_353, %c56_354, %c0_355], %882 {strides = array<i32>} : memref<2x64x128xf32, #tpu.memory_space<vmem>>, vector<1x8x128xf32>,
    %c48_356 = arith.constant 48 : index
    %c0_357 = arith.constant 0 : index
    %883 = vector.load %arg9[%c48_356, %c0_357] : memref<64x512xf32, #tpu.memory_space<vmem>>, vector<8x512xf32>
    %c1_358 = arith.constant 1 : index
    %c0_359 = arith.constant 0 : index
    %c0_360 = arith.constant 0 : index
    %884 = vector.load %arg5[%c1_358, %c0_359, %c0_360] : memref<2x128x512xf32, #tpu.memory_space<vmem>>, vector<1x128x512xf32>
    %885 = vector.shape_cast %884 : vector<1x128x512xf32> to vector<128x512xf32>
    %cst_361 = arith.constant dense<0.000000e+00> : vector<8x512xf32>
    %886 = tpu.matmul %879, %885, %cst_361 {dimension_numbers = #tpu.dot_dimension_numbers<[1], [0], [0], [1], [0, 0, 1, 1], [], []>} : vector<8x128xf32>, vector<128x512xf32>, vector<8x512xf32> -> vector<8x512xf32>
    %887 = arith.addf %883, %886 : vector<8x512xf32>
    %888 = vector.extract_strided_slice %887 {offsets = [0, 0], sizes = [8, 128], strides = [1, 1]} : vector<8x512xf32> to vector<8x128xf32>
    %889 = arith.negf %888 : vector<8x128xf32>
    %890 = math.exp %889 : vector<8x128xf32>
    %cst_362 = arith.constant 1.000000e+00 : f32
    %891 = vector.broadcast %cst_362 : f32 to vector<8x128xf32>
    %892 = arith.addf %891, %890 : vector<8x128xf32>
    %893 = arith.divf %891, %892 : vector<8x128xf32>
    %894 = vector.extract_strided_slice %887 {offsets = [0, 128], sizes = [8, 128], strides = [1, 1]} : vector<8x512xf32> to vector<8x128xf32>
    %895 = arith.negf %894 : vector<8x128xf32>
    %896 = math.exp %895 : vector<8x128xf32>
    %cst_363 = arith.constant 1.000000e+00 : f32
    %897 = vector.broadcast %cst_363 : f32 to vector<8x128xf32>
    %898 = arith.addf %897, %896 : vector<8x128xf32>
    %899 = arith.divf %897, %898 : vector<8x128xf32>
    %900 = vector.extract_strided_slice %887 {offsets = [0, 256], sizes = [8, 128], strides = [1, 1]} : vector<8x512xf32> to vector<8x128xf32>
    %901 = math.tanh %900 : vector<8x128xf32>
    %902 = vector.extract_strided_slice %887 {offsets = [0, 384], sizes = [8, 128], strides = [1, 1]} : vector<8x512xf32> to vector<8x128xf32>
    %903 = arith.negf %902 : vector<8x128xf32>
    %904 = math.exp %903 : vector<8x128xf32>
    %cst_364 = arith.constant 1.000000e+00 : f32
    %905 = vector.broadcast %cst_364 : f32 to vector<8x128xf32>
    %906 = arith.addf %905, %904 : vector<8x128xf32>
    %907 = arith.divf %905, %906 : vector<8x128xf32>
    %908 = arith.mulf %899, %877 : vector<8x128xf32>
    %909 = arith.mulf %893, %901 : vector<8x128xf32>
    %910 = arith.addf %908, %909 : vector<8x128xf32>
    %911 = math.tanh %910 : vector<8x128xf32>
    %912 = arith.mulf %907, %911 : vector<8x128xf32>
    %c1_365 = arith.constant 1 : index
    %c48_366 = arith.constant 48 : index
    %c0_367 = arith.constant 0 : index
    %913 = vector.load %arg7[%c1_365, %c48_366, %c0_367] : memref<2x64x128xf32, #tpu.memory_space<vmem>>, vector<1x8x128xf32>
    %914 = vector.shape_cast %913 : vector<1x8x128xf32> to vector<8x128xf32>
    %915 = vector.shape_cast %912 : vector<8x128xf32> to vector<1x8x128xf32>
    tpu.vector_store %arg7[%c1_365, %c48_366, %c0_367], %915 {strides = array<i32>} : memref<2x64x128xf32, #tpu.memory_space<vmem>>, vector<1x8x128xf32>,
    %c40_368 = arith.constant 40 : index
    %c0_369 = arith.constant 0 : index
    %916 = vector.load %arg9[%c40_368, %c0_369] : memref<64x512xf32, #tpu.memory_space<vmem>>, vector<8x512xf32>
    %c1_370 = arith.constant 1 : index
    %c0_371 = arith.constant 0 : index
    %c0_372 = arith.constant 0 : index
    %917 = vector.load %arg5[%c1_370, %c0_371, %c0_372] : memref<2x128x512xf32, #tpu.memory_space<vmem>>, vector<1x128x512xf32>
    %918 = vector.shape_cast %917 : vector<1x128x512xf32> to vector<128x512xf32>
    %cst_373 = arith.constant dense<0.000000e+00> : vector<8x512xf32>
    %919 = tpu.matmul %912, %918, %cst_373 {dimension_numbers = #tpu.dot_dimension_numbers<[1], [0], [0], [1], [0, 0, 1, 1], [], []>} : vector<8x128xf32>, vector<128x512xf32>, vector<8x512xf32> -> vector<8x512xf32>
    %920 = arith.addf %916, %919 : vector<8x512xf32>
    %921 = vector.extract_strided_slice %920 {offsets = [0, 0], sizes = [8, 128], strides = [1, 1]} : vector<8x512xf32> to vector<8x128xf32>
    %922 = arith.negf %921 : vector<8x128xf32>
    %923 = math.exp %922 : vector<8x128xf32>
    %cst_374 = arith.constant 1.000000e+00 : f32
    %924 = vector.broadcast %cst_374 : f32 to vector<8x128xf32>
    %925 = arith.addf %924, %923 : vector<8x128xf32>
    %926 = arith.divf %924, %925 : vector<8x128xf32>
    %927 = vector.extract_strided_slice %920 {offsets = [0, 128], sizes = [8, 128], strides = [1, 1]} : vector<8x512xf32> to vector<8x128xf32>
    %928 = arith.negf %927 : vector<8x128xf32>
    %929 = math.exp %928 : vector<8x128xf32>
    %cst_375 = arith.constant 1.000000e+00 : f32
    %930 = vector.broadcast %cst_375 : f32 to vector<8x128xf32>
    %931 = arith.addf %930, %929 : vector<8x128xf32>
    %932 = arith.divf %930, %931 : vector<8x128xf32>
    %933 = vector.extract_strided_slice %920 {offsets = [0, 256], sizes = [8, 128], strides = [1, 1]} : vector<8x512xf32> to vector<8x128xf32>
    %934 = math.tanh %933 : vector<8x128xf32>
    %935 = vector.extract_strided_slice %920 {offsets = [0, 384], sizes = [8, 128], strides = [1, 1]} : vector<8x512xf32> to vector<8x128xf32>
    %936 = arith.negf %935 : vector<8x128xf32>
    %937 = math.exp %936 : vector<8x128xf32>
    %cst_376 = arith.constant 1.000000e+00 : f32
    %938 = vector.broadcast %cst_376 : f32 to vector<8x128xf32>
    %939 = arith.addf %938, %937 : vector<8x128xf32>
    %940 = arith.divf %938, %939 : vector<8x128xf32>
    %941 = arith.mulf %932, %910 : vector<8x128xf32>
    %942 = arith.mulf %926, %934 : vector<8x128xf32>
    %943 = arith.addf %941, %942 : vector<8x128xf32>
    %944 = math.tanh %943 : vector<8x128xf32>
    %945 = arith.mulf %940, %944 : vector<8x128xf32>
    %c1_377 = arith.constant 1 : index
    %c40_378 = arith.constant 40 : index
    %c0_379 = arith.constant 0 : index
    %946 = vector.load %arg7[%c1_377, %c40_378, %c0_379] : memref<2x64x128xf32, #tpu.memory_space<vmem>>, vector<1x8x128xf32>
    %947 = vector.shape_cast %946 : vector<1x8x128xf32> to vector<8x128xf32>
    %948 = vector.shape_cast %945 : vector<8x128xf32> to vector<1x8x128xf32>
    tpu.vector_store %arg7[%c1_377, %c40_378, %c0_379], %948 {strides = array<i32>} : memref<2x64x128xf32, #tpu.memory_space<vmem>>, vector<1x8x128xf32>,
    %c32_380 = arith.constant 32 : index
    %c0_381 = arith.constant 0 : index
    %949 = vector.load %arg9[%c32_380, %c0_381] : memref<64x512xf32, #tpu.memory_space<vmem>>, vector<8x512xf32>
    %c1_382 = arith.constant 1 : index
    %c0_383 = arith.constant 0 : index
    %c0_384 = arith.constant 0 : index
    %950 = vector.load %arg5[%c1_382, %c0_383, %c0_384] : memref<2x128x512xf32, #tpu.memory_space<vmem>>, vector<1x128x512xf32>
    %951 = vector.shape_cast %950 : vector<1x128x512xf32> to vector<128x512xf32>
    %cst_385 = arith.constant dense<0.000000e+00> : vector<8x512xf32>
    %952 = tpu.matmul %945, %951, %cst_385 {dimension_numbers = #tpu.dot_dimension_numbers<[1], [0], [0], [1], [0, 0, 1, 1], [], []>} : vector<8x128xf32>, vector<128x512xf32>, vector<8x512xf32> -> vector<8x512xf32>
    %953 = arith.addf %949, %952 : vector<8x512xf32>
    %954 = vector.extract_strided_slice %953 {offsets = [0, 0], sizes = [8, 128], strides = [1, 1]} : vector<8x512xf32> to vector<8x128xf32>
    %955 = arith.negf %954 : vector<8x128xf32>
    %956 = math.exp %955 : vector<8x128xf32>
    %cst_386 = arith.constant 1.000000e+00 : f32
    %957 = vector.broadcast %cst_386 : f32 to vector<8x128xf32>
    %958 = arith.addf %957, %956 : vector<8x128xf32>
    %959 = arith.divf %957, %958 : vector<8x128xf32>
    %960 = vector.extract_strided_slice %953 {offsets = [0, 128], sizes = [8, 128], strides = [1, 1]} : vector<8x512xf32> to vector<8x128xf32>
    %961 = arith.negf %960 : vector<8x128xf32>
    %962 = math.exp %961 : vector<8x128xf32>
    %cst_387 = arith.constant 1.000000e+00 : f32
    %963 = vector.broadcast %cst_387 : f32 to vector<8x128xf32>
    %964 = arith.addf %963, %962 : vector<8x128xf32>
    %965 = arith.divf %963, %964 : vector<8x128xf32>
    %966 = vector.extract_strided_slice %953 {offsets = [0, 256], sizes = [8, 128], strides = [1, 1]} : vector<8x512xf32> to vector<8x128xf32>
    %967 = math.tanh %966 : vector<8x128xf32>
    %968 = vector.extract_strided_slice %953 {offsets = [0, 384], sizes = [8, 128], strides = [1, 1]} : vector<8x512xf32> to vector<8x128xf32>
    %969 = arith.negf %968 : vector<8x128xf32>
    %970 = math.exp %969 : vector<8x128xf32>
    %cst_388 = arith.constant 1.000000e+00 : f32
    %971 = vector.broadcast %cst_388 : f32 to vector<8x128xf32>
    %972 = arith.addf %971, %970 : vector<8x128xf32>
    %973 = arith.divf %971, %972 : vector<8x128xf32>
    %974 = arith.mulf %965, %943 : vector<8x128xf32>
    %975 = arith.mulf %959, %967 : vector<8x128xf32>
    %976 = arith.addf %974, %975 : vector<8x128xf32>
    %977 = math.tanh %976 : vector<8x128xf32>
    %978 = arith.mulf %973, %977 : vector<8x128xf32>
    %c1_389 = arith.constant 1 : index
    %c32_390 = arith.constant 32 : index
    %c0_391 = arith.constant 0 : index
    %979 = vector.load %arg7[%c1_389, %c32_390, %c0_391] : memref<2x64x128xf32, #tpu.memory_space<vmem>>, vector<1x8x128xf32>
    %980 = vector.shape_cast %979 : vector<1x8x128xf32> to vector<8x128xf32>
    %981 = vector.shape_cast %978 : vector<8x128xf32> to vector<1x8x128xf32>
    tpu.vector_store %arg7[%c1_389, %c32_390, %c0_391], %981 {strides = array<i32>} : memref<2x64x128xf32, #tpu.memory_space<vmem>>, vector<1x8x128xf32>,
    %c24_392 = arith.constant 24 : index
    %c0_393 = arith.constant 0 : index
    %982 = vector.load %arg9[%c24_392, %c0_393] : memref<64x512xf32, #tpu.memory_space<vmem>>, vector<8x512xf32>
    %c1_394 = arith.constant 1 : index
    %c0_395 = arith.constant 0 : index
    %c0_396 = arith.constant 0 : index
    %983 = vector.load %arg5[%c1_394, %c0_395, %c0_396] : memref<2x128x512xf32, #tpu.memory_space<vmem>>, vector<1x128x512xf32>
    %984 = vector.shape_cast %983 : vector<1x128x512xf32> to vector<128x512xf32>
    %cst_397 = arith.constant dense<0.000000e+00> : vector<8x512xf32>
    %985 = tpu.matmul %978, %984, %cst_397 {dimension_numbers = #tpu.dot_dimension_numbers<[1], [0], [0], [1], [0, 0, 1, 1], [], []>} : vector<8x128xf32>, vector<128x512xf32>, vector<8x512xf32> -> vector<8x512xf32>
    %986 = arith.addf %982, %985 : vector<8x512xf32>
    %987 = vector.extract_strided_slice %986 {offsets = [0, 0], sizes = [8, 128], strides = [1, 1]} : vector<8x512xf32> to vector<8x128xf32>
    %988 = arith.negf %987 : vector<8x128xf32>
    %989 = math.exp %988 : vector<8x128xf32>
    %cst_398 = arith.constant 1.000000e+00 : f32
    %990 = vector.broadcast %cst_398 : f32 to vector<8x128xf32>
    %991 = arith.addf %990, %989 : vector<8x128xf32>
    %992 = arith.divf %990, %991 : vector<8x128xf32>
    %993 = vector.extract_strided_slice %986 {offsets = [0, 128], sizes = [8, 128], strides = [1, 1]} : vector<8x512xf32> to vector<8x128xf32>
    %994 = arith.negf %993 : vector<8x128xf32>
    %995 = math.exp %994 : vector<8x128xf32>
    %cst_399 = arith.constant 1.000000e+00 : f32
    %996 = vector.broadcast %cst_399 : f32 to vector<8x128xf32>
    %997 = arith.addf %996, %995 : vector<8x128xf32>
    %998 = arith.divf %996, %997 : vector<8x128xf32>
    %999 = vector.extract_strided_slice %986 {offsets = [0, 256], sizes = [8, 128], strides = [1, 1]} : vector<8x512xf32> to vector<8x128xf32>
    %1000 = math.tanh %999 : vector<8x128xf32>
    %1001 = vector.extract_strided_slice %986 {offsets = [0, 384], sizes = [8, 128], strides = [1, 1]} : vector<8x512xf32> to vector<8x128xf32>
    %1002 = arith.negf %1001 : vector<8x128xf32>
    %1003 = math.exp %1002 : vector<8x128xf32>
    %cst_400 = arith.constant 1.000000e+00 : f32
    %1004 = vector.broadcast %cst_400 : f32 to vector<8x128xf32>
    %1005 = arith.addf %1004, %1003 : vector<8x128xf32>
    %1006 = arith.divf %1004, %1005 : vector<8x128xf32>
    %1007 = arith.mulf %998, %976 : vector<8x128xf32>
    %1008 = arith.mulf %992, %1000 : vector<8x128xf32>
    %1009 = arith.addf %1007, %1008 : vector<8x128xf32>
    %1010 = math.tanh %1009 : vector<8x128xf32>
    %1011 = arith.mulf %1006, %1010 : vector<8x128xf32>
    %c1_401 = arith.constant 1 : index
    %c24_402 = arith.constant 24 : index
    %c0_403 = arith.constant 0 : index
    %1012 = vector.load %arg7[%c1_401, %c24_402, %c0_403] : memref<2x64x128xf32, #tpu.memory_space<vmem>>, vector<1x8x128xf32>
    %1013 = vector.shape_cast %1012 : vector<1x8x128xf32> to vector<8x128xf32>
    %1014 = vector.shape_cast %1011 : vector<8x128xf32> to vector<1x8x128xf32>
    tpu.vector_store %arg7[%c1_401, %c24_402, %c0_403], %1014 {strides = array<i32>} : memref<2x64x128xf32, #tpu.memory_space<vmem>>, vector<1x8x128xf32>,
    %c16_404 = arith.constant 16 : index
    %c0_405 = arith.constant 0 : index
    %1015 = vector.load %arg9[%c16_404, %c0_405] : memref<64x512xf32, #tpu.memory_space<vmem>>, vector<8x512xf32>
    %c1_406 = arith.constant 1 : index
    %c0_407 = arith.constant 0 : index
    %c0_408 = arith.constant 0 : index
    %1016 = vector.load %arg5[%c1_406, %c0_407, %c0_408] : memref<2x128x512xf32, #tpu.memory_space<vmem>>, vector<1x128x512xf32>
    %1017 = vector.shape_cast %1016 : vector<1x128x512xf32> to vector<128x512xf32>
    %cst_409 = arith.constant dense<0.000000e+00> : vector<8x512xf32>
    %1018 = tpu.matmul %1011, %1017, %cst_409 {dimension_numbers = #tpu.dot_dimension_numbers<[1], [0], [0], [1], [0, 0, 1, 1], [], []>} : vector<8x128xf32>, vector<128x512xf32>, vector<8x512xf32> -> vector<8x512xf32>
    %1019 = arith.addf %1015, %1018 : vector<8x512xf32>
    %1020 = vector.extract_strided_slice %1019 {offsets = [0, 0], sizes = [8, 128], strides = [1, 1]} : vector<8x512xf32> to vector<8x128xf32>
    %1021 = arith.negf %1020 : vector<8x128xf32>
    %1022 = math.exp %1021 : vector<8x128xf32>
    %cst_410 = arith.constant 1.000000e+00 : f32
    %1023 = vector.broadcast %cst_410 : f32 to vector<8x128xf32>
    %1024 = arith.addf %1023, %1022 : vector<8x128xf32>
    %1025 = arith.divf %1023, %1024 : vector<8x128xf32>
    %1026 = vector.extract_strided_slice %1019 {offsets = [0, 128], sizes = [8, 128], strides = [1, 1]} : vector<8x512xf32> to vector<8x128xf32>
    %1027 = arith.negf %1026 : vector<8x128xf32>
    %1028 = math.exp %1027 : vector<8x128xf32>
    %cst_411 = arith.constant 1.000000e+00 : f32
    %1029 = vector.broadcast %cst_411 : f32 to vector<8x128xf32>
    %1030 = arith.addf %1029, %1028 : vector<8x128xf32>
    %1031 = arith.divf %1029, %1030 : vector<8x128xf32>
    %1032 = vector.extract_strided_slice %1019 {offsets = [0, 256], sizes = [8, 128], strides = [1, 1]} : vector<8x512xf32> to vector<8x128xf32>
    %1033 = math.tanh %1032 : vector<8x128xf32>
    %1034 = vector.extract_strided_slice %1019 {offsets = [0, 384], sizes = [8, 128], strides = [1, 1]} : vector<8x512xf32> to vector<8x128xf32>
    %1035 = arith.negf %1034 : vector<8x128xf32>
    %1036 = math.exp %1035 : vector<8x128xf32>
    %cst_412 = arith.constant 1.000000e+00 : f32
    %1037 = vector.broadcast %cst_412 : f32 to vector<8x128xf32>
    %1038 = arith.addf %1037, %1036 : vector<8x128xf32>
    %1039 = arith.divf %1037, %1038 : vector<8x128xf32>
    %1040 = arith.mulf %1031, %1009 : vector<8x128xf32>
    %1041 = arith.mulf %1025, %1033 : vector<8x128xf32>
    %1042 = arith.addf %1040, %1041 : vector<8x128xf32>
    %1043 = math.tanh %1042 : vector<8x128xf32>
    %1044 = arith.mulf %1039, %1043 : vector<8x128xf32>
    %c1_413 = arith.constant 1 : index
    %c16_414 = arith.constant 16 : index
    %c0_415 = arith.constant 0 : index
    %1045 = vector.load %arg7[%c1_413, %c16_414, %c0_415] : memref<2x64x128xf32, #tpu.memory_space<vmem>>, vector<1x8x128xf32>
    %1046 = vector.shape_cast %1045 : vector<1x8x128xf32> to vector<8x128xf32>
    %1047 = vector.shape_cast %1044 : vector<8x128xf32> to vector<1x8x128xf32>
    tpu.vector_store %arg7[%c1_413, %c16_414, %c0_415], %1047 {strides = array<i32>} : memref<2x64x128xf32, #tpu.memory_space<vmem>>, vector<1x8x128xf32>,
    %c8_416 = arith.constant 8 : index
    %c0_417 = arith.constant 0 : index
    %1048 = vector.load %arg9[%c8_416, %c0_417] : memref<64x512xf32, #tpu.memory_space<vmem>>, vector<8x512xf32>
    %c1_418 = arith.constant 1 : index
    %c0_419 = arith.constant 0 : index
    %c0_420 = arith.constant 0 : index
    %1049 = vector.load %arg5[%c1_418, %c0_419, %c0_420] : memref<2x128x512xf32, #tpu.memory_space<vmem>>, vector<1x128x512xf32>
    %1050 = vector.shape_cast %1049 : vector<1x128x512xf32> to vector<128x512xf32>
    %cst_421 = arith.constant dense<0.000000e+00> : vector<8x512xf32>
    %1051 = tpu.matmul %1044, %1050, %cst_421 {dimension_numbers = #tpu.dot_dimension_numbers<[1], [0], [0], [1], [0, 0, 1, 1], [], []>} : vector<8x128xf32>, vector<128x512xf32>, vector<8x512xf32> -> vector<8x512xf32>
    %1052 = arith.addf %1048, %1051 : vector<8x512xf32>
    %1053 = vector.extract_strided_slice %1052 {offsets = [0, 0], sizes = [8, 128], strides = [1, 1]} : vector<8x512xf32> to vector<8x128xf32>
    %1054 = arith.negf %1053 : vector<8x128xf32>
    %1055 = math.exp %1054 : vector<8x128xf32>
    %cst_422 = arith.constant 1.000000e+00 : f32
    %1056 = vector.broadcast %cst_422 : f32 to vector<8x128xf32>
    %1057 = arith.addf %1056, %1055 : vector<8x128xf32>
    %1058 = arith.divf %1056, %1057 : vector<8x128xf32>
    %1059 = vector.extract_strided_slice %1052 {offsets = [0, 128], sizes = [8, 128], strides = [1, 1]} : vector<8x512xf32> to vector<8x128xf32>
    %1060 = arith.negf %1059 : vector<8x128xf32>
    %1061 = math.exp %1060 : vector<8x128xf32>
    %cst_423 = arith.constant 1.000000e+00 : f32
    %1062 = vector.broadcast %cst_423 : f32 to vector<8x128xf32>
    %1063 = arith.addf %1062, %1061 : vector<8x128xf32>
    %1064 = arith.divf %1062, %1063 : vector<8x128xf32>
    %1065 = vector.extract_strided_slice %1052 {offsets = [0, 256], sizes = [8, 128], strides = [1, 1]} : vector<8x512xf32> to vector<8x128xf32>
    %1066 = math.tanh %1065 : vector<8x128xf32>
    %1067 = vector.extract_strided_slice %1052 {offsets = [0, 384], sizes = [8, 128], strides = [1, 1]} : vector<8x512xf32> to vector<8x128xf32>
    %1068 = arith.negf %1067 : vector<8x128xf32>
    %1069 = math.exp %1068 : vector<8x128xf32>
    %cst_424 = arith.constant 1.000000e+00 : f32
    %1070 = vector.broadcast %cst_424 : f32 to vector<8x128xf32>
    %1071 = arith.addf %1070, %1069 : vector<8x128xf32>
    %1072 = arith.divf %1070, %1071 : vector<8x128xf32>
    %1073 = arith.mulf %1064, %1042 : vector<8x128xf32>
    %1074 = arith.mulf %1058, %1066 : vector<8x128xf32>
    %1075 = arith.addf %1073, %1074 : vector<8x128xf32>
    %1076 = math.tanh %1075 : vector<8x128xf32>
    %1077 = arith.mulf %1072, %1076 : vector<8x128xf32>
    %c1_425 = arith.constant 1 : index
    %c8_426 = arith.constant 8 : index
    %c0_427 = arith.constant 0 : index
    %1078 = vector.load %arg7[%c1_425, %c8_426, %c0_427] : memref<2x64x128xf32, #tpu.memory_space<vmem>>, vector<1x8x128xf32>
    %1079 = vector.shape_cast %1078 : vector<1x8x128xf32> to vector<8x128xf32>
    %1080 = vector.shape_cast %1077 : vector<8x128xf32> to vector<1x8x128xf32>
    tpu.vector_store %arg7[%c1_425, %c8_426, %c0_427], %1080 {strides = array<i32>} : memref<2x64x128xf32, #tpu.memory_space<vmem>>, vector<1x8x128xf32>,
    %c0_428 = arith.constant 0 : index
    %c0_429 = arith.constant 0 : index
    %1081 = vector.load %arg9[%c0_428, %c0_429] : memref<64x512xf32, #tpu.memory_space<vmem>>, vector<8x512xf32>
    %c1_430 = arith.constant 1 : index
    %c0_431 = arith.constant 0 : index
    %c0_432 = arith.constant 0 : index
    %1082 = vector.load %arg5[%c1_430, %c0_431, %c0_432] : memref<2x128x512xf32, #tpu.memory_space<vmem>>, vector<1x128x512xf32>
    %1083 = vector.shape_cast %1082 : vector<1x128x512xf32> to vector<128x512xf32>
    %cst_433 = arith.constant dense<0.000000e+00> : vector<8x512xf32>
    %1084 = tpu.matmul %1077, %1083, %cst_433 {dimension_numbers = #tpu.dot_dimension_numbers<[1], [0], [0], [1], [0, 0, 1, 1], [], []>} : vector<8x128xf32>, vector<128x512xf32>, vector<8x512xf32> -> vector<8x512xf32>
    %1085 = arith.addf %1081, %1084 : vector<8x512xf32>
    %1086 = vector.extract_strided_slice %1085 {offsets = [0, 0], sizes = [8, 128], strides = [1, 1]} : vector<8x512xf32> to vector<8x128xf32>
    %1087 = arith.negf %1086 : vector<8x128xf32>
    %1088 = math.exp %1087 : vector<8x128xf32>
    %cst_434 = arith.constant 1.000000e+00 : f32
    %1089 = vector.broadcast %cst_434 : f32 to vector<8x128xf32>
    %1090 = arith.addf %1089, %1088 : vector<8x128xf32>
    %1091 = arith.divf %1089, %1090 : vector<8x128xf32>
    %1092 = vector.extract_strided_slice %1085 {offsets = [0, 128], sizes = [8, 128], strides = [1, 1]} : vector<8x512xf32> to vector<8x128xf32>
    %1093 = arith.negf %1092 : vector<8x128xf32>
    %1094 = math.exp %1093 : vector<8x128xf32>
    %cst_435 = arith.constant 1.000000e+00 : f32
    %1095 = vector.broadcast %cst_435 : f32 to vector<8x128xf32>
    %1096 = arith.addf %1095, %1094 : vector<8x128xf32>
    %1097 = arith.divf %1095, %1096 : vector<8x128xf32>
    %1098 = vector.extract_strided_slice %1085 {offsets = [0, 256], sizes = [8, 128], strides = [1, 1]} : vector<8x512xf32> to vector<8x128xf32>
    %1099 = math.tanh %1098 : vector<8x128xf32>
    %1100 = vector.extract_strided_slice %1085 {offsets = [0, 384], sizes = [8, 128], strides = [1, 1]} : vector<8x512xf32> to vector<8x128xf32>
    %1101 = arith.negf %1100 : vector<8x128xf32>
    %1102 = math.exp %1101 : vector<8x128xf32>
    %cst_436 = arith.constant 1.000000e+00 : f32
    %1103 = vector.broadcast %cst_436 : f32 to vector<8x128xf32>
    %1104 = arith.addf %1103, %1102 : vector<8x128xf32>
    %1105 = arith.divf %1103, %1104 : vector<8x128xf32>
    %1106 = arith.mulf %1097, %1075 : vector<8x128xf32>
    %1107 = arith.mulf %1091, %1099 : vector<8x128xf32>
    %1108 = arith.addf %1106, %1107 : vector<8x128xf32>
    %1109 = math.tanh %1108 : vector<8x128xf32>
    %1110 = arith.mulf %1105, %1109 : vector<8x128xf32>
    %c1_437 = arith.constant 1 : index
    %c0_438 = arith.constant 0 : index
    %c0_439 = arith.constant 0 : index
    %1111 = vector.load %arg7[%c1_437, %c0_438, %c0_439] : memref<2x64x128xf32, #tpu.memory_space<vmem>>, vector<1x8x128xf32>
    %1112 = vector.shape_cast %1111 : vector<1x8x128xf32> to vector<8x128xf32>
    %1113 = vector.shape_cast %1110 : vector<8x128xf32> to vector<1x8x128xf32>
    tpu.vector_store %arg7[%c1_437, %c0_438, %c0_439], %1113 {strides = array<i32>} : memref<2x64x128xf32, #tpu.memory_space<vmem>>, vector<1x8x128xf32>,
    return
  }
}

</mosaic_0001>

<bundles_post_ra>
// kernel: bilstm_forward.1
= control target key start
LH: loop header
LB: loop body
LE: loop exit
PB: predicated region body
PF: predicated region fallthrough
CT: control target
= control target key end

     0   :  { %12 = vsyncpa [#allocation5], 0  ;;  %s15589_s0 = inlined_call_operand.vmem [shape: f32[64,128], index: 0, kind: input, shape index: {}]   ;;  %s15590_s1 = inlined_call_operand.hbm [shape: f32[2,128,512], index: 1, kind: input, shape index: {}]   ;;  %s15591_s2 = inlined_call_operand.hbm [shape: f32[2,128,512], index: 2, kind: input, shape index: {}]   ;;  %s15592_s3 = inlined_call_operand.vmem [shape: f32[2,1,512], index: 3, kind: input, shape index: {}]   ;;  %s15593_s4 = inlined_call_operand.hbm [shape: f32[4,128,512], index: 4, kind: input, shape index: {}]   ;;  %s15594_s5 = inlined_call_operand.hbm [shape: f32[2,128,512], index: 5, kind: input, shape index: {}]   ;;  %s15595_s6 = inlined_call_operand.vmem [shape: f32[2,1,512], index: 6, kind: input, shape index: {}]   ;;  %s15596_s7 = inlined_call_operand.vmem [shape: f32[2,64,128], index: 7, kind: output, shape index: {}]  }
   0x1   :  { %13 = vsyncpa [#allocation7], 0 }
   0x2   :  { %14 = vsyncpa [#allocation10], 0  ;;  %s13285_s24 = smov [#allocation6]   ;;  %s13286_s26 = smov [#allocation4]  }
   0x3   :  { %s34_s25 = sshll.u32 %s13285_s24, 4  ;;  %s22_s27 = sshll.u32 %s13286_s26, 4  ;;  %s35_s25 = int_to_ptr.vmem [resolvable:$true] %s34_s25  ;;  %s13332_s27 = int_to_ptr.vmem [resolvable:$true] %s22_s27 }
   0x4   :  { %s13191_s30 = scalar_lea.hbm %s15591_s2, 16384 }
   0x5   :  { %p13192_p0 = scmp.ne.s32.totalorder %s15591_s2, %s13191_s30  ;;  %p13195_p1 = scmp.lt.u32.totalorder %s13191_s30, %s15591_s2 }
   0x7   :  { %p13197_p2 = pnand %p13195_p1, %p13192_p0 }
   0x9   :  { %13200 = shalt.err (!%p13197_p2)
}
   0xa   :  { %s13201_s12 = scalar_lea.vmem %s35_s25, 16384  ;;  %p13206_p4 = scmp.lt.s32.totalorder %s35_s25, %s35_s25 }
   0xb   :  { %p13202_p3 = scmp.ne.s32.totalorder %s35_s25, %s13201_s12  ;;  %p13207_p5 = scmp.lt.s32.totalorder %s13201_s12, %s13201_s12 }
   0xd   :  { %p13208_p6 = por %p13207_p5, %p13206_p4 }
   0xf   :  { %p13209_p7 = pnand %p13208_p6, %p13202_p3 }
  0x11   :  { %13212 = shalt.err (!%p13209_p7)
}
  0x12   :  { %s13287_s13 = smov 512   ;;  %s13288_s14 = smov 32  }
  0x13   :  { %40 = dma.hbm_to_vmem [thread:$0]  %s15591_s2, 16384, %s35_s25, [#allocation7], %s13287_s13, %s13287_s13, %s13288_s14  }
  0x14   :  { %s13213_s19 = scalar_lea.hbm %s15590_s1, 16384 }
  0x15   :  { %p13214_p8 = scmp.ne.s32.totalorder %s15590_s1, %s13213_s19  ;;  %p13217_p9 = scmp.lt.u32.totalorder %s13213_s19, %s15590_s1 }
  0x17   :  { %p13219_p10 = pnand %p13217_p9, %p13214_p8 }
  0x19   :  { %13222 = shalt.err (!%p13219_p10)
}
  0x1a   :  { %s13223_s24 = scalar_lea.vmem %s13332_s27, 16384  ;;  %p13228_p12 = scmp.lt.s32.totalorder %s13332_s27, %s13332_s27 }
  0x1b   :  { %p13224_p11 = scmp.ne.s32.totalorder %s13332_s27, %s13223_s24  ;;  %p13229_p13 = scmp.lt.s32.totalorder %s13223_s24, %s13223_s24 }
  0x1d   :  { %p13230_p0 = por %p13229_p13, %p13228_p12 }
  0x1f   :  { %p13231_p1 = pnand %p13230_p0, %p13224_p11 }
  0x21   :  { %13234 = shalt.err (!%p13231_p1)
}
  0x22   :  { %28 = dma.hbm_to_vmem [thread:$0]  %s15590_s1, 16384, %s13332_s27, [#allocation5], %s13287_s13, %s13287_s13, %s13288_s14  }
  0x23   :  { %s13289_s26 = smov [#allocation8]   ;;  %s13290_s29 = smov [#allocation9]  }
  0x24   :  { %s48_s28 = sshll.u32 %s13289_s26, 4  ;;  %s60_s30 = sshll.u32 %s13290_s29, 4  ;;  %s49_s28 = int_to_ptr.vmem [resolvable:$true] %s48_s28  ;;  %s13369_s30 = int_to_ptr.vmem [resolvable:$true] %s60_s30 }
  0x25   :  { %s13235_s10 = scalar_lea.hbm %s15593_s4, 32768 }
  0x26   :  { %p13236_p2 = scmp.ne.s32.totalorder %s15593_s4, %s13235_s10  ;;  %p13239_p3 = scmp.lt.u32.totalorder %s13235_s10, %s15593_s4 }
  0x28   :  { %p13241_p4 = pnand %p13239_p3, %p13236_p2 }
  0x2a   :  { %13244 = shalt.err (!%p13241_p4)
}
  0x2b   :  { %s13245_s1 = scalar_lea.vmem %s49_s28, 32768  ;;  %p13250_p6 = scmp.lt.s32.totalorder %s49_s28, %s49_s28 }
  0x2c   :  { %p13246_p5 = scmp.ne.s32.totalorder %s49_s28, %s13245_s1  ;;  %p13251_p7 = scmp.lt.s32.totalorder %s13245_s1, %s13245_s1 }
  0x2e   :  { %p13252_p8 = por %p13251_p7, %p13250_p6 }
  0x30   :  { %p13253_p9 = pnand %p13252_p8, %p13246_p5 }
  0x32   :  { %13256 = shalt.err (!%p13253_p9)
}
  0x33   :  { %54 = dma.hbm_to_vmem [thread:$0]  %s15593_s4, 32768, %s49_s28, [#allocation7], %s13287_s13, %s13287_s13, %s13288_s14  }
  0x34   :  { %s13257_s20 = scalar_lea.hbm %s15594_s5, 16384 }
  0x35   :  { %p13258_p10 = scmp.ne.s32.totalorder %s15594_s5, %s13257_s20  ;;  %p13261_p11 = scmp.lt.u32.totalorder %s13257_s20, %s15594_s5 }
  0x37   :  { %p13263_p12 = pnand %p13261_p11, %p13258_p10 }
  0x39   :  { %13266 = shalt.err (!%p13263_p12)
}
  0x3a   :  { %s13267_s2 = scalar_lea.vmem %s13369_s30, 16384  ;;  %p13272_p0 = scmp.lt.s32.totalorder %s13369_s30, %s13369_s30 }
  0x3b   :  { %p13268_p13 = scmp.ne.s32.totalorder %s13369_s30, %s13267_s2  ;;  %p13273_p1 = scmp.lt.s32.totalorder %s13267_s2, %s13267_s2 }
  0x3d   :  { %p13274_p2 = por %p13273_p1, %p13272_p0 }
  0x3f   :  { %p13275_p3 = pnand %p13274_p2, %p13268_p13 }
  0x41   :  { %13278 = shalt.err (!%p13275_p3)
}
  0x42   :  { %66 = dma.hbm_to_vmem [thread:$0]  %s15594_s5, 16384, %s13369_s30, [#allocation10], %s13287_s13, %s13287_s13, %s13288_s14  }
  0x43   :  { %13279 = dma.done.wait [#allocation5], 16384  }
  0x44   :  { %13280 = vsyncadd [#allocation5], 4294950912 }
  0x45   :  { %13281 = dma.done.wait [#allocation7], 49152  }
  0x46   :  { %13282 = vsyncadd [#allocation7], 4294918144 }
  0x47   :  { %13283 = dma.done.wait [#allocation10], 16384  }
  0x48   :  { %13284 = vsyncadd [#allocation10], 4294950912  ;;  %v15597_v0 = vmov 0.0   ;;  %v90_v1 = vld [vmem:[#allocation4 + $0x8] sm:$0xff]  ;;  %v92_v3 = vld [vmem:[#allocation4 + $0x18] sm:$0xff] }
  0x49   :  { %239 = vmatprep.mubr.f32.mxu0 %v15597_v0  ;;  %352 = vmatprep.mubr.f32.mxu1 %v15597_v0  ;;  %v94_v2 = vld [vmem:[#allocation4 + $0x28] sm:$0xff]  ;;  %v96_v5 = vld [vmem:[#allocation4 + $0x38] sm:$0xff]  ;;  %v89_v6 = vld [vmem:[#allocation4] sm:$0xff] }
  0x4a   :  { %v9920_v4 = vpack.c.bf16 %v94_v2, %v90_v1  ;;  %v93_v7 = vld [vmem:[#allocation4 + $0x20] sm:$0xff]  ;;  %v9952_v8 = vpack.c.bf16 %v96_v5, %v92_v3  ;;  %v91_v10 = vld [vmem:[#allocation4 + $0x10] sm:$0xff]  ;;  %v98_v12 = vld [vmem:[#allocation4 + $0x48] sm:$0xff] }
  0x4b   :  { %v9922_v9 = vpack.c.bf16 %v93_v7, %v89_v6  ;;  %v95_v11 = vld [vmem:[#allocation4 + $0x30] sm:$0xff]  ;;  %v102_v14 = vld [vmem:[#allocation4 + $0x68] sm:$0xff]  ;;  %v100_v15 = vld [vmem:[#allocation4 + $0x58] sm:$0xff] }
  0x4c   :  { %9921 = vmatprep.subr.bf16.mxu0 %v9920_v4  ;;  %v9954_v13 = vpack.c.bf16 %v95_v11, %v91_v10  ;;  %v104_v16 = vld [vmem:[#allocation4 + $0x78] sm:$0xff]  ;;  %9953 = vmatprep.subr.bf16.mxu1 %v9952_v8  ;;  %v9924_v17 = vpack.c.bf16 %v102_v14, %v98_v12  ;;  %v97_v19 = vld [vmem:[#allocation4 + $0x40] sm:$0xff]  ;;  %v99_v21 = vld [vmem:[#allocation4 + $0x50] sm:$0xff] }
  0x4d   :  { %9923 = vmatpush1.bf16.msra.mxu0 %v9922_v9  ;;  %v9956_v18 = vpack.c.bf16 %v104_v16, %v100_v15  ;;  %v101_v20 = vld [vmem:[#allocation4 + $0x60] sm:$0xff]  ;;  %v103_v23 = vld [vmem:[#allocation4 + $0x70] sm:$0xff]  ;;  %v106_v24 = vld [vmem:[#allocation4 + $0x88] sm:$0xff] }
  0x4e   :  { %9955 = vmatpush1.bf16.msra.mxu1 %v9954_v13  ;;  %v9926_v22 = vpack.c.bf16 %v101_v20, %v97_v19  ;;  %v110_v25 = vld [vmem:[#allocation4 + $0xa8] sm:$0xff]  ;;  %9925 = vmatprep.subr.bf16.mxu0 %v9924_v17  ;;  %v9958_v26 = vpack.c.bf16 %v103_v23, %v99_v21  ;;  %v108_v28 = vld [vmem:[#allocation4 + $0x98] sm:$0xff]  ;;  %v105_v30 = vld [vmem:[#allocation4 + $0x80] sm:$0xff] }
  0x4f   :  { %9957 = vmatprep.subr.bf16.mxu1 %v9956_v18  ;;  %v9928_v27 = vpack.c.bf16 %v110_v25, %v106_v24  ;;  %v112_v29 = vld [vmem:[#allocation4 + $0xb8] sm:$0xff]  ;;  %v109_v32 = vld [vmem:[#allocation4 + $0xa0] sm:$0xff]  ;;  %v107_v33 = vld [vmem:[#allocation4 + $0x90] sm:$0xff] }
  0x50   :  { %v9960_v31 = vpack.c.bf16 %v112_v29, %v108_v28  ;;  %v111_v34 = vld [vmem:[#allocation4 + $0xb0] sm:$0xff]  ;;  %v9930_v35 = vpack.c.bf16 %v109_v32, %v105_v30  ;;  %v114_v36 = vld [vmem:[#allocation4 + $0xc8] sm:$0xff]  ;;  %v116_v38 = vld [vmem:[#allocation4 + $0xd8] sm:$0xff] }
  0x51   :  { %9927 = vmatpush1.bf16.msra.mxu0 %v9926_v22  ;;  %v118_v37 = vld [vmem:[#allocation4 + $0xe8] sm:$0xff]  ;;  %v9962_v39 = vpack.c.bf16 %v111_v34, %v107_v33  ;;  %v120_v41 = vld [vmem:[#allocation4 + $0xf8] sm:$0xff]  ;;  %v113_v42 = vld [vmem:[#allocation4 + $0xc0] sm:$0xff] }
  0x52   :  { %9959 = vmatpush1.bf16.msra.mxu1 %v9958_v26  ;;  %9929 = vmatprep.subr.bf16.mxu0 %v9928_v27  ;;  %v9932_v40 = vpack.c.bf16 %v118_v37, %v114_v36  ;;  %v117_v43 = vld [vmem:[#allocation4 + $0xe0] sm:$0xff]  ;;  %v9964_v44 = vpack.c.bf16 %v120_v41, %v116_v38  ;;  %v115_v45 = vld [vmem:[#allocation4 + $0xd0] sm:$0xff]  ;;  %v122_v47 = vld [vmem:[#allocation4 + $0x108] sm:$0xff] }
  0x53   :  { %9961 = vmatprep.subr.bf16.mxu1 %v9960_v31  ;;  %v119_v46 = vld [vmem:[#allocation4 + $0xf0] sm:$0xff]  ;;  %v126_v48 = vld [vmem:[#allocation4 + $0x128] sm:$0xff]  ;;  %v124_v49 = vld [vmem:[#allocation4 + $0x118] sm:$0xff]  ;;  %v9934_v51 = vpack.c.bf16 %v117_v43, %v113_v42 }
  0x54   :  { %v128_v50 = vld [vmem:[#allocation4 + $0x138] sm:$0xff]  ;;  %v9966_v52 = vpack.c.bf16 %v119_v46, %v115_v45  ;;  %v9936_v53 = vpack.c.bf16 %v126_v48, %v122_v47  ;;  %v121_v54 = vld [vmem:[#allocation4 + $0x100] sm:$0xff]  ;;  %v123_v56 = vld [vmem:[#allocation4 + $0x110] sm:$0xff] }
  0x55   :  { %9931 = vmatpush1.bf16.msra.mxu0 %v9930_v35  ;;  %v125_v55 = vld [vmem:[#allocation4 + $0x120] sm:$0xff]  ;;  %v9968_v57 = vpack.c.bf16 %v128_v50, %v124_v49  ;;  %v127_v58 = vld [vmem:[#allocation4 + $0x130] sm:$0xff]  ;;  %v130_v59 = vld [vmem:[#allocation4 + $0x148] sm:$0xff] }
  0x56   :  { %9963 = vmatpush1.bf16.msra.mxu1 %v9962_v39  ;;  %9933 = vmatprep.subr.bf16.mxu0 %v9932_v40  ;;  %v134_v60 = vld [vmem:[#allocation4 + $0x168] sm:$0xff]  ;;  %v132_v61 = vld [vmem:[#allocation4 + $0x158] sm:$0xff]  ;;  %v9938_v63 = vpack.c.bf16 %v125_v55, %v121_v54  ;;  %v9970_v1 = vpack.c.bf16 %v127_v58, %v123_v56  ;;  %v129_v3 = vld [vmem:[#allocation4 + $0x140] sm:$0xff] }
  0x57   :  { %9965 = vmatprep.subr.bf16.mxu1 %v9964_v44  ;;  %v136_v62 = vld [vmem:[#allocation4 + $0x178] sm:$0xff]  ;;  %v9940_v2 = vpack.c.bf16 %v134_v60, %v130_v59  ;;  %v133_v4 = vld [vmem:[#allocation4 + $0x160] sm:$0xff]  ;;  %v131_v5 = vld [vmem:[#allocation4 + $0x150] sm:$0xff] }
  0x58   :  { %v9972_v6 = vpack.c.bf16 %v136_v62, %v132_v61  ;;  %v135_v7 = vld [vmem:[#allocation4 + $0x170] sm:$0xff]  ;;  %v138_v8 = vld [vmem:[#allocation4 + $0x188] sm:$0xff]  ;;  %v140_v10 = vld [vmem:[#allocation4 + $0x198] sm:$0xff]  ;;  %v9942_v12 = vpack.c.bf16 %v133_v4, %v129_v3 }
  0x59   :  { %9935 = vmatpush1.bf16.msra.mxu0 %v9934_v51  ;;  %v142_v9 = vld [vmem:[#allocation4 + $0x1a8] sm:$0xff]  ;;  %v144_v11 = vld [vmem:[#allocation4 + $0x1b8] sm:$0xff]  ;;  %v9974_v13 = vpack.c.bf16 %v135_v7, %v131_v5  ;;  %v137_v15 = vld [vmem:[#allocation4 + $0x180] sm:$0xff] }
  0x5a   :  { %9967 = vmatpush1.bf16.msra.mxu1 %v9966_v52  ;;  %9937 = vmatprep.subr.bf16.mxu0 %v9936_v53  ;;  %v9944_v14 = vpack.c.bf16 %v142_v9, %v138_v8  ;;  %v141_v16 = vld [vmem:[#allocation4 + $0x1a0] sm:$0xff]  ;;  %v139_v17 = vld [vmem:[#allocation4 + $0x190] sm:$0xff]  ;;  %v9976_v18 = vpack.c.bf16 %v144_v11, %v140_v10  ;;  %v146_v20 = vld [vmem:[#allocation4 + $0x1c8] sm:$0xff] }
  0x5b   :  { %9969 = vmatprep.subr.bf16.mxu1 %v9968_v57  ;;  %v143_v19 = vld [vmem:[#allocation4 + $0x1b0] sm:$0xff]  ;;  %v150_v21 = vld [vmem:[#allocation4 + $0x1e8] sm:$0xff]  ;;  %v148_v22 = vld [vmem:[#allocation4 + $0x1d8] sm:$0xff]  ;;  %v9946_v24 = vpack.c.bf16 %v141_v16, %v137_v15 }
  0x5c   :  { %v152_v23 = vld [vmem:[#allocation4 + $0x1f8] sm:$0xff]  ;;  %v9978_v25 = vpack.c.bf16 %v143_v19, %v139_v17  ;;  %v9948_v26 = vpack.c.bf16 %v150_v21, %v146_v20  ;;  %v145_v27 = vld [vmem:[#allocation4 + $0x1c0] sm:$0xff]  ;;  %v147_v29 = vld [vmem:[#allocation4 + $0x1d0] sm:$0xff] }
  0x5d   :  { %9939 = vmatpush1.bf16.msra.mxu0 %v9938_v63  ;;  %v149_v28 = vld [vmem:[#allocation4 + $0x1e0] sm:$0xff]  ;;  %v9980_v30 = vpack.c.bf16 %v152_v23, %v148_v22  ;;  %v151_v31 = vld [vmem:[#allocation4 + $0x1f0] sm:$0xff]  ;;  %v438_v32 = vld [vmem:[#allocation6 + $0x8] sm:$0xff] }
  0x5e   :  { %9971 = vmatpush1.bf16.msra.mxu1 %v9970_v1  ;;  %9941 = vmatprep.subr.bf16.mxu0 %v9940_v2  ;;  %v442_v33 = vld [vmem:[#allocation6 + $0x28] sm:$0xff]  ;;  %v440_v34 = vld [vmem:[#allocation6 + $0x18] sm:$0xff]  ;;  %v9950_v36 = vpack.c.bf16 %v149_v28, %v145_v27  ;;  %v9982_v37 = vpack.c.bf16 %v151_v31, %v147_v29  ;;  %v437_v39 = vld [vmem:[#allocation6] sm:$0xff] }
  0x5f   :  { %9973 = vmatprep.subr.bf16.mxu1 %v9972_v6  ;;  %v444_v35 = vld [vmem:[#allocation6 + $0x38] sm:$0xff]  ;;  %v13408_v38 = vpack.c.bf16 %v442_v33, %v438_v32  ;;  %v441_v40 = vld [vmem:[#allocation6 + $0x20] sm:$0xff]  ;;  %v439_v42 = vld [vmem:[#allocation6 + $0x10] sm:$0xff] }
  0x60   :  { %v13410_v41 = vpack.c.bf16 %v444_v35, %v440_v34  ;;  %v443_v43 = vld [vmem:[#allocation6 + $0x30] sm:$0xff]  ;;  %v446_v44 = vld [vmem:[#allocation6 + $0x48] sm:$0xff]  ;;  %v81_v46 = vld [vmem:[%s15589_s0] sm:$0xff]  ;;  %v13415_v47 = vpack.c.bf16 %v441_v40, %v437_v39 }
  0x61   :  { %9943 = vmatpush1.bf16.msra.mxu0 %v9942_v12  ;;  %v450_v45 = vld [vmem:[#allocation6 + $0x68] sm:$0xff]  ;;  %v448_v48 = vld [vmem:[#allocation6 + $0x58] sm:$0xff]  ;;  %v13418_v50 = vpack.c.bf16 %v443_v43, %v439_v42  ;;  %v445_v51 = vld [vmem:[#allocation6 + $0x40] sm:$0xff] }
  0x62   :  { %9975 = vmatpush1.bf16.msra.mxu1 %v9974_v13  ;;  %9945 = vmatprep.subr.bf16.mxu0 %v9944_v14  ;;  %v452_v49 = vld [vmem:[#allocation6 + $0x78] sm:$0xff]  ;;  %v449_v52 = vld [vmem:[#allocation6 + $0x60] sm:$0xff]  ;;  %v13421_v53 = vpack.c.bf16 %v450_v45, %v446_v44  ;;  %v447_v54 = vld [vmem:[#allocation6 + $0x50] sm:$0xff] }
  0x63   :  { %9977 = vmatprep.subr.bf16.mxu1 %v9976_v18  ;;  %v451_v55 = vld [vmem:[#allocation6 + $0x70] sm:$0xff]  ;;  %v13423_v56 = vpack.c.bf16 %v452_v49, %v448_v48  ;;  %v454_v57 = vld [vmem:[#allocation6 + $0x88] sm:$0xff]  ;;  %v13429_v60 = vpack.c.bf16 %v449_v52, %v445_v51  ;;  %v456_v61 = vld [vmem:[#allocation6 + $0x98] sm:$0xff] }
  0x64   :  { %v458_v58 = vld [vmem:[#allocation6 + $0xa8] sm:$0xff]  ;;  %v460_v62 = vld [vmem:[#allocation6 + $0xb8] sm:$0xff]  ;;  %v13433_v63 = vpack.c.bf16 %v451_v55, %v447_v54  ;;  %v453_v1 = vld [vmem:[#allocation6 + $0x80] sm:$0xff] }
  0x65   :  { %9947 = vmatpush1.bf16.msra.mxu0 %v9946_v24  ;;  %v82_v59 = vld [vmem:[%s15589_s0 + $0x8] sm:$0xff]  ;;  %v457_v2 = vld [vmem:[#allocation6 + $0xa0] sm:$0xff]  ;;  %v13437_v3 = vpack.c.bf16 %v458_v58, %v454_v57  ;;  %v455_v4 = vld [vmem:[#allocation6 + $0x90] sm:$0xff]  ;;  %v13440_v6 = vpack.c.bf16 %v460_v62, %v456_v61 }
  0x66   :  { %9979 = vmatpush1.bf16.msra.mxu1 %v9978_v25  ;;  %9949 = vmatprep.subr.bf16.mxu0 %v9948_v26  ;;  %v459_v5 = vld [vmem:[#allocation6 + $0xb0] sm:$0xff]  ;;  %v462_v7 = vld [vmem:[#allocation6 + $0xc8] sm:$0xff]  ;;  %v13446_v10 = vpack.c.bf16 %v457_v2, %v453_v1  ;;  %v464_v11 = vld [vmem:[#allocation6 + $0xd8] sm:$0xff] }
  0x67   :  { %9981 = vmatprep.subr.bf16.mxu1 %v9980_v30  ;;  %v466_v8 = vld [vmem:[#allocation6 + $0xe8] sm:$0xff]  ;;  %v83_v9 = vld [vmem:[%s15589_s0 + $0x10] sm:$0xff]  ;;  %v468_v12 = vld [vmem:[#allocation6 + $0xf8] sm:$0xff]  ;;  %v13450_v13 = vpack.c.bf16 %v459_v5, %v455_v4 }
  0x68   :  { %v461_v14 = vld [vmem:[#allocation6 + $0xc0] sm:$0xff]  ;;  %v13454_v16 = vpack.c.bf16 %v466_v8, %v462_v7  ;;  %v463_v17 = vld [vmem:[#allocation6 + $0xd0] sm:$0xff]  ;;  %v13457_v19 = vpack.c.bf16 %v468_v12, %v464_v11  ;;  %v470_v20 = vld [vmem:[#allocation6 + $0x108] sm:$0xff] }
  0x69   :  { %9951 = vmatpush1.bf16.msra.mxu0 %v9950_v36  ;;  %v465_v15 = vld [vmem:[#allocation6 + $0xe0] sm:$0xff]  ;;  %v467_v18 = vld [vmem:[#allocation6 + $0xf0] sm:$0xff]  ;;  %v474_v21 = vld [vmem:[#allocation6 + $0x128] sm:$0xff] }
  0x6a   :  { %9983 = vmatpush1.bf16.msra.mxu1 %v9982_v37  ;;  %9985 = vmatprep.subr.bf16.mxu0 %v13408_v38  ;;  %v84_v22 = vld [vmem:[%s15589_s0 + $0x18] sm:$0xff]  ;;  %v13463_v23 = vpack.c.bf16 %v465_v15, %v461_v14  ;;  %v13467_v26 = vpack.c.bf16 %v467_v18, %v463_v17  ;;  %v469_v27 = vld [vmem:[#allocation6 + $0x100] sm:$0xff]  ;;  %v13471_v29 = vpack.c.bf16 %v474_v21, %v470_v20  ;;  %v471_v30 = vld [vmem:[#allocation6 + $0x110] sm:$0xff] }
  0x6b   :  { %10017 = vmatprep.subr.bf16.mxu1 %v13410_v41  ;;  %v472_v24 = vld [vmem:[#allocation6 + $0x118] sm:$0xff]  ;;  %v473_v28 = vld [vmem:[#allocation6 + $0x120] sm:$0xff]  ;;  %v475_v31 = vld [vmem:[#allocation6 + $0x130] sm:$0xff] }
  0x6c   :  { %240 = vmatmul.mubr.f32.vlgmr.msra.gmra.mrb[0].mxu0 %v81_v46  ;;  %v476_v25 = vld [vmem:[#allocation6 + $0x138] sm:$0xff]  ;;  %v478_v33 = vld [vmem:[#allocation6 + $0x148] sm:$0xff]  ;;  %v85_v35 = vld [vmem:[%s15589_s0 + $0x20] sm:$0xff]  ;;  %v13480_v36 = vpack.c.bf16 %v473_v28, %v469_v27  ;;  %v13484_v40 = vpack.c.bf16 %v475_v31, %v471_v30  ;;  %v155_v28 = vlaneseq }
  0x6d   :  { %353 = vmatmul.mubr.f32.vlgmr.msra.gmra.mrb[0].mxu1 %v81_v46  ;;  %9987 = vmatpush1.bf16.msra.mxu0 %v13415_v47  ;;  %v13474_v32 = vpack.c.bf16 %v476_v25, %v472_v24  ;;  %v482_v34 = vld [vmem:[#allocation6 + $0x168] sm:$0xff]  ;;  %v480_v37 = vld [vmem:[#allocation6 + $0x158] sm:$0xff]  ;;  %v477_v42 = vld [vmem:[#allocation6 + $0x140] sm:$0xff] }
  0x6e   :  { %10019 = vmatpush1.bf16.msra.mxu1 %v13418_v50  ;;  %245 = vmatprep.mubr.f32.mxu0 %v15597_v0  ;;  %v484_v39 = vld [vmem:[#allocation6 + $0x178] sm:$0xff]  ;;  %v481_v43 = vld [vmem:[#allocation6 + $0x160] sm:$0xff]  ;;  %v13488_v44 = vpack.c.bf16 %v482_v34, %v478_v33  ;;  %v479_v45 = vld [vmem:[#allocation6 + $0x150] sm:$0xff]  ;;  %v156_v30 = vshrl.u32 %v155_v28, 7 }
  0x6f   :  { %358 = vmatprep.mubr.f32.mxu1 %v15597_v0  ;;  %9989 = vmatprep.subr.bf16.mxu0 %v13421_v53  ;;  %v483_v46 = vld [vmem:[#allocation6 + $0x170] sm:$0xff]  ;;  %v13491_v48 = vpack.c.bf16 %v484_v39, %v480_v37  ;;  %v486_v49 = vld [vmem:[#allocation6 + $0x188] sm:$0xff]  ;;  %v13497_v54 = vpack.c.bf16 %v481_v43, %v477_v42  ;;  %v488_v55 = vld [vmem:[#allocation6 + $0x198] sm:$0xff] }
  0x70   :  { %246 = vmatmul.mubr.f32.gmra.mrb[2].mxu0 %v82_v59  ;;  %10021 = vmatprep.subr.bf16.mxu1 %v13423_v56  ;;  %v490_v51 = vld [vmem:[#allocation6 + $0x1a8] sm:$0xff]  ;;  %v492_v57 = vld [vmem:[#allocation6 + $0x1b8] sm:$0xff]  ;;  %v13501_v58 = vpack.c.bf16 %v483_v46, %v479_v45  ;;  %v489_v61 = vld [vmem:[#allocation6 + $0x1a0] sm:$0xff]  ;;  %v13582_v31 = vsub.s32 0, %v156_v30  ;;  %v13587_v34 = vsub.s32 1, %v156_v30 }
  0x71   :  { %359 = vmatmul.mubr.f32.gmra.mrb[2].mxu1 %v82_v59  ;;  %9991 = vmatpush1.bf16.msra.mxu0 %v13429_v60  ;;  %v86_v52 = vld [vmem:[%s15589_s0 + $0x28] sm:$0xff]  ;;  %v485_v59 = vld [vmem:[#allocation6 + $0x180] sm:$0xff]  ;;  %v13505_v62 = vpack.c.bf16 %v490_v51, %v486_v49  ;;  %v487_v1 = vld [vmem:[#allocation6 + $0x190] sm:$0xff]  ;;  %v13508_v4 = vpack.c.bf16 %v492_v57, %v488_v55  ;;  %v13602_v55 = vsub.s32 2, %v156_v30 }
  0x72   :  { %10023 = vmatpush1.bf16.msra.mxu1 %v13433_v63  ;;  %251 = vmatprep.mubr.f32.mxu0 %v15597_v0  ;;  %v491_v2 = vld [vmem:[#allocation6 + $0x1b0] sm:$0xff]  ;;  %v494_v5 = vld [vmem:[#allocation6 + $0x1c8] sm:$0xff]  ;;  %v496_v11 = vld [vmem:[#allocation6 + $0x1d8] sm:$0xff]  ;;  %15619 = vst [vmem:[#allocation14_spill] sm:$0xff] %v13582_v31 }
  0x73   :  { %364 = vmatprep.mubr.f32.mxu1 %v15597_v0  ;;  %9993 = vmatprep.subr.bf16.mxu0 %v13437_v3  ;;  %v498_v7 = vld [vmem:[#allocation6 + $0x1e8] sm:$0xff]  ;;  %v87_v8 = vld [vmem:[%s15589_s0 + $0x30] sm:$0xff]  ;;  %v500_v12 = vld [vmem:[#allocation6 + $0x1f8] sm:$0xff]  ;;  %v13518_v14 = vpack.c.bf16 %v491_v2, %v487_v1  ;;  %15620 = vst [vmem:[#allocation15_spill] sm:$0xff] %v13587_v34 }
  0x74   :  { %252 = vmatmul.mubr.f32.gmra.mrb[4].mxu0 %v83_v9  ;;  %10025 = vmatprep.subr.bf16.mxu1 %v13440_v6  ;;  %v493_v15 = vld [vmem:[#allocation6 + $0x1c0] sm:$0xff]  ;;  %v13522_v18 = vpack.c.bf16 %v498_v7, %v494_v5  ;;  %v495_v20 = vld [vmem:[#allocation6 + $0x1d0] sm:$0xff]  ;;  %v88_v24 = vld [vmem:[%s15589_s0 + $0x38] sm:$0xff]  ;;  %15622 = vst [vmem:[#allocation17_spill] sm:$0xff] %v13602_v55 }
  0x75   :  { %365 = vmatmul.mubr.f32.gmra.mrb[4].mxu1 %v83_v9  ;;  %9995 = vmatpush1.bf16.msra.mxu0 %v13446_v10  ;;  %v13514_v9 = vpack.c.bf16 %v489_v61, %v485_v59  ;;  %v497_v17 = vld [vmem:[#allocation6 + $0x1e0] sm:$0xff]  ;;  %v499_v21 = vld [vmem:[#allocation6 + $0x1f0] sm:$0xff] }
  0x76   :  { %10027 = vmatpush1.bf16.msra.mxu1 %v13450_v13  ;;  %257 = vmatprep.mubr.f32.mxu0 %v15597_v0  ;;  %v13531_v25 = vpack.c.bf16 %v497_v17, %v493_v15  ;;  %v13535_v27 = vpack.c.bf16 %v499_v21, %v495_v20  ;;  %v153_v33 = vld [vmem:[%s15592_s3] sm:$0xf] }
  0x77   :  { %370 = vmatprep.mubr.f32.mxu1 %v15597_v0  ;;  %9997 = vmatprep.subr.bf16.mxu0 %v13454_v16  ;;  %v13593_v37 = vrot.slane %v153_v33, %v13587_v34  ;;  %v13606_v59 = vrot.slane %v153_v33, %v13602_v55 }
  0x78   :  { %258 = vmatmul.mubr.f32.gmra.mrb[6].mxu0 %v84_v22  ;;  %10029 = vmatprep.subr.bf16.mxu1 %v13457_v19 }
  0x79   :  { %371 = vmatmul.mubr.f32.gmra.mrb[6].mxu1 %v84_v22  ;;  %9999 = vmatpush1.bf16.msra.mxu0 %v13463_v23  ;;  %v13525_v22 = vpack.c.bf16 %v500_v12, %v496_v11 }
  0x7a   :  { %10031 = vmatpush1.bf16.msra.mxu1 %v13467_v26  ;;  %263 = vmatprep.mubr.f32.mxu0 %v15597_v0 }
  0x7b   :  { %376 = vmatprep.mubr.f32.mxu1 %v15597_v0  ;;  %10001 = vmatprep.subr.bf16.mxu0 %v13471_v29 }
  0x7c   :  { %264 = vmatmul.mubr.f32.gmra.mrb[8].mxu0 %v85_v35  ;;  %10033 = vmatprep.subr.bf16.mxu1 %v13474_v32 }
  0x7d   :  { %377 = vmatmul.mubr.f32.gmra.mrb[8].mxu1 %v85_v35  ;;  %10003 = vmatpush1.bf16.msra.mxu0 %v13480_v36  ;;  %v13590_v35 = vrot.slane %v153_v33, %v13582_v31 }
  0x7e   :  { %10035 = vmatpush1.bf16.msra.mxu1 %v13484_v40  ;;  %269 = vmatprep.mubr.f32.mxu0 %v15597_v0 }
  0x7f   :  { %382 = vmatprep.mubr.f32.mxu1 %v15597_v0  ;;  %10005 = vmatprep.subr.bf16.mxu0 %v13488_v44 }
  0x80   :  { %270 = vmatmul.mubr.f32.gmra.mrb[10].mxu0 %v86_v52  ;;  %10037 = vmatprep.subr.bf16.mxu1 %v13491_v48 }
  0x81   :  { %383 = vmatmul.mubr.f32.gmra.mrb[10].mxu1 %v86_v52  ;;  %10007 = vmatpush1.bf16.msra.mxu0 %v13497_v54 }
  0x82   :  { %10039 = vmatpush1.bf16.msra.mxu1 %v13501_v58  ;;  %275 = vmatprep.mubr.f32.mxu0 %v15597_v0 }
  0x83   :  { %388 = vmatprep.mubr.f32.mxu1 %v15597_v0  ;;  %10009 = vmatprep.subr.bf16.mxu0 %v13505_v62 }
  0x84   :  { %276 = vmatmul.mubr.f32.gmra.mrb[12].mxu0 %v87_v8  ;;  %10041 = vmatprep.subr.bf16.mxu1 %v13508_v4 }
  0x85   :  { %389 = vmatmul.mubr.f32.gmra.mrb[12].mxu1 %v87_v8  ;;  %10011 = vmatpush1.bf16.msra.mxu0 %v13514_v9 }
  0x86   :  { %10043 = vmatpush1.bf16.msra.mxu1 %v13518_v14  ;;  %281 = vmatprep.mubr.f32.mxu0 %v15597_v0 }
  0x87   :  { %394 = vmatprep.mubr.f32.mxu1 %v15597_v0  ;;  %10013 = vmatprep.subr.bf16.mxu0 %v13522_v18 }
  0x88   :  { %282 = vmatmul.mubr.f32.gmra.mrb[14].mxu0 %v88_v24  ;;  %10045 = vmatprep.subr.bf16.mxu1 %v13525_v22 }
  0x89   :  { %395 = vmatmul.mubr.f32.gmra.mrb[14].mxu1 %v88_v24  ;;  %10015 = vmatpush1.bf16.msra.mxu0 %v13531_v25 }
  0x8a   :  { %10047 = vmatpush1.bf16.msra.mxu1 %v13535_v27  ;;  %565 = vmatprep.mubr.f32.mxu0 %v15597_v0 }
  0x8b   :  { %636 = vmatprep.mubr.f32.mxu1 %v15597_v0  ;;  %10049 = vmatprep.subr.bf16.mxu0 %v13408_v38 }
  0x8c   :  { %566 = vmatmul.mubr.f32.vlgmr.msra.gmra.mrb[0].mxu0 %v15597_v0  ;;  %10081 = vmatprep.subr.bf16.mxu1 %v13410_v41 }
  0x8d   :  { %637 = vmatmul.mubr.f32.vlgmr.msra.gmra.mrb[0].mxu1 %v15597_v0  ;;  %10051 = vmatpush1.bf16.msra.mxu0 %v13415_v47 }
  0x8e   :  { %10083 = vmatpush1.bf16.msra.mxu1 %v13418_v50  ;;  %10053 = vmatprep.subr.bf16.mxu0 %v13421_v53 }
  0x8f   :  { %10085 = vmatprep.subr.bf16.mxu1 %v13423_v56  ;;  %804 = vmatprep.mubr.f32.mxu0 %v15597_v0 }
  0x90   :  { %875 = vmatprep.mubr.f32.mxu1 %v15597_v0 }
  0x91   :  { %10055 = vmatpush1.bf16.msra.mxu0 %v13429_v60 }
  0x92   :  { %10087 = vmatpush1.bf16.msra.mxu1 %v13433_v63  ;;  %10057 = vmatprep.subr.bf16.mxu0 %v13437_v3 }
  0x93   :  { %10089 = vmatprep.subr.bf16.mxu1 %v13440_v6 }
  0x95   :  { %10059 = vmatpush1.bf16.msra.mxu0 %v13446_v10 }
  0x96   :  { %10091 = vmatpush1.bf16.msra.mxu1 %v13450_v13  ;;  %10061 = vmatprep.subr.bf16.mxu0 %v13454_v16 }
  0x97   :  { %10093 = vmatprep.subr.bf16.mxu1 %v13457_v19 }
  0x99   :  { %10063 = vmatpush1.bf16.msra.mxu0 %v13463_v23 }
  0x9a   :  { %10095 = vmatpush1.bf16.msra.mxu1 %v13467_v26  ;;  %10065 = vmatprep.subr.bf16.mxu0 %v13471_v29 }
  0x9b   :  { %10097 = vmatprep.subr.bf16.mxu1 %v13474_v32 }
  0x9d   :  { %10067 = vmatpush1.bf16.msra.mxu0 %v13480_v36 }
  0x9e   :  { %10099 = vmatpush1.bf16.msra.mxu1 %v13484_v40  ;;  %10069 = vmatprep.subr.bf16.mxu0 %v13488_v44 }
  0x9f   :  { %10101 = vmatprep.subr.bf16.mxu1 %v13491_v48 }
  0xa1   :  { %10071 = vmatpush1.bf16.msra.mxu0 %v13497_v54 }
  0xa2   :  { %10103 = vmatpush1.bf16.msra.mxu1 %v13501_v58  ;;  %10073 = vmatprep.subr.bf16.mxu0 %v13505_v62 }
  0xa3   :  { %10105 = vmatprep.subr.bf16.mxu1 %v13508_v4 }
  0xa5   :  { %10075 = vmatpush1.bf16.msra.mxu0 %v13514_v9 }
  0xa6   :  { %10107 = vmatpush1.bf16.msra.mxu1 %v13518_v14  ;;  %10077 = vmatprep.subr.bf16.mxu0 %v13522_v18 }
  0xa7   :  { %10109 = vmatprep.subr.bf16.mxu1 %v13525_v22 }
  0xa9   :  { %10079 = vmatpush1.bf16.msra.mxu0 %v13531_v25 }
  0xaa   :  { %10111 = vmatpush1.bf16.msra.mxu1 %v13535_v27  ;;  %10113 = vmatprep.subr.bf16.mxu0 %v13408_v38  ;;  %v13595_v38 = vsub.s32 3, %v156_v30 }
  0xab   :  { %10145 = vmatprep.subr.bf16.mxu1 %v13410_v41 }
  0xac   :  { %15621 = vst [vmem:[#allocation16_spill] sm:$0xff] %v13595_v38  ;;  %v13600_v52 = vrot.slane %v153_v33, %v13595_v38 }
 0x15f   :  { %v567_v39 = vpop.f32.mrb[0].mxu0 }
 0x160   :  { %v12352_v41 = vadd.f32 %v567_v39, %v13590_v35  ;;  %v638_v42 = vpop.f32.mrb[0].mxu1  ;;  %v569_v43 = vpop.f32.mrb[1].mxu0 }
 0x161   :  { %v12353_v45 = vadd.f32 %v569_v43, %v13593_v37  ;;  %v640_v46 = vpop.f32.mrb[1].mxu1  ;;  %v12368_v1 = vadd.f32 %v638_v42, %v13606_v59 }
 0x162   :  { %v9814_v49 = vmul.f32 -1.442695, %v12352_v41  ;;  %v12369_v57 = vadd.f32 %v640_v46, %v13600_v52 }
 0x163   :  { %v9815_v51 = vmul.f32 -1.442695, %v12353_v45 }
 0x164   :  { %12679 = vpow2.f32 %v9814_v49  ;;  %v9816_v61 = vmul.f32 -1.442695, %v12369_v57 }
 0x165   :  { %12681 = vpow2.f32 %v9815_v51 }
 0x166   :  { %12683 = vpow2.f32 %v9816_v61 }
 0x167   :  { %12685 = vtanh.f32 %v12368_v1 }
 0x16e   :  { %v12680_v2 = vpop.eup %12679 }
 0x16f   :  { %v12682_v5 = vpop.eup %12681  ;;  %v650_v7 = vadd.f32 1.0, %v12680_v2 }
 0x170   :  { %v656_v8 = vadd.f32 1.0, %v12682_v5  ;;  %v12684_v11 = vpop.eup %12683 }
 0x171   :  { %12687 = vrcp.f32 %v650_v7  ;;  %v12686_v12 = vpop.eup %12685  ;;  %v663_v21 = vadd.f32 1.0, %v12684_v11 }
 0x172   :  { %12689 = vrcp.f32 %v656_v8 }
 0x173   :  { %12691 = vrcp.f32 %v663_v21 }
 0x17b   :  { %v12688_v15 = vpop.eup %12687 }
 0x17c   :  { %v12690_v17 = vpop.eup %12689  ;;  %v667_v20 = vmul.f32 %v12688_v15, %v12686_v12 }
 0x17d   :  { %v666_v24 = vmul.f32 0.0, %v12690_v17  ;;  %v12692_v30 = vpop.eup %12691 }
 0x17f   :  { %v13609_v28 = vadd.f32 %v667_v20, %v666_v24  ;;  %v1155_v24 = vld [vmem:[#allocation6 + $0x8] sm:$0xff] }
 0x181   :  { %12693 = vtanh.f32 %v13609_v28 }
 0x18b   :  { %v12694_v33 = vpop.eup %12693 }
 0x18c   :  { %v13612_v39 = vmul.f32 %v12694_v33, %v12692_v30  ;;  %v1159_v30 = vld [vmem:[#allocation6 + $0x28] sm:$0xff] }
 0x18d   :  { %v13662_v33 = vpack.c.bf16 %v1159_v30, %v1155_v24  ;;  %v1416_v30 = vld [vmem:[#allocation6 + $0xb8] sm:$0xff] }
 0x18e   :  { %805 = vmatmul.mubr.f32.vlgmr.msra.gmra.mrb[2].mxu0 %v13612_v39  ;;  %876 = vmatmul.mubr.f32.vlgmr.msra.gmra.mrb[2].mxu1 %v13612_v39 }
 0x18f   :  { %10115 = vmatpush1.bf16.msra.mxu0 %v13415_v47  ;;  %10147 = vmatpush1.bf16.msra.mxu1 %v13418_v50 }
 0x190   :  { %10117 = vmatprep.subr.bf16.mxu0 %v13421_v53  ;;  %10149 = vmatprep.subr.bf16.mxu1 %v13423_v56 }
 0x191   :  { %1043 = vmatprep.mubr.f32.mxu0 %v15597_v0  ;;  %1114 = vmatprep.mubr.f32.mxu1 %v15597_v0 }
 0x193   :  { %10119 = vmatpush1.bf16.msra.mxu0 %v13429_v60  ;;  %10151 = vmatpush1.bf16.msra.mxu1 %v13433_v63 }
 0x194   :  { %10121 = vmatprep.subr.bf16.mxu0 %v13437_v3  ;;  %10153 = vmatprep.subr.bf16.mxu1 %v13440_v6 }
 0x197   :  { %10123 = vmatpush1.bf16.msra.mxu0 %v13446_v10  ;;  %10155 = vmatpush1.bf16.msra.mxu1 %v13450_v13 }
 0x198   :  { %10125 = vmatprep.subr.bf16.mxu0 %v13454_v16  ;;  %10157 = vmatprep.subr.bf16.mxu1 %v13457_v19 }
 0x19b   :  { %10127 = vmatpush1.bf16.msra.mxu0 %v13463_v23  ;;  %10159 = vmatpush1.bf16.msra.mxu1 %v13467_v26 }
 0x19c   :  { %10129 = vmatprep.subr.bf16.mxu0 %v13471_v29  ;;  %10161 = vmatprep.subr.bf16.mxu1 %v13474_v32 }
 0x19f   :  { %10131 = vmatpush1.bf16.msra.mxu0 %v13480_v36  ;;  %10163 = vmatpush1.bf16.msra.mxu1 %v13484_v40 }
 0x1a0   :  { %10133 = vmatprep.subr.bf16.mxu0 %v13488_v44  ;;  %10165 = vmatprep.subr.bf16.mxu1 %v13491_v48 }
 0x1a3   :  { %10135 = vmatpush1.bf16.msra.mxu0 %v13497_v54  ;;  %10167 = vmatpush1.bf16.msra.mxu1 %v13501_v58 }
 0x1a4   :  { %10137 = vmatprep.subr.bf16.mxu0 %v13505_v62  ;;  %10169 = vmatprep.subr.bf16.mxu1 %v13508_v4 }
 0x1a7   :  { %10139 = vmatpush1.bf16.msra.mxu0 %v13514_v9  ;;  %10171 = vmatpush1.bf16.msra.mxu1 %v13518_v14 }
 0x1a8   :  { %10141 = vmatprep.subr.bf16.mxu0 %v13522_v18  ;;  %10173 = vmatprep.subr.bf16.mxu1 %v13525_v22 }
 0x1ab   :  { %10143 = vmatpush1.bf16.msra.mxu0 %v13531_v25  ;;  %10175 = vmatpush1.bf16.msra.mxu1 %v13535_v27 }
 0x1ac   :  { %10177 = vmatprep.subr.bf16.mxu0 %v13662_v33 }
 0x261   :  { %v806_v47 = vpop.f32.mrb[2].mxu0  ;;  %v877_v50 = vpop.f32.mrb[2].mxu1 }
 0x262   :  { %v12354_v53 = vadd.f32 %v806_v47, %v13590_v35  ;;  %v808_v56 = vpop.f32.mrb[3].mxu0  ;;  %v879_v60 = vpop.f32.mrb[3].mxu1  ;;  %v12370_v46 = vadd.f32 %v877_v50, %v13606_v59  ;;  %v1161_v47 = vld [vmem:[#allocation6 + $0x38] sm:$0xff]  ;;  %v1154_v50 = vld [vmem:[#allocation6] sm:$0xff] }
 0x263   :  { %v12355_v63 = vadd.f32 %v808_v56, %v13593_v37  ;;  %v12371_v43 = vadd.f32 %v879_v60, %v13600_v52 }
 0x264   :  { %v9817_v41 = vmul.f32 -1.442695, %v12354_v53  ;;  %v1158_v53 = vld [vmem:[#allocation6 + $0x20] sm:$0xff] }
 0x265   :  { %v9818_v42 = vmul.f32 -1.442695, %v12355_v63  ;;  %v9819_v45 = vmul.f32 -1.442695, %v12371_v43  ;;  %v13666_v60 = vpack.c.bf16 %v1158_v53, %v1154_v50  ;;  %v1156_v63 = vld [vmem:[#allocation6 + $0x10] sm:$0xff]  ;;  %v1163_v43 = vld [vmem:[#allocation6 + $0x48] sm:$0xff] }
 0x266   :  { %12695 = vpow2.f32 %v9817_v41  ;;  %v1160_v41 = vld [vmem:[#allocation6 + $0x30] sm:$0xff] }
 0x267   :  { %12697 = vpow2.f32 %v9818_v42  ;;  %v13669_v42 = vpack.c.bf16 %v1160_v41, %v1156_v63  ;;  %v1411_v63 = vld [vmem:[#allocation6 + $0x90] sm:$0xff] }
 0x268   :  { %12699 = vpow2.f32 %v9819_v45  ;;  %v1167_v45 = vld [vmem:[#allocation6 + $0x68] sm:$0xff]  ;;  %v1415_v41 = vld [vmem:[#allocation6 + $0xb0] sm:$0xff] }
 0x269   :  { %12701 = vtanh.f32 %v12370_v46  ;;  %v1165_v46 = vld [vmem:[#allocation6 + $0x58] sm:$0xff] }
 0x270   :  { %v12696_v49 = vpop.eup %12695 }
 0x271   :  { %v12698_v51 = vpop.eup %12697  ;;  %v889_v57 = vadd.f32 1.0, %v12696_v49  ;;  %v13674_v49 = vpack.c.bf16 %v1167_v45, %v1163_v43  ;;  %v13739_v43 = vpack.c.bf16 %v1415_v41, %v1411_v63  ;;  %v1418_v45 = vld [vmem:[#allocation6 + $0xc8] sm:$0xff]  ;;  %v1444_v41 = vld [vmem:[#allocation6 + $0x198] sm:$0xff] }
 0x272   :  { %v895_v61 = vadd.f32 1.0, %v12698_v51  ;;  %v12700_v1 = vpop.eup %12699  ;;  %v1169_v51 = vld [vmem:[#allocation6 + $0x78] sm:$0xff]  ;;  %v1446_v63 = vld [vmem:[#allocation6 + $0x1a8] sm:$0xff] }
 0x273   :  { %12703 = vrcp.f32 %v889_v57  ;;  %v12702_v2 = vpop.eup %12701  ;;  %v902_v11 = vadd.f32 1.0, %v12700_v1  ;;  %v1162_v57 = vld [vmem:[#allocation6 + $0x40] sm:$0xff]  ;;  %v13676_v1 = vpack.c.bf16 %v1169_v51, %v1165_v46  ;;  %v1422_v46 = vld [vmem:[#allocation6 + $0xe8] sm:$0xff]  ;;  %v1420_v51 = vld [vmem:[#allocation6 + $0xd8] sm:$0xff] }
 0x274   :  { %12705 = vrcp.f32 %v895_v61  ;;  %v1166_v61 = vld [vmem:[#allocation6 + $0x60] sm:$0xff] }
 0x275   :  { %12707 = vrcp.f32 %v902_v11 }
 0x27d   :  { %v12704_v5 = vpop.eup %12703 }
 0x27e   :  { %v12706_v7 = vpop.eup %12705  ;;  %v906_v8 = vmul.f32 %v12704_v5, %v12702_v2  ;;  %v13678_v2 = vpack.c.bf16 %v1166_v61, %v1162_v57  ;;  %v1164_v5 = vld [vmem:[#allocation6 + $0x50] sm:$0xff]  ;;  %v13744_v57 = vpack.c.bf16 %v1422_v46, %v1418_v45  ;;  %v1424_v61 = vld [vmem:[#allocation6 + $0xf8] sm:$0xff] }
 0x27f   :  { %v905_v12 = vmul.f32 %v12706_v7, %v13609_v28  ;;  %v12708_v17 = vpop.eup %12707  ;;  %v1157_v28 = vld [vmem:[#allocation6 + $0x18] sm:$0xff]  ;;  %v1168_v7 = vld [vmem:[#allocation6 + $0x70] sm:$0xff] }
 0x280   :  { %v13664_v56 = vpack.c.bf16 %v1161_v47, %v1157_v28  ;;  %v1409_v28 = vld [vmem:[#allocation6 + $0x80] sm:$0xff]  ;;  %v1448_v46 = vld [vmem:[#allocation6 + $0x1b8] sm:$0xff] }
 0x281   :  { %v13653_v15 = vadd.f32 %v906_v8, %v905_v12  ;;  %v13681_v8 = vpack.c.bf16 %v1168_v7, %v1164_v5  ;;  %v1413_v47 = vld [vmem:[#allocation6 + $0xa0] sm:$0xff] }
 0x282   :  { %10209 = vmatprep.subr.bf16.mxu1 %v13664_v56  ;;  %v13736_v53 = vpack.c.bf16 %v1413_v47, %v1409_v28  ;;  %v1417_v5 = vld [vmem:[#allocation6 + $0xc0] sm:$0xff]  ;;  %v1442_v47 = vld [vmem:[#allocation6 + $0x188] sm:$0xff] }
 0x283   :  { %12709 = vtanh.f32 %v13653_v15  ;;  %v1421_v7 = vld [vmem:[#allocation6 + $0xe0] sm:$0xff]  ;;  %v13780_v45 = vpack.c.bf16 %v1446_v63, %v1442_v47 }
 0x28d   :  { %v12710_v20 = vpop.eup %12709 }
 0x28e   :  { %v13656_v21 = vmul.f32 %v12710_v20, %v12708_v17  ;;  %v1414_v17 = vld [vmem:[#allocation6 + $0xa8] sm:$0xff]  ;;  %v1412_v20 = vld [vmem:[#allocation6 + $0x98] sm:$0xff] }
 0x28f   :  { %v13734_v50 = vpack.c.bf16 %v1416_v30, %v1412_v20  ;;  %v1435_v20 = vld [vmem:[#allocation6 + $0x150] sm:$0xff] }
 0x290   :  { %1044 = vmatmul.mubr.f32.vlgmr.msra.gmra.mrb[4].mxu0 %v13656_v21  ;;  %1115 = vmatmul.mubr.f32.vlgmr.msra.gmra.mrb[4].mxu1 %v13656_v21  ;;  %v1439_v30 = vld [vmem:[#allocation6 + $0x170] sm:$0xff] }
 0x291   :  { %1282 = vmatprep.mubr.f32.mxu0 %v15597_v0  ;;  %1353 = vmatprep.mubr.f32.mxu1 %v15597_v0  ;;  %v13775_v28 = vpack.c.bf16 %v1439_v30, %v1435_v20 }
 0x292   :  { %10179 = vmatpush1.bf16.msra.mxu0 %v13666_v60  ;;  %10211 = vmatpush1.bf16.msra.mxu1 %v13669_v42 }
 0x293   :  { %10181 = vmatprep.subr.bf16.mxu0 %v13674_v49  ;;  %10213 = vmatprep.subr.bf16.mxu1 %v13676_v1 }
 0x296   :  { %10183 = vmatpush1.bf16.msra.mxu0 %v13678_v2  ;;  %10215 = vmatpush1.bf16.msra.mxu1 %v13681_v8 }
 0x297   :  { %10185 = vmatprep.subr.bf16.mxu0 %v13437_v3  ;;  %10217 = vmatprep.subr.bf16.mxu1 %v13440_v6 }
 0x29a   :  { %10187 = vmatpush1.bf16.msra.mxu0 %v13446_v10  ;;  %10219 = vmatpush1.bf16.msra.mxu1 %v13450_v13 }
 0x29b   :  { %10189 = vmatprep.subr.bf16.mxu0 %v13454_v16  ;;  %10221 = vmatprep.subr.bf16.mxu1 %v13457_v19 }
 0x29e   :  { %10191 = vmatpush1.bf16.msra.mxu0 %v13463_v23  ;;  %10223 = vmatpush1.bf16.msra.mxu1 %v13467_v26 }
 0x29f   :  { %10193 = vmatprep.subr.bf16.mxu0 %v13471_v29  ;;  %10225 = vmatprep.subr.bf16.mxu1 %v13474_v32 }
 0x2a2   :  { %10195 = vmatpush1.bf16.msra.mxu0 %v13480_v36  ;;  %10227 = vmatpush1.bf16.msra.mxu1 %v13484_v40 }
 0x2a3   :  { %10197 = vmatprep.subr.bf16.mxu0 %v13488_v44  ;;  %10229 = vmatprep.subr.bf16.mxu1 %v13491_v48 }
 0x2a6   :  { %10199 = vmatpush1.bf16.msra.mxu0 %v13497_v54  ;;  %10231 = vmatpush1.bf16.msra.mxu1 %v13501_v58 }
 0x2a7   :  { %10201 = vmatprep.subr.bf16.mxu0 %v13505_v62  ;;  %10233 = vmatprep.subr.bf16.mxu1 %v13508_v4 }
 0x2aa   :  { %10203 = vmatpush1.bf16.msra.mxu0 %v13514_v9  ;;  %10235 = vmatpush1.bf16.msra.mxu1 %v13518_v14 }
 0x2ab   :  { %10205 = vmatprep.subr.bf16.mxu0 %v13522_v18  ;;  %10237 = vmatprep.subr.bf16.mxu1 %v13525_v22 }
 0x2ae   :  { %10207 = vmatpush1.bf16.msra.mxu0 %v13531_v25  ;;  %10239 = vmatpush1.bf16.msra.mxu1 %v13535_v27 }
 0x2af   :  { %10241 = vmatprep.subr.bf16.mxu0 %v13662_v33  ;;  %10273 = vmatprep.subr.bf16.mxu1 %v13664_v56 }
 0x363   :  { %v1045_v3 = vpop.f32.mrb[4].mxu0  ;;  %v1116_v6 = vpop.f32.mrb[4].mxu1 }
 0x364   :  { %v12356_v10 = vadd.f32 %v1045_v3, %v13590_v35  ;;  %v1047_v13 = vpop.f32.mrb[5].mxu0  ;;  %v1118_v16 = vpop.f32.mrb[5].mxu1  ;;  %v12372_v36 = vadd.f32 %v1116_v6, %v13606_v59  ;;  %v13746_v3 = vpack.c.bf16 %v1424_v61, %v1420_v51  ;;  %v13748_v6 = vpack.c.bf16 %v1421_v7, %v1417_v5  ;;  %v1441_v51 = vld [vmem:[#allocation6 + $0x180] sm:$0xff] }
 0x365   :  { %v12357_v19 = vadd.f32 %v1047_v13, %v13593_v37  ;;  %v12373_v29 = vadd.f32 %v1118_v16, %v13600_v52  ;;  %v1423_v13 = vld [vmem:[#allocation6 + $0xf0] sm:$0xff]  ;;  %v1445_v61 = vld [vmem:[#allocation6 + $0x1a0] sm:$0xff]  ;;  %v13782_v5 = vpack.c.bf16 %v1448_v46, %v1444_v41 }
 0x366   :  { %v9820_v23 = vmul.f32 -1.442695, %v12356_v10  ;;  %v1419_v10 = vld [vmem:[#allocation6 + $0xd0] sm:$0xff]  ;;  %v13784_v7 = vpack.c.bf16 %v1445_v61, %v1441_v51 }
 0x367   :  { %v9821_v26 = vmul.f32 -1.442695, %v12357_v19  ;;  %v9822_v32 = vmul.f32 -1.442695, %v12373_v29  ;;  %v13751_v16 = vpack.c.bf16 %v1423_v13, %v1419_v10  ;;  %v1426_v19 = vld [vmem:[#allocation6 + $0x108] sm:$0xff]  ;;  %v1443_v10 = vld [vmem:[#allocation6 + $0x190] sm:$0xff] }
 0x368   :  { %12711 = vpow2.f32 %v9820_v23  ;;  %v1430_v23 = vld [vmem:[#allocation6 + $0x128] sm:$0xff]  ;;  %v1447_v13 = vld [vmem:[#allocation6 + $0x1b0] sm:$0xff] }
 0x369   :  { %12713 = vpow2.f32 %v9821_v26  ;;  %v1428_v26 = vld [vmem:[#allocation6 + $0x118] sm:$0xff]  ;;  %v13756_v29 = vpack.c.bf16 %v1430_v23, %v1426_v19  ;;  %v13787_v19 = vpack.c.bf16 %v1447_v13, %v1443_v10  ;;  %v1450_v23 = vld [vmem:[#allocation6 + $0x1c8] sm:$0xff] }
 0x36a   :  { %12715 = vpow2.f32 %v9822_v32  ;;  %v1432_v32 = vld [vmem:[#allocation6 + $0x138] sm:$0xff] }
 0x36b   :  { %12717 = vtanh.f32 %v12372_v36  ;;  %v1425_v36 = vld [vmem:[#allocation6 + $0x100] sm:$0xff] }
 0x372   :  { %v12712_v40 = vpop.eup %12711 }
 0x373   :  { %v12714_v44 = vpop.eup %12713  ;;  %v1128_v48 = vadd.f32 1.0, %v12712_v40  ;;  %v1429_v40 = vld [vmem:[#allocation6 + $0x120] sm:$0xff] }
 0x374   :  { %v1134_v54 = vadd.f32 1.0, %v12714_v44  ;;  %v12716_v58 = vpop.eup %12715  ;;  %v13758_v44 = vpack.c.bf16 %v1432_v32, %v1428_v26  ;;  %v1454_v26 = vld [vmem:[#allocation6 + $0x1e8] sm:$0xff]  ;;  %v1452_v32 = vld [vmem:[#allocation6 + $0x1d8] sm:$0xff] }
 0x375   :  { %12719 = vrcp.f32 %v1128_v48  ;;  %v12718_v62 = vpop.eup %12717  ;;  %v1141_v18 = vadd.f32 1.0, %v12716_v58  ;;  %v13760_v48 = vpack.c.bf16 %v1429_v40, %v1425_v36  ;;  %v1431_v58 = vld [vmem:[#allocation6 + $0x130] sm:$0xff]  ;;  %v13792_v36 = vpack.c.bf16 %v1454_v26, %v1450_v23  ;;  %v1456_v40 = vld [vmem:[#allocation6 + $0x1f8] sm:$0xff] }
 0x376   :  { %12721 = vrcp.f32 %v1134_v54  ;;  %v1427_v54 = vld [vmem:[#allocation6 + $0x110] sm:$0xff] }
 0x377   :  { %12723 = vrcp.f32 %v1141_v18 }
 0x37f   :  { %v12720_v4 = vpop.eup %12719 }
 0x380   :  { %v12722_v9 = vpop.eup %12721  ;;  %v1145_v14 = vmul.f32 %v12720_v4, %v12718_v62  ;;  %v13763_v62 = vpack.c.bf16 %v1431_v58, %v1427_v54  ;;  %v1434_v4 = vld [vmem:[#allocation6 + $0x148] sm:$0xff]  ;;  %v1449_v54 = vld [vmem:[#allocation6 + $0x1c0] sm:$0xff] }
 0x381   :  { %v1144_v22 = vmul.f32 %v12722_v9, %v13653_v15  ;;  %v12724_v27 = vpop.eup %12723  ;;  %v1410_v15 = vld [vmem:[#allocation6 + $0x88] sm:$0xff]  ;;  %v1453_v58 = vld [vmem:[#allocation6 + $0x1e0] sm:$0xff] }
 0x382   :  { %v13732_v24 = vpack.c.bf16 %v1414_v17, %v1410_v15  ;;  %v1438_v9 = vld [vmem:[#allocation6 + $0x168] sm:$0xff] }
 0x383   :  { %v13717_v25 = vadd.f32 %v1145_v14, %v1144_v22  ;;  %v1436_v14 = vld [vmem:[#allocation6 + $0x158] sm:$0xff]  ;;  %v13768_v18 = vpack.c.bf16 %v1438_v9, %v1434_v4  ;;  %v13794_v4 = vpack.c.bf16 %v1456_v40, %v1452_v32  ;;  %v13796_v9 = vpack.c.bf16 %v1453_v58, %v1449_v54 }
 0x384   :  { %v1440_v22 = vld [vmem:[#allocation6 + $0x178] sm:$0xff] }
 0x385   :  { %12725 = vtanh.f32 %v13717_v25  ;;  %v13770_v15 = vpack.c.bf16 %v1440_v22, %v1436_v14  ;;  %v1451_v14 = vld [vmem:[#allocation6 + $0x1d0] sm:$0xff] }
 0x386   :  { %v1455_v22 = vld [vmem:[#allocation6 + $0x1f0] sm:$0xff] }
 0x38f   :  { %v12726_v11 = vpop.eup %12725 }
 0x390   :  { %v13720_v12 = vmul.f32 %v12726_v11, %v12724_v27  ;;  %v1433_v27 = vld [vmem:[#allocation6 + $0x140] sm:$0xff] }
 0x391   :  { %v1437_v11 = vld [vmem:[#allocation6 + $0x160] sm:$0xff] }
 0x392   :  { %15623 = vst [vmem:[#allocation18_spill] sm:$0xff] %v13720_v12  ;;  %1283 = vmatmul.mubr.f32.vlgmr.msra.gmra.mrb[6].mxu0 %v13720_v12  ;;  %1354 = vmatmul.mubr.f32.vlgmr.msra.gmra.mrb[6].mxu1 %v13720_v12  ;;  %v13772_v17 = vpack.c.bf16 %v1437_v11, %v1433_v27  ;;  %v13799_v27 = vpack.c.bf16 %v1455_v22, %v1451_v14 }
 0x393   :  { %10243 = vmatpush1.bf16.msra.mxu0 %v13666_v60  ;;  %10275 = vmatpush1.bf16.msra.mxu1 %v13669_v42 }
 0x394   :  { %10245 = vmatprep.subr.bf16.mxu0 %v13674_v49  ;;  %10277 = vmatprep.subr.bf16.mxu1 %v13676_v1 }
 0x395   :  { %1521 = vmatprep.mubr.f32.mxu0 %v15597_v0  ;;  %1592 = vmatprep.mubr.f32.mxu1 %v15597_v0 }
 0x397   :  { %10247 = vmatpush1.bf16.msra.mxu0 %v13678_v2  ;;  %10279 = vmatpush1.bf16.msra.mxu1 %v13681_v8 }
 0x398   :  { %10249 = vmatprep.subr.bf16.mxu0 %v13732_v24  ;;  %10281 = vmatprep.subr.bf16.mxu1 %v13734_v50 }
 0x39b   :  { %10251 = vmatpush1.bf16.msra.mxu0 %v13736_v53  ;;  %10283 = vmatpush1.bf16.msra.mxu1 %v13739_v43 }
 0x39c   :  { %10253 = vmatprep.subr.bf16.mxu0 %v13744_v57  ;;  %10285 = vmatprep.subr.bf16.mxu1 %v13746_v3 }
 0x39f   :  { %10255 = vmatpush1.bf16.msra.mxu0 %v13748_v6  ;;  %10287 = vmatpush1.bf16.msra.mxu1 %v13751_v16 }
 0x3a0   :  { %10257 = vmatprep.subr.bf16.mxu0 %v13756_v29  ;;  %10289 = vmatprep.subr.bf16.mxu1 %v13758_v44 }
 0x3a3   :  { %10259 = vmatpush1.bf16.msra.mxu0 %v13760_v48  ;;  %10291 = vmatpush1.bf16.msra.mxu1 %v13763_v62 }
 0x3a4   :  { %10261 = vmatprep.subr.bf16.mxu0 %v13768_v18  ;;  %10293 = vmatprep.subr.bf16.mxu1 %v13770_v15 }
 0x3a7   :  { %10263 = vmatpush1.bf16.msra.mxu0 %v13772_v17  ;;  %10295 = vmatpush1.bf16.msra.mxu1 %v13775_v28 }
 0x3a8   :  { %10265 = vmatprep.subr.bf16.mxu0 %v13780_v45  ;;  %10297 = vmatprep.subr.bf16.mxu1 %v13782_v5 }
 0x3ab   :  { %10267 = vmatpush1.bf16.msra.mxu0 %v13784_v7  ;;  %10299 = vmatpush1.bf16.msra.mxu1 %v13787_v19 }
 0x3ac   :  { %10269 = vmatprep.subr.bf16.mxu0 %v13792_v36  ;;  %10301 = vmatprep.subr.bf16.mxu1 %v13794_v4 }
 0x3af   :  { %10271 = vmatpush1.bf16.msra.mxu0 %v13796_v9  ;;  %10303 = vmatpush1.bf16.msra.mxu1 %v13799_v27 }
 0x3b0   :  { %10305 = vmatprep.subr.bf16.mxu0 %v13662_v33  ;;  %10337 = vmatprep.subr.bf16.mxu1 %v13664_v56 }
 0x465   :  { %v1284_v11 = vpop.f32.mrb[6].mxu0  ;;  %v1355_v20 = vpop.f32.mrb[6].mxu1 }
 0x466   :  { %v12358_v30 = vadd.f32 %v1284_v11, %v13590_v35  ;;  %v1286_v47 = vpop.f32.mrb[7].mxu0  ;;  %v1357_v63 = vpop.f32.mrb[7].mxu1  ;;  %v12374_v13 = vadd.f32 %v1355_v20, %v13606_v59 }
 0x467   :  { %v12359_v41 = vadd.f32 %v1286_v47, %v13593_v37  ;;  %v12375_v61 = vadd.f32 %v1357_v63, %v13600_v52 }
 0x468   :  { %v9823_v46 = vmul.f32 -1.442695, %v12358_v30 }
 0x469   :  { %v9824_v51 = vmul.f32 -1.442695, %v12359_v41  ;;  %v9825_v10 = vmul.f32 -1.442695, %v12375_v61 }
 0x46a   :  { %12727 = vpow2.f32 %v9823_v46 }
 0x46b   :  { %12729 = vpow2.f32 %v9824_v51 }
 0x46c   :  { %12731 = vpow2.f32 %v9825_v10 }
 0x46d   :  { %12733 = vtanh.f32 %v12374_v13 }
 0x474   :  { %v12728_v23 = vpop.eup %12727 }
 0x475   :  { %v12730_v26 = vpop.eup %12729  ;;  %v1367_v32 = vadd.f32 1.0, %v12728_v23 }
 0x476   :  { %v1373_v40 = vadd.f32 1.0, %v12730_v26  ;;  %v12732_v54 = vpop.eup %12731 }
 0x477   :  { %12735 = vrcp.f32 %v1367_v32  ;;  %v12734_v58 = vpop.eup %12733  ;;  %v1380_v30 = vadd.f32 1.0, %v12732_v54 }
 0x478   :  { %12737 = vrcp.f32 %v1373_v40 }
 0x479   :  { %12739 = vrcp.f32 %v1380_v30 }
 0x481   :  { %v12736_v14 = vpop.eup %12735 }
 0x482   :  { %v12738_v22 = vpop.eup %12737  ;;  %v1384_v11 = vmul.f32 %v12736_v14, %v12734_v58 }
 0x483   :  { %v1383_v47 = vmul.f32 %v12738_v22, %v13717_v25  ;;  %v12740_v20 = vpop.eup %12739 }
 0x485   :  { %v13811_v63 = vadd.f32 %v1384_v11, %v1383_v47 }
 0x487   :  { %12741 = vtanh.f32 %v13811_v63 }
 0x491   :  { %v12742_v41 = vpop.eup %12741 }
 0x492   :  { %v13814_v46 = vmul.f32 %v12742_v41, %v12740_v20 }
 0x494   :  { %15624 = vst [vmem:[#allocation19_spill] sm:$0xff] %v13814_v46  ;;  %1522 = vmatmul.mubr.f32.vlgmr.msra.gmra.mrb[8].mxu0 %v13814_v46  ;;  %1593 = vmatmul.mubr.f32.vlgmr.msra.gmra.mrb[8].mxu1 %v13814_v46 }
 0x495   :  { %10307 = vmatpush1.bf16.msra.mxu0 %v13666_v60  ;;  %10339 = vmatpush1.bf16.msra.mxu1 %v13669_v42 }
 0x496   :  { %10309 = vmatprep.subr.bf16.mxu0 %v13674_v49  ;;  %10341 = vmatprep.subr.bf16.mxu1 %v13676_v1 }
 0x497   :  { %1760 = vmatprep.mubr.f32.mxu0 %v15597_v0  ;;  %1831 = vmatprep.mubr.f32.mxu1 %v15597_v0 }
 0x499   :  { %10311 = vmatpush1.bf16.msra.mxu0 %v13678_v2  ;;  %10343 = vmatpush1.bf16.msra.mxu1 %v13681_v8 }
 0x49a   :  { %10313 = vmatprep.subr.bf16.mxu0 %v13732_v24  ;;  %10345 = vmatprep.subr.bf16.mxu1 %v13734_v50 }
 0x49d   :  { %10315 = vmatpush1.bf16.msra.mxu0 %v13736_v53  ;;  %10347 = vmatpush1.bf16.msra.mxu1 %v13739_v43 }
 0x49e   :  { %10317 = vmatprep.subr.bf16.mxu0 %v13744_v57  ;;  %10349 = vmatprep.subr.bf16.mxu1 %v13746_v3 }
 0x4a1   :  { %10319 = vmatpush1.bf16.msra.mxu0 %v13748_v6  ;;  %10351 = vmatpush1.bf16.msra.mxu1 %v13751_v16 }
 0x4a2   :  { %10321 = vmatprep.subr.bf16.mxu0 %v13756_v29  ;;  %10353 = vmatprep.subr.bf16.mxu1 %v13758_v44 }
 0x4a5   :  { %10323 = vmatpush1.bf16.msra.mxu0 %v13760_v48  ;;  %10355 = vmatpush1.bf16.msra.mxu1 %v13763_v62 }
 0x4a6   :  { %10325 = vmatprep.subr.bf16.mxu0 %v13768_v18  ;;  %10357 = vmatprep.subr.bf16.mxu1 %v13770_v15 }
 0x4a9   :  { %10327 = vmatpush1.bf16.msra.mxu0 %v13772_v17  ;;  %10359 = vmatpush1.bf16.msra.mxu1 %v13775_v28 }
 0x4aa   :  { %10329 = vmatprep.subr.bf16.mxu0 %v13780_v45  ;;  %10361 = vmatprep.subr.bf16.mxu1 %v13782_v5 }
 0x4ad   :  { %10331 = vmatpush1.bf16.msra.mxu0 %v13784_v7  ;;  %10363 = vmatpush1.bf16.msra.mxu1 %v13787_v19 }
 0x4ae   :  { %10333 = vmatprep.subr.bf16.mxu0 %v13792_v36  ;;  %10365 = vmatprep.subr.bf16.mxu1 %v13794_v4 }
 0x4b1   :  { %10335 = vmatpush1.bf16.msra.mxu0 %v13796_v9  ;;  %10367 = vmatpush1.bf16.msra.mxu1 %v13799_v27 }
 0x4b2   :  { %10369 = vmatprep.subr.bf16.mxu0 %v13662_v33  ;;  %10401 = vmatprep.subr.bf16.mxu1 %v13664_v56 }
 0x567   :  { %v1523_v25 = vpop.f32.mrb[8].mxu0  ;;  %v1594_v51 = vpop.f32.mrb[8].mxu1 }
 0x568   :  { %v12360_v61 = vadd.f32 %v1523_v25, %v13590_v35  ;;  %v1525_v10 = vpop.f32.mrb[9].mxu0  ;;  %v1596_v13 = vpop.f32.mrb[9].mxu1  ;;  %v12376_v58 = vadd.f32 %v1594_v51, %v13606_v59 }
 0x569   :  { %v12361_v23 = vadd.f32 %v1525_v10, %v13593_v37  ;;  %v12377_v40 = vadd.f32 %v1596_v13, %v13600_v52 }
 0x56a   :  { %v9826_v26 = vmul.f32 -1.442695, %v12360_v61 }
 0x56b   :  { %v9827_v32 = vmul.f32 -1.442695, %v12361_v23  ;;  %v9828_v54 = vmul.f32 -1.442695, %v12377_v40 }
 0x56c   :  { %12743 = vpow2.f32 %v9826_v26 }
 0x56d   :  { %12745 = vpow2.f32 %v9827_v32 }
 0x56e   :  { %12747 = vpow2.f32 %v9828_v54 }
 0x56f   :  { %12749 = vtanh.f32 %v12376_v58 }
 0x576   :  { %v12744_v33 = vpop.eup %12743 }
 0x577   :  { %v12746_v14 = vpop.eup %12745  ;;  %v1606_v56 = vadd.f32 1.0, %v12744_v33 }
 0x578   :  { %v1612_v22 = vadd.f32 1.0, %v12746_v14  ;;  %v12748_v11 = vpop.eup %12747 }
 0x579   :  { %12751 = vrcp.f32 %v1606_v56  ;;  %v12750_v30 = vpop.eup %12749  ;;  %v1619_v25 = vadd.f32 1.0, %v12748_v11 }
 0x57a   :  { %12753 = vrcp.f32 %v1612_v22 }
 0x57b   :  { %12755 = vrcp.f32 %v1619_v25 }
 0x583   :  { %v12752_v47 = vpop.eup %12751 }
 0x584   :  { %v12754_v20 = vpop.eup %12753  ;;  %v1623_v41 = vmul.f32 %v12752_v47, %v12750_v30 }
 0x585   :  { %v1622_v61 = vmul.f32 %v12754_v20, %v13811_v63  ;;  %v12756_v51 = vpop.eup %12755 }
 0x587   :  { %v13857_v10 = vadd.f32 %v1623_v41, %v1622_v61 }
 0x589   :  { %12757 = vtanh.f32 %v13857_v10 }
 0x593   :  { %v12758_v13 = vpop.eup %12757 }
 0x594   :  { %v13860_v23 = vmul.f32 %v12758_v13, %v12756_v51 }
 0x596   :  { %15625 = vst [vmem:[#allocation20_spill] sm:$0xff] %v13860_v23  ;;  %1761 = vmatmul.mubr.f32.vlgmr.msra.gmra.mrb[10].mxu0 %v13860_v23  ;;  %1832 = vmatmul.mubr.f32.vlgmr.msra.gmra.mrb[10].mxu1 %v13860_v23 }
 0x597   :  { %10371 = vmatpush1.bf16.msra.mxu0 %v13666_v60  ;;  %10403 = vmatpush1.bf16.msra.mxu1 %v13669_v42 }
 0x598   :  { %10373 = vmatprep.subr.bf16.mxu0 %v13674_v49  ;;  %10405 = vmatprep.subr.bf16.mxu1 %v13676_v1 }
 0x599   :  { %1999 = vmatprep.mubr.f32.mxu0 %v15597_v0  ;;  %2070 = vmatprep.mubr.f32.mxu1 %v15597_v0 }
 0x59b   :  { %10375 = vmatpush1.bf16.msra.mxu0 %v13678_v2  ;;  %10407 = vmatpush1.bf16.msra.mxu1 %v13681_v8 }
 0x59c   :  { %10377 = vmatprep.subr.bf16.mxu0 %v13732_v24  ;;  %10409 = vmatprep.subr.bf16.mxu1 %v13734_v50 }
 0x59f   :  { %10379 = vmatpush1.bf16.msra.mxu0 %v13736_v53  ;;  %10411 = vmatpush1.bf16.msra.mxu1 %v13739_v43 }
 0x5a0   :  { %10381 = vmatprep.subr.bf16.mxu0 %v13744_v57  ;;  %10413 = vmatprep.subr.bf16.mxu1 %v13746_v3 }
 0x5a3   :  { %10383 = vmatpush1.bf16.msra.mxu0 %v13748_v6  ;;  %10415 = vmatpush1.bf16.msra.mxu1 %v13751_v16 }
 0x5a4   :  { %10385 = vmatprep.subr.bf16.mxu0 %v13756_v29  ;;  %10417 = vmatprep.subr.bf16.mxu1 %v13758_v44 }
 0x5a7   :  { %10387 = vmatpush1.bf16.msra.mxu0 %v13760_v48  ;;  %10419 = vmatpush1.bf16.msra.mxu1 %v13763_v62 }
 0x5a8   :  { %10389 = vmatprep.subr.bf16.mxu0 %v13768_v18  ;;  %10421 = vmatprep.subr.bf16.mxu1 %v13770_v15 }
 0x5ab   :  { %10391 = vmatpush1.bf16.msra.mxu0 %v13772_v17  ;;  %10423 = vmatpush1.bf16.msra.mxu1 %v13775_v28 }
 0x5ac   :  { %10393 = vmatprep.subr.bf16.mxu0 %v13780_v45  ;;  %10425 = vmatprep.subr.bf16.mxu1 %v13782_v5 }
 0x5af   :  { %10395 = vmatpush1.bf16.msra.mxu0 %v13784_v7  ;;  %10427 = vmatpush1.bf16.msra.mxu1 %v13787_v19 }
 0x5b0   :  { %10397 = vmatprep.subr.bf16.mxu0 %v13792_v36  ;;  %10429 = vmatprep.subr.bf16.mxu1 %v13794_v4 }
 0x5b3   :  { %10399 = vmatpush1.bf16.msra.mxu0 %v13796_v9  ;;  %10431 = vmatpush1.bf16.msra.mxu1 %v13799_v27 }
 0x669   :  { %v1762_v60 = vpop.f32.mrb[10].mxu0  ;;  %v1833_v42 = vpop.f32.mrb[10].mxu1 }
 0x66a   :  { %v12362_v49 = vadd.f32 %v1762_v60, %v13590_v35  ;;  %v1764_v1 = vpop.f32.mrb[11].mxu0  ;;  %v1835_v2 = vpop.f32.mrb[11].mxu1  ;;  %v12378_v54 = vadd.f32 %v1833_v42, %v13606_v59  ;;  %v2111_v42 = vld [vmem:[#allocation6 + $0x8] sm:$0xff] }
 0x66b   :  { %v12363_v8 = vadd.f32 %v1764_v1, %v13593_v37  ;;  %v12379_v32 = vadd.f32 %v1835_v2, %v13600_v52  ;;  %v2110_v1 = vld [vmem:[#allocation6] sm:$0xff] }
 0x66c   :  { %v9829_v63 = vmul.f32 -1.442695, %v12362_v49  ;;  %v2115_v49 = vld [vmem:[#allocation6 + $0x28] sm:$0xff]  ;;  %v2114_v2 = vld [vmem:[#allocation6 + $0x20] sm:$0xff] }
 0x66d   :  { %v9830_v26 = vmul.f32 -1.442695, %v12363_v8  ;;  %v9831_v40 = vmul.f32 -1.442695, %v12379_v32  ;;  %v2113_v8 = vld [vmem:[#allocation6 + $0x18] sm:$0xff]  ;;  %v2112_v32 = vld [vmem:[#allocation6 + $0x10] sm:$0xff] }
 0x66e   :  { %12759 = vpow2.f32 %v9829_v63  ;;  %v10434_v63 = vpack.c.bf16 %v2114_v2, %v2110_v1 }
 0x66f   :  { %12761 = vpow2.f32 %v9830_v26  ;;  %v2117_v26 = vld [vmem:[#allocation6 + $0x38] sm:$0xff] }
 0x670   :  { %12763 = vpow2.f32 %v9831_v40  ;;  %v2116_v40 = vld [vmem:[#allocation6 + $0x30] sm:$0xff] }
 0x671   :  { %12765 = vtanh.f32 %v12378_v54  ;;  %v10464_v54 = vpack.c.bf16 %v2117_v26, %v2113_v8  ;;  %v2354_v8 = vld [vmem:[#allocation4 + $0x200] sm:$0xff]  ;;  %v2363_v26 = vld [vmem:[#allocation4 + $0x248] sm:$0xff] }
 0x673   :  { %10465 = vmatprep.subr.bf16.mxu1 %v10464_v54  ;;  %v2367_v54 = vld [vmem:[#allocation4 + $0x268] sm:$0xff] }
 0x678   :  { %v12760_v58 = vpop.eup %12759 }
 0x679   :  { %v12762_v33 = vpop.eup %12761  ;;  %v1845_v14 = vadd.f32 1.0, %v12760_v58  ;;  %v10466_v58 = vpack.c.bf16 %v2116_v40, %v2112_v32  ;;  %v2356_v32 = vld [vmem:[#allocation4 + $0x210] sm:$0xff] }
 0x67a   :  { %v1851_v56 = vadd.f32 1.0, %v12762_v33  ;;  %v12764_v22 = vpop.eup %12763  ;;  %v2119_v33 = vld [vmem:[#allocation6 + $0x48] sm:$0xff]  ;;  %v2360_v40 = vld [vmem:[#allocation4 + $0x230] sm:$0xff] }
 0x67b   :  { %12767 = vrcp.f32 %v1845_v14  ;;  %v12766_v11 = vpop.eup %12765  ;;  %v1858_v41 = vadd.f32 1.0, %v12764_v22  ;;  %v2123_v14 = vld [vmem:[#allocation6 + $0x68] sm:$0xff]  ;;  %v2118_v22 = vld [vmem:[#allocation6 + $0x40] sm:$0xff] }
 0x67c   :  { %12769 = vrcp.f32 %v1851_v56  ;;  %v10436_v56 = vpack.c.bf16 %v2123_v14, %v2119_v33  ;;  %v2369_v33 = vld [vmem:[#allocation4 + $0x278] sm:$0xff] }
 0x67d   :  { %12771 = vrcp.f32 %v1858_v41  ;;  %v2120_v41 = vld [vmem:[#allocation6 + $0x50] sm:$0xff] }
 0x685   :  { %v12768_v30 = vpop.eup %12767 }
 0x686   :  { %v12770_v47 = vpop.eup %12769  ;;  %v1862_v20 = vmul.f32 %v12768_v30, %v12766_v11  ;;  %v2122_v11 = vld [vmem:[#allocation6 + $0x60] sm:$0xff]  ;;  %v2121_v30 = vld [vmem:[#allocation6 + $0x58] sm:$0xff] }
 0x687   :  { %v1861_v25 = vmul.f32 %v12770_v47, %v13857_v10  ;;  %v12772_v51 = vpop.eup %12771  ;;  %v10432_v10 = vpack.c.bf16 %v2115_v49, %v2111_v42  ;;  %v10438_v47 = vpack.c.bf16 %v2122_v11, %v2118_v22  ;;  %v2362_v11 = vld [vmem:[#allocation4 + $0x240] sm:$0xff] }
 0x689   :  { %v13901_v61 = vadd.f32 %v1862_v20, %v1861_v25  ;;  %10433 = vmatprep.subr.bf16.mxu0 %v10432_v10  ;;  %v2125_v20 = vld [vmem:[#allocation6 + $0x78] sm:$0xff]  ;;  %v2124_v25 = vld [vmem:[#allocation6 + $0x70] sm:$0xff] }
 0x68b   :  { %12773 = vtanh.f32 %v13901_v61 }
 0x695   :  { %v12774_v13 = vpop.eup %12773 }
 0x696   :  { %v13904_v60 = vmul.f32 %v12774_v13, %v12772_v51  ;;  %v10468_v51 = vpack.c.bf16 %v2125_v20, %v2121_v30  ;;  %v10470_v13 = vpack.c.bf16 %v2124_v25, %v2120_v41  ;;  %v2366_v30 = vld [vmem:[#allocation4 + $0x260] sm:$0xff]  ;;  %v10500_v20 = vpack.c.bf16 %v2367_v54, %v2363_v26  ;;  %v2371_v41 = vld [vmem:[#allocation4 + $0x288] sm:$0xff] }
 0x698   :  { %15626 = vst [vmem:[#allocation21_spill] sm:$0xff] %v13904_v60  ;;  %2000 = vmatmul.mubr.f32.vlgmr.msra.gmra.mrb[12].mxu0 %v13904_v60  ;;  %2071 = vmatmul.mubr.f32.vlgmr.msra.gmra.mrb[12].mxu1 %v13904_v60 }
 0x699   :  { %2238 = vmatprep.mubr.f32.mxu0 %v15597_v0  ;;  %2309 = vmatprep.mubr.f32.mxu1 %v15597_v0 }
 0x69a   :  { %10435 = vmatpush1.bf16.msra.mxu0 %v10434_v63  ;;  %10467 = vmatpush1.bf16.msra.mxu1 %v10466_v58  ;;  %v2358_v63 = vld [vmem:[#allocation4 + $0x220] sm:$0xff]  ;;  %v2365_v58 = vld [vmem:[#allocation4 + $0x258] sm:$0xff] }
 0x69b   :  { %10437 = vmatprep.subr.bf16.mxu0 %v10436_v56  ;;  %10469 = vmatprep.subr.bf16.mxu1 %v10468_v51  ;;  %v10498_v22 = vpack.c.bf16 %v2358_v63, %v2354_v8  ;;  %v10532_v25 = vpack.c.bf16 %v2369_v33, %v2365_v58  ;;  %v2364_v51 = vld [vmem:[#allocation4 + $0x250] sm:$0xff]  ;;  %v2386_v8 = vld [vmem:[#allocation4 + $0x300] sm:$0xff] }
 0x69c   :  { %v2390_v63 = vld [vmem:[#allocation4 + $0x320] sm:$0xff]  ;;  %v2388_v58 = vld [vmem:[#allocation4 + $0x310] sm:$0xff] }
 0x69d   :  { %v2392_v33 = vld [vmem:[#allocation4 + $0x330] sm:$0xff] }
 0x69e   :  { %10439 = vmatpush1.bf16.msra.mxu0 %v10438_v47  ;;  %10471 = vmatpush1.bf16.msra.mxu1 %v10470_v13  ;;  %v10530_v47 = vpack.c.bf16 %v2360_v40, %v2356_v32  ;;  %v2368_v13 = vld [vmem:[#allocation4 + $0x270] sm:$0xff]  ;;  %v2395_v40 = vld [vmem:[#allocation4 + $0x348] sm:$0xff] }
 0x69f   :  { %10441 = vmatprep.subr.bf16.mxu0 %v13732_v24  ;;  %10473 = vmatprep.subr.bf16.mxu1 %v13734_v50  ;;  %v2355_v24 = vld [vmem:[#allocation4 + $0x208] sm:$0xff] }
 0x6a0   :  { %v2359_v50 = vld [vmem:[#allocation4 + $0x228] sm:$0xff] }
 0x6a2   :  { %10443 = vmatpush1.bf16.msra.mxu0 %v13736_v53  ;;  %10475 = vmatpush1.bf16.msra.mxu1 %v13739_v43  ;;  %v10496_v53 = vpack.c.bf16 %v2359_v50, %v2355_v24  ;;  %v2357_v43 = vld [vmem:[#allocation4 + $0x218] sm:$0xff]  ;;  %v2375_v24 = vld [vmem:[#allocation4 + $0x2a8] sm:$0xff] }
 0x6a3   :  { %10445 = vmatprep.subr.bf16.mxu0 %v13744_v57  ;;  %10477 = vmatprep.subr.bf16.mxu1 %v13746_v3  ;;  %v2361_v57 = vld [vmem:[#allocation4 + $0x238] sm:$0xff] }
 0x6a4   :  { %v10528_v3 = vpack.c.bf16 %v2361_v57, %v2357_v43  ;;  %v2373_v50 = vld [vmem:[#allocation4 + $0x298] sm:$0xff]  ;;  %v10502_v43 = vpack.c.bf16 %v2366_v30, %v2362_v11  ;;  %v2370_v57 = vld [vmem:[#allocation4 + $0x280] sm:$0xff]  ;;  %v10514_v11 = vpack.c.bf16 %v2390_v63, %v2386_v8 }
 0x6a5   :  { %v2394_v30 = vld [vmem:[#allocation4 + $0x340] sm:$0xff] }
 0x6a6   :  { %10447 = vmatpush1.bf16.msra.mxu0 %v13748_v6  ;;  %10479 = vmatpush1.bf16.msra.mxu1 %v13751_v16 }
 0x6a7   :  { %10449 = vmatprep.subr.bf16.mxu0 %v13756_v29  ;;  %10481 = vmatprep.subr.bf16.mxu1 %v13758_v44 }
 0x6aa   :  { %10451 = vmatpush1.bf16.msra.mxu0 %v13760_v48  ;;  %10483 = vmatpush1.bf16.msra.mxu1 %v13763_v62 }
 0x6ab   :  { %10453 = vmatprep.subr.bf16.mxu0 %v13768_v18  ;;  %10485 = vmatprep.subr.bf16.mxu1 %v13770_v15 }
 0x6ae   :  { %10455 = vmatpush1.bf16.msra.mxu0 %v13772_v17  ;;  %10487 = vmatpush1.bf16.msra.mxu1 %v13775_v28 }
 0x6af   :  { %10457 = vmatprep.subr.bf16.mxu0 %v13780_v45  ;;  %10489 = vmatprep.subr.bf16.mxu1 %v13782_v5 }
 0x6b2   :  { %10459 = vmatpush1.bf16.msra.mxu0 %v13784_v7  ;;  %10491 = vmatpush1.bf16.msra.mxu1 %v13787_v19 }
 0x6b3   :  { %10461 = vmatprep.subr.bf16.mxu0 %v13792_v36  ;;  %10493 = vmatprep.subr.bf16.mxu1 %v13794_v4 }
 0x6b6   :  { %10463 = vmatpush1.bf16.msra.mxu0 %v13796_v9  ;;  %10495 = vmatpush1.bf16.msra.mxu1 %v13799_v27 }
 0x6b7   :  { %10497 = vmatprep.subr.bf16.mxu0 %v10496_v53  ;;  %10529 = vmatprep.subr.bf16.mxu1 %v10528_v3  ;;  %v2377_v53 = vld [vmem:[#allocation4 + $0x2b8] sm:$0xff]  ;;  %v2374_v3 = vld [vmem:[#allocation4 + $0x2a0] sm:$0xff] }
 0x76b   :  { %v2001_v6 = vpop.f32.mrb[12].mxu0  ;;  %v2072_v16 = vpop.f32.mrb[12].mxu1 }
 0x76c   :  { %v12364_v29 = vadd.f32 %v2001_v6, %v13590_v35  ;;  %v2003_v44 = vpop.f32.mrb[13].mxu0  ;;  %v2074_v48 = vpop.f32.mrb[13].mxu1  ;;  %v12380_v45 = vadd.f32 %v2072_v16, %v13606_v59  ;;  %v10534_v6 = vpack.c.bf16 %v2368_v13, %v2364_v51  ;;  %v10504_v16 = vpack.c.bf16 %v2375_v24, %v2371_v41  ;;  %v2396_v13 = vld [vmem:[#allocation4 + $0x350] sm:$0xff] }
 0x76d   :  { %v12365_v62 = vadd.f32 %v2003_v44, %v13593_v37  ;;  %v12381_v17 = vadd.f32 %v2074_v48, %v13600_v52  ;;  %v10536_v44 = vpack.c.bf16 %v2377_v53, %v2373_v50  ;;  %v2372_v48 = vld [vmem:[#allocation4 + $0x290] sm:$0xff]  ;;  %v2407_v50 = vld [vmem:[#allocation4 + $0x3a8] sm:$0xff]  ;;  %v2405_v53 = vld [vmem:[#allocation4 + $0x398] sm:$0xff] }
 0x76e   :  { %v9832_v18 = vmul.f32 -1.442695, %v12364_v29  ;;  %v2379_v29 = vld [vmem:[#allocation4 + $0x2c8] sm:$0xff]  ;;  %v2400_v24 = vld [vmem:[#allocation4 + $0x370] sm:$0xff] }
 0x76f   :  { %v9833_v15 = vmul.f32 -1.442695, %v12365_v62  ;;  %v9834_v28 = vmul.f32 -1.442695, %v12381_v17  ;;  %v2376_v62 = vld [vmem:[#allocation4 + $0x2b0] sm:$0xff]  ;;  %v2385_v17 = vld [vmem:[#allocation4 + $0x2f8] sm:$0xff] }
 0x770   :  { %12775 = vpow2.f32 %v9832_v18  ;;  %v2383_v18 = vld [vmem:[#allocation4 + $0x2e8] sm:$0xff] }
 0x771   :  { %12777 = vpow2.f32 %v9833_v15  ;;  %v2381_v15 = vld [vmem:[#allocation4 + $0x2d8] sm:$0xff] }
 0x772   :  { %12779 = vpow2.f32 %v9834_v28  ;;  %v10506_v28 = vpack.c.bf16 %v2374_v3, %v2370_v57  ;;  %v2402_v3 = vld [vmem:[#allocation4 + $0x380] sm:$0xff] }
 0x773   :  { %12781 = vtanh.f32 %v12380_v45  ;;  %v2378_v45 = vld [vmem:[#allocation4 + $0x2c0] sm:$0xff] }
 0x77a   :  { %v12776_v5 = vpop.eup %12775 }
 0x77b   :  { %v12778_v7 = vpop.eup %12777  ;;  %v2084_v19 = vadd.f32 1.0, %v12776_v5  ;;  %v2382_v5 = vld [vmem:[#allocation4 + $0x2e0] sm:$0xff] }
 0x77c   :  { %v2090_v36 = vadd.f32 1.0, %v12778_v7  ;;  %v12780_v4 = vpop.eup %12779  ;;  %v10538_v7 = vpack.c.bf16 %v2376_v62, %v2372_v48  ;;  %v2404_v62 = vld [vmem:[#allocation4 + $0x390] sm:$0xff] }
 0x77d   :  { %12783 = vrcp.f32 %v2084_v19  ;;  %v12782_v9 = vpop.eup %12781  ;;  %v2097_v10 = vadd.f32 1.0, %v12780_v4  ;;  %v10508_v19 = vpack.c.bf16 %v2383_v18, %v2379_v29  ;;  %v10540_v4 = vpack.c.bf16 %v2385_v17, %v2381_v15  ;;  %v2408_v18 = vld [vmem:[#allocation4 + $0x3b0] sm:$0xff]  ;;  %v2415_v15 = vld [vmem:[#allocation4 + $0x3e8] sm:$0xff]  ;;  %v2413_v17 = vld [vmem:[#allocation4 + $0x3d8] sm:$0xff] }
 0x77e   :  { %12785 = vrcp.f32 %v2090_v36  ;;  %v2387_v36 = vld [vmem:[#allocation4 + $0x308] sm:$0xff] }
 0x77f   :  { %12787 = vrcp.f32 %v2097_v10  ;;  %v2393_v10 = vld [vmem:[#allocation4 + $0x338] sm:$0xff] }
 0x787   :  { %v12784_v27 = vpop.eup %12783 }
 0x788   :  { %v12786_v42 = vpop.eup %12785  ;;  %v2101_v49 = vmul.f32 %v12784_v27, %v12782_v9  ;;  %v2380_v9 = vld [vmem:[#allocation4 + $0x2d0] sm:$0xff] }
 0x789   :  { %v2100_v1 = vmul.f32 %v12786_v42, %v13901_v61  ;;  %v12788_v14 = vpop.eup %12787  ;;  %v2384_v27 = vld [vmem:[#allocation4 + $0x2f0] sm:$0xff]  ;;  %v2391_v42 = vld [vmem:[#allocation4 + $0x328] sm:$0xff] }
 0x78a   :  { %v10542_v26 = vpack.c.bf16 %v2384_v27, %v2380_v9  ;;  %v10512_v32 = vpack.c.bf16 %v2391_v42, %v2387_v36  ;;  %v2412_v27 = vld [vmem:[#allocation4 + $0x3d0] sm:$0xff] }
 0x78b   :  { %v13939_v2 = vadd.f32 %v2101_v49, %v2100_v1  ;;  %v2389_v49 = vld [vmem:[#allocation4 + $0x318] sm:$0xff]  ;;  %v10510_v1 = vpack.c.bf16 %v2382_v5, %v2378_v45  ;;  %v2410_v5 = vld [vmem:[#allocation4 + $0x3c0] sm:$0xff]  ;;  %v2416_v42 = vld [vmem:[#allocation4 + $0x3f0] sm:$0xff] }
 0x78c   :  { %v10544_v54 = vpack.c.bf16 %v2393_v10, %v2389_v49  ;;  %v2709_v49 = vld [vmem:[#allocation6 + $0x228] sm:$0xff]  ;;  %v2707_v10 = vld [vmem:[#allocation6 + $0x218] sm:$0xff]  ;;  %v10558_v63 = vpack.c.bf16 %v2416_v42, %v2412_v27  ;;  %v2726_v27 = vld [vmem:[#allocation6 + $0x2b0] sm:$0xff] }
 0x78d   :  { %12789 = vtanh.f32 %v13939_v2  ;;  %v2731_v42 = vld [vmem:[#allocation6 + $0x2d8] sm:$0xff] }
 0x797   :  { %v12790_v56 = vpop.eup %12789 }
 0x798   :  { %v13942_v61 = vmul.f32 %v12790_v56, %v12788_v14  ;;  %v2399_v14 = vld [vmem:[#allocation4 + $0x368] sm:$0xff]  ;;  %v2397_v56 = vld [vmem:[#allocation4 + $0x358] sm:$0xff] }
 0x799   :  { %v10516_v41 = vpack.c.bf16 %v2399_v14, %v2395_v40  ;;  %v2708_v40 = vld [vmem:[#allocation6 + $0x220] sm:$0xff]  ;;  %v2706_v14 = vld [vmem:[#allocation6 + $0x210] sm:$0xff] }
 0x79a   :  { %15627 = vst [vmem:[#allocation22_spill] sm:$0xff] %v13942_v61  ;;  %2239 = vmatmul.mubr.f32.vlgmr.msra.gmra.mrb[14].mxu0 %v13942_v61  ;;  %2310 = vmatmul.mubr.f32.vlgmr.msra.gmra.mrb[14].mxu1 %v13942_v61 }
 0x79b   :  { %10499 = vmatpush1.bf16.msra.mxu0 %v10498_v22  ;;  %10531 = vmatpush1.bf16.msra.mxu1 %v10530_v47  ;;  %v2401_v22 = vld [vmem:[#allocation4 + $0x378] sm:$0xff]  ;;  %v2398_v47 = vld [vmem:[#allocation4 + $0x360] sm:$0xff] }
 0x79c   :  { %10501 = vmatprep.subr.bf16.mxu0 %v10500_v20  ;;  %10533 = vmatprep.subr.bf16.mxu1 %v10532_v25  ;;  %v10546_v20 = vpack.c.bf16 %v2392_v33, %v2388_v58  ;;  %v2403_v25 = vld [vmem:[#allocation4 + $0x388] sm:$0xff]  ;;  %v10548_v51 = vpack.c.bf16 %v2401_v22, %v2397_v56  ;;  %v10518_v57 = vpack.c.bf16 %v2398_v47, %v2394_v30  ;;  %v2710_v56 = vld [vmem:[#allocation6 + $0x230] sm:$0xff]  ;;  %v2345_v22 = vld [vmem:[%s15589_s0] sm:$0xff] }
 0x79d   :  { %2505 = vmatprep.mubr.f32.mxu0 %v15597_v0  ;;  %2618 = vmatprep.mubr.f32.mxu1 %v15597_v0  ;;  %v10520_v29 = vpack.c.bf16 %v2407_v50, %v2403_v25  ;;  %v2713_v58 = vld [vmem:[#allocation6 + $0x248] sm:$0xff]  ;;  %v2712_v47 = vld [vmem:[#allocation6 + $0x240] sm:$0xff] }
 0x79e   :  { %v2717_v33 = vld [vmem:[#allocation6 + $0x268] sm:$0xff] }
 0x79f   :  { %10503 = vmatpush1.bf16.msra.mxu0 %v10502_v43  ;;  %10535 = vmatpush1.bf16.msra.mxu1 %v10534_v6  ;;  %v2409_v43 = vld [vmem:[#allocation4 + $0x3b8] sm:$0xff]  ;;  %v2406_v6 = vld [vmem:[#allocation4 + $0x3a0] sm:$0xff]  ;;  %v13958_v30 = vpack.c.bf16 %v2717_v33, %v2713_v58  ;;  %v2725_v25 = vld [vmem:[#allocation6 + $0x2a8] sm:$0xff] }
 0x7a0   :  { %10505 = vmatprep.subr.bf16.mxu0 %v10504_v16  ;;  %10537 = vmatprep.subr.bf16.mxu1 %v10536_v44  ;;  %v10550_v16 = vpack.c.bf16 %v2400_v24, %v2396_v13  ;;  %v2411_v44 = vld [vmem:[#allocation4 + $0x3c8] sm:$0xff]  ;;  %v10552_v48 = vpack.c.bf16 %v2409_v43, %v2405_v53  ;;  %v10522_v45 = vpack.c.bf16 %v2406_v6, %v2402_v3  ;;  %v2715_v13 = vld [vmem:[#allocation6 + $0x258] sm:$0xff]  ;;  %v2724_v3 = vld [vmem:[#allocation6 + $0x2a0] sm:$0xff] }
 0x7a1   :  { %v10524_v36 = vpack.c.bf16 %v2415_v15, %v2411_v44  ;;  %v2719_v24 = vld [vmem:[#allocation6 + $0x278] sm:$0xff]  ;;  %v2346_v50 = vld [vmem:[%s15589_s0 + $0x8] sm:$0xff]  ;;  %v2714_v44 = vld [vmem:[#allocation6 + $0x250] sm:$0xff] }
 0x7a2   :  { %v2729_v6 = vld [vmem:[#allocation6 + $0x2c8] sm:$0xff]  ;;  %v2347_v15 = vld [vmem:[%s15589_s0 + $0x10] sm:$0xff] }
 0x7a3   :  { %10507 = vmatpush1.bf16.msra.mxu0 %v10506_v28  ;;  %10539 = vmatpush1.bf16.msra.mxu1 %v10538_v7  ;;  %v2417_v28 = vld [vmem:[#allocation4 + $0x3f8] sm:$0xff]  ;;  %v2414_v7 = vld [vmem:[#allocation4 + $0x3e0] sm:$0xff]  ;;  %v2730_v58 = vld [vmem:[#allocation6 + $0x2d0] sm:$0xff] }
 0x7a4   :  { %10509 = vmatprep.subr.bf16.mxu0 %v10508_v19  ;;  %10541 = vmatprep.subr.bf16.mxu1 %v10540_v4  ;;  %v10554_v19 = vpack.c.bf16 %v2408_v18, %v2404_v62  ;;  %v2705_v4 = vld [vmem:[#allocation6 + $0x208] sm:$0xff]  ;;  %v10556_v9 = vpack.c.bf16 %v2417_v28, %v2413_v17  ;;  %v10526_v8 = vpack.c.bf16 %v2414_v7, %v2410_v5  ;;  %v2723_v62 = vld [vmem:[#allocation6 + $0x298] sm:$0xff]  ;;  %v2732_v5 = vld [vmem:[#allocation6 + $0x2e0] sm:$0xff] }
 0x7a5   :  { %v2727_v18 = vld [vmem:[#allocation6 + $0x2b8] sm:$0xff] }
 0x7a7   :  { %10511 = vmatpush1.bf16.msra.mxu0 %v10510_v1  ;;  %10543 = vmatpush1.bf16.msra.mxu1 %v10542_v26  ;;  %v2711_v1 = vld [vmem:[#allocation6 + $0x238] sm:$0xff]  ;;  %v13948_v26 = vpack.c.bf16 %v2709_v49, %v2705_v4  ;;  %v13991_v4 = vpack.c.bf16 %v2727_v18, %v2723_v62 }
 0x7a8   :  { %10513 = vmatprep.subr.bf16.mxu0 %v10512_v32  ;;  %10545 = vmatprep.subr.bf16.mxu1 %v10544_v54  ;;  %v2704_v32 = vld [vmem:[#allocation6 + $0x200] sm:$0xff]  ;;  %v13950_v54 = vpack.c.bf16 %v2711_v1, %v2707_v10  ;;  %v2735_v49 = vld [vmem:[#allocation6 + $0x2f8] sm:$0xff] }
 0x7a9   :  { %v2348_v10 = vld [vmem:[%s15589_s0 + $0x18] sm:$0xff]  ;;  %v14008_v33 = vpack.c.bf16 %v2735_v49, %v2731_v42  ;;  %v2750_v49 = vld [vmem:[#allocation6 + $0x370] sm:$0xff] }
 0x7aa   :  { %v2747_v62 = vld [vmem:[#allocation6 + $0x358] sm:$0xff] }
 0x7ab   :  { %10515 = vmatpush1.bf16.msra.mxu0 %v10514_v11  ;;  %10547 = vmatpush1.bf16.msra.mxu1 %v10546_v20  ;;  %v13955_v11 = vpack.c.bf16 %v2708_v40, %v2704_v32  ;;  %v2716_v20 = vld [vmem:[#allocation6 + $0x260] sm:$0xff]  ;;  %v2751_v18 = vld [vmem:[#allocation6 + $0x378] sm:$0xff] }
 0x7ac   :  { %10517 = vmatprep.subr.bf16.mxu0 %v10516_v41  ;;  %10549 = vmatprep.subr.bf16.mxu1 %v10548_v51  ;;  %v2721_v41 = vld [vmem:[#allocation6 + $0x288] sm:$0xff]  ;;  %v13961_v51 = vpack.c.bf16 %v2710_v56, %v2706_v14  ;;  %v13968_v53 = vpack.c.bf16 %v2716_v20, %v2712_v47  ;;  %v2740_v32 = vld [vmem:[#allocation6 + $0x320] sm:$0xff]  ;;  %v2739_v47 = vld [vmem:[#allocation6 + $0x318] sm:$0xff]  ;;  %v14042_v42 = vpack.c.bf16 %v2751_v18, %v2747_v62 }
 0x7ad   :  { %v13972_v43 = vpack.c.bf16 %v2725_v25, %v2721_v41  ;;  %v2745_v14 = vld [vmem:[#allocation6 + $0x348] sm:$0xff]  ;;  %v2743_v20 = vld [vmem:[#allocation6 + $0x338] sm:$0xff]  ;;  %v2349_v41 = vld [vmem:[%s15589_s0 + $0x20] sm:$0xff] }
 0x7ae   :  { %v2749_v56 = vld [vmem:[#allocation6 + $0x368] sm:$0xff] }
 0x7af   :  { %10519 = vmatpush1.bf16.msra.mxu0 %v10518_v57  ;;  %10551 = vmatpush1.bf16.msra.mxu1 %v10550_v16  ;;  %v2720_v57 = vld [vmem:[#allocation6 + $0x280] sm:$0xff]  ;;  %v2733_v16 = vld [vmem:[#allocation6 + $0x2e8] sm:$0xff] }
 0x7b0   :  { %10521 = vmatprep.subr.bf16.mxu0 %v10520_v29  ;;  %10553 = vmatprep.subr.bf16.mxu1 %v10552_v48  ;;  %v13975_v29 = vpack.c.bf16 %v2719_v24, %v2715_v13  ;;  %v2718_v48 = vld [vmem:[#allocation6 + $0x270] sm:$0xff]  ;;  %v13982_v17 = vpack.c.bf16 %v2724_v3, %v2720_v57  ;;  %v13986_v28 = vpack.c.bf16 %v2733_v16, %v2729_v6  ;;  %v2748_v57 = vld [vmem:[#allocation6 + $0x360] sm:$0xff]  ;;  %v2753_v16 = vld [vmem:[#allocation6 + $0x388] sm:$0xff] }
 0x7b1   :  { %v13988_v7 = vpack.c.bf16 %v2718_v48, %v2714_v44  ;;  %v14019_v13 = vpack.c.bf16 %v2749_v56, %v2745_v14  ;;  %v2738_v3 = vld [vmem:[#allocation6 + $0x310] sm:$0xff]  ;;  %v14025_v6 = vpack.c.bf16 %v2743_v20, %v2739_v47  ;;  %v2757_v44 = vld [vmem:[#allocation6 + $0x3a8] sm:$0xff]  ;;  %v2760_v20 = vld [vmem:[#allocation6 + $0x3c0] sm:$0xff] }
 0x7b2   :  { %v2742_v48 = vld [vmem:[#allocation6 + $0x330] sm:$0xff] }
 0x7b3   :  { %10523 = vmatpush1.bf16.msra.mxu0 %v10522_v45  ;;  %10555 = vmatpush1.bf16.msra.mxu1 %v10554_v19  ;;  %v2728_v45 = vld [vmem:[#allocation6 + $0x2c0] sm:$0xff]  ;;  %v2737_v19 = vld [vmem:[#allocation6 + $0x308] sm:$0xff]  ;;  %v2351_v14 = vld [vmem:[%s15589_s0 + $0x30] sm:$0xff] }
 0x7b4   :  { %10525 = vmatprep.subr.bf16.mxu0 %v10524_v36  ;;  %10557 = vmatprep.subr.bf16.mxu1 %v10556_v9  ;;  %v2741_v36 = vld [vmem:[#allocation6 + $0x328] sm:$0xff]  ;;  %v2722_v9 = vld [vmem:[#allocation6 + $0x290] sm:$0xff]  ;;  %v13998_v1 = vpack.c.bf16 %v2732_v5, %v2728_v45  ;;  %v14036_v5 = vpack.c.bf16 %v2757_v44, %v2753_v16  ;;  %v2763_v16 = vld [vmem:[#allocation6 + $0x3d8] sm:$0xff] }
 0x7b5   :  { %v14004_v40 = vpack.c.bf16 %v2726_v27, %v2722_v9  ;;  %v2756_v9 = vld [vmem:[#allocation6 + $0x3a0] sm:$0xff]  ;;  %v2746_v27 = vld [vmem:[#allocation6 + $0x350] sm:$0xff]  ;;  %v2767_v44 = vld [vmem:[#allocation6 + $0x3f8] sm:$0xff] }
 0x7b7   :  { %10527 = vmatpush1.bf16.msra.mxu0 %v10526_v8  ;;  %10559 = vmatpush1.bf16.msra.mxu1 %v10558_v63  ;;  %v14002_v8 = vpack.c.bf16 %v2741_v36, %v2737_v19  ;;  %v2736_v63 = vld [vmem:[#allocation6 + $0x300] sm:$0xff]  ;;  %v14038_v19 = vpack.c.bf16 %v2742_v48, %v2738_v3  ;;  %v2758_v3 = vld [vmem:[#allocation6 + $0x3b0] sm:$0xff]  ;;  %v2352_v48 = vld [vmem:[%s15589_s0 + $0x38] sm:$0xff] }
 0x7b8   :  { %10561 = vmatprep.subr.bf16.mxu0 %v13948_v26  ;;  %10593 = vmatprep.subr.bf16.mxu1 %v13950_v54  ;;  %v14015_v25 = vpack.c.bf16 %v2740_v32, %v2736_v63  ;;  %v2752_v36 = vld [vmem:[#allocation6 + $0x380] sm:$0xff]  ;;  %v2765_v63 = vld [vmem:[#allocation6 + $0x3e8] sm:$0xff]  ;;  %v2755_v32 = vld [vmem:[#allocation6 + $0x398] sm:$0xff] }
 0x7b9   :  { %v14049_v56 = vpack.c.bf16 %v2756_v9, %v2752_v36  ;;  %v2762_v36 = vld [vmem:[#allocation6 + $0x3d0] sm:$0xff] }
 0x7ba   :  { %2506 = vmatmul.mubr.f32.vlgmr.msra.gmra.mrb[16].mxu0 %v2345_v22  ;;  %2619 = vmatmul.mubr.f32.vlgmr.msra.gmra.mrb[16].mxu1 %v2345_v22  ;;  %v2734_v22 = vld [vmem:[#allocation6 + $0x2f0] sm:$0xff] }
 0x7bb   :  { %10563 = vmatpush1.bf16.msra.mxu0 %v13955_v11  ;;  %2511 = vmatprep.mubr.f32.mxu0 %v15597_v0  ;;  %v14021_v24 = vpack.c.bf16 %v2734_v22, %v2730_v58  ;;  %v2759_v58 = vld [vmem:[#allocation6 + $0x3b8] sm:$0xff]  ;;  %v14053_v22 = vpack.c.bf16 %v2750_v49, %v2746_v27  ;;  %v2766_v9 = vld [vmem:[#allocation6 + $0x3f0] sm:$0xff] }
 0x7bc   :  { %10565 = vmatprep.subr.bf16.mxu0 %v13958_v30  ;;  %2624 = vmatprep.mubr.f32.mxu1 %v15597_v0  ;;  %v14079_v27 = vpack.c.bf16 %v2766_v9, %v2762_v36 }
 0x7bd   :  { %10595 = vmatpush1.bf16.msra.mxu1 %v13961_v51 }
 0x7be   :  { %2512 = vmatmul.mubr.f32.gmra.mrb[18].mxu0 %v2346_v50  ;;  %2625 = vmatmul.mubr.f32.gmra.mrb[18].mxu1 %v2346_v50  ;;  %v2744_v50 = vld [vmem:[#allocation6 + $0x340] sm:$0xff] }
 0x7bf   :  { %10567 = vmatpush1.bf16.msra.mxu0 %v13968_v53  ;;  %2517 = vmatprep.mubr.f32.mxu0 %v15597_v0  ;;  %v14032_v45 = vpack.c.bf16 %v2748_v57, %v2744_v50  ;;  %v14059_v50 = vpack.c.bf16 %v2759_v58, %v2755_v32  ;;  %v2754_v57 = vld [vmem:[#allocation6 + $0x390] sm:$0xff] }
 0x7c0   :  { %10569 = vmatprep.subr.bf16.mxu0 %v13972_v43  ;;  %2630 = vmatprep.mubr.f32.mxu1 %v15597_v0  ;;  %v14070_v18 = vpack.c.bf16 %v2758_v3, %v2754_v57 }
 0x7c1   :  { %10597 = vmatprep.subr.bf16.mxu1 %v13975_v29 }
 0x7c2   :  { %2518 = vmatmul.mubr.f32.gmra.mrb[20].mxu0 %v2347_v15  ;;  %2631 = vmatmul.mubr.f32.gmra.mrb[20].mxu1 %v2347_v15  ;;  %v2350_v15 = vld [vmem:[%s15589_s0 + $0x28] sm:$0xff] }
 0x7c3   :  { %10571 = vmatpush1.bf16.msra.mxu0 %v13982_v17  ;;  %2523 = vmatprep.mubr.f32.mxu0 %v15597_v0 }
 0x7c4   :  { %10573 = vmatprep.subr.bf16.mxu0 %v13986_v28  ;;  %10599 = vmatpush1.bf16.msra.mxu1 %v13988_v7 }
 0x7c5   :  { %2636 = vmatprep.mubr.f32.mxu1 %v15597_v0  ;;  %10601 = vmatprep.subr.bf16.mxu1 %v13991_v4 }
 0x7c6   :  { %2524 = vmatmul.mubr.f32.gmra.mrb[22].mxu0 %v2348_v10  ;;  %2637 = vmatmul.mubr.f32.gmra.mrb[22].mxu1 %v2348_v10  ;;  %v2761_v10 = vld [vmem:[#allocation6 + $0x3c8] sm:$0xff] }
 0x7c7   :  { %2529 = vmatprep.mubr.f32.mxu0 %v15597_v0  ;;  %10575 = vmatpush1.bf16.msra.mxu0 %v13998_v1  ;;  %v14055_v47 = vpack.c.bf16 %v2765_v63, %v2761_v10 }
 0x7c8   :  { %10577 = vmatprep.subr.bf16.mxu0 %v14002_v8  ;;  %10603 = vmatpush1.bf16.msra.mxu1 %v14004_v40 }
 0x7c9   :  { %2642 = vmatprep.mubr.f32.mxu1 %v15597_v0  ;;  %10605 = vmatprep.subr.bf16.mxu1 %v14008_v33 }
 0x7ca   :  { %2530 = vmatmul.mubr.f32.gmra.mrb[24].mxu0 %v2349_v41  ;;  %2643 = vmatmul.mubr.f32.gmra.mrb[24].mxu1 %v2349_v41  ;;  %v2764_v41 = vld [vmem:[#allocation6 + $0x3e0] sm:$0xff] }
 0x7cb   :  { %2535 = vmatprep.mubr.f32.mxu0 %v15597_v0  ;;  %10579 = vmatpush1.bf16.msra.mxu0 %v14015_v25  ;;  %v14066_v62 = vpack.c.bf16 %v2764_v41, %v2760_v20 }
 0x7cc   :  { %10581 = vmatprep.subr.bf16.mxu0 %v14019_v13  ;;  %10607 = vmatpush1.bf16.msra.mxu1 %v14021_v24 }
 0x7cd   :  { %2648 = vmatprep.mubr.f32.mxu1 %v15597_v0  ;;  %10609 = vmatprep.subr.bf16.mxu1 %v14025_v6 }
 0x7ce   :  { %2536 = vmatmul.mubr.f32.gmra.mrb[26].mxu0 %v2350_v15  ;;  %2649 = vmatmul.mubr.f32.gmra.mrb[26].mxu1 %v2350_v15  ;;  %v14074_v15 = vpack.c.bf16 %v2767_v44, %v2763_v16 }
 0x7cf   :  { %2541 = vmatprep.mubr.f32.mxu0 %v15597_v0  ;;  %10583 = vmatpush1.bf16.msra.mxu0 %v14032_v45 }
 0x7d0   :  { %10585 = vmatprep.subr.bf16.mxu0 %v14036_v5  ;;  %10611 = vmatpush1.bf16.msra.mxu1 %v14038_v19 }
 0x7d1   :  { %2654 = vmatprep.mubr.f32.mxu1 %v15597_v0  ;;  %10613 = vmatprep.subr.bf16.mxu1 %v14042_v42 }
 0x7d2   :  { %2542 = vmatmul.mubr.f32.gmra.mrb[28].mxu0 %v2351_v14  ;;  %2655 = vmatmul.mubr.f32.gmra.mrb[28].mxu1 %v2351_v14 }
 0x7d3   :  { %2547 = vmatprep.mubr.f32.mxu0 %v15597_v0  ;;  %10587 = vmatpush1.bf16.msra.mxu0 %v14049_v56 }
 0x7d4   :  { %10615 = vmatpush1.bf16.msra.mxu1 %v14053_v22  ;;  %10589 = vmatprep.subr.bf16.mxu0 %v14055_v47 }
 0x7d5   :  { %2660 = vmatprep.mubr.f32.mxu1 %v15597_v0  ;;  %10617 = vmatprep.subr.bf16.mxu1 %v14059_v50 }
 0x7d6   :  { %2548 = vmatmul.mubr.f32.gmra.mrb[30].mxu0 %v2352_v48  ;;  %2661 = vmatmul.mubr.f32.gmra.mrb[30].mxu1 %v2352_v48 }
 0x7d7   :  { %10591 = vmatpush1.bf16.msra.mxu0 %v14066_v62  ;;  %2832 = vmatprep.mubr.f32.mxu0 %v15597_v0 }
 0x7d8   :  { %10619 = vmatpush1.bf16.msra.mxu1 %v14070_v18  ;;  %2903 = vmatprep.mubr.f32.mxu1 %v15597_v0 }
 0x7d9   :  { %10621 = vmatprep.subr.bf16.mxu1 %v14074_v15  ;;  %10625 = vmatprep.subr.bf16.mxu0 %v13948_v26 }
 0x7dc   :  { %10623 = vmatpush1.bf16.msra.mxu1 %v14079_v27 }
 0x7dd   :  { %10657 = vmatprep.subr.bf16.mxu1 %v13950_v54 }
 0x7de   :  { %2833 = vmatmul.mubr.f32.vlgmr.msra.gmra.mrb[30].mxu0 %v15597_v0 }
 0x7df   :  { %2904 = vmatmul.mubr.f32.vlgmr.msra.gmra.mrb[30].mxu1 %v15597_v0  ;;  %10627 = vmatpush1.bf16.msra.mxu0 %v13955_v11 }
 0x7e0   :  { %10659 = vmatpush1.bf16.msra.mxu1 %v13961_v51  ;;  %10629 = vmatprep.subr.bf16.mxu0 %v13958_v30 }
 0x7e1   :  { %10661 = vmatprep.subr.bf16.mxu1 %v13975_v29  ;;  %3072 = vmatprep.mubr.f32.mxu0 %v15597_v0 }
 0x7e2   :  { %3143 = vmatprep.mubr.f32.mxu1 %v15597_v0 }
 0x7e3   :  { %10631 = vmatpush1.bf16.msra.mxu0 %v13968_v53 }
 0x7e4   :  { %10663 = vmatpush1.bf16.msra.mxu1 %v13988_v7  ;;  %10633 = vmatprep.subr.bf16.mxu0 %v13972_v43 }
 0x7e5   :  { %10665 = vmatprep.subr.bf16.mxu1 %v13991_v4 }
 0x7e7   :  { %10635 = vmatpush1.bf16.msra.mxu0 %v13982_v17 }
 0x7e8   :  { %10667 = vmatpush1.bf16.msra.mxu1 %v14004_v40  ;;  %10637 = vmatprep.subr.bf16.mxu0 %v13986_v28 }
 0x7e9   :  { %10669 = vmatprep.subr.bf16.mxu1 %v14008_v33 }
 0x7eb   :  { %10639 = vmatpush1.bf16.msra.mxu0 %v13998_v1 }
 0x7ec   :  { %10671 = vmatpush1.bf16.msra.mxu1 %v14021_v24  ;;  %10641 = vmatprep.subr.bf16.mxu0 %v14002_v8 }
 0x7ed   :  { %10673 = vmatprep.subr.bf16.mxu1 %v14025_v6 }
 0x7ef   :  { %10643 = vmatpush1.bf16.msra.mxu0 %v14015_v25 }
 0x7f0   :  { %10675 = vmatpush1.bf16.msra.mxu1 %v14038_v19  ;;  %10645 = vmatprep.subr.bf16.mxu0 %v14019_v13 }
 0x7f1   :  { %10677 = vmatprep.subr.bf16.mxu1 %v14042_v42 }
 0x7f3   :  { %10647 = vmatpush1.bf16.msra.mxu0 %v14032_v45 }
 0x7f4   :  { %10679 = vmatpush1.bf16.msra.mxu1 %v14053_v22  ;;  %10649 = vmatprep.subr.bf16.mxu0 %v14036_v5 }
 0x7f5   :  { %10681 = vmatprep.subr.bf16.mxu1 %v14059_v50 }
 0x7f7   :  { %10651 = vmatpush1.bf16.msra.mxu0 %v14049_v56 }
 0x7f8   :  { %10683 = vmatpush1.bf16.msra.mxu1 %v14070_v18  ;;  %10653 = vmatprep.subr.bf16.mxu0 %v14055_v47 }
 0x7f9   :  { %10685 = vmatprep.subr.bf16.mxu1 %v14074_v15 }
 0x7fb   :  { %10655 = vmatpush1.bf16.msra.mxu0 %v14066_v62 }
 0x7fc   :  { %10687 = vmatpush1.bf16.msra.mxu1 %v14079_v27  ;;  %10689 = vmatprep.subr.bf16.mxu0 %v13948_v26 }
 0x7fd   :  { %10721 = vmatprep.subr.bf16.mxu1 %v13950_v54 }
 0x86d   :  { %v2240_v49 = vpop.f32.mrb[14].mxu0  ;;  %v2311_v10 = vpop.f32.mrb[14].mxu1 }
 0x86e   :  { %v12366_v63 = vadd.f32 %v2240_v49, %v13590_v35  ;;  %v2242_v32 = vpop.f32.mrb[15].mxu0  ;;  %v2313_v58 = vpop.f32.mrb[15].mxu1  ;;  %v12382_v16 = vadd.f32 %v2311_v10, %v13606_v59 }
 0x86f   :  { %v12367_v14 = vadd.f32 %v2242_v32, %v13593_v37  ;;  %v12383_v57 = vadd.f32 %v2313_v58, %v13600_v52 }
 0x870   :  { %v9835_v20 = vmul.f32 -1.442695, %v12366_v63 }
 0x871   :  { %v9836_v41 = vmul.f32 -1.442695, %v12367_v14  ;;  %v9837_v3 = vmul.f32 -1.442695, %v12383_v57 }
 0x872   :  { %12791 = vpow2.f32 %v9835_v20  ;;  %v9838_v20 = vld [vmem:[%s15592_s3 + $0x4] sm:$0xf] }
 0x873   :  { %12793 = vpow2.f32 %v9836_v41  ;;  %v14133_v41 = vrot.slane %v9838_v20, %v13582_v31  ;;  %v14136_v57 = vrot.slane %v9838_v20, %v13587_v34 }
 0x874   :  { %12795 = vpow2.f32 %v9837_v3 }
 0x875   :  { %12797 = vtanh.f32 %v12382_v16 }
 0x87c   :  { %v12792_v26 = vpop.eup %12791 }
 0x87d   :  { %v12794_v44 = vpop.eup %12793  ;;  %v2323_v48 = vadd.f32 1.0, %v12792_v26 }
 0x87e   :  { %v2329_v36 = vadd.f32 1.0, %v12794_v44  ;;  %v12796_v35 = vpop.eup %12795 }
 0x87f   :  { %12799 = vrcp.f32 %v2323_v48  ;;  %v12798_v9 = vpop.eup %12797  ;;  %v2336_v32 = vadd.f32 1.0, %v12796_v35 }
 0x880   :  { %12801 = vrcp.f32 %v2329_v36 }
 0x881   :  { %12803 = vrcp.f32 %v2336_v32 }
 0x889   :  { %v12800_v37 = vpop.eup %12799 }
 0x88a   :  { %v12802_v49 = vpop.eup %12801  ;;  %v2340_v63 = vmul.f32 %v12800_v37, %v12798_v9  ;;  %v14141_v9 = vrot.slane %v9838_v20, %v13595_v38 }
 0x88b   :  { %v2339_v14 = vmul.f32 %v12802_v49, %v13939_v2  ;;  %v12804_v59 = vpop.eup %12803  ;;  %v14145_v49 = vrot.slane %v9838_v20, %v13602_v55 }
 0x88d   :  { %v2341_v52 = vadd.f32 %v2340_v63, %v2339_v14 }
 0x88f   :  { %12805 = vtanh.f32 %v2341_v52 }
 0x899   :  { %v12806_v10 = vpop.eup %12805 }
 0x89a   :  { %v14127_v58 = vmul.f32 %v12806_v10, %v12804_v59 }
 0x89c   :  { %15628 = vst [vmem:[#allocation23_spill] sm:$0xff] %v14127_v58 }
 0x8b1   :  { %v2834_v3 = vpop.f32.mrb[30].mxu0 }
 0x8b2   :  { %v12398_v2 = vadd.f32 %v2834_v3, %v14133_v41  ;;  %v2836_v16 = vpop.f32.mrb[31].mxu0  ;;  %v2905_v26 = vpop.f32.mrb[30].mxu1 }
 0x8b3   :  { %v12399_v44 = vadd.f32 %v2836_v16, %v14136_v57  ;;  %v2907_v48 = vpop.f32.mrb[31].mxu1  ;;  %v12414_v32 = vadd.f32 %v2905_v26, %v14145_v49 }
 0x8b4   :  { %v9839_v36 = vmul.f32 -1.442695, %v12398_v2  ;;  %v12415_v37 = vadd.f32 %v2907_v48, %v14141_v9 }
 0x8b5   :  { %v9840_v35 = vmul.f32 -1.442695, %v12399_v44 }
 0x8b6   :  { %12807 = vpow2.f32 %v9839_v36  ;;  %v9841_v63 = vmul.f32 -1.442695, %v12415_v37 }
 0x8b7   :  { %12809 = vpow2.f32 %v9840_v35 }
 0x8b8   :  { %12811 = vpow2.f32 %v9841_v63 }
 0x8b9   :  { %12813 = vtanh.f32 %v12414_v32 }
 0x8c0   :  { %v12808_v14 = vpop.eup %12807 }
 0x8c1   :  { %v12810_v52 = vpop.eup %12809  ;;  %v2917_v59 = vadd.f32 1.0, %v12808_v14 }
 0x8c2   :  { %v2923_v10 = vadd.f32 1.0, %v12810_v52  ;;  %v12812_v3 = vpop.eup %12811 }
 0x8c3   :  { %12815 = vrcp.f32 %v2917_v59  ;;  %v12814_v2 = vpop.eup %12813  ;;  %v2930_v48 = vadd.f32 1.0, %v12812_v3 }
 0x8c4   :  { %12817 = vrcp.f32 %v2923_v10 }
 0x8c5   :  { %12819 = vrcp.f32 %v2930_v48  ;;  %v3427_v48 = vld [vmem:[#allocation6 + $0x228] sm:$0xff] }
 0x8cd   :  { %v12816_v16 = vpop.eup %12815 }
 0x8ce   :  { %v12818_v44 = vpop.eup %12817  ;;  %v2934_v36 = vmul.f32 %v12816_v16, %v12814_v2 }
 0x8cf   :  { %v2933_v35 = vmul.f32 0.0, %v12818_v44  ;;  %v12820_v26 = vpop.eup %12819 }
 0x8d1   :  { %v14148_v20 = vadd.f32 %v2934_v36, %v2933_v35  ;;  %v3423_v36 = vld [vmem:[#allocation6 + $0x208] sm:$0xff] }
 0x8d2   :  { %v14202_v35 = vpack.c.bf16 %v3427_v48, %v3423_v36  ;;  %v3462_v48 = vld [vmem:[#allocation6 + $0x340] sm:$0xff] }
 0x8d3   :  { %12821 = vtanh.f32 %v14148_v20 }
 0x8dd   :  { %v12822_v37 = vpop.eup %12821 }
 0x8de   :  { %v14151_v14 = vmul.f32 %v12822_v37, %v12820_v26  ;;  %v3426_v26 = vld [vmem:[#allocation6 + $0x220] sm:$0xff]  ;;  %v3424_v37 = vld [vmem:[#allocation6 + $0x210] sm:$0xff] }
 0x8e0   :  { %3073 = vmatmul.mubr.f32.vlgmr.msra.gmra.mrb[28].mxu0 %v14151_v14  ;;  %3144 = vmatmul.mubr.f32.vlgmr.msra.gmra.mrb[28].mxu1 %v14151_v14 }
 0x8e1   :  { %10691 = vmatpush1.bf16.msra.mxu0 %v13955_v11  ;;  %10723 = vmatpush1.bf16.msra.mxu1 %v13961_v51 }
 0x8e2   :  { %10693 = vmatprep.subr.bf16.mxu0 %v13958_v30  ;;  %10725 = vmatprep.subr.bf16.mxu1 %v13975_v29 }
 0x8e3   :  { %3311 = vmatprep.mubr.f32.mxu0 %v15597_v0  ;;  %3382 = vmatprep.mubr.f32.mxu1 %v15597_v0 }
 0x8e5   :  { %10695 = vmatpush1.bf16.msra.mxu0 %v13968_v53  ;;  %10727 = vmatpush1.bf16.msra.mxu1 %v13988_v7 }
 0x8e6   :  { %10697 = vmatprep.subr.bf16.mxu0 %v13972_v43  ;;  %10729 = vmatprep.subr.bf16.mxu1 %v13991_v4 }
 0x8e9   :  { %10699 = vmatpush1.bf16.msra.mxu0 %v13982_v17  ;;  %10731 = vmatpush1.bf16.msra.mxu1 %v14004_v40 }
 0x8ea   :  { %10701 = vmatprep.subr.bf16.mxu0 %v13986_v28  ;;  %10733 = vmatprep.subr.bf16.mxu1 %v14008_v33 }
 0x8ed   :  { %10703 = vmatpush1.bf16.msra.mxu0 %v13998_v1  ;;  %10735 = vmatpush1.bf16.msra.mxu1 %v14021_v24 }
 0x8ee   :  { %10705 = vmatprep.subr.bf16.mxu0 %v14002_v8  ;;  %10737 = vmatprep.subr.bf16.mxu1 %v14025_v6 }
 0x8f1   :  { %10707 = vmatpush1.bf16.msra.mxu0 %v14015_v25  ;;  %10739 = vmatpush1.bf16.msra.mxu1 %v14038_v19 }
 0x8f2   :  { %10709 = vmatprep.subr.bf16.mxu0 %v14019_v13  ;;  %10741 = vmatprep.subr.bf16.mxu1 %v14042_v42 }
 0x8f5   :  { %10711 = vmatpush1.bf16.msra.mxu0 %v14032_v45  ;;  %10743 = vmatpush1.bf16.msra.mxu1 %v14053_v22 }
 0x8f6   :  { %10713 = vmatprep.subr.bf16.mxu0 %v14036_v5  ;;  %10745 = vmatprep.subr.bf16.mxu1 %v14059_v50 }
 0x8f9   :  { %10715 = vmatpush1.bf16.msra.mxu0 %v14049_v56  ;;  %10747 = vmatpush1.bf16.msra.mxu1 %v14070_v18 }
 0x8fa   :  { %10717 = vmatprep.subr.bf16.mxu0 %v14055_v47  ;;  %10749 = vmatprep.subr.bf16.mxu1 %v14074_v15 }
 0x8fd   :  { %10719 = vmatpush1.bf16.msra.mxu0 %v14066_v62  ;;  %10751 = vmatpush1.bf16.msra.mxu1 %v14079_v27 }
 0x8fe   :  { %10785 = vmatprep.subr.bf16.mxu1 %v13950_v54  ;;  %10753 = vmatprep.subr.bf16.mxu0 %v14202_v35 }
 0x9b3   :  { %v3074_v11 = vpop.f32.mrb[28].mxu0  ;;  %v3145_v30 = vpop.f32.mrb[28].mxu1 }
 0x9b4   :  { %v12396_v51 = vadd.f32 %v3074_v11, %v14133_v41  ;;  %v3076_v53 = vpop.f32.mrb[29].mxu0  ;;  %v3147_v43 = vpop.f32.mrb[29].mxu1  ;;  %v12412_v13 = vadd.f32 %v3145_v30, %v14145_v49  ;;  %v3428_v30 = vld [vmem:[#allocation6 + $0x230] sm:$0xff] }
 0x9b5   :  { %v12397_v17 = vadd.f32 %v3076_v53, %v14136_v57  ;;  %v12413_v8 = vadd.f32 %v3147_v43, %v14141_v9  ;;  %v3431_v53 = vld [vmem:[#allocation6 + $0x248] sm:$0xff] }
 0x9b6   :  { %v9842_v28 = vmul.f32 -1.442695, %v12396_v51  ;;  %v14207_v51 = vpack.c.bf16 %v3428_v30, %v3424_v37  ;;  %v3435_v43 = vld [vmem:[#allocation6 + $0x268] sm:$0xff]  ;;  %v3470_v30 = vld [vmem:[#allocation6 + $0x380] sm:$0xff] }
 0x9b7   :  { %v9843_v1 = vmul.f32 -1.442695, %v12397_v17  ;;  %v9844_v25 = vmul.f32 -1.442695, %v12413_v8  ;;  %v14211_v17 = vpack.c.bf16 %v3435_v43, %v3431_v53  ;;  %v3483_v43 = vld [vmem:[#allocation6 + $0x3e8] sm:$0xff] }
 0x9b8   :  { %12823 = vpow2.f32 %v9842_v28  ;;  %v3430_v28 = vld [vmem:[#allocation6 + $0x240] sm:$0xff] }
 0x9b9   :  { %12825 = vpow2.f32 %v9843_v1  ;;  %v3434_v1 = vld [vmem:[#allocation6 + $0x260] sm:$0xff] }
 0x9ba   :  { %12827 = vpow2.f32 %v9844_v25  ;;  %v14214_v8 = vpack.c.bf16 %v3434_v1, %v3430_v28  ;;  %v3439_v25 = vld [vmem:[#allocation6 + $0x288] sm:$0xff]  ;;  %v3478_v1 = vld [vmem:[#allocation6 + $0x3c0] sm:$0xff] }
 0x9bb   :  { %12829 = vtanh.f32 %v12412_v13  ;;  %v3443_v13 = vld [vmem:[#allocation6 + $0x2a8] sm:$0xff] }
 0x9c2   :  { %v12824_v45 = vpop.eup %12823 }
 0x9c3   :  { %v12826_v5 = vpop.eup %12825  ;;  %v3157_v54 = vadd.f32 1.0, %v12824_v45  ;;  %v14219_v45 = vpack.c.bf16 %v3443_v13, %v3439_v25 }
 0x9c4   :  { %v3163_v56 = vadd.f32 1.0, %v12826_v5  ;;  %v12828_v47 = vpop.eup %12827  ;;  %v3438_v5 = vld [vmem:[#allocation6 + $0x280] sm:$0xff] }
 0x9c5   :  { %12831 = vrcp.f32 %v3157_v54  ;;  %v12830_v62 = vpop.eup %12829  ;;  %v3170_v59 = vadd.f32 1.0, %v12828_v47  ;;  %v3442_v54 = vld [vmem:[#allocation6 + $0x2a0] sm:$0xff]  ;;  %v3451_v47 = vld [vmem:[#allocation6 + $0x2e8] sm:$0xff] }
 0x9c6   :  { %12833 = vrcp.f32 %v3163_v56  ;;  %v14222_v56 = vpack.c.bf16 %v3442_v54, %v3438_v5 }
 0x9c7   :  { %12835 = vrcp.f32 %v3170_v59 }
 0x9cf   :  { %v12832_v63 = vpop.eup %12831 }
 0x9d0   :  { %v12834_v32 = vpop.eup %12833  ;;  %v3174_v52 = vmul.f32 %v12832_v63, %v12830_v62  ;;  %v3446_v63 = vld [vmem:[#allocation6 + $0x2c0] sm:$0xff] }
 0x9d1   :  { %v3173_v10 = vmul.f32 %v12834_v32, %v14148_v20  ;;  %v12836_v2 = vpop.eup %12835  ;;  %v3422_v20 = vld [vmem:[#allocation6 + $0x200] sm:$0xff] }
 0x9d2   :  { %v14204_v11 = vpack.c.bf16 %v3426_v26, %v3422_v20  ;;  %v3475_v26 = vld [vmem:[#allocation6 + $0x3a8] sm:$0xff] }
 0x9d3   :  { %v14193_v3 = vadd.f32 %v3174_v52, %v3173_v10  ;;  %v3459_v52 = vld [vmem:[#allocation6 + $0x328] sm:$0xff]  ;;  %v3454_v10 = vld [vmem:[#allocation6 + $0x300] sm:$0xff] }
 0x9d5   :  { %12837 = vtanh.f32 %v14193_v3 }
 0x9df   :  { %v12838_v16 = vpop.eup %12837 }
 0x9e0   :  { %v14196_v44 = vmul.f32 %v12838_v16, %v12836_v2  ;;  %v3467_v16 = vld [vmem:[#allocation6 + $0x368] sm:$0xff] }
 0x9e2   :  { %3312 = vmatmul.mubr.f32.vlgmr.msra.gmra.mrb[26].mxu0 %v14196_v44  ;;  %3383 = vmatmul.mubr.f32.vlgmr.msra.gmra.mrb[26].mxu1 %v14196_v44 }
 0x9e3   :  { %3550 = vmatprep.mubr.f32.mxu0 %v15597_v0  ;;  %3621 = vmatprep.mubr.f32.mxu1 %v15597_v0 }
 0x9e4   :  { %10755 = vmatpush1.bf16.msra.mxu0 %v14204_v11  ;;  %10787 = vmatpush1.bf16.msra.mxu1 %v14207_v51 }
 0x9e5   :  { %10789 = vmatprep.subr.bf16.mxu1 %v13975_v29  ;;  %10757 = vmatprep.subr.bf16.mxu0 %v14211_v17  ;;  %v3447_v29 = vld [vmem:[#allocation6 + $0x2c8] sm:$0xff] }
 0x9e6   :  { %v14227_v62 = vpack.c.bf16 %v3451_v47, %v3447_v29 }
 0x9e8   :  { %10759 = vmatpush1.bf16.msra.mxu0 %v14214_v8  ;;  %10791 = vmatpush1.bf16.msra.mxu1 %v13988_v7  ;;  %v3450_v7 = vld [vmem:[#allocation6 + $0x2e0] sm:$0xff] }
 0x9e9   :  { %10793 = vmatprep.subr.bf16.mxu1 %v13991_v4  ;;  %10761 = vmatprep.subr.bf16.mxu0 %v14219_v45  ;;  %v14230_v32 = vpack.c.bf16 %v3450_v7, %v3446_v63  ;;  %v3455_v4 = vld [vmem:[#allocation6 + $0x308] sm:$0xff] }
 0x9ea   :  { %v14235_v59 = vpack.c.bf16 %v3459_v52, %v3455_v4 }
 0x9ec   :  { %10763 = vmatpush1.bf16.msra.mxu0 %v14222_v56  ;;  %10795 = vmatpush1.bf16.msra.mxu1 %v14004_v40  ;;  %v3458_v40 = vld [vmem:[#allocation6 + $0x320] sm:$0xff] }
 0x9ed   :  { %10797 = vmatprep.subr.bf16.mxu1 %v14008_v33  ;;  %10765 = vmatprep.subr.bf16.mxu0 %v14227_v62  ;;  %v14238_v2 = vpack.c.bf16 %v3458_v40, %v3454_v10  ;;  %v3463_v33 = vld [vmem:[#allocation6 + $0x348] sm:$0xff] }
 0x9ee   :  { %v14243_v36 = vpack.c.bf16 %v3467_v16, %v3463_v33 }
 0x9f0   :  { %10767 = vmatpush1.bf16.msra.mxu0 %v14230_v32  ;;  %10799 = vmatpush1.bf16.msra.mxu1 %v14021_v24  ;;  %v3466_v24 = vld [vmem:[#allocation6 + $0x360] sm:$0xff] }
 0x9f1   :  { %10801 = vmatprep.subr.bf16.mxu1 %v14025_v6  ;;  %10769 = vmatprep.subr.bf16.mxu0 %v14235_v59  ;;  %v14246_v20 = vpack.c.bf16 %v3466_v24, %v3462_v48  ;;  %v3471_v6 = vld [vmem:[#allocation6 + $0x388] sm:$0xff] }
 0x9f2   :  { %v14251_v37 = vpack.c.bf16 %v3475_v26, %v3471_v6 }
 0x9f4   :  { %10771 = vmatpush1.bf16.msra.mxu0 %v14238_v2  ;;  %10803 = vmatpush1.bf16.msra.mxu1 %v14038_v19  ;;  %v3474_v19 = vld [vmem:[#allocation6 + $0x3a0] sm:$0xff] }
 0x9f5   :  { %10805 = vmatprep.subr.bf16.mxu1 %v14042_v42  ;;  %10773 = vmatprep.subr.bf16.mxu0 %v14243_v36  ;;  %v14254_v53 = vpack.c.bf16 %v3474_v19, %v3470_v30  ;;  %v3479_v42 = vld [vmem:[#allocation6 + $0x3c8] sm:$0xff] }
 0x9f6   :  { %v14259_v28 = vpack.c.bf16 %v3483_v43, %v3479_v42 }
 0x9f8   :  { %10775 = vmatpush1.bf16.msra.mxu0 %v14246_v20  ;;  %10807 = vmatpush1.bf16.msra.mxu1 %v14053_v22  ;;  %v3482_v22 = vld [vmem:[#allocation6 + $0x3e0] sm:$0xff] }
 0x9f9   :  { %10809 = vmatprep.subr.bf16.mxu1 %v14059_v50  ;;  %10777 = vmatprep.subr.bf16.mxu0 %v14251_v37  ;;  %v14262_v25 = vpack.c.bf16 %v3482_v22, %v3478_v1  ;;  %v3668_v22 = vld [vmem:[#allocation6 + $0x238] sm:$0xff] }
 0x9fc   :  { %10779 = vmatpush1.bf16.msra.mxu0 %v14254_v53  ;;  %10811 = vmatpush1.bf16.msra.mxu1 %v14070_v18 }
 0x9fd   :  { %10813 = vmatprep.subr.bf16.mxu1 %v14074_v15  ;;  %10781 = vmatprep.subr.bf16.mxu0 %v14259_v28 }
 0xa00   :  { %10783 = vmatpush1.bf16.msra.mxu0 %v14262_v25  ;;  %10815 = vmatpush1.bf16.msra.mxu1 %v14079_v27 }
 0xa01   :  { %10817 = vmatprep.subr.bf16.mxu0 %v14202_v35 }
 0xab5   :  { %v3313_v50 = vpop.f32.mrb[26].mxu0  ;;  %v3384_v13 = vpop.f32.mrb[26].mxu1 }
 0xab6   :  { %v12394_v18 = vadd.f32 %v3313_v50, %v14133_v41  ;;  %v3315_v5 = vpop.f32.mrb[27].mxu0  ;;  %v3386_v54 = vpop.f32.mrb[27].mxu1  ;;  %v12410_v4 = vadd.f32 %v3384_v13, %v14145_v49  ;;  %v3672_v13 = vld [vmem:[#allocation6 + $0x258] sm:$0xff] }
 0xab7   :  { %v12395_v29 = vadd.f32 %v3315_v5, %v14136_v57  ;;  %v12411_v63 = vadd.f32 %v3386_v54, %v14141_v9  ;;  %v3671_v54 = vld [vmem:[#allocation6 + $0x250] sm:$0xff] }
 0xab8   :  { %v9845_v47 = vmul.f32 -1.442695, %v12394_v18  ;;  %v3676_v18 = vld [vmem:[#allocation6 + $0x278] sm:$0xff] }
 0xab9   :  { %v9846_v15 = vmul.f32 -1.442695, %v12395_v29  ;;  %v9847_v7 = vmul.f32 -1.442695, %v12411_v63  ;;  %v14302_v5 = vpack.c.bf16 %v3676_v18, %v3672_v13  ;;  %v3675_v29 = vld [vmem:[#allocation6 + $0x270] sm:$0xff]  ;;  %v3684_v63 = vld [vmem:[#allocation6 + $0x2b8] sm:$0xff] }
 0xaba   :  { %12839 = vpow2.f32 %v9845_v47  ;;  %v14304_v47 = vpack.c.bf16 %v3675_v29, %v3671_v54  ;;  %v3708_v13 = vld [vmem:[#allocation6 + $0x378] sm:$0xff]  ;;  %v3703_v54 = vld [vmem:[#allocation6 + $0x350] sm:$0xff] }
 0xabb   :  { %12841 = vpow2.f32 %v9846_v15  ;;  %v3680_v15 = vld [vmem:[#allocation6 + $0x298] sm:$0xff]  ;;  %v3707_v29 = vld [vmem:[#allocation6 + $0x370] sm:$0xff] }
 0xabc   :  { %12843 = vpow2.f32 %v9847_v7  ;;  %v14308_v7 = vpack.c.bf16 %v3684_v63, %v3680_v15  ;;  %v14328_v15 = vpack.c.bf16 %v3707_v29, %v3703_v54  ;;  %v3712_v63 = vld [vmem:[#allocation6 + $0x398] sm:$0xff] }
 0xabd   :  { %12845 = vtanh.f32 %v12410_v4  ;;  %v3679_v4 = vld [vmem:[#allocation6 + $0x290] sm:$0xff] }
 0xac4   :  { %v12840_v27 = vpop.eup %12839 }
 0xac5   :  { %v12842_v52 = vpop.eup %12841  ;;  %v3396_v10 = vadd.f32 1.0, %v12840_v27  ;;  %v3683_v27 = vld [vmem:[#allocation6 + $0x2b0] sm:$0xff] }
 0xac6   :  { %v3402_v40 = vadd.f32 1.0, %v12842_v52  ;;  %v12844_v33 = vpop.eup %12843  ;;  %v14310_v52 = vpack.c.bf16 %v3683_v27, %v3679_v4  ;;  %v3716_v4 = vld [vmem:[#allocation6 + $0x3b8] sm:$0xff] }
 0xac7   :  { %12847 = vrcp.f32 %v3396_v10  ;;  %v12846_v16 = vpop.eup %12845  ;;  %v3409_v26 = vadd.f32 1.0, %v12844_v33  ;;  %v3688_v10 = vld [vmem:[#allocation6 + $0x2d8] sm:$0xff]  ;;  %v14332_v27 = vpack.c.bf16 %v3716_v4, %v3712_v63 }
 0xac8   :  { %12849 = vrcp.f32 %v3402_v40  ;;  %v3692_v40 = vld [vmem:[#allocation6 + $0x2f8] sm:$0xff] }
 0xac9   :  { %12851 = vrcp.f32 %v3409_v26  ;;  %v14314_v33 = vpack.c.bf16 %v3692_v40, %v3688_v10  ;;  %v3700_v26 = vld [vmem:[#allocation6 + $0x338] sm:$0xff]  ;;  %v3711_v10 = vld [vmem:[#allocation6 + $0x390] sm:$0xff] }
 0xaca   :  { %v3715_v40 = vld [vmem:[#allocation6 + $0x3b0] sm:$0xff] }
 0xad1   :  { %v12848_v48 = vpop.eup %12847 }
 0xad2   :  { %v12850_v24 = vpop.eup %12849  ;;  %v3413_v6 = vmul.f32 %v12848_v48, %v12846_v16  ;;  %v3687_v16 = vld [vmem:[#allocation6 + $0x2d0] sm:$0xff] }
 0xad3   :  { %v3412_v30 = vmul.f32 %v12850_v24, %v14193_v3  ;;  %v12852_v42 = vpop.eup %12851  ;;  %v3664_v3 = vld [vmem:[#allocation6 + $0x218] sm:$0xff]  ;;  %v3691_v48 = vld [vmem:[#allocation6 + $0x2f0] sm:$0xff] }
 0xad4   :  { %v14298_v50 = vpack.c.bf16 %v3668_v22, %v3664_v3  ;;  %v14316_v24 = vpack.c.bf16 %v3691_v48, %v3687_v16  ;;  %v3704_v22 = vld [vmem:[#allocation6 + $0x358] sm:$0xff]  ;;  %v14334_v16 = vpack.c.bf16 %v3715_v40, %v3711_v10 }
 0xad5   :  { %v14273_v19 = vadd.f32 %v3413_v6, %v3412_v30  ;;  %v3696_v6 = vld [vmem:[#allocation6 + $0x318] sm:$0xff]  ;;  %v14326_v18 = vpack.c.bf16 %v3708_v13, %v3704_v22 }
 0xad6   :  { %10849 = vmatprep.subr.bf16.mxu1 %v14298_v50  ;;  %v14320_v30 = vpack.c.bf16 %v3700_v26, %v3696_v6  ;;  %v3720_v48 = vld [vmem:[#allocation6 + $0x3d8] sm:$0xff] }
 0xad7   :  { %12853 = vtanh.f32 %v14273_v19  ;;  %v3724_v6 = vld [vmem:[#allocation6 + $0x3f8] sm:$0xff] }
 0xad8   :  { %v14338_v26 = vpack.c.bf16 %v3724_v6, %v3720_v48 }
 0xae1   :  { %v12854_v43 = vpop.eup %12853 }
 0xae2   :  { %v14276_v1 = vmul.f32 %v12854_v43, %v12852_v42  ;;  %v3695_v42 = vld [vmem:[#allocation6 + $0x310] sm:$0xff] }
 0xae3   :  { %v3699_v43 = vld [vmem:[#allocation6 + $0x330] sm:$0xff] }
 0xae4   :  { %3551 = vmatmul.mubr.f32.vlgmr.msra.gmra.mrb[24].mxu0 %v14276_v1  ;;  %3622 = vmatmul.mubr.f32.vlgmr.msra.gmra.mrb[24].mxu1 %v14276_v1  ;;  %v14322_v3 = vpack.c.bf16 %v3699_v43, %v3695_v42  ;;  %v3719_v42 = vld [vmem:[#allocation6 + $0x3d0] sm:$0xff] }
 0xae5   :  { %10819 = vmatpush1.bf16.msra.mxu0 %v14204_v11  ;;  %3789 = vmatprep.mubr.f32.mxu0 %v15597_v0  ;;  %v3723_v43 = vld [vmem:[#allocation6 + $0x3f0] sm:$0xff] }
 0xae6   :  { %10821 = vmatprep.subr.bf16.mxu0 %v14211_v17  ;;  %3860 = vmatprep.mubr.f32.mxu1 %v15597_v0  ;;  %v14340_v22 = vpack.c.bf16 %v3723_v43, %v3719_v42 }
 0xae7   :  { %10851 = vmatpush1.bf16.msra.mxu1 %v14207_v51 }
 0xae8   :  { %10853 = vmatprep.subr.bf16.mxu1 %v14302_v5 }
 0xae9   :  { %10823 = vmatpush1.bf16.msra.mxu0 %v14214_v8 }
 0xaea   :  { %10825 = vmatprep.subr.bf16.mxu0 %v14219_v45 }
 0xaeb   :  { %10855 = vmatpush1.bf16.msra.mxu1 %v14304_v47 }
 0xaec   :  { %10857 = vmatprep.subr.bf16.mxu1 %v14308_v7 }
 0xaed   :  { %10827 = vmatpush1.bf16.msra.mxu0 %v14222_v56 }
 0xaee   :  { %10829 = vmatprep.subr.bf16.mxu0 %v14227_v62 }
 0xaef   :  { %10859 = vmatpush1.bf16.msra.mxu1 %v14310_v52 }
 0xaf0   :  { %10861 = vmatprep.subr.bf16.mxu1 %v14314_v33 }
 0xaf1   :  { %10831 = vmatpush1.bf16.msra.mxu0 %v14230_v32 }
 0xaf2   :  { %10833 = vmatprep.subr.bf16.mxu0 %v14235_v59 }
 0xaf3   :  { %10863 = vmatpush1.bf16.msra.mxu1 %v14316_v24 }
 0xaf4   :  { %10865 = vmatprep.subr.bf16.mxu1 %v14320_v30 }
 0xaf5   :  { %10835 = vmatpush1.bf16.msra.mxu0 %v14238_v2 }
 0xaf6   :  { %10837 = vmatprep.subr.bf16.mxu0 %v14243_v36 }
 0xaf7   :  { %10867 = vmatpush1.bf16.msra.mxu1 %v14322_v3 }
 0xaf8   :  { %10869 = vmatprep.subr.bf16.mxu1 %v14326_v18 }
 0xaf9   :  { %10839 = vmatpush1.bf16.msra.mxu0 %v14246_v20 }
 0xafa   :  { %10841 = vmatprep.subr.bf16.mxu0 %v14251_v37 }
 0xafb   :  { %10871 = vmatpush1.bf16.msra.mxu1 %v14328_v15 }
 0xafc   :  { %10873 = vmatprep.subr.bf16.mxu1 %v14332_v27 }
 0xafd   :  { %10843 = vmatpush1.bf16.msra.mxu0 %v14254_v53 }
 0xafe   :  { %10845 = vmatprep.subr.bf16.mxu0 %v14259_v28 }
 0xaff   :  { %10875 = vmatpush1.bf16.msra.mxu1 %v14334_v16 }
 0xb00   :  { %10877 = vmatprep.subr.bf16.mxu1 %v14338_v26 }
 0xb01   :  { %10847 = vmatpush1.bf16.msra.mxu0 %v14262_v25 }
 0xb02   :  { %10881 = vmatprep.subr.bf16.mxu0 %v14202_v35 }
 0xb03   :  { %10879 = vmatpush1.bf16.msra.mxu1 %v14340_v22 }
 0xb04   :  { %10913 = vmatprep.subr.bf16.mxu1 %v14298_v50 }
 0xbb7   :  { %v3552_v13 = vpop.f32.mrb[24].mxu0  ;;  %v3623_v54 = vpop.f32.mrb[24].mxu1 }
 0xbb8   :  { %v12392_v29 = vadd.f32 %v3552_v13, %v14133_v41  ;;  %v3554_v63 = vpop.f32.mrb[25].mxu0  ;;  %v3625_v4 = vpop.f32.mrb[25].mxu1  ;;  %v12408_v43 = vadd.f32 %v3623_v54, %v14145_v49 }
 0xbb9   :  { %v12393_v10 = vadd.f32 %v3554_v63, %v14136_v57  ;;  %v12409_v6 = vadd.f32 %v3625_v4, %v14141_v9 }
 0xbba   :  { %v9848_v40 = vmul.f32 -1.442695, %v12392_v29 }
 0xbbb   :  { %v9849_v48 = vmul.f32 -1.442695, %v12393_v10  ;;  %v9850_v42 = vmul.f32 -1.442695, %v12409_v6 }
 0xbbc   :  { %12855 = vpow2.f32 %v9848_v40 }
 0xbbd   :  { %12857 = vpow2.f32 %v9849_v48 }
 0xbbe   :  { %12859 = vpow2.f32 %v9850_v42 }
 0xbbf   :  { %12861 = vtanh.f32 %v12408_v43 }
 0xbc6   :  { %v12856_v0 = vpop.eup %12855 }
 0xbc7   :  { %v12858_v55 = vpop.eup %12857  ;;  %v3635_v38 = vadd.f32 1.0, %v12856_v0 }
 0xbc8   :  { %v3641_v34 = vadd.f32 1.0, %v12858_v55  ;;  %v12860_v13 = vpop.eup %12859 }
 0xbc9   :  { %12863 = vrcp.f32 %v3635_v38  ;;  %v12862_v31 = vpop.eup %12861  ;;  %v3648_v40 = vadd.f32 1.0, %v12860_v13 }
 0xbca   :  { %12865 = vrcp.f32 %v3641_v34 }
 0xbcb   :  { %12867 = vrcp.f32 %v3648_v40 }
 0xbd3   :  { %v12864_v63 = vpop.eup %12863 }
 0xbd4   :  { %v12866_v29 = vpop.eup %12865  ;;  %v3652_v10 = vmul.f32 %v12864_v63, %v12862_v31  ;;  %v15629_v31 = vmov 0.0  }
 0xbd5   :  { %v3651_v48 = vmul.f32 %v12866_v29, %v14273_v19  ;;  %v12868_v54 = vpop.eup %12867 }
 0xbd7   :  { %v14350_v4 = vadd.f32 %v3652_v10, %v3651_v48 }
 0xbd9   :  { %12869 = vtanh.f32 %v14350_v4 }
 0xbe3   :  { %v12870_v0 = vpop.eup %12869 }
 0xbe4   :  { %v14353_v6 = vmul.f32 %v12870_v0, %v12868_v54 }
 0xbe6   :  { %3790 = vmatmul.mubr.f32.vlgmr.msra.gmra.mrb[22].mxu0 %v14353_v6  ;;  %3861 = vmatmul.mubr.f32.vlgmr.msra.gmra.mrb[22].mxu1 %v14353_v6 }
 0xbe7   :  { %10883 = vmatpush1.bf16.msra.mxu0 %v14204_v11  ;;  %10915 = vmatpush1.bf16.msra.mxu1 %v14207_v51 }
 0xbe8   :  { %10885 = vmatprep.subr.bf16.mxu0 %v14211_v17  ;;  %10917 = vmatprep.subr.bf16.mxu1 %v14302_v5 }
 0xbe9   :  { %4028 = vmatprep.mubr.f32.mxu0 %v15629_v31  ;;  %4099 = vmatprep.mubr.f32.mxu1 %v15629_v31 }
 0xbeb   :  { %10887 = vmatpush1.bf16.msra.mxu0 %v14214_v8  ;;  %10919 = vmatpush1.bf16.msra.mxu1 %v14304_v47 }
 0xbec   :  { %10889 = vmatprep.subr.bf16.mxu0 %v14219_v45  ;;  %10921 = vmatprep.subr.bf16.mxu1 %v14308_v7 }
 0xbef   :  { %10891 = vmatpush1.bf16.msra.mxu0 %v14222_v56  ;;  %10923 = vmatpush1.bf16.msra.mxu1 %v14310_v52 }
 0xbf0   :  { %10893 = vmatprep.subr.bf16.mxu0 %v14227_v62  ;;  %10925 = vmatprep.subr.bf16.mxu1 %v14314_v33 }
 0xbf3   :  { %10895 = vmatpush1.bf16.msra.mxu0 %v14230_v32  ;;  %10927 = vmatpush1.bf16.msra.mxu1 %v14316_v24 }
 0xbf4   :  { %10897 = vmatprep.subr.bf16.mxu0 %v14235_v59  ;;  %10929 = vmatprep.subr.bf16.mxu1 %v14320_v30 }
 0xbf7   :  { %10899 = vmatpush1.bf16.msra.mxu0 %v14238_v2  ;;  %10931 = vmatpush1.bf16.msra.mxu1 %v14322_v3 }
 0xbf8   :  { %10901 = vmatprep.subr.bf16.mxu0 %v14243_v36  ;;  %10933 = vmatprep.subr.bf16.mxu1 %v14326_v18 }
 0xbfb   :  { %10903 = vmatpush1.bf16.msra.mxu0 %v14246_v20  ;;  %10935 = vmatpush1.bf16.msra.mxu1 %v14328_v15 }
 0xbfc   :  { %10905 = vmatprep.subr.bf16.mxu0 %v14251_v37  ;;  %10937 = vmatprep.subr.bf16.mxu1 %v14332_v27 }
 0xbff   :  { %10907 = vmatpush1.bf16.msra.mxu0 %v14254_v53  ;;  %10939 = vmatpush1.bf16.msra.mxu1 %v14334_v16 }
 0xc00   :  { %10909 = vmatprep.subr.bf16.mxu0 %v14259_v28  ;;  %10941 = vmatprep.subr.bf16.mxu1 %v14338_v26 }
 0xc03   :  { %10911 = vmatpush1.bf16.msra.mxu0 %v14262_v25  ;;  %10943 = vmatpush1.bf16.msra.mxu1 %v14340_v22 }
 0xc04   :  { %10945 = vmatprep.subr.bf16.mxu0 %v14202_v35  ;;  %10977 = vmatprep.subr.bf16.mxu1 %v14298_v50 }
 0xcb9   :  { %v3791_v34 = vpop.f32.mrb[22].mxu0  ;;  %v3862_v38 = vpop.f32.mrb[22].mxu1 }
 0xcba   :  { %v12390_v55 = vadd.f32 %v3791_v34, %v14133_v41  ;;  %v3793_v19 = vpop.f32.mrb[23].mxu0  ;;  %v3864_v42 = vpop.f32.mrb[23].mxu1  ;;  %v12406_v40 = vadd.f32 %v3862_v38, %v14145_v49 }
 0xcbb   :  { %v12391_v43 = vadd.f32 %v3793_v19, %v14136_v57  ;;  %v12407_v29 = vadd.f32 %v3864_v42, %v14141_v9 }
 0xcbc   :  { %v9851_v13 = vmul.f32 -1.442695, %v12390_v55 }
 0xcbd   :  { %v9852_v63 = vmul.f32 -1.442695, %v12391_v43  ;;  %v9853_v10 = vmul.f32 -1.442695, %v12407_v29 }
 0xcbe   :  { %12871 = vpow2.f32 %v9851_v13 }
 0xcbf   :  { %12873 = vpow2.f32 %v9852_v63 }
 0xcc0   :  { %12875 = vpow2.f32 %v9853_v10 }
 0xcc1   :  { %12877 = vtanh.f32 %v12406_v40 }
 0xcc8   :  { %v12872_v35 = vpop.eup %12871 }
 0xcc9   :  { %v12874_v48 = vpop.eup %12873  ;;  %v3874_v54 = vadd.f32 1.0, %v12872_v35 }
 0xcca   :  { %v3880_v0 = vadd.f32 1.0, %v12874_v48  ;;  %v12876_v34 = vpop.eup %12875 }
 0xccb   :  { %12879 = vrcp.f32 %v3874_v54  ;;  %v12878_v58 = vpop.eup %12877  ;;  %v3887_v13 = vadd.f32 1.0, %v12876_v34 }
 0xccc   :  { %12881 = vrcp.f32 %v3880_v0 }
 0xccd   :  { %12883 = vrcp.f32 %v3887_v13 }
 0xcd5   :  { %v12880_v19 = vpop.eup %12879 }
 0xcd6   :  { %v12882_v55 = vpop.eup %12881  ;;  %v3891_v43 = vmul.f32 %v12880_v19, %v12878_v58 }
 0xcd7   :  { %v3890_v63 = vmul.f32 %v12882_v55, %v14350_v4  ;;  %v12884_v38 = vpop.eup %12883  ;;  %v4379_v55 = vld [vmem:[#allocation6 + $0x208] sm:$0xff] }
 0xcd9   :  { %v14396_v42 = vadd.f32 %v3891_v43, %v3890_v63  ;;  %v4383_v43 = vld [vmem:[#allocation6 + $0x228] sm:$0xff]  ;;  %v4378_v63 = vld [vmem:[#allocation6 + $0x200] sm:$0xff] }
 0xcda   :  { %v11008_v13 = vpack.c.bf16 %v4383_v43, %v4379_v55  ;;  %v4418_v55 = vld [vmem:[#allocation6 + $0x340] sm:$0xff] }
 0xcdb   :  { %12885 = vtanh.f32 %v14396_v42  ;;  %v4422_v43 = vld [vmem:[#allocation6 + $0x360] sm:$0xff] }
 0xce5   :  { %v12886_v29 = vpop.eup %12885 }
 0xce6   :  { %v14399_v10 = vmul.f32 %v12886_v29, %v12884_v38  ;;  %v4380_v38 = vld [vmem:[#allocation6 + $0x210] sm:$0xff] }
 0xce8   :  { %4029 = vmatmul.mubr.f32.vlgmr.msra.gmra.mrb[20].mxu0 %v14399_v10  ;;  %4100 = vmatmul.mubr.f32.vlgmr.msra.gmra.mrb[20].mxu1 %v14399_v10 }
 0xce9   :  { %10947 = vmatpush1.bf16.msra.mxu0 %v14204_v11  ;;  %10979 = vmatpush1.bf16.msra.mxu1 %v14207_v51 }
 0xcea   :  { %10949 = vmatprep.subr.bf16.mxu0 %v14211_v17  ;;  %10981 = vmatprep.subr.bf16.mxu1 %v14302_v5 }
 0xceb   :  { %4267 = vmatprep.mubr.f32.mxu0 %v15629_v31  ;;  %4338 = vmatprep.mubr.f32.mxu1 %v15629_v31 }
 0xced   :  { %10951 = vmatpush1.bf16.msra.mxu0 %v14214_v8  ;;  %10983 = vmatpush1.bf16.msra.mxu1 %v14304_v47 }
 0xcee   :  { %10953 = vmatprep.subr.bf16.mxu0 %v14219_v45  ;;  %10985 = vmatprep.subr.bf16.mxu1 %v14308_v7 }
 0xcf1   :  { %10955 = vmatpush1.bf16.msra.mxu0 %v14222_v56  ;;  %10987 = vmatpush1.bf16.msra.mxu1 %v14310_v52 }
 0xcf2   :  { %10957 = vmatprep.subr.bf16.mxu0 %v14227_v62  ;;  %10989 = vmatprep.subr.bf16.mxu1 %v14314_v33 }
 0xcf5   :  { %10959 = vmatpush1.bf16.msra.mxu0 %v14230_v32  ;;  %10991 = vmatpush1.bf16.msra.mxu1 %v14316_v24 }
 0xcf6   :  { %10961 = vmatprep.subr.bf16.mxu0 %v14235_v59  ;;  %10993 = vmatprep.subr.bf16.mxu1 %v14320_v30 }
 0xcf9   :  { %10963 = vmatpush1.bf16.msra.mxu0 %v14238_v2  ;;  %10995 = vmatpush1.bf16.msra.mxu1 %v14322_v3 }
 0xcfa   :  { %10965 = vmatprep.subr.bf16.mxu0 %v14243_v36  ;;  %10997 = vmatprep.subr.bf16.mxu1 %v14326_v18 }
 0xcfd   :  { %10967 = vmatpush1.bf16.msra.mxu0 %v14246_v20  ;;  %10999 = vmatpush1.bf16.msra.mxu1 %v14328_v15 }
 0xcfe   :  { %10969 = vmatprep.subr.bf16.mxu0 %v14251_v37  ;;  %11001 = vmatprep.subr.bf16.mxu1 %v14332_v27 }
 0xd01   :  { %10971 = vmatpush1.bf16.msra.mxu0 %v14254_v53  ;;  %11003 = vmatpush1.bf16.msra.mxu1 %v14334_v16 }
 0xd02   :  { %10973 = vmatprep.subr.bf16.mxu0 %v14259_v28  ;;  %11005 = vmatprep.subr.bf16.mxu1 %v14338_v26 }
 0xd05   :  { %10975 = vmatpush1.bf16.msra.mxu0 %v14262_v25  ;;  %11007 = vmatpush1.bf16.msra.mxu1 %v14340_v22 }
 0xd06   :  { %11041 = vmatprep.subr.bf16.mxu1 %v14298_v50  ;;  %11009 = vmatprep.subr.bf16.mxu0 %v11008_v13  ;;  %v11030_v13 = vpack.c.bf16 %v4422_v43, %v4418_v55  ;;  %v4694_v55 = vld [vmem:[#allocation8 + $0x200] sm:$0xff] }
 0xd07   :  { %v4698_v43 = vld [vmem:[#allocation8 + $0x220] sm:$0xff] }
 0xdbb   :  { %v4030_v58 = vpop.f32.mrb[20].mxu0  ;;  %v4101_v11 = vpop.f32.mrb[20].mxu1 }
 0xdbc   :  { %v12388_v51 = vadd.f32 %v4030_v58, %v14133_v41  ;;  %v4032_v17 = vpop.f32.mrb[21].mxu0  ;;  %v4103_v8 = vpop.f32.mrb[21].mxu1  ;;  %v12404_v2 = vadd.f32 %v4101_v11, %v14145_v49  ;;  %v4384_v58 = vld [vmem:[#allocation6 + $0x230] sm:$0xff] }
 0xdbd   :  { %v12389_v45 = vadd.f32 %v4032_v17, %v14136_v57  ;;  %v12405_v32 = vadd.f32 %v4103_v8, %v14141_v9  ;;  %v11042_v11 = vpack.c.bf16 %v4384_v58, %v4380_v38  ;;  %v4391_v17 = vld [vmem:[#allocation6 + $0x268] sm:$0xff]  ;;  %v4430_v38 = vld [vmem:[#allocation6 + $0x3a0] sm:$0xff] }
 0xdbe   :  { %v9854_v56 = vmul.f32 -1.442695, %v12388_v51  ;;  %v4387_v51 = vld [vmem:[#allocation6 + $0x248] sm:$0xff] }
 0xdbf   :  { %v9855_v62 = vmul.f32 -1.442695, %v12389_v45  ;;  %v9856_v59 = vmul.f32 -1.442695, %v12405_v32  ;;  %v11012_v8 = vpack.c.bf16 %v4391_v17, %v4387_v51  ;;  %v4386_v45 = vld [vmem:[#allocation6 + $0x240] sm:$0xff]  ;;  %v4395_v32 = vld [vmem:[#allocation6 + $0x288] sm:$0xff] }
 0xdc0   :  { %12887 = vpow2.f32 %v9854_v56  ;;  %v4390_v56 = vld [vmem:[#allocation6 + $0x260] sm:$0xff]  ;;  %v4439_v58 = vld [vmem:[#allocation6 + $0x3e8] sm:$0xff] }
 0xdc1   :  { %12889 = vpow2.f32 %v9855_v62  ;;  %v11014_v62 = vpack.c.bf16 %v4390_v56, %v4386_v45  ;;  %v4438_v51 = vld [vmem:[#allocation6 + $0x3e0] sm:$0xff] }
 0xdc2   :  { %12891 = vpow2.f32 %v9856_v59  ;;  %v4399_v59 = vld [vmem:[#allocation6 + $0x2a8] sm:$0xff] }
 0xdc3   :  { %12893 = vtanh.f32 %v12404_v2  ;;  %v11016_v2 = vpack.c.bf16 %v4399_v59, %v4395_v32 }
 0xdca   :  { %v12888_v36 = vpop.eup %12887 }
 0xdcb   :  { %v12890_v20 = vpop.eup %12889  ;;  %v4113_v37 = vadd.f32 1.0, %v12888_v36  ;;  %v4394_v36 = vld [vmem:[#allocation6 + $0x280] sm:$0xff] }
 0xdcc   :  { %v4119_v53 = vadd.f32 1.0, %v12890_v20  ;;  %v12892_v28 = vpop.eup %12891  ;;  %v4398_v20 = vld [vmem:[#allocation6 + $0x2a0] sm:$0xff] }
 0xdcd   :  { %12895 = vrcp.f32 %v4113_v37  ;;  %v12894_v25 = vpop.eup %12893  ;;  %v4126_v35 = vadd.f32 1.0, %v12892_v28  ;;  %v11018_v37 = vpack.c.bf16 %v4398_v20, %v4394_v36  ;;  %v4407_v28 = vld [vmem:[#allocation6 + $0x2e8] sm:$0xff] }
 0xdce   :  { %12897 = vrcp.f32 %v4119_v53  ;;  %v4403_v53 = vld [vmem:[#allocation6 + $0x2c8] sm:$0xff] }
 0xdcf   :  { %12899 = vrcp.f32 %v4126_v35  ;;  %v4410_v35 = vld [vmem:[#allocation6 + $0x300] sm:$0xff] }
 0xdd7   :  { %v12896_v50 = vpop.eup %12895 }
 0xdd8   :  { %v12898_v4 = vpop.eup %12897  ;;  %v4130_v40 = vmul.f32 %v12896_v50, %v12894_v25  ;;  %v4402_v25 = vld [vmem:[#allocation6 + $0x2c0] sm:$0xff] }
 0xdd9   :  { %v4129_v48 = vmul.f32 %v12898_v4, %v14396_v42  ;;  %v12900_v0 = vpop.eup %12899  ;;  %v4382_v42 = vld [vmem:[#allocation6 + $0x220] sm:$0xff] }
 0xdda   :  { %v11010_v29 = vpack.c.bf16 %v4382_v42, %v4378_v63  ;;  %v4406_v50 = vld [vmem:[#allocation6 + $0x2e0] sm:$0xff]  ;;  %v4431_v63 = vld [vmem:[#allocation6 + $0x3a8] sm:$0xff] }
 0xddb   :  { %v14441_v54 = vadd.f32 %v4130_v40, %v4129_v48  ;;  %v11022_v4 = vpack.c.bf16 %v4406_v50, %v4402_v25  ;;  %v4415_v40 = vld [vmem:[#allocation6 + $0x328] sm:$0xff]  ;;  %v4414_v48 = vld [vmem:[#allocation6 + $0x320] sm:$0xff] }
 0xddc   :  { %v4426_v42 = vld [vmem:[#allocation6 + $0x380] sm:$0xff] }
 0xddd   :  { %12901 = vtanh.f32 %v14441_v54 }
 0xde7   :  { %v12902_v34 = vpop.eup %12901 }
 0xde8   :  { %v14444_v19 = vmul.f32 %v12902_v34, %v12900_v0  ;;  %v11026_v0 = vpack.c.bf16 %v4414_v48, %v4410_v35  ;;  %v4423_v34 = vld [vmem:[#allocation6 + $0x368] sm:$0xff] }
 0xdea   :  { %4268 = vmatmul.mubr.f32.vlgmr.msra.gmra.mrb[18].mxu0 %v14444_v19  ;;  %4339 = vmatmul.mubr.f32.vlgmr.msra.gmra.mrb[18].mxu1 %v14444_v19 }
 0xdeb   :  { %4506 = vmatprep.mubr.f32.mxu0 %v15629_v31  ;;  %4577 = vmatprep.mubr.f32.mxu1 %v15629_v31 }
 0xdec   :  { %11011 = vmatpush1.bf16.msra.mxu0 %v11010_v29  ;;  %11043 = vmatpush1.bf16.msra.mxu1 %v11042_v11  ;;  %v11034_v29 = vpack.c.bf16 %v4430_v38, %v4426_v42  ;;  %v4434_v11 = vld [vmem:[#allocation6 + $0x3c0] sm:$0xff]  ;;  %v4703_v38 = vld [vmem:[#allocation8 + $0x248] sm:$0xff] }
 0xded   :  { %11045 = vmatprep.subr.bf16.mxu1 %v14302_v5  ;;  %11013 = vmatprep.subr.bf16.mxu0 %v11012_v8  ;;  %v11020_v5 = vpack.c.bf16 %v4407_v28, %v4403_v53  ;;  %v11038_v17 = vpack.c.bf16 %v4438_v51, %v4434_v11  ;;  %v4702_v11 = vld [vmem:[#allocation8 + $0x240] sm:$0xff] }
 0xdee   :  { %v4706_v51 = vld [vmem:[#allocation8 + $0x260] sm:$0xff] }
 0xdf0   :  { %11015 = vmatpush1.bf16.msra.mxu0 %v11014_v62  ;;  %11047 = vmatpush1.bf16.msra.mxu1 %v14304_v47  ;;  %v4411_v47 = vld [vmem:[#allocation6 + $0x308] sm:$0xff] }
 0xdf1   :  { %11049 = vmatprep.subr.bf16.mxu1 %v14308_v7  ;;  %11017 = vmatprep.subr.bf16.mxu0 %v11016_v2  ;;  %v11024_v7 = vpack.c.bf16 %v4415_v40, %v4411_v47 }
 0xdf4   :  { %11019 = vmatpush1.bf16.msra.mxu0 %v11018_v37  ;;  %11051 = vmatpush1.bf16.msra.mxu1 %v14310_v52  ;;  %v4419_v52 = vld [vmem:[#allocation6 + $0x348] sm:$0xff] }
 0xdf5   :  { %11053 = vmatprep.subr.bf16.mxu1 %v14314_v33  ;;  %11021 = vmatprep.subr.bf16.mxu0 %v11020_v5  ;;  %v11028_v33 = vpack.c.bf16 %v4423_v34, %v4419_v52  ;;  %v4699_v52 = vld [vmem:[#allocation8 + $0x228] sm:$0xff] }
 0xdf8   :  { %11023 = vmatpush1.bf16.msra.mxu0 %v11022_v4  ;;  %11055 = vmatpush1.bf16.msra.mxu1 %v14316_v24  ;;  %v4427_v24 = vld [vmem:[#allocation6 + $0x388] sm:$0xff] }
 0xdf9   :  { %11057 = vmatprep.subr.bf16.mxu1 %v14320_v30  ;;  %11025 = vmatprep.subr.bf16.mxu0 %v11024_v7  ;;  %v11032_v30 = vpack.c.bf16 %v4431_v63, %v4427_v24  ;;  %v11074_v24 = vpack.c.bf16 %v4698_v43, %v4694_v55  ;;  %v4696_v63 = vld [vmem:[#allocation8 + $0x210] sm:$0xff]  ;;  %v4731_v55 = vld [vmem:[#allocation8 + $0x328] sm:$0xff]  ;;  %v4729_v43 = vld [vmem:[#allocation8 + $0x318] sm:$0xff] }
 0xdfc   :  { %11027 = vmatpush1.bf16.msra.mxu0 %v11026_v0  ;;  %11059 = vmatpush1.bf16.msra.mxu1 %v14322_v3  ;;  %v4435_v3 = vld [vmem:[#allocation6 + $0x3c8] sm:$0xff] }
 0xdfd   :  { %11061 = vmatprep.subr.bf16.mxu1 %v14326_v18  ;;  %11029 = vmatprep.subr.bf16.mxu0 %v11028_v33  ;;  %v11036_v18 = vpack.c.bf16 %v4439_v58, %v4435_v3  ;;  %v4695_v0 = vld [vmem:[#allocation8 + $0x208] sm:$0xff]  ;;  %v4701_v33 = vld [vmem:[#allocation8 + $0x238] sm:$0xff] }
 0xdfe   :  { %v11072_v34 = vpack.c.bf16 %v4699_v52, %v4695_v0  ;;  %v4705_v3 = vld [vmem:[#allocation8 + $0x258] sm:$0xff]  ;;  %v4720_v52 = vld [vmem:[#allocation8 + $0x2d0] sm:$0xff] }
 0xe00   :  { %11031 = vmatpush1.bf16.msra.mxu0 %v11030_v13  ;;  %11063 = vmatpush1.bf16.msra.mxu1 %v14328_v15 }
 0xe01   :  { %11065 = vmatprep.subr.bf16.mxu1 %v14332_v27  ;;  %11033 = vmatprep.subr.bf16.mxu0 %v11032_v30  ;;  %v4700_v30 = vld [vmem:[#allocation8 + $0x230] sm:$0xff] }
 0xe02   :  { %v11106_v42 = vpack.c.bf16 %v4700_v30, %v4696_v63  ;;  %v4726_v63 = vld [vmem:[#allocation8 + $0x300] sm:$0xff] }
 0xe03   :  { %v4730_v30 = vld [vmem:[#allocation8 + $0x320] sm:$0xff] }
 0xe04   :  { %11035 = vmatpush1.bf16.msra.mxu0 %v11034_v29  ;;  %11067 = vmatpush1.bf16.msra.mxu1 %v14334_v16  ;;  %v4707_v29 = vld [vmem:[#allocation8 + $0x268] sm:$0xff] }
 0xe05   :  { %11069 = vmatprep.subr.bf16.mxu1 %v14338_v26  ;;  %11037 = vmatprep.subr.bf16.mxu0 %v11036_v18  ;;  %v11076_v58 = vpack.c.bf16 %v4707_v29, %v4703_v38  ;;  %v4709_v18 = vld [vmem:[#allocation8 + $0x278] sm:$0xff]  ;;  %v11090_v38 = vpack.c.bf16 %v4730_v30, %v4726_v63  ;;  %v4728_v29 = vld [vmem:[#allocation8 + $0x310] sm:$0xff]  ;;  %v4626_v63 = vld [vmem:[#allocation8 + $0x28] sm:$0xff] }
 0xe06   :  { %v4624_v30 = vld [vmem:[#allocation8 + $0x18] sm:$0xff] }
 0xe08   :  { %11039 = vmatpush1.bf16.msra.mxu0 %v11038_v17  ;;  %11071 = vmatpush1.bf16.msra.mxu1 %v14340_v22  ;;  %v11108_v17 = vpack.c.bf16 %v4709_v18, %v4705_v3  ;;  %v4732_v3 = vld [vmem:[#allocation8 + $0x330] sm:$0xff]  ;;  %v4735_v18 = vld [vmem:[#allocation8 + $0x348] sm:$0xff] }
 0xe09   :  { %11073 = vmatprep.subr.bf16.mxu0 %v11072_v34 }
 0xebd   :  { %v4269_v15 = vpop.f32.mrb[18].mxu0  ;;  %v4340_v8 = vpop.f32.mrb[18].mxu1 }
 0xebe   :  { %v12386_v27 = vadd.f32 %v4269_v15, %v14133_v41  ;;  %v4271_v45 = vpop.f32.mrb[19].mxu0  ;;  %v4342_v56 = vpop.f32.mrb[19].mxu1  ;;  %v12402_v2 = vadd.f32 %v4340_v8, %v14145_v49  ;;  %v11078_v15 = vpack.c.bf16 %v4706_v51, %v4702_v11  ;;  %v4704_v8 = vld [vmem:[#allocation8 + $0x250] sm:$0xff]  ;;  %v4739_v11 = vld [vmem:[#allocation8 + $0x368] sm:$0xff]  ;;  %v4737_v51 = vld [vmem:[#allocation8 + $0x358] sm:$0xff] }
 0xebf   :  { %v12387_v62 = vadd.f32 %v4271_v45, %v14136_v57  ;;  %v12403_v59 = vadd.f32 %v4342_v56, %v14141_v9  ;;  %v4711_v56 = vld [vmem:[#allocation8 + $0x288] sm:$0xff] }
 0xec0   :  { %v9857_v32 = vmul.f32 -1.442695, %v12386_v27  ;;  %v4708_v27 = vld [vmem:[#allocation8 + $0x270] sm:$0xff] }
 0xec1   :  { %v9858_v16 = vmul.f32 -1.442695, %v12387_v62  ;;  %v9859_v26 = vmul.f32 -1.442695, %v12403_v59  ;;  %v11110_v45 = vpack.c.bf16 %v4708_v27, %v4704_v8  ;;  %v4715_v62 = vld [vmem:[#allocation8 + $0x2a8] sm:$0xff]  ;;  %v4717_v59 = vld [vmem:[#allocation8 + $0x2b8] sm:$0xff] }
 0xec2   :  { %12903 = vpow2.f32 %v9857_v32  ;;  %v4713_v32 = vld [vmem:[#allocation8 + $0x298] sm:$0xff]  ;;  %v4734_v8 = vld [vmem:[#allocation8 + $0x340] sm:$0xff] }
 0xec3   :  { %12905 = vpow2.f32 %v9858_v16  ;;  %v11080_v16 = vpack.c.bf16 %v4715_v62, %v4711_v56  ;;  %v4738_v27 = vld [vmem:[#allocation8 + $0x360] sm:$0xff]  ;;  %v4736_v62 = vld [vmem:[#allocation8 + $0x350] sm:$0xff] }
 0xec4   :  { %12907 = vpow2.f32 %v9859_v26  ;;  %v4710_v26 = vld [vmem:[#allocation8 + $0x280] sm:$0xff]  ;;  %v11094_v56 = vpack.c.bf16 %v4738_v27, %v4734_v8 }
 0xec5   :  { %12909 = vtanh.f32 %v12402_v2  ;;  %v4714_v2 = vld [vmem:[#allocation8 + $0x2a0] sm:$0xff] }
 0xecc   :  { %v12904_v36 = vpop.eup %12903 }
 0xecd   :  { %v12906_v20 = vpop.eup %12905  ;;  %v4352_v22 = vadd.f32 1.0, %v12904_v36  ;;  %v11112_v36 = vpack.c.bf16 %v4717_v59, %v4713_v32  ;;  %v4740_v32 = vld [vmem:[#allocation8 + $0x370] sm:$0xff] }
 0xece   :  { %v4358_v37 = vadd.f32 1.0, %v12906_v20  ;;  %v12908_v53 = vpop.eup %12907  ;;  %v11082_v20 = vpack.c.bf16 %v4714_v2, %v4710_v26  ;;  %v11126_v59 = vpack.c.bf16 %v4740_v32, %v4736_v62  ;;  %v4747_v26 = vld [vmem:[#allocation8 + $0x3a8] sm:$0xff]  ;;  %v4745_v2 = vld [vmem:[#allocation8 + $0x398] sm:$0xff] }
 0xecf   :  { %12911 = vrcp.f32 %v4352_v22  ;;  %v12910_v28 = vpop.eup %12909  ;;  %v4365_v4 = vadd.f32 1.0, %v12908_v53  ;;  %v4712_v22 = vld [vmem:[#allocation8 + $0x290] sm:$0xff] }
 0xed0   :  { %12913 = vrcp.f32 %v4358_v37  ;;  %v4716_v37 = vld [vmem:[#allocation8 + $0x2b0] sm:$0xff] }
 0xed1   :  { %12915 = vrcp.f32 %v4365_v4  ;;  %v11114_v53 = vpack.c.bf16 %v4716_v37, %v4712_v22  ;;  %v4725_v4 = vld [vmem:[#allocation8 + $0x2f8] sm:$0xff]  ;;  %v4742_v37 = vld [vmem:[#allocation8 + $0x380] sm:$0xff] }
 0xed9   :  { %v12912_v5 = vpop.eup %12911 }
 0xeda   :  { %v12914_v25 = vpop.eup %12913  ;;  %v4369_v50 = vmul.f32 %v12912_v5, %v12910_v28  ;;  %v4719_v28 = vld [vmem:[#allocation8 + $0x2c8] sm:$0xff] }
 0xedb   :  { %v4368_v47 = vmul.f32 %v12914_v25, %v14441_v54  ;;  %v12916_v7 = vpop.eup %12915  ;;  %v4697_v54 = vld [vmem:[#allocation8 + $0x218] sm:$0xff]  ;;  %v4723_v5 = vld [vmem:[#allocation8 + $0x2e8] sm:$0xff] }
 0xedc   :  { %v11104_v13 = vpack.c.bf16 %v4701_v33, %v4697_v54  ;;  %v4721_v25 = vld [vmem:[#allocation8 + $0x2d8] sm:$0xff]  ;;  %v4724_v54 = vld [vmem:[#allocation8 + $0x2f0] sm:$0xff]  ;;  %v4727_v33 = vld [vmem:[#allocation8 + $0x308] sm:$0xff] }
 0xedd   :  { %v14469_v40 = vadd.f32 %v4369_v50, %v4368_v47  ;;  %v11084_v50 = vpack.c.bf16 %v4723_v5, %v4719_v28  ;;  %v4718_v47 = vld [vmem:[#allocation8 + $0x2c0] sm:$0xff]  ;;  %v11118_v34 = vpack.c.bf16 %v4724_v54, %v4720_v52  ;;  %v4744_v28 = vld [vmem:[#allocation8 + $0x390] sm:$0xff] }
 0xede   :  { %11105 = vmatprep.subr.bf16.mxu1 %v11104_v13  ;;  %v11088_v13 = vpack.c.bf16 %v4731_v55, %v4727_v33  ;;  %v4750_v52 = vld [vmem:[#allocation8 + $0x3c0] sm:$0xff]  ;;  %v4752_v33 = vld [vmem:[#allocation8 + $0x3d0] sm:$0xff] }
 0xedf   :  { %12917 = vtanh.f32 %v14469_v40  ;;  %v4756_v55 = vld [vmem:[#allocation8 + $0x3f0] sm:$0xff] }
 0xee9   :  { %v12918_v35 = vpop.eup %12917 }
 0xeea   :  { %v14472_v48 = vmul.f32 %v12918_v35, %v12916_v7  ;;  %v4722_v7 = vld [vmem:[#allocation8 + $0x2e0] sm:$0xff]  ;;  %v11116_v35 = vpack.c.bf16 %v4725_v4, %v4721_v25  ;;  %v4748_v25 = vld [vmem:[#allocation8 + $0x3b0] sm:$0xff]  ;;  %v4755_v4 = vld [vmem:[#allocation8 + $0x3e8] sm:$0xff] }
 0xeeb   :  { %v11086_v0 = vpack.c.bf16 %v4722_v7, %v4718_v47  ;;  %v11130_v47 = vpack.c.bf16 %v4748_v25, %v4744_v28  ;;  %v4627_v28 = vld [vmem:[#allocation8 + $0x30] sm:$0xff] }
 0xeec   :  { %4507 = vmatmul.mubr.f32.vlgmr.msra.gmra.mrb[16].mxu0 %v14472_v48  ;;  %4578 = vmatmul.mubr.f32.vlgmr.msra.gmra.mrb[16].mxu1 %v14472_v48 }
 0xeed   :  { %4822 = vmatprep.mubr.f32.mxu0 %v15629_v31  ;;  %4935 = vmatprep.mubr.f32.mxu1 %v15629_v31 }
 0xeee   :  { %11075 = vmatpush1.bf16.msra.mxu0 %v11074_v24  ;;  %11107 = vmatpush1.bf16.msra.mxu1 %v11106_v42  ;;  %v4733_v24 = vld [vmem:[#allocation8 + $0x338] sm:$0xff] }
 0xeef   :  { %11077 = vmatprep.subr.bf16.mxu0 %v11076_v58  ;;  %11109 = vmatprep.subr.bf16.mxu1 %v11108_v17  ;;  %v11120_v42 = vpack.c.bf16 %v4733_v24, %v4729_v43  ;;  %v11122_v58 = vpack.c.bf16 %v4732_v3, %v4728_v29  ;;  %v11092_v17 = vpack.c.bf16 %v4739_v11, %v4735_v18  ;;  %v4622_v24 = vld [vmem:[#allocation8 + $0x8] sm:$0xff] }
 0xef2   :  { %11079 = vmatpush1.bf16.msra.mxu0 %v11078_v15  ;;  %11111 = vmatpush1.bf16.msra.mxu1 %v11110_v45  ;;  %v4741_v15 = vld [vmem:[#allocation8 + $0x378] sm:$0xff] }
 0xef3   :  { %11081 = vmatprep.subr.bf16.mxu0 %v11080_v16  ;;  %11113 = vmatprep.subr.bf16.mxu1 %v11112_v36  ;;  %v11124_v45 = vpack.c.bf16 %v4741_v15, %v4737_v51  ;;  %v4743_v16 = vld [vmem:[#allocation8 + $0x388] sm:$0xff]  ;;  %v4749_v36 = vld [vmem:[#allocation8 + $0x3b8] sm:$0xff] }
 0xef4   :  { %v11128_v22 = vpack.c.bf16 %v4749_v36, %v4745_v2 }
 0xef6   :  { %11083 = vmatpush1.bf16.msra.mxu0 %v11082_v20  ;;  %11115 = vmatpush1.bf16.msra.mxu1 %v11114_v53  ;;  %v11096_v20 = vpack.c.bf16 %v4747_v26, %v4743_v16  ;;  %v4746_v53 = vld [vmem:[#allocation8 + $0x3a0] sm:$0xff] }
 0xef7   :  { %11085 = vmatprep.subr.bf16.mxu0 %v11084_v50  ;;  %11117 = vmatprep.subr.bf16.mxu1 %v11116_v35  ;;  %v11098_v5 = vpack.c.bf16 %v4746_v53, %v4742_v37  ;;  %v4751_v50 = vld [vmem:[#allocation8 + $0x3c8] sm:$0xff]  ;;  %v4753_v35 = vld [vmem:[#allocation8 + $0x3d8] sm:$0xff]  ;;  %v4625_v37 = vld [vmem:[#allocation8 + $0x20] sm:$0xff] }
 0xef8   :  { %v11100_v7 = vpack.c.bf16 %v4755_v4, %v4751_v50  ;;  %v4623_v53 = vld [vmem:[#allocation8 + $0x10] sm:$0xff]  ;;  %v4634_v50 = vld [vmem:[#allocation8 + $0x68] sm:$0xff]  ;;  %v4632_v4 = vld [vmem:[#allocation8 + $0x58] sm:$0xff] }
 0xefa   :  { %11087 = vmatpush1.bf16.msra.mxu0 %v11086_v0  ;;  %11119 = vmatpush1.bf16.msra.mxu1 %v11118_v34  ;;  %v4757_v0 = vld [vmem:[#allocation8 + $0x3f8] sm:$0xff]  ;;  %v4754_v34 = vld [vmem:[#allocation8 + $0x3e0] sm:$0xff] }
 0xefb   :  { %11089 = vmatprep.subr.bf16.mxu0 %v11088_v13  ;;  %11121 = vmatprep.subr.bf16.mxu1 %v11120_v42  ;;  %v11132_v54 = vpack.c.bf16 %v4757_v0, %v4753_v35  ;;  %v11102_v43 = vpack.c.bf16 %v4754_v34, %v4750_v52  ;;  %v11134_v13 = vpack.c.bf16 %v4756_v55, %v4752_v33  ;;  %v4629_v52 = vld [vmem:[#allocation8 + $0x40] sm:$0xff]  ;;  %v4635_v33 = vld [vmem:[#allocation8 + $0x70] sm:$0xff] }
 0xefc   :  { %v11136_v42 = vpack.c.bf16 %v4626_v63, %v4622_v24  ;;  %v11170_v0 = vpack.c.bf16 %v4627_v28, %v4623_v53  ;;  %v4633_v34 = vld [vmem:[#allocation8 + $0x60] sm:$0xff]  ;;  %v4642_v24 = vld [vmem:[#allocation8 + $0xa8] sm:$0xff]  ;;  %v4640_v63 = vld [vmem:[#allocation8 + $0x98] sm:$0xff] }
 0xefd   :  { %v4655_v53 = vld [vmem:[#allocation8 + $0x110] sm:$0xff] }
 0xefe   :  { %11091 = vmatpush1.bf16.msra.mxu0 %v11090_v38  ;;  %11123 = vmatpush1.bf16.msra.mxu1 %v11122_v58  ;;  %v4628_v38 = vld [vmem:[#allocation8 + $0x38] sm:$0xff]  ;;  %v4659_v28 = vld [vmem:[#allocation8 + $0x130] sm:$0xff] }
 0xeff   :  { %11093 = vmatprep.subr.bf16.mxu0 %v11092_v17  ;;  %11125 = vmatprep.subr.bf16.mxu1 %v11124_v45  ;;  %v11168_v29 = vpack.c.bf16 %v4628_v38, %v4624_v30  ;;  %v4644_v30 = vld [vmem:[#allocation8 + $0xb8] sm:$0xff] }
 0xf02   :  { %11095 = vmatpush1.bf16.msra.mxu0 %v11094_v56  ;;  %11127 = vmatpush1.bf16.msra.mxu1 %v11126_v59 }
 0xf03   :  { %11097 = vmatprep.subr.bf16.mxu0 %v11096_v20  ;;  %11129 = vmatprep.subr.bf16.mxu1 %v11128_v22 }
 0xf06   :  { %11099 = vmatpush1.bf16.msra.mxu0 %v11098_v5  ;;  %11131 = vmatpush1.bf16.msra.mxu1 %v11130_v47  ;;  %v4630_v5 = vld [vmem:[#allocation8 + $0x48] sm:$0xff]  ;;  %v4636_v47 = vld [vmem:[#allocation8 + $0x78] sm:$0xff] }
 0xf07   :  { %11101 = vmatprep.subr.bf16.mxu0 %v11100_v7  ;;  %11133 = vmatprep.subr.bf16.mxu1 %v11132_v54  ;;  %v11140_v55 = vpack.c.bf16 %v4634_v50, %v4630_v5  ;;  %v4662_v50 = vld [vmem:[#allocation8 + $0x148] sm:$0xff] }
 0xf0a   :  { %11103 = vmatpush1.bf16.msra.mxu0 %v11102_v43  ;;  %11135 = vmatpush1.bf16.msra.mxu1 %v11134_v13  ;;  %v11172_v43 = vpack.c.bf16 %v4636_v47, %v4632_v4  ;;  %v4638_v13 = vld [vmem:[#allocation8 + $0x88] sm:$0xff]  ;;  %v4664_v47 = vld [vmem:[#allocation8 + $0x158] sm:$0xff] }
 0xf0b   :  { %11137 = vmatprep.subr.bf16.mxu0 %v11136_v42  ;;  %11169 = vmatprep.subr.bf16.mxu1 %v11168_v29  ;;  %v11142_v42 = vpack.c.bf16 %v4633_v34, %v4629_v52  ;;  %v4637_v29 = vld [vmem:[#allocation8 + $0x80] sm:$0xff]  ;;  %v4666_v4 = vld [vmem:[#allocation8 + $0x168] sm:$0xff] }
 0xf0c   :  { %v4661_v52 = vld [vmem:[#allocation8 + $0x140] sm:$0xff] }
 0xf0d   :  { %v4665_v34 = vld [vmem:[#allocation8 + $0x160] sm:$0xff] }
 0xfbf   :  { %v4508_v3 = vpop.f32.mrb[16].mxu0  ;;  %v4579_v58 = vpop.f32.mrb[16].mxu1 }
 0xfc0   :  { %v12384_v18 = vadd.f32 %v4508_v3, %v14133_v41  ;;  %v4510_v11 = vpop.f32.mrb[17].mxu0  ;;  %v4581_v51 = vpop.f32.mrb[17].mxu1  ;;  %v12400_v56 = vadd.f32 %v4579_v58, %v14145_v49  ;;  %v4621_v49 = vld [vmem:[#allocation8] sm:$0xff]  ;;  %v4639_v58 = vld [vmem:[#allocation8 + $0x90] sm:$0xff] }
 0xfc1   :  { %v12385_v17 = vadd.f32 %v4510_v11, %v14136_v57  ;;  %v12401_v27 = vadd.f32 %v4581_v51, %v14141_v9  ;;  %v11138_v35 = vpack.c.bf16 %v4625_v37, %v4621_v49  ;;  %v4641_v3 = vld [vmem:[#allocation8 + $0xa0] sm:$0xff]  ;;  %v11144_v11 = vpack.c.bf16 %v4642_v24, %v4638_v13  ;;  %v4670_v13 = vld [vmem:[#allocation8 + $0x188] sm:$0xff] }
 0xfc2   :  { %v9860_v15 = vmul.f32 -1.442695, %v12384_v18  ;;  %v4643_v18 = vld [vmem:[#allocation8 + $0xb0] sm:$0xff]  ;;  %v11176_v51 = vpack.c.bf16 %v4644_v30, %v4640_v63  ;;  %v4653_v49 = vld [vmem:[#allocation8 + $0x100] sm:$0xff]  ;;  %v4674_v24 = vld [vmem:[#allocation8 + $0x1a8] sm:$0xff] }
 0xfc3   :  { %v9861_v8 = vmul.f32 -1.442695, %v12385_v17  ;;  %v9862_v45 = vmul.f32 -1.442695, %v12401_v27  ;;  %v4646_v17 = vld [vmem:[#allocation8 + $0xc8] sm:$0xff]  ;;  %v4652_v27 = vld [vmem:[#allocation8 + $0xf8] sm:$0xff] }
 0xfc4   :  { %12919 = vpow2.f32 %v9860_v15  ;;  %v4650_v15 = vld [vmem:[#allocation8 + $0xe8] sm:$0xff]  ;;  %v4657_v37 = vld [vmem:[#allocation8 + $0x120] sm:$0xff]  ;;  %v4672_v63 = vld [vmem:[#allocation8 + $0x198] sm:$0xff] }
 0xfc5   :  { %12921 = vpow2.f32 %v9861_v8  ;;  %v4648_v8 = vld [vmem:[#allocation8 + $0xd8] sm:$0xff] }
 0xfc6   :  { %12923 = vpow2.f32 %v9862_v45  ;;  %v11146_v45 = vpack.c.bf16 %v4641_v3, %v4637_v29  ;;  %v4676_v30 = vld [vmem:[#allocation8 + $0x1b8] sm:$0xff]  ;;  %v4669_v29 = vld [vmem:[#allocation8 + $0x180] sm:$0xff] }
 0xfc7   :  { %12925 = vtanh.f32 %v12400_v56  ;;  %v11178_v56 = vpack.c.bf16 %v4643_v18, %v4639_v58  ;;  %v4673_v3 = vld [vmem:[#allocation8 + $0x1a0] sm:$0xff]  ;;  %v4671_v58 = vld [vmem:[#allocation8 + $0x190] sm:$0xff] }
 0xfc8   :  { %v4675_v18 = vld [vmem:[#allocation8 + $0x1b0] sm:$0xff] }
 0xfce   :  { %v12920_v62 = vpop.eup %12919 }
 0xfcf   :  { %v12922_v32 = vpop.eup %12921  ;;  %v4591_v16 = vadd.f32 1.0, %v12920_v62  ;;  %v4645_v62 = vld [vmem:[#allocation8 + $0xc0] sm:$0xff] }
 0xfd0   :  { %v4597_v59 = vadd.f32 1.0, %v12922_v32  ;;  %v12924_v41 = vpop.eup %12923  ;;  %v4649_v32 = vld [vmem:[#allocation8 + $0xe0] sm:$0xff] }
 0xfd1   :  { %12927 = vrcp.f32 %v4591_v16  ;;  %v12926_v26 = vpop.eup %12925  ;;  %v4604_v20 = vadd.f32 1.0, %v12924_v41  ;;  %v4647_v16 = vld [vmem:[#allocation8 + $0xd0] sm:$0xff]  ;;  %v11148_v41 = vpack.c.bf16 %v4650_v15, %v4646_v17  ;;  %v4678_v17 = vld [vmem:[#allocation8 + $0x1c8] sm:$0xff] }
 0xfd2   :  { %12929 = vrcp.f32 %v4597_v59  ;;  %v4651_v59 = vld [vmem:[#allocation8 + $0xf0] sm:$0xff]  ;;  %v4682_v15 = vld [vmem:[#allocation8 + $0x1e8] sm:$0xff] }
 0xfd3   :  { %12931 = vrcp.f32 %v4604_v20  ;;  %v4660_v20 = vld [vmem:[#allocation8 + $0x138] sm:$0xff] }
 0xfdb   :  { %v12928_v57 = vpop.eup %12927 }
 0xfdc   :  { %v12930_v2 = vpop.eup %12929  ;;  %v4608_v36 = vmul.f32 %v12928_v57, %v12926_v26  ;;  %v11180_v26 = vpack.c.bf16 %v4652_v27, %v4648_v8  ;;  %v4654_v57 = vld [vmem:[#allocation8 + $0x108] sm:$0xff]  ;;  %v4680_v8 = vld [vmem:[#allocation8 + $0x1d8] sm:$0xff] }
 0xfdd   :  { %v4607_v22 = vmul.f32 %v12930_v2, %v14469_v40  ;;  %v12932_v25 = vpop.eup %12931  ;;  %v4631_v40 = vld [vmem:[#allocation8 + $0x50] sm:$0xff]  ;;  %v4658_v2 = vld [vmem:[#allocation8 + $0x128] sm:$0xff]  ;;  %v4684_v27 = vld [vmem:[#allocation8 + $0x1f8] sm:$0xff] }
 0xfde   :  { %v11174_v38 = vpack.c.bf16 %v4635_v33, %v4631_v40  ;;  %v11152_v5 = vpack.c.bf16 %v4658_v2, %v4654_v57  ;;  %v4663_v40 = vld [vmem:[#allocation8 + $0x150] sm:$0xff]  ;;  %v5301_v57 = vld [vmem:[#allocation9 + $0x8] sm:$0xff] }
 0xfdf   :  { %v4609_v9 = vadd.f32 %v4608_v36, %v4607_v22  ;;  %v4656_v36 = vld [vmem:[#allocation8 + $0x118] sm:$0xff]  ;;  %v11150_v22 = vpack.c.bf16 %v4649_v32, %v4645_v62  ;;  %v4667_v33 = vld [vmem:[#allocation8 + $0x170] sm:$0xff]  ;;  %v4677_v62 = vld [vmem:[#allocation8 + $0x1c0] sm:$0xff] }
 0xfe0   :  { %v4681_v32 = vld [vmem:[#allocation8 + $0x1e0] sm:$0xff]  ;;  %v5305_v2 = vld [vmem:[#allocation9 + $0x28] sm:$0xff] }
 0xfe1   :  { %12933 = vtanh.f32 %v4609_v9  ;;  %v11182_v9 = vpack.c.bf16 %v4651_v59, %v4647_v16  ;;  %v4679_v16 = vld [vmem:[#allocation8 + $0x1d0] sm:$0xff] }
 0xfe2   :  { %v4683_v59 = vld [vmem:[#allocation8 + $0x1f0] sm:$0xff] }
 0xfeb   :  { %v12934_v7 = vpop.eup %12933 }
 0xfec   :  { %v14483_v54 = vmul.f32 %v12934_v7, %v12932_v25  ;;  %v11184_v25 = vpack.c.bf16 %v4660_v20, %v4656_v36  ;;  %v4668_v7 = vld [vmem:[#allocation8 + $0x178] sm:$0xff] }
 0xfed   :  { %v5303_v36 = vld [vmem:[#allocation9 + $0x18] sm:$0xff] }
 0xfee   :  { %4823 = vmatmul.mubr.f32.vlgmr.msra.gmra.mrb[32].mxu0 %v14483_v54  ;;  %4936 = vmatmul.mubr.f32.vlgmr.msra.gmra.mrb[32].mxu1 %v14483_v54  ;;  %v5307_v20 = vld [vmem:[#allocation9 + $0x38] sm:$0xff] }
 0xfef   :  { %11139 = vmatpush1.bf16.msra.mxu0 %v11138_v35  ;;  %11171 = vmatpush1.bf16.msra.mxu1 %v11170_v0  ;;  %v11154_v35 = vpack.c.bf16 %v4657_v37, %v4653_v49  ;;  %v11186_v0 = vpack.c.bf16 %v4659_v28, %v4655_v53  ;;  %v5300_v49 = vld [vmem:[#allocation9] sm:$0xff]  ;;  %v5302_v53 = vld [vmem:[#allocation9 + $0x10] sm:$0xff] }
 0xff0   :  { %4828 = vmatprep.mubr.f32.mxu0 %v15629_v31  ;;  %4941 = vmatprep.mubr.f32.mxu1 %v15629_v31  ;;  %v5304_v37 = vld [vmem:[#allocation9 + $0x20] sm:$0xff]  ;;  %v5306_v28 = vld [vmem:[#allocation9 + $0x30] sm:$0xff] }
 0xff1   :  { %11141 = vmatprep.subr.bf16.mxu0 %v11140_v55  ;;  %11173 = vmatprep.subr.bf16.mxu1 %v11172_v43  ;;  %v11156_v55 = vpack.c.bf16 %v4666_v4, %v4662_v50  ;;  %v11188_v43 = vpack.c.bf16 %v4668_v7, %v4664_v47  ;;  %v5309_v50 = vld [vmem:[#allocation9 + $0x48] sm:$0xff]  ;;  %v5311_v47 = vld [vmem:[#allocation9 + $0x58] sm:$0xff] }
 0xff2   :  { %4829 = vmatmul.mubr.f32.gmra.mrb[34].mxu0 %v14472_v48  ;;  %4942 = vmatmul.mubr.f32.gmra.mrb[34].mxu1 %v14472_v48  ;;  %v5313_v4 = vld [vmem:[#allocation9 + $0x68] sm:$0xff]  ;;  %v5315_v7 = vld [vmem:[#allocation9 + $0x78] sm:$0xff] }
 0xff3   :  { %11143 = vmatpush1.bf16.msra.mxu0 %v11142_v42  ;;  %11175 = vmatpush1.bf16.msra.mxu1 %v11174_v38  ;;  %v11158_v42 = vpack.c.bf16 %v4665_v34, %v4661_v52  ;;  %v11190_v38 = vpack.c.bf16 %v4667_v33, %v4663_v40  ;;  %v5308_v52 = vld [vmem:[#allocation9 + $0x40] sm:$0xff]  ;;  %v5310_v40 = vld [vmem:[#allocation9 + $0x50] sm:$0xff] }
 0xff4   :  { %4834 = vmatprep.mubr.f32.mxu0 %v15629_v31  ;;  %4947 = vmatprep.mubr.f32.mxu1 %v15629_v31  ;;  %v5312_v34 = vld [vmem:[#allocation9 + $0x60] sm:$0xff]  ;;  %v5314_v33 = vld [vmem:[#allocation9 + $0x70] sm:$0xff] }
 0xff5   :  { %11145 = vmatprep.subr.bf16.mxu0 %v11144_v11  ;;  %11177 = vmatprep.subr.bf16.mxu1 %v11176_v51  ;;  %v11160_v11 = vpack.c.bf16 %v4674_v24, %v4670_v13  ;;  %v11192_v51 = vpack.c.bf16 %v4676_v30, %v4672_v63  ;;  %v5317_v13 = vld [vmem:[#allocation9 + $0x88] sm:$0xff]  ;;  %v5319_v63 = vld [vmem:[#allocation9 + $0x98] sm:$0xff] }
 0xff6   :  { %4835 = vmatmul.mubr.f32.gmra.mrb[36].mxu0 %v14444_v19  ;;  %4948 = vmatmul.mubr.f32.gmra.mrb[36].mxu1 %v14444_v19  ;;  %v5321_v24 = vld [vmem:[#allocation9 + $0xa8] sm:$0xff]  ;;  %v5323_v30 = vld [vmem:[#allocation9 + $0xb8] sm:$0xff] }
 0xff7   :  { %11147 = vmatpush1.bf16.msra.mxu0 %v11146_v45  ;;  %11179 = vmatpush1.bf16.msra.mxu1 %v11178_v56  ;;  %v11162_v45 = vpack.c.bf16 %v4673_v3, %v4669_v29  ;;  %v11194_v56 = vpack.c.bf16 %v4675_v18, %v4671_v58  ;;  %v5316_v29 = vld [vmem:[#allocation9 + $0x80] sm:$0xff]  ;;  %v5318_v58 = vld [vmem:[#allocation9 + $0x90] sm:$0xff] }
 0xff8   :  { %4840 = vmatprep.mubr.f32.mxu0 %v15629_v31  ;;  %4953 = vmatprep.mubr.f32.mxu1 %v15629_v31  ;;  %v5320_v3 = vld [vmem:[#allocation9 + $0xa0] sm:$0xff]  ;;  %v5322_v18 = vld [vmem:[#allocation9 + $0xb0] sm:$0xff] }
 0xff9   :  { %11149 = vmatprep.subr.bf16.mxu0 %v11148_v41  ;;  %11181 = vmatprep.subr.bf16.mxu1 %v11180_v26  ;;  %v11164_v41 = vpack.c.bf16 %v4682_v15, %v4678_v17  ;;  %v11196_v26 = vpack.c.bf16 %v4684_v27, %v4680_v8  ;;  %v5325_v17 = vld [vmem:[#allocation9 + $0xc8] sm:$0xff]  ;;  %v5327_v8 = vld [vmem:[#allocation9 + $0xd8] sm:$0xff] }
 0xffa   :  { %4841 = vmatmul.mubr.f32.gmra.mrb[38].mxu0 %v14399_v10  ;;  %4954 = vmatmul.mubr.f32.gmra.mrb[38].mxu1 %v14399_v10  ;;  %v5329_v15 = vld [vmem:[#allocation9 + $0xe8] sm:$0xff]  ;;  %v5331_v27 = vld [vmem:[#allocation9 + $0xf8] sm:$0xff] }
 0xffb   :  { %11151 = vmatpush1.bf16.msra.mxu0 %v11150_v22  ;;  %11183 = vmatpush1.bf16.msra.mxu1 %v11182_v9  ;;  %v11166_v22 = vpack.c.bf16 %v4681_v32, %v4677_v62  ;;  %v11198_v9 = vpack.c.bf16 %v4683_v59, %v4679_v16  ;;  %v5324_v62 = vld [vmem:[#allocation9 + $0xc0] sm:$0xff]  ;;  %v5326_v16 = vld [vmem:[#allocation9 + $0xd0] sm:$0xff] }
 0xffc   :  { %4846 = vmatprep.mubr.f32.mxu0 %v15629_v31  ;;  %4959 = vmatprep.mubr.f32.mxu1 %v15629_v31  ;;  %v5328_v32 = vld [vmem:[#allocation9 + $0xe0] sm:$0xff]  ;;  %v5330_v59 = vld [vmem:[#allocation9 + $0xf0] sm:$0xff] }
 0xffd   :  { %11153 = vmatprep.subr.bf16.mxu0 %v11152_v5  ;;  %11185 = vmatprep.subr.bf16.mxu1 %v11184_v25  ;;  %v14513_v5 = vpack.c.bf16 %v5305_v2, %v5301_v57  ;;  %v14515_v25 = vpack.c.bf16 %v5307_v20, %v5303_v36  ;;  %v5333_v57 = vld [vmem:[#allocation9 + $0x108] sm:$0xff]  ;;  %v5335_v36 = vld [vmem:[#allocation9 + $0x118] sm:$0xff] }
 0xffe   :  { %4847 = vmatmul.mubr.f32.gmra.mrb[40].mxu0 %v14353_v6  ;;  %4960 = vmatmul.mubr.f32.gmra.mrb[40].mxu1 %v14353_v6  ;;  %v5337_v2 = vld [vmem:[#allocation9 + $0x128] sm:$0xff]  ;;  %v5339_v20 = vld [vmem:[#allocation9 + $0x138] sm:$0xff] }
 0xfff   :  { %11155 = vmatpush1.bf16.msra.mxu0 %v11154_v35  ;;  %11187 = vmatpush1.bf16.msra.mxu1 %v11186_v0  ;;  %v14519_v35 = vpack.c.bf16 %v5304_v37, %v5300_v49  ;;  %v14521_v0 = vpack.c.bf16 %v5306_v28, %v5302_v53  ;;  %v5332_v49 = vld [vmem:[#allocation9 + $0x100] sm:$0xff]  ;;  %v5334_v53 = vld [vmem:[#allocation9 + $0x110] sm:$0xff] }
0x1000   :  { %4852 = vmatprep.mubr.f32.mxu0 %v15629_v31  ;;  %4965 = vmatprep.mubr.f32.mxu1 %v15629_v31  ;;  %v5336_v37 = vld [vmem:[#allocation9 + $0x120] sm:$0xff]  ;;  %v5338_v28 = vld [vmem:[#allocation9 + $0x130] sm:$0xff] }
0x1001   :  { %11157 = vmatprep.subr.bf16.mxu0 %v11156_v55  ;;  %11189 = vmatprep.subr.bf16.mxu1 %v11188_v43  ;;  %v14527_v55 = vpack.c.bf16 %v5313_v4, %v5309_v50  ;;  %v14529_v43 = vpack.c.bf16 %v5315_v7, %v5311_v47  ;;  %v14575_v50 = vpack.c.bf16 %v5337_v2, %v5333_v57  ;;  %v5341_v47 = vld [vmem:[#allocation9 + $0x148] sm:$0xff] }
0x1002   :  { %4853 = vmatmul.mubr.f32.gmra.mrb[42].mxu0 %v14276_v1  ;;  %4966 = vmatmul.mubr.f32.gmra.mrb[42].mxu1 %v14276_v1  ;;  %v14577_v4 = vpack.c.bf16 %v5339_v20, %v5335_v36  ;;  %v5345_v7 = vld [vmem:[#allocation9 + $0x168] sm:$0xff] }
0x1003   :  { %11159 = vmatpush1.bf16.msra.mxu0 %v11158_v42  ;;  %11191 = vmatpush1.bf16.msra.mxu1 %v11190_v38  ;;  %v14535_v42 = vpack.c.bf16 %v5312_v34, %v5308_v52  ;;  %v14537_v38 = vpack.c.bf16 %v5314_v33, %v5310_v40  ;;  %v5343_v52 = vld [vmem:[#allocation9 + $0x158] sm:$0xff]  ;;  %v14583_v40 = vpack.c.bf16 %v5336_v37, %v5332_v49  ;;  %v5357_v36 = vld [vmem:[#allocation9 + $0x1c8] sm:$0xff] }
0x1004   :  { %4858 = vmatprep.mubr.f32.mxu0 %v15629_v31  ;;  %4971 = vmatprep.mubr.f32.mxu1 %v15629_v31  ;;  %v5347_v34 = vld [vmem:[#allocation9 + $0x178] sm:$0xff]  ;;  %v14585_v33 = vpack.c.bf16 %v5338_v28, %v5334_v53  ;;  %v5361_v20 = vld [vmem:[#allocation9 + $0x1e8] sm:$0xff] }
0x1005   :  { %11161 = vmatprep.subr.bf16.mxu0 %v11160_v11  ;;  %11193 = vmatprep.subr.bf16.mxu1 %v11192_v51  ;;  %v14543_v11 = vpack.c.bf16 %v5321_v24, %v5317_v13  ;;  %v14545_v51 = vpack.c.bf16 %v5323_v30, %v5319_v63  ;;  %v5340_v13 = vld [vmem:[#allocation9 + $0x140] sm:$0xff]  ;;  %v5342_v63 = vld [vmem:[#allocation9 + $0x150] sm:$0xff]  ;;  %v5359_v49 = vld [vmem:[#allocation9 + $0x1d8] sm:$0xff] }
0x1006   :  { %4859 = vmatmul.mubr.f32.gmra.mrb[44].mxu0 %v14196_v44  ;;  %4972 = vmatmul.mubr.f32.gmra.mrb[44].mxu1 %v14196_v44  ;;  %v5344_v24 = vld [vmem:[#allocation9 + $0x160] sm:$0xff]  ;;  %v5346_v30 = vld [vmem:[#allocation9 + $0x170] sm:$0xff]  ;;  %v5363_v37 = vld [vmem:[#allocation9 + $0x1f8] sm:$0xff] }
0x1007   :  { %11163 = vmatpush1.bf16.msra.mxu0 %v11162_v45  ;;  %11195 = vmatpush1.bf16.msra.mxu1 %v11194_v56  ;;  %v14551_v45 = vpack.c.bf16 %v5320_v3, %v5316_v29  ;;  %v14553_v56 = vpack.c.bf16 %v5322_v18, %v5318_v58  ;;  %v14591_v29 = vpack.c.bf16 %v5345_v7, %v5341_v47  ;;  %v5349_v58 = vld [vmem:[#allocation9 + $0x188] sm:$0xff]  ;;  %v5356_v47 = vld [vmem:[#allocation9 + $0x1c0] sm:$0xff] }
0x1008   :  { %4864 = vmatprep.mubr.f32.mxu0 %v15629_v31  ;;  %4977 = vmatprep.mubr.f32.mxu1 %v15629_v31  ;;  %v14593_v3 = vpack.c.bf16 %v5347_v34, %v5343_v52  ;;  %v5353_v18 = vld [vmem:[#allocation9 + $0x1a8] sm:$0xff]  ;;  %v5360_v7 = vld [vmem:[#allocation9 + $0x1e0] sm:$0xff]  ;;  %v5358_v52 = vld [vmem:[#allocation9 + $0x1d0] sm:$0xff] }
0x1009   :  { %11165 = vmatprep.subr.bf16.mxu0 %v11164_v41  ;;  %11197 = vmatprep.subr.bf16.mxu1 %v11196_v26  ;;  %v14559_v41 = vpack.c.bf16 %v5329_v15, %v5325_v17  ;;  %v14561_v26 = vpack.c.bf16 %v5331_v27, %v5327_v8  ;;  %v5351_v17 = vld [vmem:[#allocation9 + $0x198] sm:$0xff]  ;;  %v14599_v8 = vpack.c.bf16 %v5344_v24, %v5340_v13  ;;  %v5362_v34 = vld [vmem:[#allocation9 + $0x1f0] sm:$0xff] }
0x100a   :  { %4865 = vmatmul.mubr.f32.gmra.mrb[46].mxu0 %v14151_v14  ;;  %4978 = vmatmul.mubr.f32.gmra.mrb[46].mxu1 %v14151_v14  ;;  %v5355_v15 = vld [vmem:[#allocation9 + $0x1b8] sm:$0xff]  ;;  %v14601_v27 = vpack.c.bf16 %v5346_v30, %v5342_v63  ;;  %v14607_v57 = vpack.c.bf16 %v5353_v18, %v5349_v58  ;;  %v14623_v13 = vpack.c.bf16 %v5361_v20, %v5357_v36  ;;  %v15630_v58 = vld [vmem:[#allocation23_spill] sm:$0xff]  ;;  %v5210_v18 = vld [vmem:[%s15595_s6] sm:$0xf] }
0x100b   :  { %11167 = vmatpush1.bf16.msra.mxu0 %v11166_v22  ;;  %11199 = vmatpush1.bf16.msra.mxu1 %v11198_v9  ;;  %v14567_v22 = vpack.c.bf16 %v5328_v32, %v5324_v62  ;;  %v14569_v9 = vpack.c.bf16 %v5330_v59, %v5326_v16  ;;  %v5348_v62 = vld [vmem:[#allocation9 + $0x180] sm:$0xff]  ;;  %v5350_v16 = vld [vmem:[#allocation9 + $0x190] sm:$0xff]  ;;  %v14609_v2 = vpack.c.bf16 %v5355_v15, %v5351_v17 }
0x100c   :  { %5048 = vmatprep.mubr.f32.mxu0 %v15629_v31  ;;  %5161 = vmatprep.mubr.f32.mxu1 %v15629_v31  ;;  %v5352_v32 = vld [vmem:[#allocation9 + $0x1a0] sm:$0xff]  ;;  %v5354_v59 = vld [vmem:[#allocation9 + $0x1b0] sm:$0xff]  ;;  %v14625_v24 = vpack.c.bf16 %v5363_v37, %v5359_v49  ;;  %v14631_v63 = vpack.c.bf16 %v5360_v7, %v5356_v47  ;;  %v14633_v30 = vpack.c.bf16 %v5362_v34, %v5358_v52 }
0x100d   :  { %11201 = vmatprep.subr.bf16.mxu0 %v14513_v5  ;;  %11233 = vmatprep.subr.bf16.mxu1 %v14515_v25  ;;  %v14615_v53 = vpack.c.bf16 %v5352_v32, %v5348_v62  ;;  %v14617_v28 = vpack.c.bf16 %v5354_v59, %v5350_v16  ;;  %v15631_v17 = vld [vmem:[#allocation14_spill] sm:$0xff]  ;;  %v15632_v62 = vld [vmem:[#allocation15_spill] sm:$0xff]  ;;  %v15633_v52 = vld [vmem:[#allocation16_spill] sm:$0xff] }
0x100e   :  { %5049 = vmatmul.mubr.f32.vlgmr.msra.gmra.mrb[32].mxu0 %v13612_v39  ;;  %5162 = vmatmul.mubr.f32.vlgmr.msra.gmra.mrb[32].mxu1 %v13612_v39  ;;  %v14687_v15 = vrot.slane %v5210_v18, %v15631_v17  ;;  %v14690_v32 = vrot.slane %v5210_v18, %v15632_v62  ;;  %v14695_v34 = vrot.slane %v5210_v18, %v15633_v52 }
0x100f   :  { %11203 = vmatpush1.bf16.msra.mxu0 %v14519_v35  ;;  %11235 = vmatpush1.bf16.msra.mxu1 %v14521_v0 }
0x1010   :  { %5054 = vmatprep.mubr.f32.mxu0 %v15629_v31  ;;  %5167 = vmatprep.mubr.f32.mxu1 %v15629_v31 }
0x1011   :  { %11205 = vmatprep.subr.bf16.mxu0 %v14527_v55  ;;  %11237 = vmatprep.subr.bf16.mxu1 %v14529_v43 }
0x1012   :  { %5055 = vmatmul.mubr.f32.gmra.mrb[34].mxu0 %v13656_v21  ;;  %5168 = vmatmul.mubr.f32.gmra.mrb[34].mxu1 %v13656_v21 }
0x1013   :  { %11207 = vmatpush1.bf16.msra.mxu0 %v14535_v42  ;;  %11239 = vmatpush1.bf16.msra.mxu1 %v14537_v38 }
0x1014   :  { %5060 = vmatprep.mubr.f32.mxu0 %v15629_v31  ;;  %5173 = vmatprep.mubr.f32.mxu1 %v15629_v31 }
0x1015   :  { %11209 = vmatprep.subr.bf16.mxu0 %v14543_v11  ;;  %11241 = vmatprep.subr.bf16.mxu1 %v14545_v51 }
0x1016   :  { %5061 = vmatmul.mubr.f32.gmra.mrb[36].mxu0 %v13720_v12  ;;  %5174 = vmatmul.mubr.f32.gmra.mrb[36].mxu1 %v13720_v12 }
0x1017   :  { %11211 = vmatpush1.bf16.msra.mxu0 %v14551_v45  ;;  %11243 = vmatpush1.bf16.msra.mxu1 %v14553_v56 }
0x1018   :  { %5066 = vmatprep.mubr.f32.mxu0 %v15629_v31  ;;  %5179 = vmatprep.mubr.f32.mxu1 %v15629_v31 }
0x1019   :  { %11213 = vmatprep.subr.bf16.mxu0 %v14559_v41  ;;  %11245 = vmatprep.subr.bf16.mxu1 %v14561_v26 }
0x101a   :  { %5067 = vmatmul.mubr.f32.gmra.mrb[38].mxu0 %v13814_v46  ;;  %5180 = vmatmul.mubr.f32.gmra.mrb[38].mxu1 %v13814_v46 }
0x101b   :  { %11215 = vmatpush1.bf16.msra.mxu0 %v14567_v22  ;;  %11247 = vmatpush1.bf16.msra.mxu1 %v14569_v9 }
0x101c   :  { %5072 = vmatprep.mubr.f32.mxu0 %v15629_v31  ;;  %5185 = vmatprep.mubr.f32.mxu1 %v15629_v31 }
0x101d   :  { %11217 = vmatprep.subr.bf16.mxu0 %v14575_v50  ;;  %11249 = vmatprep.subr.bf16.mxu1 %v14577_v4 }
0x101e   :  { %5073 = vmatmul.mubr.f32.gmra.mrb[40].mxu0 %v13860_v23  ;;  %5186 = vmatmul.mubr.f32.gmra.mrb[40].mxu1 %v13860_v23 }
0x101f   :  { %11219 = vmatpush1.bf16.msra.mxu0 %v14583_v40  ;;  %11251 = vmatpush1.bf16.msra.mxu1 %v14585_v33 }
0x1020   :  { %5078 = vmatprep.mubr.f32.mxu0 %v15629_v31  ;;  %5191 = vmatprep.mubr.f32.mxu1 %v15629_v31 }
0x1021   :  { %11221 = vmatprep.subr.bf16.mxu0 %v14591_v29  ;;  %11253 = vmatprep.subr.bf16.mxu1 %v14593_v3 }
0x1022   :  { %5079 = vmatmul.mubr.f32.gmra.mrb[42].mxu0 %v13904_v60  ;;  %5192 = vmatmul.mubr.f32.gmra.mrb[42].mxu1 %v13904_v60 }
0x1023   :  { %11223 = vmatpush1.bf16.msra.mxu0 %v14599_v8  ;;  %11255 = vmatpush1.bf16.msra.mxu1 %v14601_v27 }
0x1024   :  { %5084 = vmatprep.mubr.f32.mxu0 %v15629_v31  ;;  %5197 = vmatprep.mubr.f32.mxu1 %v15629_v31 }
0x1025   :  { %11225 = vmatprep.subr.bf16.mxu0 %v14607_v57  ;;  %11257 = vmatprep.subr.bf16.mxu1 %v14609_v2 }
0x1026   :  { %5085 = vmatmul.mubr.f32.gmra.mrb[44].mxu0 %v13942_v61  ;;  %5198 = vmatmul.mubr.f32.gmra.mrb[44].mxu1 %v13942_v61 }
0x1027   :  { %11227 = vmatpush1.bf16.msra.mxu0 %v14615_v53  ;;  %11259 = vmatpush1.bf16.msra.mxu1 %v14617_v28 }
0x1028   :  { %5090 = vmatprep.mubr.f32.mxu0 %v15629_v31  ;;  %5203 = vmatprep.mubr.f32.mxu1 %v15629_v31 }
0x1029   :  { %11229 = vmatprep.subr.bf16.mxu0 %v14623_v13  ;;  %11261 = vmatprep.subr.bf16.mxu1 %v14625_v24 }
0x102a   :  { %5091 = vmatmul.mubr.f32.gmra.mrb[46].mxu0 %v15630_v58  ;;  %5204 = vmatmul.mubr.f32.gmra.mrb[46].mxu1 %v15630_v58  ;;  %v15634_v58 = vld [vmem:[#allocation17_spill] sm:$0xff] }
0x102b   :  { %11231 = vmatpush1.bf16.msra.mxu0 %v14631_v63  ;;  %11263 = vmatpush1.bf16.msra.mxu1 %v14633_v30  ;;  %v14699_v62 = vrot.slane %v5210_v18, %v15634_v58 }
0x102c   :  { %5428 = vmatprep.mubr.f32.mxu0 %v15629_v31  ;;  %5499 = vmatprep.mubr.f32.mxu1 %v15629_v31 }
0x102d   :  { %11265 = vmatprep.subr.bf16.mxu0 %v14513_v5  ;;  %11297 = vmatprep.subr.bf16.mxu1 %v14515_v25 }
0x102e   :  { %5429 = vmatmul.mubr.f32.vlgmr.msra.gmra.mrb[32].mxu0 %v15629_v31  ;;  %5500 = vmatmul.mubr.f32.vlgmr.msra.gmra.mrb[32].mxu1 %v15629_v31 }
0x102f   :  { %11267 = vmatpush1.bf16.msra.mxu0 %v14519_v35  ;;  %11299 = vmatpush1.bf16.msra.mxu1 %v14521_v0 }
0x1030   :  { %11269 = vmatprep.subr.bf16.mxu0 %v14527_v55  ;;  %11301 = vmatprep.subr.bf16.mxu1 %v14529_v43 }
0x1031   :  { %5667 = vmatprep.mubr.f32.mxu0 %v15629_v31  ;;  %5738 = vmatprep.mubr.f32.mxu1 %v15629_v31 }
0x1033   :  { %11271 = vmatpush1.bf16.msra.mxu0 %v14535_v42  ;;  %11303 = vmatpush1.bf16.msra.mxu1 %v14537_v38 }
0x1034   :  { %11273 = vmatprep.subr.bf16.mxu0 %v14543_v11  ;;  %11305 = vmatprep.subr.bf16.mxu1 %v14545_v51 }
0x1037   :  { %11275 = vmatpush1.bf16.msra.mxu0 %v14551_v45  ;;  %11307 = vmatpush1.bf16.msra.mxu1 %v14553_v56 }
0x1038   :  { %11277 = vmatprep.subr.bf16.mxu0 %v14559_v41  ;;  %11309 = vmatprep.subr.bf16.mxu1 %v14561_v26 }
0x103b   :  { %11279 = vmatpush1.bf16.msra.mxu0 %v14567_v22  ;;  %11311 = vmatpush1.bf16.msra.mxu1 %v14569_v9 }
0x103c   :  { %11281 = vmatprep.subr.bf16.mxu0 %v14575_v50  ;;  %11313 = vmatprep.subr.bf16.mxu1 %v14577_v4 }
0x103f   :  { %11283 = vmatpush1.bf16.msra.mxu0 %v14583_v40  ;;  %11315 = vmatpush1.bf16.msra.mxu1 %v14585_v33 }
0x1040   :  { %11285 = vmatprep.subr.bf16.mxu0 %v14591_v29  ;;  %11317 = vmatprep.subr.bf16.mxu1 %v14593_v3 }
0x1043   :  { %11287 = vmatpush1.bf16.msra.mxu0 %v14599_v8  ;;  %11319 = vmatpush1.bf16.msra.mxu1 %v14601_v27 }
0x1044   :  { %11289 = vmatprep.subr.bf16.mxu0 %v14607_v57  ;;  %11321 = vmatprep.subr.bf16.mxu1 %v14609_v2 }
0x1047   :  { %11291 = vmatpush1.bf16.msra.mxu0 %v14615_v53  ;;  %11323 = vmatpush1.bf16.msra.mxu1 %v14617_v28 }
0x1048   :  { %11293 = vmatprep.subr.bf16.mxu0 %v14623_v13  ;;  %11325 = vmatprep.subr.bf16.mxu1 %v14625_v24 }
0x104b   :  { %11295 = vmatpush1.bf16.msra.mxu0 %v14631_v63  ;;  %11327 = vmatpush1.bf16.msra.mxu1 %v14633_v30 }
0x104c   :  { %11329 = vmatprep.subr.bf16.mxu0 %v14513_v5  ;;  %11361 = vmatprep.subr.bf16.mxu1 %v14515_v25 }
0x1101   :  { %v5430_v16 = vpop.f32.mrb[32].mxu0  ;;  %v5501_v59 = vpop.f32.mrb[32].mxu1 }
0x1102   :  { %v12416_v36 = vadd.f32 %v5430_v16, %v14687_v15  ;;  %v5432_v20 = vpop.f32.mrb[33].mxu0  ;;  %v5503_v49 = vpop.f32.mrb[33].mxu1  ;;  %v12432_v60 = vadd.f32 %v5501_v59, %v14699_v62 }
0x1103   :  { %v12417_v37 = vadd.f32 %v5432_v20, %v14690_v32  ;;  %v12433_v17 = vadd.f32 %v5503_v49, %v14695_v34 }
0x1104   :  { %v9863_v47 = vmul.f32 -1.442695, %v12416_v36 }
0x1105   :  { %v9864_v7 = vmul.f32 -1.442695, %v12417_v37  ;;  %v9865_v61 = vmul.f32 -1.442695, %v12433_v17 }
0x1106   :  { %12935 = vpow2.f32 %v9863_v47 }
0x1107   :  { %12937 = vpow2.f32 %v9864_v7 }
0x1108   :  { %12939 = vpow2.f32 %v9865_v61 }
0x1109   :  { %12941 = vtanh.f32 %v12432_v60 }
0x1110   :  { %v12936_v16 = vpop.eup %12935 }
0x1111   :  { %v12938_v23 = vpop.eup %12937  ;;  %v5513_v46 = vadd.f32 1.0, %v12936_v16 }
0x1112   :  { %v5519_v36 = vadd.f32 1.0, %v12938_v23  ;;  %v12940_v20 = vpop.eup %12939 }
0x1113   :  { %12943 = vrcp.f32 %v5513_v46  ;;  %v12942_v37 = vpop.eup %12941  ;;  %v5526_v49 = vadd.f32 1.0, %v12940_v20 }
0x1114   :  { %12945 = vrcp.f32 %v5519_v36 }
0x1115   :  { %12947 = vrcp.f32 %v5526_v49 }
0x111d   :  { %v12944_v47 = vpop.eup %12943 }
0x111e   :  { %v12946_v7 = vpop.eup %12945  ;;  %v5530_v52 = vmul.f32 %v12944_v47, %v12942_v37 }
0x111f   :  { %v5529_v12 = vmul.f32 0.0, %v12946_v7  ;;  %v12948_v17 = vpop.eup %12947 }
0x1121   :  { %v14702_v18 = vadd.f32 %v5530_v52, %v5529_v12 }
0x1123   :  { %12949 = vtanh.f32 %v14702_v18 }
0x112d   :  { %v12950_v59 = vpop.eup %12949 }
0x112e   :  { %v5533_v16 = vmul.f32 %v12950_v59, %v12948_v17 }
0x1130   :  { %5534 = vst [vmem:[%s15596_s7] sm:$0xff] %v5533_v16  ;;  %5668 = vmatmul.mubr.f32.vlgmr.msra.gmra.mrb[34].mxu0 %v5533_v16  ;;  %5739 = vmatmul.mubr.f32.vlgmr.msra.gmra.mrb[34].mxu1 %v5533_v16 }
0x1131   :  { %11331 = vmatpush1.bf16.msra.mxu0 %v14519_v35  ;;  %11363 = vmatpush1.bf16.msra.mxu1 %v14521_v0 }
0x1132   :  { %11333 = vmatprep.subr.bf16.mxu0 %v14527_v55  ;;  %11365 = vmatprep.subr.bf16.mxu1 %v14529_v43 }
0x1133   :  { %5906 = vmatprep.mubr.f32.mxu0 %v15629_v31  ;;  %5977 = vmatprep.mubr.f32.mxu1 %v15629_v31 }
0x1135   :  { %11335 = vmatpush1.bf16.msra.mxu0 %v14535_v42  ;;  %11367 = vmatpush1.bf16.msra.mxu1 %v14537_v38 }
0x1136   :  { %11337 = vmatprep.subr.bf16.mxu0 %v14543_v11  ;;  %11369 = vmatprep.subr.bf16.mxu1 %v14545_v51 }
0x1139   :  { %11339 = vmatpush1.bf16.msra.mxu0 %v14551_v45  ;;  %11371 = vmatpush1.bf16.msra.mxu1 %v14553_v56 }
0x113a   :  { %11341 = vmatprep.subr.bf16.mxu0 %v14559_v41  ;;  %11373 = vmatprep.subr.bf16.mxu1 %v14561_v26 }
0x113d   :  { %11343 = vmatpush1.bf16.msra.mxu0 %v14567_v22  ;;  %11375 = vmatpush1.bf16.msra.mxu1 %v14569_v9 }
0x113e   :  { %11345 = vmatprep.subr.bf16.mxu0 %v14575_v50  ;;  %11377 = vmatprep.subr.bf16.mxu1 %v14577_v4 }
0x1141   :  { %11347 = vmatpush1.bf16.msra.mxu0 %v14583_v40  ;;  %11379 = vmatpush1.bf16.msra.mxu1 %v14585_v33 }
0x1142   :  { %11349 = vmatprep.subr.bf16.mxu0 %v14591_v29  ;;  %11381 = vmatprep.subr.bf16.mxu1 %v14593_v3 }
0x1145   :  { %11351 = vmatpush1.bf16.msra.mxu0 %v14599_v8  ;;  %11383 = vmatpush1.bf16.msra.mxu1 %v14601_v27 }
0x1146   :  { %11353 = vmatprep.subr.bf16.mxu0 %v14607_v57  ;;  %11385 = vmatprep.subr.bf16.mxu1 %v14609_v2 }
0x1149   :  { %11355 = vmatpush1.bf16.msra.mxu0 %v14615_v53  ;;  %11387 = vmatpush1.bf16.msra.mxu1 %v14617_v28 }
0x114a   :  { %11357 = vmatprep.subr.bf16.mxu0 %v14623_v13  ;;  %11389 = vmatprep.subr.bf16.mxu1 %v14625_v24 }
0x114d   :  { %11359 = vmatpush1.bf16.msra.mxu0 %v14631_v63  ;;  %11391 = vmatpush1.bf16.msra.mxu1 %v14633_v30 }
0x114e   :  { %11393 = vmatprep.subr.bf16.mxu0 %v14513_v5  ;;  %11425 = vmatprep.subr.bf16.mxu1 %v14515_v25 }
0x1203   :  { %v5669_v12 = vpop.f32.mrb[34].mxu0  ;;  %v5740_v46 = vpop.f32.mrb[34].mxu1 }
0x1204   :  { %v12418_v23 = vadd.f32 %v5669_v12, %v14687_v15  ;;  %v5671_v60 = vpop.f32.mrb[35].mxu0  ;;  %v5742_v61 = vpop.f32.mrb[35].mxu1  ;;  %v12434_v7 = vadd.f32 %v5740_v46, %v14699_v62 }
0x1205   :  { %v12419_v52 = vadd.f32 %v5671_v60, %v14690_v32  ;;  %v12435_v37 = vadd.f32 %v5742_v61, %v14695_v34 }
0x1206   :  { %v9866_v36 = vmul.f32 -1.442695, %v12418_v23 }
0x1207   :  { %v9867_v20 = vmul.f32 -1.442695, %v12419_v52  ;;  %v9868_v47 = vmul.f32 -1.442695, %v12435_v37 }
0x1208   :  { %12951 = vpow2.f32 %v9866_v36 }
0x1209   :  { %12953 = vpow2.f32 %v9867_v20 }
0x120a   :  { %12955 = vpow2.f32 %v9868_v47  ;;  %v6256_v47 = vld [vmem:[#allocation9] sm:$0xff] }
0x120b   :  { %12957 = vtanh.f32 %v12434_v7  ;;  %v6260_v7 = vld [vmem:[#allocation9 + $0x20] sm:$0xff] }
0x1212   :  { %v12952_v5 = vpop.eup %12951 }
0x1213   :  { %v12954_v49 = vpop.eup %12953  ;;  %v5752_v25 = vadd.f32 1.0, %v12952_v5 }
0x1214   :  { %v5758_v17 = vadd.f32 1.0, %v12954_v49  ;;  %v12956_v59 = vpop.eup %12955  ;;  %v14802_v49 = vpack.c.bf16 %v6260_v7, %v6256_v47  ;;  %v6295_v7 = vld [vmem:[#allocation9 + $0x138] sm:$0xff] }
0x1215   :  { %12959 = vrcp.f32 %v5752_v25  ;;  %v12958_v16 = vpop.eup %12957  ;;  %v5765_v52 = vadd.f32 1.0, %v12956_v59  ;;  %v6258_v25 = vld [vmem:[#allocation9 + $0x10] sm:$0xff] }
0x1216   :  { %12961 = vrcp.f32 %v5758_v17  ;;  %v6262_v17 = vld [vmem:[#allocation9 + $0x30] sm:$0xff] }
0x1217   :  { %12963 = vrcp.f32 %v5765_v52  ;;  %v14805_v59 = vpack.c.bf16 %v6262_v17, %v6258_v25  ;;  %v6271_v52 = vld [vmem:[#allocation9 + $0x78] sm:$0xff]  ;;  %v6288_v25 = vld [vmem:[#allocation9 + $0x100] sm:$0xff] }
0x1218   :  { %v6292_v17 = vld [vmem:[#allocation9 + $0x120] sm:$0xff] }
0x121f   :  { %v12960_v12 = vpop.eup %12959 }
0x1220   :  { %v12962_v23 = vpop.eup %12961  ;;  %v5769_v60 = vmul.f32 %v12960_v12, %v12958_v16  ;;  %v6265_v16 = vld [vmem:[#allocation9 + $0x48] sm:$0xff] }
0x1221   :  { %v5768_v36 = vmul.f32 %v12962_v23, %v14702_v18  ;;  %v12964_v46 = vpop.eup %12963  ;;  %v6263_v18 = vld [vmem:[#allocation9 + $0x38] sm:$0xff]  ;;  %v6269_v12 = vld [vmem:[#allocation9 + $0x68] sm:$0xff] }
0x1222   :  { %v6267_v23 = vld [vmem:[#allocation9 + $0x58] sm:$0xff] }
0x1223   :  { %v14747_v61 = vadd.f32 %v5769_v60, %v5768_v36  ;;  %v14810_v60 = vpack.c.bf16 %v6269_v12, %v6265_v16  ;;  %v6264_v36 = vld [vmem:[#allocation9 + $0x40] sm:$0xff]  ;;  %v14850_v12 = vpack.c.bf16 %v6292_v17, %v6288_v25  ;;  %v6313_v25 = vld [vmem:[#allocation9 + $0x1c8] sm:$0xff] }
0x1224   :  { %v6317_v17 = vld [vmem:[#allocation9 + $0x1e8] sm:$0xff] }
0x1225   :  { %12965 = vtanh.f32 %v14747_v61 }
0x122f   :  { %v12966_v20 = vpop.eup %12965 }
0x1230   :  { %v5772_v37 = vmul.f32 %v12966_v20, %v12964_v46  ;;  %v14812_v46 = vpack.c.bf16 %v6271_v52, %v6267_v23  ;;  %v6290_v23 = vld [vmem:[#allocation9 + $0x110] sm:$0xff] }
0x1231   :  { %v6294_v52 = vld [vmem:[#allocation9 + $0x130] sm:$0xff] }
0x1232   :  { %5773 = vst [vmem:[%s15596_s7 + $0x8] sm:$0xff] %v5772_v37  ;;  %5907 = vmatmul.mubr.f32.vlgmr.msra.gmra.mrb[36].mxu0 %v5772_v37  ;;  %5978 = vmatmul.mubr.f32.vlgmr.msra.gmra.mrb[36].mxu1 %v5772_v37  ;;  %v6266_v37 = vld [vmem:[#allocation9 + $0x50] sm:$0xff] }
0x1233   :  { %11395 = vmatpush1.bf16.msra.mxu0 %v14519_v35  ;;  %11427 = vmatpush1.bf16.msra.mxu1 %v14521_v0 }
0x1234   :  { %11397 = vmatprep.subr.bf16.mxu0 %v14527_v55  ;;  %11429 = vmatprep.subr.bf16.mxu1 %v14529_v43 }
0x1235   :  { %6145 = vmatprep.mubr.f32.mxu0 %v15629_v31  ;;  %6216 = vmatprep.mubr.f32.mxu1 %v15629_v31 }
0x1237   :  { %11399 = vmatpush1.bf16.msra.mxu0 %v14535_v42  ;;  %11431 = vmatpush1.bf16.msra.mxu1 %v14537_v38 }
0x1238   :  { %11401 = vmatprep.subr.bf16.mxu0 %v14543_v11  ;;  %11433 = vmatprep.subr.bf16.mxu1 %v14545_v51 }
0x123b   :  { %11403 = vmatpush1.bf16.msra.mxu0 %v14551_v45  ;;  %11435 = vmatpush1.bf16.msra.mxu1 %v14553_v56 }
0x123c   :  { %11405 = vmatprep.subr.bf16.mxu0 %v14559_v41  ;;  %11437 = vmatprep.subr.bf16.mxu1 %v14561_v26 }
0x123f   :  { %11407 = vmatpush1.bf16.msra.mxu0 %v14567_v22  ;;  %11439 = vmatpush1.bf16.msra.mxu1 %v14569_v9 }
0x1240   :  { %11409 = vmatprep.subr.bf16.mxu0 %v14575_v50  ;;  %11441 = vmatprep.subr.bf16.mxu1 %v14577_v4 }
0x1243   :  { %11411 = vmatpush1.bf16.msra.mxu0 %v14583_v40  ;;  %11443 = vmatpush1.bf16.msra.mxu1 %v14585_v33 }
0x1244   :  { %11413 = vmatprep.subr.bf16.mxu0 %v14591_v29  ;;  %11445 = vmatprep.subr.bf16.mxu1 %v14593_v3 }
0x1247   :  { %11415 = vmatpush1.bf16.msra.mxu0 %v14599_v8  ;;  %11447 = vmatpush1.bf16.msra.mxu1 %v14601_v27 }
0x1248   :  { %11417 = vmatprep.subr.bf16.mxu0 %v14607_v57  ;;  %11449 = vmatprep.subr.bf16.mxu1 %v14609_v2 }
0x124b   :  { %11419 = vmatpush1.bf16.msra.mxu0 %v14615_v53  ;;  %11451 = vmatpush1.bf16.msra.mxu1 %v14617_v28 }
0x124c   :  { %11421 = vmatprep.subr.bf16.mxu0 %v14623_v13  ;;  %11453 = vmatprep.subr.bf16.mxu1 %v14625_v24  ;;  %v6257_v13 = vld [vmem:[#allocation9 + $0x8] sm:$0xff] }
0x124d   :  { %v6261_v24 = vld [vmem:[#allocation9 + $0x28] sm:$0xff] }
0x124f   :  { %11423 = vmatpush1.bf16.msra.mxu0 %v14631_v63  ;;  %11455 = vmatpush1.bf16.msra.mxu1 %v14633_v30  ;;  %v6259_v63 = vld [vmem:[#allocation9 + $0x18] sm:$0xff]  ;;  %v14798_v30 = vpack.c.bf16 %v6261_v24, %v6257_v13  ;;  %v6289_v24 = vld [vmem:[#allocation9 + $0x108] sm:$0xff] }
0x1250   :  { %v14800_v5 = vpack.c.bf16 %v6263_v18, %v6259_v63  ;;  %v6293_v63 = vld [vmem:[#allocation9 + $0x128] sm:$0xff]  ;;  %v6291_v18 = vld [vmem:[#allocation9 + $0x118] sm:$0xff] }
0x1251   :  { %11457 = vmatprep.subr.bf16.mxu0 %v14798_v30  ;;  %v14846_v47 = vpack.c.bf16 %v6293_v63, %v6289_v24  ;;  %v14848_v16 = vpack.c.bf16 %v6295_v7, %v6291_v18  ;;  %v6308_v24 = vld [vmem:[#allocation9 + $0x1a0] sm:$0xff]  ;;  %v6306_v63 = vld [vmem:[#allocation9 + $0x190] sm:$0xff] }
0x1252   :  { %11489 = vmatprep.subr.bf16.mxu1 %v14800_v5  ;;  %v6310_v7 = vld [vmem:[#allocation9 + $0x1b0] sm:$0xff] }
0x1305   :  { %v5908_v35 = vpop.f32.mrb[36].mxu0  ;;  %v5979_v0 = vpop.f32.mrb[36].mxu1 }
0x1306   :  { %v12420_v55 = vadd.f32 %v5908_v35, %v14687_v15  ;;  %v5910_v43 = vpop.f32.mrb[37].mxu0  ;;  %v5981_v42 = vpop.f32.mrb[37].mxu1  ;;  %v12436_v41 = vadd.f32 %v5979_v0, %v14699_v62  ;;  %v6270_v35 = vld [vmem:[#allocation9 + $0x70] sm:$0xff] }
0x1307   :  { %v12421_v38 = vadd.f32 %v5910_v43, %v14690_v32  ;;  %v12437_v45 = vadd.f32 %v5981_v42, %v14695_v34  ;;  %v14817_v0 = vpack.c.bf16 %v6270_v35, %v6266_v37  ;;  %v6277_v43 = vld [vmem:[#allocation9 + $0xa8] sm:$0xff]  ;;  %v6275_v42 = vld [vmem:[#allocation9 + $0x98] sm:$0xff] }
0x1308   :  { %v9869_v11 = vmul.f32 -1.442695, %v12420_v55  ;;  %v6273_v55 = vld [vmem:[#allocation9 + $0x88] sm:$0xff]  ;;  %v6299_v35 = vld [vmem:[#allocation9 + $0x158] sm:$0xff] }
0x1309   :  { %v9870_v51 = vmul.f32 -1.442695, %v12421_v38  ;;  %v9871_v56 = vmul.f32 -1.442695, %v12437_v45  ;;  %v14822_v38 = vpack.c.bf16 %v6277_v43, %v6273_v55  ;;  %v6276_v45 = vld [vmem:[#allocation9 + $0xa0] sm:$0xff]  ;;  %v6301_v37 = vld [vmem:[#allocation9 + $0x168] sm:$0xff] }
0x130a   :  { %12967 = vpow2.f32 %v9869_v11  ;;  %v6279_v11 = vld [vmem:[#allocation9 + $0xb8] sm:$0xff] }
0x130b   :  { %12969 = vpow2.f32 %v9870_v51  ;;  %v6272_v51 = vld [vmem:[#allocation9 + $0x80] sm:$0xff]  ;;  %v6303_v43 = vld [vmem:[#allocation9 + $0x178] sm:$0xff] }
0x130c   :  { %12971 = vpow2.f32 %v9871_v56  ;;  %v14824_v56 = vpack.c.bf16 %v6279_v11, %v6275_v42  ;;  %v6296_v42 = vld [vmem:[#allocation9 + $0x140] sm:$0xff] }
0x130d   :  { %12973 = vtanh.f32 %v12436_v41  ;;  %v14826_v41 = vpack.c.bf16 %v6276_v45, %v6272_v51  ;;  %v6300_v11 = vld [vmem:[#allocation9 + $0x160] sm:$0xff]  ;;  %v14860_v51 = vpack.c.bf16 %v6303_v43, %v6299_v35 }
0x130e   :  { %v14862_v45 = vpack.c.bf16 %v6300_v11, %v6296_v42  ;;  %v6312_v35 = vld [vmem:[#allocation9 + $0x1c0] sm:$0xff]  ;;  %v6314_v11 = vld [vmem:[#allocation9 + $0x1d0] sm:$0xff] }
0x130f   :  { %v6316_v42 = vld [vmem:[#allocation9 + $0x1e0] sm:$0xff] }
0x1314   :  { %v12968_v26 = vpop.eup %12967 }
0x1315   :  { %v12970_v22 = vpop.eup %12969  ;;  %v5991_v9 = vadd.f32 1.0, %v12968_v26  ;;  %v6274_v26 = vld [vmem:[#allocation9 + $0x90] sm:$0xff] }
0x1316   :  { %v5997_v50 = vadd.f32 1.0, %v12970_v22  ;;  %v12972_v4 = vpop.eup %12971  ;;  %v6278_v22 = vld [vmem:[#allocation9 + $0xb0] sm:$0xff] }
0x1317   :  { %12975 = vrcp.f32 %v5991_v9  ;;  %v12974_v40 = vpop.eup %12973  ;;  %v6004_v8 = vadd.f32 1.0, %v12972_v4  ;;  %v14829_v9 = vpack.c.bf16 %v6278_v22, %v6274_v26  ;;  %v6285_v4 = vld [vmem:[#allocation9 + $0xe8] sm:$0xff]  ;;  %v6298_v26 = vld [vmem:[#allocation9 + $0x150] sm:$0xff] }
0x1318   :  { %12977 = vrcp.f32 %v5997_v50  ;;  %v6281_v50 = vld [vmem:[#allocation9 + $0xc8] sm:$0xff]  ;;  %v6302_v22 = vld [vmem:[#allocation9 + $0x170] sm:$0xff] }
0x1319   :  { %12979 = vrcp.f32 %v6004_v8  ;;  %v6284_v8 = vld [vmem:[#allocation9 + $0xe0] sm:$0xff] }
0x1321   :  { %v12976_v33 = vpop.eup %12975 }
0x1322   :  { %v12978_v29 = vpop.eup %12977  ;;  %v6008_v3 = vmul.f32 %v12976_v33, %v12974_v40  ;;  %v6283_v40 = vld [vmem:[#allocation9 + $0xd8] sm:$0xff]  ;;  %v14834_v33 = vpack.c.bf16 %v6285_v4, %v6281_v50  ;;  %v6305_v50 = vld [vmem:[#allocation9 + $0x188] sm:$0xff]  ;;  %v14865_v4 = vpack.c.bf16 %v6302_v22, %v6298_v26  ;;  %v6318_v26 = vld [vmem:[#allocation9 + $0x1f0] sm:$0xff]  ;;  %v14885_v22 = vpack.c.bf16 %v6316_v42, %v6312_v35 }
0x1323   :  { %v6007_v27 = vmul.f32 %v12978_v29, %v14747_v61  ;;  %v12980_v2 = vpop.eup %12979  ;;  %v6268_v61 = vld [vmem:[#allocation9 + $0x60] sm:$0xff]  ;;  %v6287_v29 = vld [vmem:[#allocation9 + $0xf8] sm:$0xff] }
0x1324   :  { %v14814_v20 = vpack.c.bf16 %v6268_v61, %v6264_v36  ;;  %v14853_v36 = vpack.c.bf16 %v6294_v52, %v6290_v23  ;;  %v6297_v61 = vld [vmem:[#allocation9 + $0x148] sm:$0xff]  ;;  %v14877_v23 = vpack.c.bf16 %v6310_v7, %v6306_v63  ;;  %v14879_v52 = vpack.c.bf16 %v6317_v17, %v6313_v25 }
0x1325   :  { %v14790_v57 = vadd.f32 %v6008_v3, %v6007_v27  ;;  %v6280_v3 = vld [vmem:[#allocation9 + $0xc0] sm:$0xff]  ;;  %v14836_v27 = vpack.c.bf16 %v6287_v29, %v6283_v40  ;;  %v14857_v55 = vpack.c.bf16 %v6301_v37, %v6297_v61  ;;  %v6309_v40 = vld [vmem:[#allocation9 + $0x1a8] sm:$0xff]  ;;  %v6307_v29 = vld [vmem:[#allocation9 + $0x198] sm:$0xff] }
0x1326   :  { %v6315_v61 = vld [vmem:[#allocation9 + $0x1d8] sm:$0xff] }
0x1327   :  { %12981 = vtanh.f32 %v14790_v57  ;;  %v6319_v37 = vld [vmem:[#allocation9 + $0x1f8] sm:$0xff] }
0x1328   :  { %v14882_v43 = vpack.c.bf16 %v6319_v37, %v6315_v61 }
0x1331   :  { %v12982_v53 = vpop.eup %12981 }
0x1332   :  { %v6011_v28 = vmul.f32 %v12982_v53, %v12980_v2  ;;  %v14838_v2 = vpack.c.bf16 %v6284_v8, %v6280_v3  ;;  %v6282_v53 = vld [vmem:[#allocation9 + $0xd0] sm:$0xff]  ;;  %v6311_v3 = vld [vmem:[#allocation9 + $0x1b8] sm:$0xff]  ;;  %v14868_v8 = vpack.c.bf16 %v6309_v40, %v6305_v50  ;;  %v14889_v50 = vpack.c.bf16 %v6318_v26, %v6314_v11 }
0x1334   :  { %6012 = vst [vmem:[%s15596_s7 + $0x10] sm:$0xff] %v6011_v28  ;;  %6146 = vmatmul.mubr.f32.vlgmr.msra.gmra.mrb[38].mxu0 %v6011_v28  ;;  %6217 = vmatmul.mubr.f32.vlgmr.msra.gmra.mrb[38].mxu1 %v6011_v28  ;;  %v6286_v28 = vld [vmem:[#allocation9 + $0xf0] sm:$0xff] }
0x1335   :  { %6384 = vmatprep.mubr.f32.mxu0 %v15629_v31  ;;  %6455 = vmatprep.mubr.f32.mxu1 %v15629_v31  ;;  %v14841_v13 = vpack.c.bf16 %v6286_v28, %v6282_v53  ;;  %v14870_v53 = vpack.c.bf16 %v6311_v3, %v6307_v29  ;;  %v6304_v28 = vld [vmem:[#allocation9 + $0x180] sm:$0xff] }
0x1336   :  { %11459 = vmatpush1.bf16.msra.mxu0 %v14802_v49  ;;  %11491 = vmatpush1.bf16.msra.mxu1 %v14805_v59  ;;  %v14873_v18 = vpack.c.bf16 %v6308_v24, %v6304_v28 }
0x1337   :  { %11461 = vmatprep.subr.bf16.mxu0 %v14810_v60  ;;  %11493 = vmatprep.subr.bf16.mxu1 %v14812_v46 }
0x133a   :  { %11463 = vmatpush1.bf16.msra.mxu0 %v14814_v20  ;;  %11495 = vmatpush1.bf16.msra.mxu1 %v14817_v0 }
0x133b   :  { %11465 = vmatprep.subr.bf16.mxu0 %v14822_v38  ;;  %11497 = vmatprep.subr.bf16.mxu1 %v14824_v56 }
0x133e   :  { %11467 = vmatpush1.bf16.msra.mxu0 %v14826_v41  ;;  %11499 = vmatpush1.bf16.msra.mxu1 %v14829_v9 }
0x133f   :  { %11469 = vmatprep.subr.bf16.mxu0 %v14834_v33  ;;  %11501 = vmatprep.subr.bf16.mxu1 %v14836_v27 }
0x1342   :  { %11471 = vmatpush1.bf16.msra.mxu0 %v14838_v2  ;;  %11503 = vmatpush1.bf16.msra.mxu1 %v14841_v13 }
0x1343   :  { %11473 = vmatprep.subr.bf16.mxu0 %v14846_v47  ;;  %11505 = vmatprep.subr.bf16.mxu1 %v14848_v16 }
0x1346   :  { %11475 = vmatpush1.bf16.msra.mxu0 %v14850_v12  ;;  %11507 = vmatpush1.bf16.msra.mxu1 %v14853_v36 }
0x1347   :  { %11477 = vmatprep.subr.bf16.mxu0 %v14857_v55  ;;  %11509 = vmatprep.subr.bf16.mxu1 %v14860_v51 }
0x134a   :  { %11479 = vmatpush1.bf16.msra.mxu0 %v14862_v45  ;;  %11511 = vmatpush1.bf16.msra.mxu1 %v14865_v4 }
0x134b   :  { %11481 = vmatprep.subr.bf16.mxu0 %v14868_v8  ;;  %11513 = vmatprep.subr.bf16.mxu1 %v14870_v53 }
0x134e   :  { %11483 = vmatpush1.bf16.msra.mxu0 %v14873_v18  ;;  %11515 = vmatpush1.bf16.msra.mxu1 %v14877_v23 }
0x134f   :  { %11485 = vmatprep.subr.bf16.mxu0 %v14879_v52  ;;  %11517 = vmatprep.subr.bf16.mxu1 %v14882_v43 }
0x1352   :  { %11487 = vmatpush1.bf16.msra.mxu0 %v14885_v22  ;;  %11519 = vmatpush1.bf16.msra.mxu1 %v14889_v50 }
0x1353   :  { %11521 = vmatprep.subr.bf16.mxu0 %v14798_v30  ;;  %11553 = vmatprep.subr.bf16.mxu1 %v14800_v5 }
0x1407   :  { %v6147_v40 = vpop.f32.mrb[38].mxu0  ;;  %v6218_v29 = vpop.f32.mrb[38].mxu1 }
0x1408   :  { %v12422_v3 = vadd.f32 %v6147_v40, %v14687_v15  ;;  %v6149_v28 = vpop.f32.mrb[39].mxu0  ;;  %v6220_v24 = vpop.f32.mrb[39].mxu1  ;;  %v12438_v37 = vadd.f32 %v6218_v29, %v14699_v62 }
0x1409   :  { %v12423_v63 = vadd.f32 %v6149_v28, %v14690_v32  ;;  %v12439_v17 = vadd.f32 %v6220_v24, %v14695_v34 }
0x140a   :  { %v9872_v7 = vmul.f32 -1.442695, %v12422_v3 }
0x140b   :  { %v9873_v25 = vmul.f32 -1.442695, %v12423_v63  ;;  %v9874_v61 = vmul.f32 -1.442695, %v12439_v17 }
0x140c   :  { %12983 = vpow2.f32 %v9872_v7 }
0x140d   :  { %12985 = vpow2.f32 %v9873_v25 }
0x140e   :  { %12987 = vpow2.f32 %v9874_v61 }
0x140f   :  { %12989 = vtanh.f32 %v12438_v37 }
0x1416   :  { %v12984_v35 = vpop.eup %12983 }
0x1417   :  { %v12986_v42 = vpop.eup %12985  ;;  %v6230_v11 = vadd.f32 1.0, %v12984_v35 }
0x1418   :  { %v6236_v26 = vadd.f32 1.0, %v12986_v42  ;;  %v12988_v40 = vpop.eup %12987 }
0x1419   :  { %12991 = vrcp.f32 %v6230_v11  ;;  %v12990_v58 = vpop.eup %12989  ;;  %v6243_v7 = vadd.f32 1.0, %v12988_v40 }
0x141a   :  { %12993 = vrcp.f32 %v6236_v26 }
0x141b   :  { %12995 = vrcp.f32 %v6243_v7 }
0x1423   :  { %v12992_v28 = vpop.eup %12991 }
0x1424   :  { %v12994_v3 = vpop.eup %12993  ;;  %v6247_v63 = vmul.f32 %v12992_v28, %v12990_v58 }
0x1425   :  { %v6246_v25 = vmul.f32 %v12994_v3, %v14790_v57  ;;  %v12996_v29 = vpop.eup %12995 }
0x1427   :  { %v14901_v24 = vadd.f32 %v6247_v63, %v6246_v25 }
0x1429   :  { %12997 = vtanh.f32 %v14901_v24 }
0x1433   :  { %v12998_v17 = vpop.eup %12997 }
0x1434   :  { %v6250_v61 = vmul.f32 %v12998_v17, %v12996_v29 }
0x1436   :  { %6251 = vst [vmem:[%s15596_s7 + $0x18] sm:$0xff] %v6250_v61  ;;  %6385 = vmatmul.mubr.f32.vlgmr.msra.gmra.mrb[40].mxu0 %v6250_v61  ;;  %6456 = vmatmul.mubr.f32.vlgmr.msra.gmra.mrb[40].mxu1 %v6250_v61 }
0x1437   :  { %11523 = vmatpush1.bf16.msra.mxu0 %v14802_v49  ;;  %11555 = vmatpush1.bf16.msra.mxu1 %v14805_v59 }
0x1438   :  { %11525 = vmatprep.subr.bf16.mxu0 %v14810_v60  ;;  %11557 = vmatprep.subr.bf16.mxu1 %v14812_v46 }
0x1439   :  { %6623 = vmatprep.mubr.f32.mxu0 %v15629_v31  ;;  %6694 = vmatprep.mubr.f32.mxu1 %v15629_v31 }
0x143b   :  { %11527 = vmatpush1.bf16.msra.mxu0 %v14814_v20  ;;  %11559 = vmatpush1.bf16.msra.mxu1 %v14817_v0 }
0x143c   :  { %11529 = vmatprep.subr.bf16.mxu0 %v14822_v38  ;;  %11561 = vmatprep.subr.bf16.mxu1 %v14824_v56 }
0x143f   :  { %11531 = vmatpush1.bf16.msra.mxu0 %v14826_v41  ;;  %11563 = vmatpush1.bf16.msra.mxu1 %v14829_v9 }
0x1440   :  { %11533 = vmatprep.subr.bf16.mxu0 %v14834_v33  ;;  %11565 = vmatprep.subr.bf16.mxu1 %v14836_v27 }
0x1443   :  { %11535 = vmatpush1.bf16.msra.mxu0 %v14838_v2  ;;  %11567 = vmatpush1.bf16.msra.mxu1 %v14841_v13 }
0x1444   :  { %11537 = vmatprep.subr.bf16.mxu0 %v14846_v47  ;;  %11569 = vmatprep.subr.bf16.mxu1 %v14848_v16 }
0x1447   :  { %11539 = vmatpush1.bf16.msra.mxu0 %v14850_v12  ;;  %11571 = vmatpush1.bf16.msra.mxu1 %v14853_v36 }
0x1448   :  { %11541 = vmatprep.subr.bf16.mxu0 %v14857_v55  ;;  %11573 = vmatprep.subr.bf16.mxu1 %v14860_v51 }
0x144b   :  { %11543 = vmatpush1.bf16.msra.mxu0 %v14862_v45  ;;  %11575 = vmatpush1.bf16.msra.mxu1 %v14865_v4 }
0x144c   :  { %11545 = vmatprep.subr.bf16.mxu0 %v14868_v8  ;;  %11577 = vmatprep.subr.bf16.mxu1 %v14870_v53 }
0x144f   :  { %11547 = vmatpush1.bf16.msra.mxu0 %v14873_v18  ;;  %11579 = vmatpush1.bf16.msra.mxu1 %v14877_v23 }
0x1450   :  { %11549 = vmatprep.subr.bf16.mxu0 %v14879_v52  ;;  %11581 = vmatprep.subr.bf16.mxu1 %v14882_v43 }
0x1453   :  { %11551 = vmatpush1.bf16.msra.mxu0 %v14885_v22  ;;  %11583 = vmatpush1.bf16.msra.mxu1 %v14889_v50 }
0x1454   :  { %11585 = vmatprep.subr.bf16.mxu0 %v14798_v30  ;;  %11617 = vmatprep.subr.bf16.mxu1 %v14800_v5 }
0x1509   :  { %v6386_v58 = vpop.f32.mrb[40].mxu0  ;;  %v6457_v57 = vpop.f32.mrb[40].mxu1 }
0x150a   :  { %v12424_v37 = vadd.f32 %v6386_v58, %v14687_v15  ;;  %v6388_v35 = vpop.f32.mrb[41].mxu0  ;;  %v6459_v42 = vpop.f32.mrb[41].mxu1  ;;  %v12440_v63 = vadd.f32 %v6457_v57, %v14699_v62 }
0x150b   :  { %v12425_v11 = vadd.f32 %v6388_v35, %v14690_v32  ;;  %v12441_v28 = vadd.f32 %v6459_v42, %v14695_v34 }
0x150c   :  { %v9875_v26 = vmul.f32 -1.442695, %v12424_v37 }
0x150d   :  { %v9876_v40 = vmul.f32 -1.442695, %v12425_v11  ;;  %v9877_v3 = vmul.f32 -1.442695, %v12441_v28 }
0x150e   :  { %12999 = vpow2.f32 %v9875_v26 }
0x150f   :  { %13001 = vpow2.f32 %v9876_v40 }
0x1510   :  { %13003 = vpow2.f32 %v9877_v3 }
0x1511   :  { %13005 = vtanh.f32 %v12440_v63 }
0x1518   :  { %v13000_v7 = vpop.eup %12999 }
0x1519   :  { %v13002_v25 = vpop.eup %13001  ;;  %v6469_v29 = vadd.f32 1.0, %v13000_v7 }
0x151a   :  { %v6475_v17 = vadd.f32 1.0, %v13002_v25  ;;  %v13004_v61 = vpop.eup %13003 }
0x151b   :  { %13007 = vrcp.f32 %v6469_v29  ;;  %v13006_v58 = vpop.eup %13005  ;;  %v6482_v26 = vadd.f32 1.0, %v13004_v61 }
0x151c   :  { %13009 = vrcp.f32 %v6475_v17 }
0x151d   :  { %13011 = vrcp.f32 %v6482_v26 }
0x1525   :  { %v13008_v35 = vpop.eup %13007 }
0x1526   :  { %v13010_v37 = vpop.eup %13009  ;;  %v6486_v11 = vmul.f32 %v13008_v35, %v13006_v58 }
0x1527   :  { %v6485_v40 = vmul.f32 %v13010_v37, %v14901_v24  ;;  %v13012_v57 = vpop.eup %13011 }
0x1529   :  { %v14946_v42 = vadd.f32 %v6486_v11, %v6485_v40 }
0x152b   :  { %13013 = vtanh.f32 %v14946_v42 }
0x1535   :  { %v13014_v28 = vpop.eup %13013 }
0x1536   :  { %v6489_v3 = vmul.f32 %v13014_v28, %v13012_v57 }
0x1538   :  { %6490 = vst [vmem:[%s15596_s7 + $0x20] sm:$0xff] %v6489_v3  ;;  %6624 = vmatmul.mubr.f32.vlgmr.msra.gmra.mrb[42].mxu0 %v6489_v3  ;;  %6695 = vmatmul.mubr.f32.vlgmr.msra.gmra.mrb[42].mxu1 %v6489_v3 }
0x1539   :  { %11587 = vmatpush1.bf16.msra.mxu0 %v14802_v49  ;;  %11619 = vmatpush1.bf16.msra.mxu1 %v14805_v59 }
0x153a   :  { %11589 = vmatprep.subr.bf16.mxu0 %v14810_v60  ;;  %11621 = vmatprep.subr.bf16.mxu1 %v14812_v46 }
0x153b   :  { %6862 = vmatprep.mubr.f32.mxu0 %v15629_v31  ;;  %6933 = vmatprep.mubr.f32.mxu1 %v15629_v31 }
0x153d   :  { %11591 = vmatpush1.bf16.msra.mxu0 %v14814_v20  ;;  %11623 = vmatpush1.bf16.msra.mxu1 %v14817_v0 }
0x153e   :  { %11593 = vmatprep.subr.bf16.mxu0 %v14822_v38  ;;  %11625 = vmatprep.subr.bf16.mxu1 %v14824_v56 }
0x1541   :  { %11595 = vmatpush1.bf16.msra.mxu0 %v14826_v41  ;;  %11627 = vmatpush1.bf16.msra.mxu1 %v14829_v9 }
0x1542   :  { %11597 = vmatprep.subr.bf16.mxu0 %v14834_v33  ;;  %11629 = vmatprep.subr.bf16.mxu1 %v14836_v27 }
0x1545   :  { %11599 = vmatpush1.bf16.msra.mxu0 %v14838_v2  ;;  %11631 = vmatpush1.bf16.msra.mxu1 %v14841_v13 }
0x1546   :  { %11601 = vmatprep.subr.bf16.mxu0 %v14846_v47  ;;  %11633 = vmatprep.subr.bf16.mxu1 %v14848_v16 }
0x1549   :  { %11603 = vmatpush1.bf16.msra.mxu0 %v14850_v12  ;;  %11635 = vmatpush1.bf16.msra.mxu1 %v14853_v36 }
0x154a   :  { %11605 = vmatprep.subr.bf16.mxu0 %v14857_v55  ;;  %11637 = vmatprep.subr.bf16.mxu1 %v14860_v51 }
0x154d   :  { %11607 = vmatpush1.bf16.msra.mxu0 %v14862_v45  ;;  %11639 = vmatpush1.bf16.msra.mxu1 %v14865_v4 }
0x154e   :  { %11609 = vmatprep.subr.bf16.mxu0 %v14868_v8  ;;  %11641 = vmatprep.subr.bf16.mxu1 %v14870_v53 }
0x1551   :  { %11611 = vmatpush1.bf16.msra.mxu0 %v14873_v18  ;;  %11643 = vmatpush1.bf16.msra.mxu1 %v14877_v23 }
0x1552   :  { %11613 = vmatprep.subr.bf16.mxu0 %v14879_v52  ;;  %11645 = vmatprep.subr.bf16.mxu1 %v14882_v43 }
0x1555   :  { %11615 = vmatpush1.bf16.msra.mxu0 %v14885_v22  ;;  %11647 = vmatpush1.bf16.msra.mxu1 %v14889_v50 }
0x1556   :  { %11649 = vmatprep.subr.bf16.mxu0 %v14798_v30  ;;  %11681 = vmatprep.subr.bf16.mxu1 %v14800_v5 }
0x160b   :  { %v6625_v24 = vpop.f32.mrb[42].mxu0  ;;  %v6696_v63 = vpop.f32.mrb[42].mxu1 }
0x160c   :  { %v12426_v7 = vadd.f32 %v6625_v24, %v14687_v15  ;;  %v6627_v25 = vpop.f32.mrb[43].mxu0  ;;  %v6698_v29 = vpop.f32.mrb[43].mxu1  ;;  %v12442_v11 = vadd.f32 %v6696_v63, %v14699_v62 }
0x160d   :  { %v12427_v17 = vadd.f32 %v6627_v25, %v14690_v32  ;;  %v12443_v35 = vadd.f32 %v6698_v29, %v14695_v34 }
0x160e   :  { %v9878_v61 = vmul.f32 -1.442695, %v12426_v7 }
0x160f   :  { %v9879_v58 = vmul.f32 -1.442695, %v12427_v17  ;;  %v9880_v37 = vmul.f32 -1.442695, %v12443_v35  ;;  %v7292_v35 = vld [vmem:[#allocation8 + $0x610] sm:$0xff] }
0x1610   :  { %13015 = vpow2.f32 %v9878_v61 }
0x1611   :  { %13017 = vpow2.f32 %v9879_v58 }
0x1612   :  { %13019 = vpow2.f32 %v9880_v37  ;;  %v7296_v37 = vld [vmem:[#allocation8 + $0x630] sm:$0xff] }
0x1613   :  { %13021 = vtanh.f32 %v12442_v11  ;;  %v7299_v11 = vld [vmem:[#allocation8 + $0x648] sm:$0xff] }
0x161a   :  { %v13016_v30 = vpop.eup %13015 }
0x161b   :  { %v13018_v26 = vpop.eup %13017  ;;  %v6708_v5 = vadd.f32 1.0, %v13016_v30  ;;  %v7303_v30 = vld [vmem:[#allocation8 + $0x668] sm:$0xff] }
0x161c   :  { %v6714_v40 = vadd.f32 1.0, %v13018_v26  ;;  %v13020_v57 = vpop.eup %13019  ;;  %v7301_v26 = vld [vmem:[#allocation8 + $0x658] sm:$0xff] }
0x161d   :  { %13023 = vrcp.f32 %v6708_v5  ;;  %v13022_v28 = vpop.eup %13021  ;;  %v6721_v25 = vadd.f32 1.0, %v13020_v57  ;;  %v7305_v5 = vld [vmem:[#allocation8 + $0x678] sm:$0xff] }
0x161e   :  { %13025 = vrcp.f32 %v6714_v40 }
0x161f   :  { %13027 = vrcp.f32 %v6721_v25 }
0x1627   :  { %v13024_v3 = vpop.eup %13023 }
0x1628   :  { %v13026_v24 = vpop.eup %13025  ;;  %v6725_v7 = vmul.f32 %v13024_v3, %v13022_v28  ;;  %v11746_v3 = vpack.c.bf16 %v7296_v37, %v7292_v35  ;;  %v7326_v35 = vld [vmem:[#allocation8 + $0x720] sm:$0xff] }
0x1629   :  { %v6724_v17 = vmul.f32 %v13026_v24, %v14946_v42  ;;  %v13028_v63 = vpop.eup %13027  ;;  %v7294_v42 = vld [vmem:[#allocation8 + $0x620] sm:$0xff] }
0x162a   :  { %v7298_v24 = vld [vmem:[#allocation8 + $0x640] sm:$0xff] }
0x162b   :  { %v14991_v29 = vadd.f32 %v6725_v7, %v6724_v17  ;;  %v7302_v7 = vld [vmem:[#allocation8 + $0x660] sm:$0xff]  ;;  %v11716_v17 = vpack.c.bf16 %v7303_v30, %v7299_v11  ;;  %v7324_v30 = vld [vmem:[#allocation8 + $0x710] sm:$0xff] }
0x162d   :  { %13029 = vtanh.f32 %v14991_v29 }
0x1637   :  { %v13030_v61 = vpop.eup %13029 }
0x1638   :  { %v6728_v58 = vmul.f32 %v13030_v61, %v13028_v63  ;;  %v7300_v63 = vld [vmem:[#allocation8 + $0x650] sm:$0xff] }
0x1639   :  { %v7304_v61 = vld [vmem:[#allocation8 + $0x670] sm:$0xff] }
0x163a   :  { %6729 = vst [vmem:[%s15596_s7 + $0x28] sm:$0xff] %v6728_v58  ;;  %6863 = vmatmul.mubr.f32.vlgmr.msra.gmra.mrb[44].mxu0 %v6728_v58  ;;  %6934 = vmatmul.mubr.f32.vlgmr.msra.gmra.mrb[44].mxu1 %v6728_v58  ;;  %v7307_v58 = vld [vmem:[#allocation8 + $0x688] sm:$0xff] }
0x163b   :  { %11651 = vmatpush1.bf16.msra.mxu0 %v14802_v49  ;;  %11683 = vmatpush1.bf16.msra.mxu1 %v14805_v59  ;;  %v7291_v49 = vld [vmem:[#allocation8 + $0x608] sm:$0xff] }
0x163c   :  { %11653 = vmatprep.subr.bf16.mxu0 %v14810_v60  ;;  %11685 = vmatprep.subr.bf16.mxu1 %v14812_v46  ;;  %v7295_v59 = vld [vmem:[#allocation8 + $0x628] sm:$0xff]  ;;  %v7293_v60 = vld [vmem:[#allocation8 + $0x618] sm:$0xff] }
0x163d   :  { %7101 = vmatprep.mubr.f32.mxu0 %v15629_v31  ;;  %7172 = vmatprep.mubr.f32.mxu1 %v15629_v31  ;;  %v11712_v46 = vpack.c.bf16 %v7295_v59, %v7291_v49  ;;  %v7311_v49 = vld [vmem:[#allocation8 + $0x6a8] sm:$0xff]  ;;  %v7309_v59 = vld [vmem:[#allocation8 + $0x698] sm:$0xff] }
0x163f   :  { %11655 = vmatpush1.bf16.msra.mxu0 %v14814_v20  ;;  %11687 = vmatpush1.bf16.msra.mxu1 %v14817_v0  ;;  %v7297_v20 = vld [vmem:[#allocation8 + $0x638] sm:$0xff] }
0x1640   :  { %11657 = vmatprep.subr.bf16.mxu0 %v14822_v38  ;;  %11689 = vmatprep.subr.bf16.mxu1 %v14824_v56  ;;  %v11744_v0 = vpack.c.bf16 %v7297_v20, %v7293_v60  ;;  %v7313_v60 = vld [vmem:[#allocation8 + $0x6b8] sm:$0xff]  ;;  %v11750_v20 = vpack.c.bf16 %v7304_v61, %v7300_v63  ;;  %v7332_v63 = vld [vmem:[#allocation8 + $0x750] sm:$0xff] }
0x1641   :  { %v7336_v61 = vld [vmem:[#allocation8 + $0x770] sm:$0xff] }
0x1643   :  { %11659 = vmatpush1.bf16.msra.mxu0 %v14826_v41  ;;  %11691 = vmatpush1.bf16.msra.mxu1 %v14829_v9 }
0x1644   :  { %11661 = vmatprep.subr.bf16.mxu0 %v14834_v33  ;;  %11693 = vmatprep.subr.bf16.mxu1 %v14836_v27 }
0x1647   :  { %11663 = vmatpush1.bf16.msra.mxu0 %v14838_v2  ;;  %11695 = vmatpush1.bf16.msra.mxu1 %v14841_v13 }
0x1648   :  { %11665 = vmatprep.subr.bf16.mxu0 %v14846_v47  ;;  %11697 = vmatprep.subr.bf16.mxu1 %v14848_v16 }
0x164b   :  { %11667 = vmatpush1.bf16.msra.mxu0 %v14850_v12  ;;  %11699 = vmatpush1.bf16.msra.mxu1 %v14853_v36 }
0x164c   :  { %11669 = vmatprep.subr.bf16.mxu0 %v14857_v55  ;;  %11701 = vmatprep.subr.bf16.mxu1 %v14860_v51 }
0x164f   :  { %11671 = vmatpush1.bf16.msra.mxu0 %v14862_v45  ;;  %11703 = vmatpush1.bf16.msra.mxu1 %v14865_v4 }
0x1650   :  { %11673 = vmatprep.subr.bf16.mxu0 %v14868_v8  ;;  %11705 = vmatprep.subr.bf16.mxu1 %v14870_v53 }
0x1653   :  { %11675 = vmatpush1.bf16.msra.mxu0 %v14873_v18  ;;  %11707 = vmatpush1.bf16.msra.mxu1 %v14877_v23 }
0x1654   :  { %11677 = vmatprep.subr.bf16.mxu0 %v14879_v52  ;;  %11709 = vmatprep.subr.bf16.mxu1 %v14882_v43 }
0x1657   :  { %11679 = vmatpush1.bf16.msra.mxu0 %v14885_v22  ;;  %11711 = vmatpush1.bf16.msra.mxu1 %v14889_v50  ;;  %v7290_v50 = vld [vmem:[#allocation8 + $0x600] sm:$0xff] }
0x1658   :  { %11713 = vmatprep.subr.bf16.mxu0 %v11712_v46  ;;  %11745 = vmatprep.subr.bf16.mxu1 %v11744_v0  ;;  %v11714_v28 = vpack.c.bf16 %v7294_v42, %v7290_v50  ;;  %v11718_v46 = vpack.c.bf16 %v7302_v7, %v7298_v24  ;;  %v7306_v0 = vld [vmem:[#allocation8 + $0x680] sm:$0xff] }
0x1659   :  { %v7322_v42 = vld [vmem:[#allocation8 + $0x700] sm:$0xff] }
0x165a   :  { %v7330_v7 = vld [vmem:[#allocation8 + $0x740] sm:$0xff] }
0x170d   :  { %v6864_v38 = vpop.f32.mrb[44].mxu0  ;;  %v6935_v56 = vpop.f32.mrb[44].mxu1 }
0x170e   :  { %v12428_v41 = vadd.f32 %v6864_v38, %v14687_v15  ;;  %v6866_v9 = vpop.f32.mrb[45].mxu0  ;;  %v6937_v33 = vpop.f32.mrb[45].mxu1  ;;  %v12444_v12 = vadd.f32 %v6935_v56, %v14699_v62  ;;  %v7310_v38 = vld [vmem:[#allocation8 + $0x6a0] sm:$0xff]  ;;  %v11720_v56 = vpack.c.bf16 %v7311_v49, %v7307_v58  ;;  %v7339_v58 = vld [vmem:[#allocation8 + $0x788] sm:$0xff] }
0x170f   :  { %v12429_v27 = vadd.f32 %v6866_v9, %v14690_v32  ;;  %v12445_v47 = vadd.f32 %v6937_v33, %v14695_v34  ;;  %v7308_v9 = vld [vmem:[#allocation8 + $0x690] sm:$0xff]  ;;  %v7343_v49 = vld [vmem:[#allocation8 + $0x7a8] sm:$0xff] }
0x1710   :  { %v9881_v2 = vmul.f32 -1.442695, %v12428_v41  ;;  %v11752_v41 = vpack.c.bf16 %v7313_v60, %v7309_v59  ;;  %v7312_v33 = vld [vmem:[#allocation8 + $0x6b0] sm:$0xff]  ;;  %v7341_v59 = vld [vmem:[#allocation8 + $0x798] sm:$0xff] }
0x1711   :  { %v9882_v13 = vmul.f32 -1.442695, %v12429_v27  ;;  %v9883_v16 = vmul.f32 -1.442695, %v12445_v47  ;;  %v7315_v27 = vld [vmem:[#allocation8 + $0x6c8] sm:$0xff]  ;;  %v7321_v47 = vld [vmem:[#allocation8 + $0x6f8] sm:$0xff] }
0x1712   :  { %13031 = vpow2.f32 %v9881_v2  ;;  %v7319_v2 = vld [vmem:[#allocation8 + $0x6e8] sm:$0xff]  ;;  %v7345_v60 = vld [vmem:[#allocation8 + $0x7b8] sm:$0xff] }
0x1713   :  { %13033 = vpow2.f32 %v9882_v13  ;;  %v7317_v13 = vld [vmem:[#allocation8 + $0x6d8] sm:$0xff] }
0x1714   :  { %13035 = vpow2.f32 %v9883_v16  ;;  %v11722_v16 = vpack.c.bf16 %v7310_v38, %v7306_v0  ;;  %v7338_v0 = vld [vmem:[#allocation8 + $0x780] sm:$0xff] }
0x1715   :  { %13037 = vtanh.f32 %v12444_v12  ;;  %v11754_v12 = vpack.c.bf16 %v7312_v33, %v7308_v9  ;;  %v7342_v38 = vld [vmem:[#allocation8 + $0x7a0] sm:$0xff]  ;;  %v7340_v9 = vld [vmem:[#allocation8 + $0x790] sm:$0xff] }
0x1716   :  { %v7344_v33 = vld [vmem:[#allocation8 + $0x7b0] sm:$0xff] }
0x171c   :  { %v13032_v36 = vpop.eup %13031 }
0x171d   :  { %v13034_v55 = vpop.eup %13033  ;;  %v6947_v51 = vadd.f32 1.0, %v13032_v36  ;;  %v7314_v36 = vld [vmem:[#allocation8 + $0x6c0] sm:$0xff] }
0x171e   :  { %v6953_v45 = vadd.f32 1.0, %v13034_v55  ;;  %v13036_v4 = vpop.eup %13035  ;;  %v7318_v55 = vld [vmem:[#allocation8 + $0x6e0] sm:$0xff] }
0x171f   :  { %13039 = vrcp.f32 %v6947_v51  ;;  %v13038_v8 = vpop.eup %13037  ;;  %v6960_v52 = vadd.f32 1.0, %v13036_v4  ;;  %v11724_v51 = vpack.c.bf16 %v7319_v2, %v7315_v27  ;;  %v7316_v4 = vld [vmem:[#allocation8 + $0x6d0] sm:$0xff]  ;;  %v7347_v27 = vld [vmem:[#allocation8 + $0x7c8] sm:$0xff] }
0x1720   :  { %13041 = vrcp.f32 %v6953_v45  ;;  %v11756_v45 = vpack.c.bf16 %v7321_v47, %v7317_v13  ;;  %v7351_v2 = vld [vmem:[#allocation8 + $0x7e8] sm:$0xff]  ;;  %v7349_v13 = vld [vmem:[#allocation8 + $0x7d8] sm:$0xff] }
0x1721   :  { %13043 = vrcp.f32 %v6960_v52  ;;  %v7329_v52 = vld [vmem:[#allocation8 + $0x738] sm:$0xff] }
0x1722   :  { %v7353_v47 = vld [vmem:[#allocation8 + $0x7f8] sm:$0xff] }
0x1729   :  { %v13040_v53 = vpop.eup %13039 }
0x172a   :  { %v13042_v18 = vpop.eup %13041  ;;  %v6964_v23 = vmul.f32 %v13040_v53, %v13038_v8  ;;  %v7320_v8 = vld [vmem:[#allocation8 + $0x6f0] sm:$0xff]  ;;  %v7323_v53 = vld [vmem:[#allocation8 + $0x708] sm:$0xff] }
0x172b   :  { %v6963_v43 = vmul.f32 %v13042_v18, %v14991_v29  ;;  %v13044_v40 = vpop.eup %13043  ;;  %v11748_v29 = vpack.c.bf16 %v7305_v5, %v7301_v26  ;;  %v7327_v18 = vld [vmem:[#allocation8 + $0x728] sm:$0xff]  ;;  %v11758_v50 = vpack.c.bf16 %v7320_v8, %v7316_v4  ;;  %v7328_v26 = vld [vmem:[#allocation8 + $0x730] sm:$0xff] }
0x172c   :  { %v11728_v37 = vpack.c.bf16 %v7327_v18, %v7323_v53  ;;  %v7331_v5 = vld [vmem:[#allocation8 + $0x748] sm:$0xff]  ;;  %v11762_v24 = vpack.c.bf16 %v7328_v26, %v7324_v30  ;;  %v7348_v4 = vld [vmem:[#allocation8 + $0x7d0] sm:$0xff] }
0x172d   :  { %v15034_v22 = vadd.f32 %v6964_v23, %v6963_v43  ;;  %v7325_v23 = vld [vmem:[#allocation8 + $0x718] sm:$0xff]  ;;  %v11726_v43 = vpack.c.bf16 %v7318_v55, %v7314_v36  ;;  %v7346_v36 = vld [vmem:[#allocation8 + $0x7c0] sm:$0xff]  ;;  %v7352_v8 = vld [vmem:[#allocation8 + $0x7f0] sm:$0xff] }
0x172e   :  { %v11760_v11 = vpack.c.bf16 %v7329_v52, %v7325_v23  ;;  %v7350_v55 = vld [vmem:[#allocation8 + $0x7e0] sm:$0xff]  ;;  %v7218_v53 = vld [vmem:[#allocation8 + $0x408] sm:$0xff]  ;;  %v7220_v23 = vld [vmem:[#allocation8 + $0x418] sm:$0xff] }
0x172f   :  { %13045 = vtanh.f32 %v15034_v22  ;;  %v7222_v18 = vld [vmem:[#allocation8 + $0x428] sm:$0xff]  ;;  %v7224_v52 = vld [vmem:[#allocation8 + $0x438] sm:$0xff]  ;;  %v7219_v30 = vld [vmem:[#allocation8 + $0x410] sm:$0xff] }
0x1730   :  { %v7223_v26 = vld [vmem:[#allocation8 + $0x430] sm:$0xff] }
0x1739   :  { %v13046_v57 = vpop.eup %13045 }
0x173a   :  { %v6967_v25 = vmul.f32 %v13046_v57, %v13044_v40  ;;  %v7335_v40 = vld [vmem:[#allocation8 + $0x768] sm:$0xff]  ;;  %v7333_v57 = vld [vmem:[#allocation8 + $0x758] sm:$0xff] }
0x173c   :  { %6968 = vst [vmem:[%s15596_s7 + $0x30] sm:$0xff] %v6967_v25  ;;  %7102 = vmatmul.mubr.f32.vlgmr.msra.gmra.mrb[46].mxu0 %v6967_v25  ;;  %7173 = vmatmul.mubr.f32.vlgmr.msra.gmra.mrb[46].mxu1 %v6967_v25  ;;  %v7334_v25 = vld [vmem:[#allocation8 + $0x760] sm:$0xff] }
0x173d   :  { %11715 = vmatpush1.bf16.msra.mxu0 %v11714_v28  ;;  %11747 = vmatpush1.bf16.msra.mxu1 %v11746_v3  ;;  %v7337_v28 = vld [vmem:[#allocation8 + $0x778] sm:$0xff]  ;;  %v11730_v3 = vpack.c.bf16 %v7326_v35, %v7322_v42  ;;  %v7217_v42 = vld [vmem:[#allocation8 + $0x400] sm:$0xff]  ;;  %v11776_v35 = vpack.c.bf16 %v7222_v18, %v7218_v53 }
0x173e   :  { %11717 = vmatprep.subr.bf16.mxu0 %v11716_v17  ;;  %11749 = vmatprep.subr.bf16.mxu1 %v11748_v29  ;;  %v11732_v17 = vpack.c.bf16 %v7335_v40, %v7331_v5  ;;  %v11764_v29 = vpack.c.bf16 %v7337_v28, %v7333_v57  ;;  %v7226_v5 = vld [vmem:[#allocation8 + $0x448] sm:$0xff]  ;;  %v7228_v57 = vld [vmem:[#allocation8 + $0x458] sm:$0xff] }
0x173f   :  { %7418 = vmatprep.mubr.f32.mxu0 %v15629_v31  ;;  %7531 = vmatprep.mubr.f32.mxu1 %v15629_v31  ;;  %v7230_v40 = vld [vmem:[#allocation8 + $0x468] sm:$0xff]  ;;  %v7232_v28 = vld [vmem:[#allocation8 + $0x478] sm:$0xff] }
0x1740   :  { %v7252_v53 = vld [vmem:[#allocation8 + $0x518] sm:$0xff] }
0x1741   :  { %11719 = vmatpush1.bf16.msra.mxu0 %v11718_v46  ;;  %11751 = vmatpush1.bf16.msra.mxu1 %v11750_v20  ;;  %v11734_v46 = vpack.c.bf16 %v7334_v25, %v7330_v7  ;;  %v11766_v20 = vpack.c.bf16 %v7336_v61, %v7332_v63  ;;  %v7225_v7 = vld [vmem:[#allocation8 + $0x440] sm:$0xff]  ;;  %v11780_v63 = vpack.c.bf16 %v7230_v40, %v7226_v5  ;;  %v7256_v18 = vld [vmem:[#allocation8 + $0x538] sm:$0xff] }
0x1742   :  { %11721 = vmatprep.subr.bf16.mxu0 %v11720_v56  ;;  %11753 = vmatprep.subr.bf16.mxu1 %v11752_v41  ;;  %v11736_v56 = vpack.c.bf16 %v7343_v49, %v7339_v58  ;;  %v11768_v41 = vpack.c.bf16 %v7345_v60, %v7341_v59  ;;  %v7229_v25 = vld [vmem:[#allocation8 + $0x460] sm:$0xff]  ;;  %v11812_v61 = vpack.c.bf16 %v7232_v28, %v7228_v57  ;;  %v7234_v58 = vld [vmem:[#allocation8 + $0x488] sm:$0xff]  ;;  %v7236_v59 = vld [vmem:[#allocation8 + $0x498] sm:$0xff] }
0x1743   :  { %v7238_v49 = vld [vmem:[#allocation8 + $0x4a8] sm:$0xff]  ;;  %v7240_v60 = vld [vmem:[#allocation8 + $0x4b8] sm:$0xff]  ;;  %v7257_v28 = vld [vmem:[#allocation8 + $0x540] sm:$0xff] }
0x1744   :  { %v7264_v5 = vld [vmem:[#allocation8 + $0x578] sm:$0xff] }
0x1745   :  { %11723 = vmatpush1.bf16.msra.mxu0 %v11722_v16  ;;  %11755 = vmatpush1.bf16.msra.mxu1 %v11754_v12  ;;  %v11738_v16 = vpack.c.bf16 %v7342_v38, %v7338_v0  ;;  %v11770_v12 = vpack.c.bf16 %v7344_v33, %v7340_v9  ;;  %v7233_v0 = vld [vmem:[#allocation8 + $0x480] sm:$0xff]  ;;  %v11784_v9 = vpack.c.bf16 %v7238_v49, %v7234_v58 }
0x1746   :  { %11725 = vmatprep.subr.bf16.mxu0 %v11724_v51  ;;  %11757 = vmatprep.subr.bf16.mxu1 %v11756_v45  ;;  %v11740_v51 = vpack.c.bf16 %v7351_v2, %v7347_v27  ;;  %v11772_v45 = vpack.c.bf16 %v7353_v47, %v7349_v13  ;;  %v7237_v38 = vld [vmem:[#allocation8 + $0x4a0] sm:$0xff]  ;;  %v11816_v33 = vpack.c.bf16 %v7240_v60, %v7236_v59  ;;  %v7246_v27 = vld [vmem:[#allocation8 + $0x4e8] sm:$0xff]  ;;  %v7244_v2 = vld [vmem:[#allocation8 + $0x4d8] sm:$0xff] }
0x1747   :  { %v7248_v13 = vld [vmem:[#allocation8 + $0x4f8] sm:$0xff]  ;;  %v11786_v47 = vpack.c.bf16 %v7237_v38, %v7233_v0  ;;  %v7265_v59 = vld [vmem:[#allocation8 + $0x580] sm:$0xff] }
0x1748   :  { %v7269_v60 = vld [vmem:[#allocation8 + $0x5a0] sm:$0xff] }
0x1749   :  { %11727 = vmatpush1.bf16.msra.mxu0 %v11726_v43  ;;  %11759 = vmatpush1.bf16.msra.mxu1 %v11758_v50  ;;  %v11742_v43 = vpack.c.bf16 %v7350_v55, %v7346_v36  ;;  %v11774_v50 = vpack.c.bf16 %v7352_v8, %v7348_v4  ;;  %v7245_v36 = vld [vmem:[#allocation8 + $0x4e0] sm:$0xff]  ;;  %v7243_v55 = vld [vmem:[#allocation8 + $0x4d0] sm:$0xff]  ;;  %v11820_v4 = vpack.c.bf16 %v7248_v13, %v7244_v2  ;;  %v7254_v8 = vld [vmem:[#allocation8 + $0x528] sm:$0xff] }
0x174a   :  { %11729 = vmatprep.subr.bf16.mxu0 %v11728_v37  ;;  %11761 = vmatprep.subr.bf16.mxu1 %v11760_v11  ;;  %v11808_v37 = vpack.c.bf16 %v7224_v52, %v7220_v23  ;;  %v7221_v11 = vld [vmem:[#allocation8 + $0x420] sm:$0xff]  ;;  %v7275_v13 = vld [vmem:[#allocation8 + $0x5d0] sm:$0xff] }
0x174b   :  { %v7277_v2 = vld [vmem:[#allocation8 + $0x5e0] sm:$0xff] }
0x174d   :  { %11731 = vmatpush1.bf16.msra.mxu0 %v11730_v3  ;;  %11763 = vmatpush1.bf16.msra.mxu1 %v11762_v24  ;;  %v11778_v3 = vpack.c.bf16 %v7221_v11, %v7217_v42  ;;  %v11810_v24 = vpack.c.bf16 %v7223_v26, %v7219_v30  ;;  %v7251_v42 = vld [vmem:[#allocation8 + $0x510] sm:$0xff]  ;;  %v11824_v11 = vpack.c.bf16 %v7256_v18, %v7252_v53  ;;  %v7262_v30 = vld [vmem:[#allocation8 + $0x568] sm:$0xff]  ;;  %v7260_v26 = vld [vmem:[#allocation8 + $0x558] sm:$0xff] }
0x174e   :  { %11733 = vmatprep.subr.bf16.mxu0 %v11732_v17  ;;  %11765 = vmatprep.subr.bf16.mxu1 %v11764_v29  ;;  %v7227_v17 = vld [vmem:[#allocation8 + $0x450] sm:$0xff] }
0x174f   :  { %v7231_v29 = vld [vmem:[#allocation8 + $0x470] sm:$0xff] }
0x1751   :  { %11735 = vmatpush1.bf16.msra.mxu0 %v11734_v46  ;;  %11767 = vmatpush1.bf16.msra.mxu1 %v11766_v20  ;;  %v11782_v46 = vpack.c.bf16 %v7229_v25, %v7225_v7  ;;  %v11814_v20 = vpack.c.bf16 %v7231_v29, %v7227_v17  ;;  %v7263_v7 = vld [vmem:[#allocation8 + $0x570] sm:$0xff]  ;;  %v11828_v17 = vpack.c.bf16 %v7264_v5, %v7260_v26  ;;  %v7270_v29 = vld [vmem:[#allocation8 + $0x5a8] sm:$0xff] }
0x1752   :  { %11737 = vmatprep.subr.bf16.mxu0 %v11736_v56  ;;  %11769 = vmatprep.subr.bf16.mxu1 %v11768_v41  ;;  %v7235_v56 = vld [vmem:[#allocation8 + $0x490] sm:$0xff]  ;;  %v7915_v26 = vld [vmem:[#allocation9 + $0x288] sm:$0xff] }
0x1753   :  { %v7239_v41 = vld [vmem:[#allocation8 + $0x4b0] sm:$0xff]  ;;  %v7919_v5 = vld [vmem:[#allocation9 + $0x2a8] sm:$0xff] }
0x1755   :  { %11739 = vmatpush1.bf16.msra.mxu0 %v11738_v16  ;;  %11771 = vmatpush1.bf16.msra.mxu1 %v11770_v12  ;;  %v11818_v16 = vpack.c.bf16 %v7239_v41, %v7235_v56  ;;  %v7241_v12 = vld [vmem:[#allocation8 + $0x4c0] sm:$0xff]  ;;  %v7278_v56 = vld [vmem:[#allocation8 + $0x5e8] sm:$0xff]  ;;  %v7276_v41 = vld [vmem:[#allocation8 + $0x5d8] sm:$0xff] }
0x1756   :  { %11741 = vmatprep.subr.bf16.mxu0 %v11740_v51  ;;  %11773 = vmatprep.subr.bf16.mxu1 %v11772_v45  ;;  %v7247_v51 = vld [vmem:[#allocation8 + $0x4f0] sm:$0xff]  ;;  %v11790_v23 = vpack.c.bf16 %v7245_v36, %v7241_v12  ;;  %v7903_v36 = vld [vmem:[#allocation9 + $0x228] sm:$0xff] }
0x1757   :  { %v11822_v52 = vpack.c.bf16 %v7247_v51, %v7243_v55  ;;  %v7901_v55 = vld [vmem:[#allocation9 + $0x218] sm:$0xff] }
0x1758   :  { %v7905_v51 = vld [vmem:[#allocation9 + $0x238] sm:$0xff] }
0x1759   :  { %11743 = vmatpush1.bf16.msra.mxu0 %v11742_v43  ;;  %11775 = vmatpush1.bf16.msra.mxu1 %v11774_v50  ;;  %v7249_v43 = vld [vmem:[#allocation8 + $0x500] sm:$0xff]  ;;  %v15072_v18 = vpack.c.bf16 %v7905_v51, %v7901_v55  ;;  %v7936_v55 = vld [vmem:[#allocation9 + $0x330] sm:$0xff]  ;;  %v7939_v51 = vld [vmem:[#allocation9 + $0x348] sm:$0xff] }
0x175a   :  { %11777 = vmatprep.subr.bf16.mxu0 %v11776_v35  ;;  %11809 = vmatprep.subr.bf16.mxu1 %v11808_v37  ;;  %v7253_v50 = vld [vmem:[#allocation8 + $0x520] sm:$0xff]  ;;  %v7255_v35 = vld [vmem:[#allocation8 + $0x530] sm:$0xff] }
0x175b   :  { %v11794_v40 = vpack.c.bf16 %v7253_v50, %v7249_v43  ;;  %v11826_v57 = vpack.c.bf16 %v7255_v35, %v7251_v42  ;;  %v7904_v43 = vld [vmem:[#allocation9 + $0x230] sm:$0xff]  ;;  %v7906_v35 = vld [vmem:[#allocation9 + $0x240] sm:$0xff] }
0x175c   :  { %7419 = vmatmul.mubr.f32.vlgmr.msra.gmra.mrb[48].mxu0 %v14483_v54  ;;  %7532 = vmatmul.mubr.f32.vlgmr.msra.gmra.mrb[48].mxu1 %v14483_v54  ;;  %v7242_v54 = vld [vmem:[#allocation8 + $0x4c8] sm:$0xff] }
0x175d   :  { %11779 = vmatpush1.bf16.msra.mxu0 %v11778_v3  ;;  %11811 = vmatpush1.bf16.msra.mxu1 %v11810_v24  ;;  %v11788_v45 = vpack.c.bf16 %v7246_v27, %v7242_v54  ;;  %v7261_v3 = vld [vmem:[#allocation8 + $0x560] sm:$0xff]  ;;  %v7259_v24 = vld [vmem:[#allocation8 + $0x550] sm:$0xff] }
0x175e   :  { %7424 = vmatprep.mubr.f32.mxu0 %v15629_v31  ;;  %7537 = vmatprep.mubr.f32.mxu1 %v15629_v31  ;;  %v11798_v58 = vpack.c.bf16 %v7261_v3, %v7257_v28  ;;  %v11830_v49 = vpack.c.bf16 %v7263_v7, %v7259_v24  ;;  %v7273_v27 = vld [vmem:[#allocation8 + $0x5c0] sm:$0xff] }
0x175f   :  { %11781 = vmatprep.subr.bf16.mxu0 %v11780_v63  ;;  %11813 = vmatprep.subr.bf16.mxu1 %v11812_v61  ;;  %v7268_v63 = vld [vmem:[#allocation8 + $0x598] sm:$0xff]  ;;  %v7914_v3 = vld [vmem:[#allocation9 + $0x280] sm:$0xff] }
0x1760   :  { %7425 = vmatmul.mubr.f32.gmra.mrb[50].mxu0 %v14472_v48  ;;  %7538 = vmatmul.mubr.f32.gmra.mrb[50].mxu1 %v14472_v48  ;;  %v7250_v48 = vld [vmem:[#allocation8 + $0x508] sm:$0xff]  ;;  %v7272_v61 = vld [vmem:[#allocation8 + $0x5b8] sm:$0xff]  ;;  %v7918_v24 = vld [vmem:[#allocation9 + $0x2a0] sm:$0xff] }
0x1761   :  { %11783 = vmatpush1.bf16.msra.mxu0 %v11782_v46  ;;  %11815 = vmatpush1.bf16.msra.mxu1 %v11814_v20  ;;  %v11792_v37 = vpack.c.bf16 %v7254_v8, %v7250_v48  ;;  %v7267_v46 = vld [vmem:[#allocation8 + $0x590] sm:$0xff]  ;;  %v11832_v38 = vpack.c.bf16 %v7272_v61, %v7268_v63  ;;  %v7898_v48 = vld [vmem:[#allocation9 + $0x200] sm:$0xff]  ;;  %v7923_v63 = vld [vmem:[#allocation9 + $0x2c8] sm:$0xff] }
0x1762   :  { %7430 = vmatprep.mubr.f32.mxu0 %v15629_v31  ;;  %7543 = vmatprep.mubr.f32.mxu1 %v15629_v31  ;;  %v7271_v20 = vld [vmem:[#allocation8 + $0x5b0] sm:$0xff]  ;;  %v7902_v8 = vld [vmem:[#allocation9 + $0x220] sm:$0xff]  ;;  %v7927_v61 = vld [vmem:[#allocation9 + $0x2e8] sm:$0xff] }
0x1763   :  { %11785 = vmatprep.subr.bf16.mxu0 %v11784_v9  ;;  %11817 = vmatprep.subr.bf16.mxu1 %v11816_v33  ;;  %v7280_v9 = vld [vmem:[#allocation8 + $0x5f8] sm:$0xff]  ;;  %v11802_v33 = vpack.c.bf16 %v7269_v60, %v7265_v59  ;;  %v11834_v54 = vpack.c.bf16 %v7271_v20, %v7267_v46  ;;  %v15076_v50 = vpack.c.bf16 %v7902_v8, %v7898_v48  ;;  %v7922_v59 = vld [vmem:[#allocation9 + $0x2c0] sm:$0xff] }
0x1764   :  { %7431 = vmatmul.mubr.f32.gmra.mrb[52].mxu0 %v14444_v19  ;;  %7544 = vmatmul.mubr.f32.gmra.mrb[52].mxu1 %v14444_v19  ;;  %v7258_v19 = vld [vmem:[#allocation8 + $0x548] sm:$0xff]  ;;  %v11836_v12 = vpack.c.bf16 %v7280_v9, %v7276_v41  ;;  %v7926_v60 = vld [vmem:[#allocation9 + $0x2e0] sm:$0xff]  ;;  %v15115_v46 = vpack.c.bf16 %v7927_v61, %v7923_v63  ;;  %v7925_v20 = vld [vmem:[#allocation9 + $0x2d8] sm:$0xff] }
0x1765   :  { %11787 = vmatpush1.bf16.msra.mxu0 %v11786_v47  ;;  %11819 = vmatpush1.bf16.msra.mxu1 %v11818_v16  ;;  %v11796_v25 = vpack.c.bf16 %v7262_v30, %v7258_v19  ;;  %v7279_v47 = vld [vmem:[#allocation8 + $0x5f0] sm:$0xff]  ;;  %v7913_v19 = vld [vmem:[#allocation9 + $0x278] sm:$0xff]  ;;  %v7931_v41 = vld [vmem:[#allocation9 + $0x308] sm:$0xff] }
0x1766   :  { %7436 = vmatprep.mubr.f32.mxu0 %v15629_v31  ;;  %7549 = vmatprep.mubr.f32.mxu1 %v15629_v31  ;;  %v7908_v30 = vld [vmem:[#allocation9 + $0x250] sm:$0xff]  ;;  %v7935_v9 = vld [vmem:[#allocation9 + $0x328] sm:$0xff]  ;;  %v7938_v8 = vld [vmem:[#allocation9 + $0x340] sm:$0xff] }
0x1767   :  { %11789 = vmatprep.subr.bf16.mxu0 %v11788_v45  ;;  %11821 = vmatprep.subr.bf16.mxu1 %v11820_v4  ;;  %v11806_v45 = vpack.c.bf16 %v7277_v2, %v7273_v27  ;;  %v11838_v4 = vpack.c.bf16 %v7279_v47, %v7275_v13  ;;  %v7930_v27 = vld [vmem:[#allocation9 + $0x300] sm:$0xff]  ;;  %v15131_v47 = vpack.c.bf16 %v7935_v9, %v7931_v41  ;;  %v7948_v63 = vld [vmem:[#allocation9 + $0x390] sm:$0xff]  ;;  %v15638_v61 = vld [vmem:[#allocation21_spill] sm:$0xff] }
0x1768   :  { %7437 = vmatmul.mubr.f32.gmra.mrb[54].mxu0 %v14399_v10  ;;  %7550 = vmatmul.mubr.f32.gmra.mrb[54].mxu1 %v14399_v10  ;;  %v7266_v10 = vld [vmem:[#allocation8 + $0x588] sm:$0xff]  ;;  %v7934_v2 = vld [vmem:[#allocation9 + $0x320] sm:$0xff] }
0x1769   :  { %11791 = vmatpush1.bf16.msra.mxu0 %v11790_v23  ;;  %11823 = vmatpush1.bf16.msra.mxu1 %v11822_v52  ;;  %v11800_v0 = vpack.c.bf16 %v7270_v29, %v7266_v10  ;;  %v7911_v23 = vld [vmem:[#allocation9 + $0x268] sm:$0xff]  ;;  %v7900_v52 = vld [vmem:[#allocation9 + $0x210] sm:$0xff] }
0x176a   :  { %7442 = vmatprep.mubr.f32.mxu0 %v15629_v31  ;;  %7555 = vmatprep.mubr.f32.mxu1 %v15629_v31  ;;  %v7916_v10 = vld [vmem:[#allocation9 + $0x290] sm:$0xff] }
0x176b   :  { %11793 = vmatprep.subr.bf16.mxu0 %v11792_v37  ;;  %11825 = vmatprep.subr.bf16.mxu1 %v11824_v11  ;;  %v7910_v37 = vld [vmem:[#allocation9 + $0x260] sm:$0xff]  ;;  %v15084_v11 = vpack.c.bf16 %v7904_v43, %v7900_v52  ;;  %v7920_v29 = vld [vmem:[#allocation9 + $0x2b0] sm:$0xff]  ;;  %v7941_v43 = vld [vmem:[#allocation9 + $0x358] sm:$0xff] }
0x176c   :  { %7443 = vmatmul.mubr.f32.gmra.mrb[56].mxu0 %v14353_v6  ;;  %7556 = vmatmul.mubr.f32.gmra.mrb[56].mxu1 %v14353_v6  ;;  %v7274_v6 = vld [vmem:[#allocation8 + $0x5c8] sm:$0xff] }
0x176d   :  { %11795 = vmatpush1.bf16.msra.mxu0 %v11794_v40  ;;  %11827 = vmatpush1.bf16.msra.mxu1 %v11826_v57  ;;  %v11804_v16 = vpack.c.bf16 %v7278_v56, %v7274_v6  ;;  %v7912_v40 = vld [vmem:[#allocation9 + $0x270] sm:$0xff]  ;;  %v15090_v57 = vpack.c.bf16 %v7910_v37, %v7906_v35  ;;  %v15635_v6 = vld [vmem:[#allocation18_spill] sm:$0xff]  ;;  %v7945_v35 = vld [vmem:[#allocation9 + $0x378] sm:$0xff] }
0x176e   :  { %7448 = vmatprep.mubr.f32.mxu0 %v15629_v31  ;;  %7561 = vmatprep.mubr.f32.mxu1 %v15629_v31  ;;  %v15099_v7 = vpack.c.bf16 %v7912_v40, %v7908_v30  ;;  %v7928_v56 = vld [vmem:[#allocation9 + $0x2f0] sm:$0xff]  ;;  %v7947_v30 = vld [vmem:[#allocation9 + $0x388] sm:$0xff]  ;;  %v15157_v40 = vpack.c.bf16 %v7945_v35, %v7941_v43 }
0x176f   :  { %11797 = vmatprep.subr.bf16.mxu0 %v11796_v25  ;;  %11829 = vmatprep.subr.bf16.mxu1 %v11828_v17  ;;  %v7917_v25 = vld [vmem:[#allocation9 + $0x298] sm:$0xff]  ;;  %v7940_v37 = vld [vmem:[#allocation9 + $0x350] sm:$0xff] }
0x1770   :  { %7449 = vmatmul.mubr.f32.gmra.mrb[58].mxu0 %v14276_v1  ;;  %7562 = vmatmul.mubr.f32.gmra.mrb[58].mxu1 %v14276_v1  ;;  %v7899_v1 = vld [vmem:[#allocation9 + $0x208] sm:$0xff]  ;;  %v7921_v17 = vld [vmem:[#allocation9 + $0x2b8] sm:$0xff] }
0x1771   :  { %11799 = vmatpush1.bf16.msra.mxu0 %v11798_v58  ;;  %11831 = vmatpush1.bf16.msra.mxu1 %v11830_v49  ;;  %v15070_v53 = vpack.c.bf16 %v7903_v36, %v7899_v1  ;;  %v15105_v58 = vpack.c.bf16 %v7918_v24, %v7914_v3  ;;  %v15109_v49 = vpack.c.bf16 %v7921_v17, %v7917_v25  ;;  %v7932_v1 = vld [vmem:[#allocation9 + $0x310] sm:$0xff]  ;;  %v15636_v36 = vld [vmem:[#allocation19_spill] sm:$0xff]  ;;  %v7946_v3 = vld [vmem:[#allocation9 + $0x380] sm:$0xff] }
0x1772   :  { %7454 = vmatprep.mubr.f32.mxu0 %v15629_v31  ;;  %7567 = vmatprep.mubr.f32.mxu1 %v15629_v31  ;;  %v7949_v24 = vld [vmem:[#allocation9 + $0x398] sm:$0xff] }
0x1773   :  { %11801 = vmatprep.subr.bf16.mxu0 %v11800_v0  ;;  %11833 = vmatprep.subr.bf16.mxu1 %v11832_v38  ;;  %v7929_v0 = vld [vmem:[#allocation9 + $0x2f8] sm:$0xff]  ;;  %v7924_v38 = vld [vmem:[#allocation9 + $0x2d0] sm:$0xff] }
0x1774   :  { %7455 = vmatmul.mubr.f32.gmra.mrb[60].mxu0 %v14196_v44  ;;  %7568 = vmatmul.mubr.f32.gmra.mrb[60].mxu1 %v14196_v44  ;;  %v7907_v44 = vld [vmem:[#allocation9 + $0x248] sm:$0xff]  ;;  %v15129_v13 = vpack.c.bf16 %v7928_v56, %v7924_v38  ;;  %v7961_v56 = vld [vmem:[#allocation9 + $0x3f8] sm:$0xff] }
0x1775   :  { %11803 = vmatpush1.bf16.msra.mxu0 %v11802_v33  ;;  %11835 = vmatpush1.bf16.msra.mxu1 %v11834_v54  ;;  %v15080_v42 = vpack.c.bf16 %v7911_v23, %v7907_v44  ;;  %v15123_v33 = vpack.c.bf16 %v7926_v60, %v7922_v59  ;;  %v15125_v54 = vpack.c.bf16 %v7929_v0, %v7925_v20  ;;  %v7942_v44 = vld [vmem:[#allocation9 + $0x360] sm:$0xff]  ;;  %v7952_v59 = vld [vmem:[#allocation9 + $0x3b0] sm:$0xff]  ;;  %v7955_v60 = vld [vmem:[#allocation9 + $0x3c8] sm:$0xff] }
0x1776   :  { %7460 = vmatprep.mubr.f32.mxu0 %v15629_v31  ;;  %7573 = vmatprep.mubr.f32.mxu1 %v15629_v31  ;;  %v15145_v23 = vpack.c.bf16 %v7936_v55, %v7932_v1  ;;  %v7959_v20 = vld [vmem:[#allocation9 + $0x3e8] sm:$0xff]  ;;  %v15177_v41 = vpack.c.bf16 %v7952_v59, %v7948_v63  ;;  %v7960_v1 = vld [vmem:[#allocation9 + $0x3f0] sm:$0xff] }
0x1777   :  { %11805 = vmatprep.subr.bf16.mxu0 %v11804_v16  ;;  %11837 = vmatprep.subr.bf16.mxu1 %v11836_v12  ;;  %v7933_v16 = vld [vmem:[#allocation9 + $0x318] sm:$0xff]  ;;  %v15179_v9 = vpack.c.bf16 %v7959_v20, %v7955_v60 }
0x1778   :  { %7461 = vmatmul.mubr.f32.gmra.mrb[62].mxu0 %v14151_v14  ;;  %7574 = vmatmul.mubr.f32.gmra.mrb[62].mxu1 %v14151_v14  ;;  %v7909_v14 = vld [vmem:[#allocation9 + $0x258] sm:$0xff] }
0x1779   :  { %11807 = vmatpush1.bf16.msra.mxu0 %v11806_v45  ;;  %11839 = vmatpush1.bf16.msra.mxu1 %v11838_v4  ;;  %v15094_v28 = vpack.c.bf16 %v7913_v19, %v7909_v14  ;;  %v7937_v12 = vld [vmem:[#allocation9 + $0x338] sm:$0xff]  ;;  %v7943_v45 = vld [vmem:[#allocation9 + $0x368] sm:$0xff]  ;;  %v15139_v4 = vpack.c.bf16 %v7934_v2, %v7930_v27  ;;  %v15637_v14 = vld [vmem:[#allocation20_spill] sm:$0xff] }
0x177a   :  { %7644 = vmatprep.mubr.f32.mxu0 %v15629_v31  ;;  %7757 = vmatprep.mubr.f32.mxu1 %v15629_v31  ;;  %v15141_v48 = vpack.c.bf16 %v7937_v12, %v7933_v16  ;;  %v15147_v52 = vpack.c.bf16 %v7943_v45, %v7939_v51  ;;  %v7944_v19 = vld [vmem:[#allocation9 + $0x370] sm:$0xff]  ;;  %v7954_v27 = vld [vmem:[#allocation9 + $0x3c0] sm:$0xff]  ;;  %v15640_v45 = vld [vmem:[#allocation23_spill] sm:$0xff] }
0x177b   :  { %11841 = vmatprep.subr.bf16.mxu0 %v15070_v53  ;;  %11873 = vmatprep.subr.bf16.mxu1 %v15072_v18  ;;  %v15161_v25 = vpack.c.bf16 %v7944_v19, %v7940_v37  ;;  %v7958_v2 = vld [vmem:[#allocation9 + $0x3e0] sm:$0xff]  ;;  %v7956_v12 = vld [vmem:[#allocation9 + $0x3d0] sm:$0xff] }
0x177c   :  { %7645 = vmatmul.mubr.f32.vlgmr.msra.gmra.mrb[48].mxu0 %v13612_v39  ;;  %7758 = vmatmul.mubr.f32.vlgmr.msra.gmra.mrb[48].mxu1 %v13612_v39  ;;  %v15097_v39 = vpack.c.bf16 %v7919_v5, %v7915_v26  ;;  %v7951_v26 = vld [vmem:[#allocation9 + $0x3a8] sm:$0xff]  ;;  %v15155_v5 = vpack.c.bf16 %v7942_v44, %v7938_v8  ;;  %v15639_v16 = vld [vmem:[#allocation22_spill] sm:$0xff]  ;;  %v15189_v55 = vpack.c.bf16 %v7958_v2, %v7954_v27 }
0x177d   :  { %11843 = vmatpush1.bf16.msra.mxu0 %v15076_v50  ;;  %7650 = vmatprep.mubr.f32.mxu0 %v15629_v31  ;;  %v15163_v17 = vpack.c.bf16 %v7951_v26, %v7947_v30  ;;  %v15193_v51 = vpack.c.bf16 %v7960_v1, %v7956_v12  ;;  %v9887_v27 = vld [vmem:[%s15595_s6 + $0x4] sm:$0xf]  ;;  %v15642_v12 = vld [vmem:[#allocation15_spill] sm:$0xff] }
0x177e   :  { %7763 = vmatprep.mubr.f32.mxu1 %v15629_v31  ;;  %11845 = vmatprep.subr.bf16.mxu0 %v15080_v42  ;;  %v15641_v2 = vld [vmem:[#allocation14_spill] sm:$0xff]  ;;  %v15255_v1 = vrot.slane %v9887_v27, %v15642_v12 }
0x177f   :  { %11875 = vmatpush1.bf16.msra.mxu1 %v15084_v11 }
0x1780   :  { %7651 = vmatmul.mubr.f32.gmra.mrb[50].mxu0 %v13656_v21  ;;  %7764 = vmatmul.mubr.f32.gmra.mrb[50].mxu1 %v13656_v21  ;;  %v15113_v21 = vpack.c.bf16 %v7920_v29, %v7916_v10  ;;  %v7950_v10 = vld [vmem:[#allocation9 + $0x3a0] sm:$0xff]  ;;  %v7953_v29 = vld [vmem:[#allocation9 + $0x3b8] sm:$0xff] }
0x1781   :  { %11847 = vmatpush1.bf16.msra.mxu0 %v15090_v57  ;;  %7656 = vmatprep.mubr.f32.mxu0 %v15629_v31  ;;  %v15171_v0 = vpack.c.bf16 %v7950_v10, %v7946_v3  ;;  %v15173_v38 = vpack.c.bf16 %v7953_v29, %v7949_v24 }
0x1782   :  { %7769 = vmatprep.mubr.f32.mxu1 %v15629_v31  ;;  %11877 = vmatprep.subr.bf16.mxu1 %v15094_v28 }
0x1783   :  { %11849 = vmatprep.subr.bf16.mxu0 %v15097_v39  ;;  %11879 = vmatpush1.bf16.msra.mxu1 %v15099_v7 }
0x1784   :  { %7657 = vmatmul.mubr.f32.gmra.mrb[52].mxu0 %v15635_v6  ;;  %7770 = vmatmul.mubr.f32.gmra.mrb[52].mxu1 %v15635_v6  ;;  %v7957_v6 = vld [vmem:[#allocation9 + $0x3d8] sm:$0xff] }
0x1785   :  { %11851 = vmatpush1.bf16.msra.mxu0 %v15105_v58  ;;  %7662 = vmatprep.mubr.f32.mxu0 %v15629_v31 }
0x1786   :  { %7775 = vmatprep.mubr.f32.mxu1 %v15629_v31  ;;  %11881 = vmatprep.subr.bf16.mxu1 %v15109_v49 }
0x1787   :  { %11883 = vmatpush1.bf16.msra.mxu1 %v15113_v21  ;;  %11853 = vmatprep.subr.bf16.mxu0 %v15115_v46 }
0x1788   :  { %7663 = vmatmul.mubr.f32.gmra.mrb[54].mxu0 %v15636_v36  ;;  %7776 = vmatmul.mubr.f32.gmra.mrb[54].mxu1 %v15636_v36  ;;  %v15185_v36 = vpack.c.bf16 %v7961_v56, %v7957_v6 }
0x1789   :  { %7668 = vmatprep.mubr.f32.mxu0 %v15629_v31  ;;  %7781 = vmatprep.mubr.f32.mxu1 %v15629_v31 }
0x178a   :  { %11855 = vmatpush1.bf16.msra.mxu0 %v15123_v33  ;;  %11885 = vmatprep.subr.bf16.mxu1 %v15125_v54 }
0x178b   :  { %11887 = vmatpush1.bf16.msra.mxu1 %v15129_v13  ;;  %11857 = vmatprep.subr.bf16.mxu0 %v15131_v47 }
0x178c   :  { %7669 = vmatmul.mubr.f32.gmra.mrb[56].mxu0 %v15637_v14  ;;  %7782 = vmatmul.mubr.f32.gmra.mrb[56].mxu1 %v15637_v14 }
0x178d   :  { %7674 = vmatprep.mubr.f32.mxu0 %v15629_v31  ;;  %7787 = vmatprep.mubr.f32.mxu1 %v15629_v31 }
0x178e   :  { %11859 = vmatpush1.bf16.msra.mxu0 %v15139_v4  ;;  %11889 = vmatprep.subr.bf16.mxu1 %v15141_v48 }
0x178f   :  { %11891 = vmatpush1.bf16.msra.mxu1 %v15145_v23  ;;  %11861 = vmatprep.subr.bf16.mxu0 %v15147_v52 }
0x1790   :  { %7675 = vmatmul.mubr.f32.gmra.mrb[58].mxu0 %v15638_v61  ;;  %7788 = vmatmul.mubr.f32.gmra.mrb[58].mxu1 %v15638_v61 }
0x1791   :  { %7680 = vmatprep.mubr.f32.mxu0 %v15629_v31  ;;  %7793 = vmatprep.mubr.f32.mxu1 %v15629_v31 }
0x1792   :  { %11863 = vmatpush1.bf16.msra.mxu0 %v15155_v5  ;;  %11893 = vmatprep.subr.bf16.mxu1 %v15157_v40 }
0x1793   :  { %11895 = vmatpush1.bf16.msra.mxu1 %v15161_v25  ;;  %11865 = vmatprep.subr.bf16.mxu0 %v15163_v17 }
0x1794   :  { %7681 = vmatmul.mubr.f32.gmra.mrb[60].mxu0 %v15639_v16  ;;  %7794 = vmatmul.mubr.f32.gmra.mrb[60].mxu1 %v15639_v16  ;;  %v15252_v16 = vrot.slane %v9887_v27, %v15641_v2 }
0x1795   :  { %7686 = vmatprep.mubr.f32.mxu0 %v15629_v31  ;;  %7799 = vmatprep.mubr.f32.mxu1 %v15629_v31 }
0x1796   :  { %11867 = vmatpush1.bf16.msra.mxu0 %v15171_v0  ;;  %11897 = vmatprep.subr.bf16.mxu1 %v15173_v38 }
0x1797   :  { %11899 = vmatpush1.bf16.msra.mxu1 %v15177_v41  ;;  %11869 = vmatprep.subr.bf16.mxu0 %v15179_v9 }
0x1798   :  { %7687 = vmatmul.mubr.f32.gmra.mrb[62].mxu0 %v15640_v45  ;;  %7800 = vmatmul.mubr.f32.gmra.mrb[62].mxu1 %v15640_v45 }
0x1799   :  { %11901 = vmatprep.subr.bf16.mxu1 %v15185_v36  ;;  %8026 = vmatprep.mubr.f32.mxu0 %v15629_v31 }
0x179a   :  { %11871 = vmatpush1.bf16.msra.mxu0 %v15189_v55  ;;  %8097 = vmatprep.mubr.f32.mxu1 %v15629_v31 }
0x179b   :  { %11903 = vmatpush1.bf16.msra.mxu1 %v15193_v51  ;;  %11905 = vmatprep.subr.bf16.mxu0 %v15070_v53 }
0x179c   :  { %11937 = vmatprep.subr.bf16.mxu1 %v15072_v18 }
0x17a0   :  { %8027 = vmatmul.mubr.f32.vlgmr.msra.gmra.mrb[62].mxu0 %v15629_v31  ;;  %8098 = vmatmul.mubr.f32.vlgmr.msra.gmra.mrb[62].mxu1 %v15629_v31 }
0x17a1   :  { %11907 = vmatpush1.bf16.msra.mxu0 %v15076_v50  ;;  %11939 = vmatpush1.bf16.msra.mxu1 %v15084_v11 }
0x17a2   :  { %11909 = vmatprep.subr.bf16.mxu0 %v15080_v42  ;;  %11941 = vmatprep.subr.bf16.mxu1 %v15094_v28 }
0x17a3   :  { %8266 = vmatprep.mubr.f32.mxu0 %v15629_v31  ;;  %8337 = vmatprep.mubr.f32.mxu1 %v15629_v31 }
0x17a5   :  { %11911 = vmatpush1.bf16.msra.mxu0 %v15090_v57  ;;  %11943 = vmatpush1.bf16.msra.mxu1 %v15099_v7 }
0x17a6   :  { %11913 = vmatprep.subr.bf16.mxu0 %v15097_v39  ;;  %11945 = vmatprep.subr.bf16.mxu1 %v15109_v49 }
0x17a9   :  { %11915 = vmatpush1.bf16.msra.mxu0 %v15105_v58  ;;  %11947 = vmatpush1.bf16.msra.mxu1 %v15113_v21 }
0x17aa   :  { %11917 = vmatprep.subr.bf16.mxu0 %v15115_v46  ;;  %11949 = vmatprep.subr.bf16.mxu1 %v15125_v54 }
0x17ad   :  { %11919 = vmatpush1.bf16.msra.mxu0 %v15123_v33  ;;  %11951 = vmatpush1.bf16.msra.mxu1 %v15129_v13 }
0x17ae   :  { %11921 = vmatprep.subr.bf16.mxu0 %v15131_v47  ;;  %11953 = vmatprep.subr.bf16.mxu1 %v15141_v48 }
0x17b1   :  { %11923 = vmatpush1.bf16.msra.mxu0 %v15139_v4  ;;  %11955 = vmatpush1.bf16.msra.mxu1 %v15145_v23 }
0x17b2   :  { %11925 = vmatprep.subr.bf16.mxu0 %v15147_v52  ;;  %11957 = vmatprep.subr.bf16.mxu1 %v15157_v40 }
0x17b5   :  { %11927 = vmatpush1.bf16.msra.mxu0 %v15155_v5  ;;  %11959 = vmatpush1.bf16.msra.mxu1 %v15161_v25 }
0x17b6   :  { %11929 = vmatprep.subr.bf16.mxu0 %v15163_v17  ;;  %11961 = vmatprep.subr.bf16.mxu1 %v15173_v38 }
0x17b9   :  { %11931 = vmatpush1.bf16.msra.mxu0 %v15171_v0  ;;  %11963 = vmatpush1.bf16.msra.mxu1 %v15177_v41 }
0x17ba   :  { %11933 = vmatprep.subr.bf16.mxu0 %v15179_v9  ;;  %11965 = vmatprep.subr.bf16.mxu1 %v15185_v36 }
0x17bd   :  { %11935 = vmatpush1.bf16.msra.mxu0 %v15189_v55  ;;  %11967 = vmatpush1.bf16.msra.mxu1 %v15193_v51 }
0x17be   :  { %11969 = vmatprep.subr.bf16.mxu0 %v15070_v53  ;;  %12001 = vmatprep.subr.bf16.mxu1 %v15072_v18 }
0x180f   :  { %v7103_v8 = vpop.f32.mrb[46].mxu0  ;;  %v7174_v44 = vpop.f32.mrb[46].mxu1 }
0x1810   :  { %v12430_v43 = vadd.f32 %v7103_v8, %v14687_v15  ;;  %v7105_v35 = vpop.f32.mrb[47].mxu0  ;;  %v7176_v37 = vpop.f32.mrb[47].mxu1  ;;  %v12446_v24 = vadd.f32 %v7174_v44, %v14699_v62 }
0x1811   :  { %v12431_v14 = vadd.f32 %v7105_v35, %v14690_v32  ;;  %v12447_v26 = vadd.f32 %v7176_v37, %v14695_v34 }
0x1812   :  { %v9884_v19 = vmul.f32 -1.442695, %v12430_v43 }
0x1813   :  { %v9885_v30 = vmul.f32 -1.442695, %v12431_v14  ;;  %v9886_v3 = vmul.f32 -1.442695, %v12447_v26 }
0x1814   :  { %13047 = vpow2.f32 %v9884_v19  ;;  %v15643_v19 = vld [vmem:[#allocation16_spill] sm:$0xff] }
0x1815   :  { %13049 = vpow2.f32 %v9885_v30  ;;  %v15260_v30 = vrot.slane %v9887_v27, %v15643_v19  ;;  %v8621_v19 = vld [vmem:[#allocation9 + $0x228] sm:$0xff] }
0x1816   :  { %13051 = vpow2.f32 %v9886_v3  ;;  %v15644_v3 = vld [vmem:[#allocation17_spill] sm:$0xff] }
0x1817   :  { %13053 = vtanh.f32 %v12446_v24  ;;  %v15264_v24 = vrot.slane %v9887_v27, %v15644_v3 }
0x181e   :  { %v13048_v53 = vpop.eup %13047 }
0x181f   :  { %v13050_v10 = vpop.eup %13049  ;;  %v7186_v18 = vadd.f32 1.0, %v13048_v53 }
0x1820   :  { %v7192_v29 = vadd.f32 1.0, %v13050_v10  ;;  %v13052_v15 = vpop.eup %13051 }
0x1821   :  { %13055 = vrcp.f32 %v7186_v18  ;;  %v13054_v63 = vpop.eup %13053  ;;  %v7199_v60 = vadd.f32 1.0, %v13052_v15 }
0x1822   :  { %13057 = vrcp.f32 %v7192_v29 }
0x1823   :  { %13059 = vrcp.f32 %v7199_v60 }
0x182b   :  { %v13056_v32 = vpop.eup %13055 }
0x182c   :  { %v13058_v61 = vpop.eup %13057  ;;  %v7203_v59 = vmul.f32 %v13056_v32, %v13054_v63 }
0x182d   :  { %v7202_v20 = vmul.f32 %v13058_v61, %v15034_v22  ;;  %v13060_v62 = vpop.eup %13059 }
0x182f   :  { %v7204_v34 = vadd.f32 %v7203_v59, %v7202_v20 }
0x1831   :  { %13061 = vtanh.f32 %v7204_v34 }
0x183b   :  { %v13062_v6 = vpop.eup %13061 }
0x183c   :  { %v7206_v56 = vmul.f32 %v13062_v6, %v13060_v62 }
0x183e   :  { %7207 = vst [vmem:[%s15596_s7 + $0x38] sm:$0xff] %v7206_v56 }
0x1873   :  { %v8028_v22 = vpop.f32.mrb[62].mxu0  ;;  %v8099_v45 = vpop.f32.mrb[62].mxu1 }
0x1874   :  { %v12462_v8 = vadd.f32 %v8028_v22, %v15252_v16  ;;  %v8030_v44 = vpop.f32.mrb[63].mxu0  ;;  %v8101_v43 = vpop.f32.mrb[63].mxu1  ;;  %v12478_v10 = vadd.f32 %v8099_v45, %v15264_v24 }
0x1875   :  { %v12463_v35 = vadd.f32 %v8030_v44, %v15255_v1  ;;  %v12479_v26 = vadd.f32 %v8101_v43, %v15260_v30 }
0x1876   :  { %v9888_v37 = vmul.f32 -1.442695, %v12462_v8 }
0x1877   :  { %v9889_v14 = vmul.f32 -1.442695, %v12463_v35  ;;  %v9890_v53 = vmul.f32 -1.442695, %v12479_v26  ;;  %v8619_v26 = vld [vmem:[#allocation9 + $0x218] sm:$0xff] }
0x1878   :  { %13063 = vpow2.f32 %v9888_v37 }
0x1879   :  { %13065 = vpow2.f32 %v9889_v14  ;;  %v8617_v14 = vld [vmem:[#allocation9 + $0x208] sm:$0xff] }
0x187a   :  { %13067 = vpow2.f32 %v9890_v53  ;;  %v15318_v3 = vpack.c.bf16 %v8621_v19, %v8617_v14  ;;  %v8623_v53 = vld [vmem:[#allocation9 + $0x238] sm:$0xff]  ;;  %v8646_v14 = vld [vmem:[#allocation9 + $0x2f0] sm:$0xff] }
0x187b   :  { %13069 = vtanh.f32 %v12478_v10  ;;  %v8616_v10 = vld [vmem:[#allocation9 + $0x200] sm:$0xff] }
0x1882   :  { %v13064_v18 = vpop.eup %13063 }
0x1883   :  { %v13066_v29 = vpop.eup %13065  ;;  %v8111_v15 = vadd.f32 1.0, %v13064_v18  ;;  %v8620_v18 = vld [vmem:[#allocation9 + $0x220] sm:$0xff] }
0x1884   :  { %v8117_v63 = vadd.f32 1.0, %v13066_v29  ;;  %v13068_v32 = vpop.eup %13067  ;;  %v15320_v29 = vpack.c.bf16 %v8623_v53, %v8619_v26  ;;  %v8649_v26 = vld [vmem:[#allocation9 + $0x308] sm:$0xff] }
0x1885   :  { %13071 = vrcp.f32 %v8111_v15  ;;  %v13070_v61 = vpop.eup %13069  ;;  %v8124_v34 = vadd.f32 1.0, %v13068_v32  ;;  %v15322_v15 = vpack.c.bf16 %v8620_v18, %v8616_v10  ;;  %v8622_v32 = vld [vmem:[#allocation9 + $0x230] sm:$0xff]  ;;  %v8653_v53 = vld [vmem:[#allocation9 + $0x328] sm:$0xff]  ;;  %v8648_v18 = vld [vmem:[#allocation9 + $0x300] sm:$0xff] }
0x1886   :  { %13073 = vrcp.f32 %v8117_v63  ;;  %v8618_v63 = vld [vmem:[#allocation9 + $0x210] sm:$0xff]  ;;  %v15366_v10 = vpack.c.bf16 %v8653_v53, %v8649_v26  ;;  %v8898_v26 = vld [vmem:[#allocation9 + $0x358] sm:$0xff] }
0x1887   :  { %13075 = vrcp.f32 %v8124_v34 }
0x188f   :  { %v13072_v59 = vpop.eup %13071 }
0x1890   :  { %v13074_v60 = vpop.eup %13073  ;;  %v8128_v20 = vmul.f32 %v13072_v59, %v13070_v61  ;;  %v15325_v61 = vpack.c.bf16 %v8622_v32, %v8618_v63  ;;  %v8625_v59 = vld [vmem:[#allocation9 + $0x248] sm:$0xff]  ;;  %v8652_v63 = vld [vmem:[#allocation9 + $0x320] sm:$0xff]  ;;  %v8650_v32 = vld [vmem:[#allocation9 + $0x310] sm:$0xff] }
0x1891   :  { %v8127_v62 = vmul.f32 0.0, %v13074_v60  ;;  %v13076_v56 = vpop.eup %13075  ;;  %v8629_v60 = vld [vmem:[#allocation9 + $0x268] sm:$0xff] }
0x1892   :  { %v15330_v34 = vpack.c.bf16 %v8629_v60, %v8625_v59  ;;  %v15369_v59 = vpack.c.bf16 %v8652_v63, %v8648_v18  ;;  %v8654_v60 = vld [vmem:[#allocation9 + $0x330] sm:$0xff]  ;;  %v8902_v18 = vld [vmem:[#allocation9 + $0x378] sm:$0xff] }
0x1893   :  { %v15267_v6 = vadd.f32 %v8128_v20, %v8127_v62  ;;  %v8627_v20 = vld [vmem:[#allocation9 + $0x258] sm:$0xff]  ;;  %v8897_v63 = vld [vmem:[#allocation9 + $0x350] sm:$0xff] }
0x1894   :  { %v8631_v62 = vld [vmem:[#allocation9 + $0x278] sm:$0xff] }
0x1895   :  { %13077 = vtanh.f32 %v15267_v6 }
0x189f   :  { %v13078_v27 = vpop.eup %13077 }
0x18a0   :  { %v8131_v2 = vmul.f32 %v13078_v27, %v13076_v56  ;;  %v8628_v56 = vld [vmem:[#allocation9 + $0x260] sm:$0xff]  ;;  %v15332_v27 = vpack.c.bf16 %v8631_v62, %v8627_v20  ;;  %v15372_v20 = vpack.c.bf16 %v8654_v60, %v8650_v32  ;;  %v8901_v32 = vld [vmem:[#allocation9 + $0x370] sm:$0xff]  ;;  %v15427_v60 = vpack.c.bf16 %v8902_v18, %v8898_v26 }
0x18a1   :  { %v8656_v62 = vld [vmem:[#allocation9 + $0x340] sm:$0xff] }
0x18a2   :  { %9891 = vst [vmem:[%s15596_s7 + $0x78] sm:$0xff] %v8131_v2  ;;  %8267 = vmatmul.mubr.f32.vlgmr.msra.gmra.mrb[60].mxu0 %v8131_v2  ;;  %8338 = vmatmul.mubr.f32.vlgmr.msra.gmra.mrb[60].mxu1 %v8131_v2 }
0x18a3   :  { %11971 = vmatpush1.bf16.msra.mxu0 %v15076_v50  ;;  %12003 = vmatpush1.bf16.msra.mxu1 %v15084_v11 }
0x18a4   :  { %11973 = vmatprep.subr.bf16.mxu0 %v15080_v42  ;;  %12005 = vmatprep.subr.bf16.mxu1 %v15094_v28 }
0x18a5   :  { %8505 = vmatprep.mubr.f32.mxu0 %v15629_v31  ;;  %8576 = vmatprep.mubr.f32.mxu1 %v15629_v31 }
0x18a7   :  { %11975 = vmatpush1.bf16.msra.mxu0 %v15090_v57  ;;  %12007 = vmatpush1.bf16.msra.mxu1 %v15099_v7 }
0x18a8   :  { %11977 = vmatprep.subr.bf16.mxu0 %v15097_v39  ;;  %12009 = vmatprep.subr.bf16.mxu1 %v15109_v49 }
0x18ab   :  { %11979 = vmatpush1.bf16.msra.mxu0 %v15105_v58  ;;  %12011 = vmatpush1.bf16.msra.mxu1 %v15113_v21 }
0x18ac   :  { %11981 = vmatprep.subr.bf16.mxu0 %v15115_v46  ;;  %12013 = vmatprep.subr.bf16.mxu1 %v15125_v54 }
0x18af   :  { %11983 = vmatpush1.bf16.msra.mxu0 %v15123_v33  ;;  %12015 = vmatpush1.bf16.msra.mxu1 %v15129_v13 }
0x18b0   :  { %11985 = vmatprep.subr.bf16.mxu0 %v15131_v47  ;;  %12017 = vmatprep.subr.bf16.mxu1 %v15141_v48 }
0x18b3   :  { %11987 = vmatpush1.bf16.msra.mxu0 %v15139_v4  ;;  %12019 = vmatpush1.bf16.msra.mxu1 %v15145_v23 }
0x18b4   :  { %11989 = vmatprep.subr.bf16.mxu0 %v15147_v52  ;;  %12021 = vmatprep.subr.bf16.mxu1 %v15157_v40 }
0x18b7   :  { %11991 = vmatpush1.bf16.msra.mxu0 %v15155_v5  ;;  %12023 = vmatpush1.bf16.msra.mxu1 %v15161_v25 }
0x18b8   :  { %11993 = vmatprep.subr.bf16.mxu0 %v15163_v17  ;;  %12025 = vmatprep.subr.bf16.mxu1 %v15173_v38 }
0x18bb   :  { %11995 = vmatpush1.bf16.msra.mxu0 %v15171_v0  ;;  %12027 = vmatpush1.bf16.msra.mxu1 %v15177_v41 }
0x18bc   :  { %11997 = vmatprep.subr.bf16.mxu0 %v15179_v9  ;;  %12029 = vmatprep.subr.bf16.mxu1 %v15185_v36 }
0x18bf   :  { %11999 = vmatpush1.bf16.msra.mxu0 %v15189_v55  ;;  %12031 = vmatpush1.bf16.msra.mxu1 %v15193_v51 }
0x18c0   :  { %12033 = vmatprep.subr.bf16.mxu0 %v15318_v3  ;;  %12065 = vmatprep.subr.bf16.mxu1 %v15320_v29 }
0x1975   :  { %v8268_v50 = vpop.f32.mrb[60].mxu0  ;;  %v8339_v42 = vpop.f32.mrb[60].mxu1 }
0x1976   :  { %v12460_v11 = vadd.f32 %v8268_v50, %v15252_v16  ;;  %v8270_v57 = vpop.f32.mrb[61].mxu0  ;;  %v8341_v28 = vpop.f32.mrb[61].mxu1  ;;  %v12476_v46 = vadd.f32 %v8339_v42, %v15264_v24  ;;  %v8626_v50 = vld [vmem:[#allocation9 + $0x250] sm:$0xff] }
0x1977   :  { %v12461_v39 = vadd.f32 %v8270_v57, %v15255_v1  ;;  %v12477_v49 = vadd.f32 %v8341_v28, %v15260_v30  ;;  %v8630_v42 = vld [vmem:[#allocation9 + $0x270] sm:$0xff]  ;;  %v8633_v57 = vld [vmem:[#allocation9 + $0x288] sm:$0xff] }
0x1978   :  { %v9892_v7 = vmul.f32 -1.442695, %v12460_v11  ;;  %v15337_v11 = vpack.c.bf16 %v8630_v42, %v8626_v50  ;;  %v8637_v28 = vld [vmem:[#allocation9 + $0x2a8] sm:$0xff] }
0x1979   :  { %v9893_v58 = vmul.f32 -1.442695, %v12461_v39  ;;  %v9894_v21 = vmul.f32 -1.442695, %v12477_v49  ;;  %v8635_v39 = vld [vmem:[#allocation9 + $0x298] sm:$0xff]  ;;  %v8632_v49 = vld [vmem:[#allocation9 + $0x280] sm:$0xff] }
0x197a   :  { %13079 = vpow2.f32 %v9892_v7  ;;  %v15342_v7 = vpack.c.bf16 %v8637_v28, %v8633_v57 }
0x197b   :  { %13081 = vpow2.f32 %v9893_v58  ;;  %v8639_v58 = vld [vmem:[#allocation9 + $0x2b8] sm:$0xff] }
0x197c   :  { %13083 = vpow2.f32 %v9894_v21  ;;  %v8636_v21 = vld [vmem:[#allocation9 + $0x2a0] sm:$0xff] }
0x197d   :  { %13085 = vtanh.f32 %v12476_v46  ;;  %v15344_v46 = vpack.c.bf16 %v8639_v58, %v8635_v39 }
0x1984   :  { %v13080_v33 = vpop.eup %13079 }
0x1985   :  { %v13082_v54 = vpop.eup %13081  ;;  %v8351_v13 = vadd.f32 1.0, %v13080_v33  ;;  %v15346_v33 = vpack.c.bf16 %v8636_v21, %v8632_v49 }
0x1986   :  { %v8357_v47 = vadd.f32 1.0, %v13082_v54  ;;  %v13084_v4 = vpop.eup %13083  ;;  %v8634_v54 = vld [vmem:[#allocation9 + $0x290] sm:$0xff] }
0x1987   :  { %13087 = vrcp.f32 %v8351_v13  ;;  %v13086_v23 = vpop.eup %13085  ;;  %v8364_v45 = vadd.f32 1.0, %v13084_v4  ;;  %v8638_v13 = vld [vmem:[#allocation9 + $0x2b0] sm:$0xff]  ;;  %v8641_v4 = vld [vmem:[#allocation9 + $0x2c8] sm:$0xff] }
0x1988   :  { %13089 = vrcp.f32 %v8357_v47  ;;  %v15349_v47 = vpack.c.bf16 %v8638_v13, %v8634_v54 }
0x1989   :  { %13091 = vrcp.f32 %v8364_v45  ;;  %v8640_v45 = vld [vmem:[#allocation9 + $0x2c0] sm:$0xff] }
0x1991   :  { %v13088_v5 = vpop.eup %13087 }
0x1992   :  { %v13090_v12 = vpop.eup %13089  ;;  %v8368_v22 = vmul.f32 %v13088_v5, %v13086_v23  ;;  %v8645_v23 = vld [vmem:[#allocation9 + $0x2e8] sm:$0xff]  ;;  %v8643_v5 = vld [vmem:[#allocation9 + $0x2d8] sm:$0xff] }
0x1993   :  { %v8367_v8 = vmul.f32 %v13090_v12, %v15267_v6  ;;  %v13092_v43 = vpop.eup %13091  ;;  %v8624_v6 = vld [vmem:[#allocation9 + $0x240] sm:$0xff]  ;;  %v15354_v12 = vpack.c.bf16 %v8645_v23, %v8641_v4 }
0x1994   :  { %v15334_v2 = vpack.c.bf16 %v8628_v56, %v8624_v6  ;;  %v8660_v6 = vld [vmem:[#allocation9 + $0x360] sm:$0xff] }
0x1995   :  { %v15310_v44 = vadd.f32 %v8368_v22, %v8367_v8  ;;  %v8647_v22 = vld [vmem:[#allocation9 + $0x2f8] sm:$0xff]  ;;  %v8644_v8 = vld [vmem:[#allocation9 + $0x2e0] sm:$0xff]  ;;  %v15375_v56 = vpack.c.bf16 %v8660_v6, %v8656_v62  ;;  %v15429_v62 = vpack.c.bf16 %v8901_v32, %v8897_v63  ;;  %v8904_v6 = vld [vmem:[#allocation9 + $0x388] sm:$0xff] }
0x1997   :  { %13093 = vtanh.f32 %v15310_v44 }
0x19a1   :  { %v13094_v35 = vpop.eup %13093 }
0x19a2   :  { %v8371_v37 = vmul.f32 %v13094_v35, %v13092_v43  ;;  %v15356_v43 = vpack.c.bf16 %v8647_v22, %v8643_v5  ;;  %v15358_v35 = vpack.c.bf16 %v8644_v8, %v8640_v45  ;;  %v8894_v45 = vld [vmem:[#allocation9 + $0x338] sm:$0xff] }
0x19a4   :  { %9895 = vst [vmem:[%s15596_s7 + $0x70] sm:$0xff] %v8371_v37  ;;  %8506 = vmatmul.mubr.f32.vlgmr.msra.gmra.mrb[58].mxu0 %v8371_v37  ;;  %8577 = vmatmul.mubr.f32.vlgmr.msra.gmra.mrb[58].mxu1 %v8371_v37  ;;  %v8642_v37 = vld [vmem:[#allocation9 + $0x2d0] sm:$0xff] }
0x19a5   :  { %8744 = vmatprep.mubr.f32.mxu0 %v15629_v31  ;;  %8815 = vmatprep.mubr.f32.mxu1 %v15629_v31  ;;  %v15361_v19 = vpack.c.bf16 %v8646_v14, %v8642_v37  ;;  %v8896_v37 = vld [vmem:[#allocation9 + $0x348] sm:$0xff] }
0x19a6   :  { %12035 = vmatpush1.bf16.msra.mxu0 %v15322_v15  ;;  %12067 = vmatpush1.bf16.msra.mxu1 %v15325_v61  ;;  %v8900_v14 = vld [vmem:[#allocation9 + $0x368] sm:$0xff] }
0x19a7   :  { %12037 = vmatprep.subr.bf16.mxu0 %v15330_v34  ;;  %12069 = vmatprep.subr.bf16.mxu1 %v15332_v27  ;;  %v15425_v53 = vpack.c.bf16 %v8900_v14, %v8896_v37 }
0x19aa   :  { %12039 = vmatpush1.bf16.msra.mxu0 %v15334_v2  ;;  %12071 = vmatpush1.bf16.msra.mxu1 %v15337_v11 }
0x19ab   :  { %12041 = vmatprep.subr.bf16.mxu0 %v15342_v7  ;;  %12073 = vmatprep.subr.bf16.mxu1 %v15344_v46 }
0x19ae   :  { %12043 = vmatpush1.bf16.msra.mxu0 %v15346_v33  ;;  %12075 = vmatpush1.bf16.msra.mxu1 %v15349_v47 }
0x19af   :  { %12045 = vmatprep.subr.bf16.mxu0 %v15354_v12  ;;  %12077 = vmatprep.subr.bf16.mxu1 %v15356_v43 }
0x19b2   :  { %12047 = vmatpush1.bf16.msra.mxu0 %v15358_v35  ;;  %12079 = vmatpush1.bf16.msra.mxu1 %v15361_v19 }
0x19b3   :  { %12081 = vmatprep.subr.bf16.mxu1 %v15141_v48  ;;  %12049 = vmatprep.subr.bf16.mxu0 %v15366_v10 }
0x19b6   :  { %12051 = vmatpush1.bf16.msra.mxu0 %v15369_v59  ;;  %12083 = vmatpush1.bf16.msra.mxu1 %v15372_v20 }
0x19b7   :  { %12053 = vmatprep.subr.bf16.mxu0 %v15147_v52  ;;  %12085 = vmatprep.subr.bf16.mxu1 %v15157_v40 }
0x19ba   :  { %12055 = vmatpush1.bf16.msra.mxu0 %v15375_v56  ;;  %12087 = vmatpush1.bf16.msra.mxu1 %v15161_v25 }
0x19bb   :  { %12057 = vmatprep.subr.bf16.mxu0 %v15163_v17  ;;  %12089 = vmatprep.subr.bf16.mxu1 %v15173_v38 }
0x19be   :  { %12059 = vmatpush1.bf16.msra.mxu0 %v15171_v0  ;;  %12091 = vmatpush1.bf16.msra.mxu1 %v15177_v41 }
0x19bf   :  { %12061 = vmatprep.subr.bf16.mxu0 %v15179_v9  ;;  %12093 = vmatprep.subr.bf16.mxu1 %v15185_v36 }
0x19c2   :  { %12063 = vmatpush1.bf16.msra.mxu0 %v15189_v55  ;;  %12095 = vmatpush1.bf16.msra.mxu1 %v15193_v51 }
0x19c3   :  { %12097 = vmatprep.subr.bf16.mxu0 %v15318_v3  ;;  %12129 = vmatprep.subr.bf16.mxu1 %v15320_v29 }
0x1a77   :  { %v8507_v48 = vpop.f32.mrb[58].mxu0  ;;  %v8578_v52 = vpop.f32.mrb[58].mxu1 }
0x1a78   :  { %v12458_v40 = vadd.f32 %v8507_v48, %v15252_v16  ;;  %v8509_v25 = vpop.f32.mrb[59].mxu0  ;;  %v8580_v17 = vpop.f32.mrb[59].mxu1  ;;  %v12474_v55 = vadd.f32 %v8578_v52, %v15264_v24  ;;  %v8908_v48 = vld [vmem:[#allocation9 + $0x3a8] sm:$0xff]  ;;  %v8906_v52 = vld [vmem:[#allocation9 + $0x398] sm:$0xff] }
0x1a79   :  { %v12459_v0 = vadd.f32 %v8509_v25, %v15255_v1  ;;  %v12475_v9 = vadd.f32 %v8580_v17, %v15260_v30  ;;  %v8910_v25 = vld [vmem:[#allocation9 + $0x3b8] sm:$0xff]  ;;  %v8903_v17 = vld [vmem:[#allocation9 + $0x380] sm:$0xff] }
0x1a7a   :  { %v9896_v38 = vmul.f32 -1.442695, %v12458_v40  ;;  %v15432_v40 = vpack.c.bf16 %v8908_v48, %v8904_v6 }
0x1a7b   :  { %v9897_v41 = vmul.f32 -1.442695, %v12459_v0  ;;  %v9898_v36 = vmul.f32 -1.442695, %v12475_v9  ;;  %v8907_v0 = vld [vmem:[#allocation9 + $0x3a0] sm:$0xff]  ;;  %v8905_v9 = vld [vmem:[#allocation9 + $0x390] sm:$0xff] }
0x1a7c   :  { %13095 = vpow2.f32 %v9896_v38  ;;  %v15436_v38 = vpack.c.bf16 %v8910_v25, %v8906_v52 }
0x1a7d   :  { %13097 = vpow2.f32 %v9897_v41  ;;  %v15438_v41 = vpack.c.bf16 %v8907_v0, %v8903_v17 }
0x1a7e   :  { %13099 = vpow2.f32 %v9898_v36  ;;  %v8909_v36 = vld [vmem:[#allocation9 + $0x3b0] sm:$0xff] }
0x1a7f   :  { %13101 = vtanh.f32 %v12474_v55  ;;  %v8912_v55 = vld [vmem:[#allocation9 + $0x3c8] sm:$0xff] }
0x1a86   :  { %v13096_v51 = vpop.eup %13095 }
0x1a87   :  { %v13098_v50 = vpop.eup %13097  ;;  %v8590_v42 = vadd.f32 1.0, %v13096_v51  ;;  %v15442_v51 = vpack.c.bf16 %v8909_v36, %v8905_v9 }
0x1a88   :  { %v8596_v57 = vadd.f32 1.0, %v13098_v50  ;;  %v13100_v28 = vpop.eup %13099  ;;  %v8916_v50 = vld [vmem:[#allocation9 + $0x3e8] sm:$0xff] }
0x1a89   :  { %13103 = vrcp.f32 %v8590_v42  ;;  %v13102_v39 = vpop.eup %13101  ;;  %v8603_v54 = vadd.f32 1.0, %v13100_v28  ;;  %v8914_v42 = vld [vmem:[#allocation9 + $0x3d8] sm:$0xff]  ;;  %v15445_v28 = vpack.c.bf16 %v8916_v50, %v8912_v55 }
0x1a8a   :  { %13105 = vrcp.f32 %v8596_v57  ;;  %v8918_v57 = vld [vmem:[#allocation9 + $0x3f8] sm:$0xff] }
0x1a8b   :  { %13107 = vrcp.f32 %v8603_v54  ;;  %v8917_v54 = vld [vmem:[#allocation9 + $0x3f0] sm:$0xff] }
0x1a93   :  { %v13104_v58 = vpop.eup %13103 }
0x1a94   :  { %v13106_v49 = vpop.eup %13105  ;;  %v8607_v21 = vmul.f32 %v13104_v58, %v13102_v39  ;;  %v15447_v39 = vpack.c.bf16 %v8918_v57, %v8914_v42  ;;  %v8911_v58 = vld [vmem:[#allocation9 + $0x3c0] sm:$0xff] }
0x1a95   :  { %v8606_v13 = vmul.f32 %v13106_v49, %v15310_v44  ;;  %v13108_v23 = vpop.eup %13107  ;;  %v8890_v44 = vld [vmem:[#allocation9 + $0x318] sm:$0xff]  ;;  %v8915_v49 = vld [vmem:[#allocation9 + $0x3e0] sm:$0xff] }
0x1a96   :  { %v15421_v8 = vpack.c.bf16 %v8894_v45, %v8890_v44 }
0x1a97   :  { %v15397_v4 = vadd.f32 %v8607_v21, %v8606_v13  ;;  %v8913_v21 = vld [vmem:[#allocation9 + $0x3d0] sm:$0xff]  ;;  %v15450_v13 = vpack.c.bf16 %v8915_v49, %v8911_v58 }
0x1a99   :  { %13109 = vtanh.f32 %v15397_v4 }
0x1aa3   :  { %v13110_v5 = vpop.eup %13109 }
0x1aa4   :  { %v8610_v22 = vmul.f32 %v13110_v5, %v13108_v23  ;;  %v15454_v23 = vpack.c.bf16 %v8917_v54, %v8913_v21 }
0x1aa6   :  { %9899 = vst [vmem:[%s15596_s7 + $0x68] sm:$0xff] %v8610_v22  ;;  %8745 = vmatmul.mubr.f32.vlgmr.msra.gmra.mrb[56].mxu0 %v8610_v22  ;;  %8816 = vmatmul.mubr.f32.vlgmr.msra.gmra.mrb[56].mxu1 %v8610_v22 }
0x1aa7   :  { %12099 = vmatpush1.bf16.msra.mxu0 %v15322_v15  ;;  %12131 = vmatpush1.bf16.msra.mxu1 %v15325_v61 }
0x1aa8   :  { %12101 = vmatprep.subr.bf16.mxu0 %v15330_v34  ;;  %12133 = vmatprep.subr.bf16.mxu1 %v15332_v27 }
0x1aa9   :  { %8983 = vmatprep.mubr.f32.mxu0 %v15629_v31  ;;  %9054 = vmatprep.mubr.f32.mxu1 %v15629_v31 }
0x1aab   :  { %12103 = vmatpush1.bf16.msra.mxu0 %v15334_v2  ;;  %12135 = vmatpush1.bf16.msra.mxu1 %v15337_v11 }
0x1aac   :  { %12105 = vmatprep.subr.bf16.mxu0 %v15342_v7  ;;  %12137 = vmatprep.subr.bf16.mxu1 %v15344_v46 }
0x1aaf   :  { %12107 = vmatpush1.bf16.msra.mxu0 %v15346_v33  ;;  %12139 = vmatpush1.bf16.msra.mxu1 %v15349_v47 }
0x1ab0   :  { %12109 = vmatprep.subr.bf16.mxu0 %v15354_v12  ;;  %12141 = vmatprep.subr.bf16.mxu1 %v15356_v43 }
0x1ab3   :  { %12111 = vmatpush1.bf16.msra.mxu0 %v15358_v35  ;;  %12143 = vmatpush1.bf16.msra.mxu1 %v15361_v19 }
0x1ab4   :  { %12113 = vmatprep.subr.bf16.mxu0 %v15366_v10  ;;  %12145 = vmatprep.subr.bf16.mxu1 %v15421_v8 }
0x1ab7   :  { %12115 = vmatpush1.bf16.msra.mxu0 %v15369_v59  ;;  %12147 = vmatpush1.bf16.msra.mxu1 %v15372_v20 }
0x1ab8   :  { %12117 = vmatprep.subr.bf16.mxu0 %v15425_v53  ;;  %12149 = vmatprep.subr.bf16.mxu1 %v15427_v60 }
0x1abb   :  { %12119 = vmatpush1.bf16.msra.mxu0 %v15375_v56  ;;  %12151 = vmatpush1.bf16.msra.mxu1 %v15429_v62 }
0x1abc   :  { %12121 = vmatprep.subr.bf16.mxu0 %v15432_v40  ;;  %12153 = vmatprep.subr.bf16.mxu1 %v15436_v38 }
0x1abf   :  { %12123 = vmatpush1.bf16.msra.mxu0 %v15438_v41  ;;  %12155 = vmatpush1.bf16.msra.mxu1 %v15442_v51 }
0x1ac0   :  { %12125 = vmatprep.subr.bf16.mxu0 %v15445_v28  ;;  %12157 = vmatprep.subr.bf16.mxu1 %v15447_v39 }
0x1ac3   :  { %12127 = vmatpush1.bf16.msra.mxu0 %v15450_v13  ;;  %12159 = vmatpush1.bf16.msra.mxu1 %v15454_v23 }
0x1ac4   :  { %12161 = vmatprep.subr.bf16.mxu0 %v15318_v3  ;;  %12193 = vmatprep.subr.bf16.mxu1 %v15320_v29 }
0x1b79   :  { %v8746_v5 = vpop.f32.mrb[56].mxu0  ;;  %v8817_v22 = vpop.f32.mrb[56].mxu1 }
0x1b7a   :  { %v12456_v44 = vadd.f32 %v8746_v5, %v15252_v16  ;;  %v8748_v45 = vpop.f32.mrb[57].mxu0  ;;  %v8819_v37 = vpop.f32.mrb[57].mxu1  ;;  %v12472_v6 = vadd.f32 %v8817_v22, %v15264_v24 }
0x1b7b   :  { %v12457_v14 = vadd.f32 %v8748_v45, %v15255_v1  ;;  %v12473_v63 = vadd.f32 %v8819_v37, %v15260_v30 }
0x1b7c   :  { %v9900_v26 = vmul.f32 -1.442695, %v12456_v44 }
0x1b7d   :  { %v9901_v18 = vmul.f32 -1.442695, %v12457_v14  ;;  %v9902_v32 = vmul.f32 -1.442695, %v12473_v63 }
0x1b7e   :  { %13111 = vpow2.f32 %v9900_v26 }
0x1b7f   :  { %13113 = vpow2.f32 %v9901_v18 }
0x1b80   :  { %13115 = vpow2.f32 %v9902_v32 }
0x1b81   :  { %13117 = vtanh.f32 %v12472_v6 }
0x1b88   :  { %v13112_v48 = vpop.eup %13111 }
0x1b89   :  { %v13114_v52 = vpop.eup %13113  ;;  %v8829_v25 = vadd.f32 1.0, %v13112_v48 }
0x1b8a   :  { %v8835_v17 = vadd.f32 1.0, %v13114_v52  ;;  %v13116_v0 = vpop.eup %13115 }
0x1b8b   :  { %13119 = vrcp.f32 %v8829_v25  ;;  %v13118_v9 = vpop.eup %13117  ;;  %v8842_v42 = vadd.f32 1.0, %v13116_v0 }
0x1b8c   :  { %13121 = vrcp.f32 %v8835_v17 }
0x1b8d   :  { %13123 = vrcp.f32 %v8842_v42 }
0x1b95   :  { %v13120_v36 = vpop.eup %13119 }
0x1b96   :  { %v13122_v55 = vpop.eup %13121  ;;  %v8846_v50 = vmul.f32 %v13120_v36, %v13118_v9 }
0x1b97   :  { %v8845_v57 = vmul.f32 %v13122_v55, %v15397_v4  ;;  %v13124_v49 = vpop.eup %13123 }
0x1b99   :  { %v15466_v58 = vadd.f32 %v8846_v50, %v8845_v57 }
0x1b9b   :  { %13125 = vtanh.f32 %v15466_v58 }
0x1ba5   :  { %v13126_v21 = vpop.eup %13125 }
0x1ba6   :  { %v8849_v54 = vmul.f32 %v13126_v21, %v13124_v49 }
0x1ba8   :  { %9903 = vst [vmem:[%s15596_s7 + $0x60] sm:$0xff] %v8849_v54  ;;  %8984 = vmatmul.mubr.f32.vlgmr.msra.gmra.mrb[54].mxu0 %v8849_v54  ;;  %9055 = vmatmul.mubr.f32.vlgmr.msra.gmra.mrb[54].mxu1 %v8849_v54 }
0x1ba9   :  { %12163 = vmatpush1.bf16.msra.mxu0 %v15322_v15  ;;  %12195 = vmatpush1.bf16.msra.mxu1 %v15325_v61 }
0x1baa   :  { %12165 = vmatprep.subr.bf16.mxu0 %v15330_v34  ;;  %12197 = vmatprep.subr.bf16.mxu1 %v15332_v27 }
0x1bab   :  { %9222 = vmatprep.mubr.f32.mxu0 %v15629_v31  ;;  %9293 = vmatprep.mubr.f32.mxu1 %v15629_v31 }
0x1bad   :  { %12167 = vmatpush1.bf16.msra.mxu0 %v15334_v2  ;;  %12199 = vmatpush1.bf16.msra.mxu1 %v15337_v11 }
0x1bae   :  { %12169 = vmatprep.subr.bf16.mxu0 %v15342_v7  ;;  %12201 = vmatprep.subr.bf16.mxu1 %v15344_v46 }
0x1bb1   :  { %12171 = vmatpush1.bf16.msra.mxu0 %v15346_v33  ;;  %12203 = vmatpush1.bf16.msra.mxu1 %v15349_v47 }
0x1bb2   :  { %12173 = vmatprep.subr.bf16.mxu0 %v15354_v12  ;;  %12205 = vmatprep.subr.bf16.mxu1 %v15356_v43 }
0x1bb5   :  { %12175 = vmatpush1.bf16.msra.mxu0 %v15358_v35  ;;  %12207 = vmatpush1.bf16.msra.mxu1 %v15361_v19 }
0x1bb6   :  { %12177 = vmatprep.subr.bf16.mxu0 %v15366_v10  ;;  %12209 = vmatprep.subr.bf16.mxu1 %v15421_v8 }
0x1bb9   :  { %12179 = vmatpush1.bf16.msra.mxu0 %v15369_v59  ;;  %12211 = vmatpush1.bf16.msra.mxu1 %v15372_v20 }
0x1bba   :  { %12181 = vmatprep.subr.bf16.mxu0 %v15425_v53  ;;  %12213 = vmatprep.subr.bf16.mxu1 %v15427_v60 }
0x1bbd   :  { %12183 = vmatpush1.bf16.msra.mxu0 %v15375_v56  ;;  %12215 = vmatpush1.bf16.msra.mxu1 %v15429_v62 }
0x1bbe   :  { %12185 = vmatprep.subr.bf16.mxu0 %v15432_v40  ;;  %12217 = vmatprep.subr.bf16.mxu1 %v15436_v38 }
0x1bc1   :  { %12187 = vmatpush1.bf16.msra.mxu0 %v15438_v41  ;;  %12219 = vmatpush1.bf16.msra.mxu1 %v15442_v51 }
0x1bc2   :  { %12189 = vmatprep.subr.bf16.mxu0 %v15445_v28  ;;  %12221 = vmatprep.subr.bf16.mxu1 %v15447_v39 }
0x1bc5   :  { %12191 = vmatpush1.bf16.msra.mxu0 %v15450_v13  ;;  %12223 = vmatpush1.bf16.msra.mxu1 %v15454_v23 }
0x1bc6   :  { %12225 = vmatprep.subr.bf16.mxu0 %v15318_v3  ;;  %12257 = vmatprep.subr.bf16.mxu1 %v15320_v29 }
0x1c7b   :  { %v8985_v4 = vpop.f32.mrb[54].mxu0  ;;  %v9056_v5 = vpop.f32.mrb[54].mxu1 }
0x1c7c   :  { %v12454_v22 = vadd.f32 %v8985_v4, %v15252_v16  ;;  %v8987_v44 = vpop.f32.mrb[55].mxu0  ;;  %v9058_v45 = vpop.f32.mrb[55].mxu1  ;;  %v12470_v32 = vadd.f32 %v9056_v5, %v15264_v24 }
0x1c7d   :  { %v12455_v37 = vadd.f32 %v8987_v44, %v15255_v1  ;;  %v12471_v18 = vadd.f32 %v9058_v45, %v15260_v30 }
0x1c7e   :  { %v9904_v14 = vmul.f32 -1.442695, %v12454_v22 }
0x1c7f   :  { %v9905_v26 = vmul.f32 -1.442695, %v12455_v37  ;;  %v9906_v63 = vmul.f32 -1.442695, %v12471_v18  ;;  %v9573_v37 = vld [vmem:[#allocation9 + $0x208] sm:$0xff] }
0x1c80   :  { %13127 = vpow2.f32 %v9904_v14  ;;  %v9577_v14 = vld [vmem:[#allocation9 + $0x228] sm:$0xff] }
0x1c81   :  { %13129 = vpow2.f32 %v9905_v26  ;;  %v9575_v26 = vld [vmem:[#allocation9 + $0x218] sm:$0xff]  ;;  %v12288_v18 = vpack.c.bf16 %v9577_v14, %v9573_v37  ;;  %v9605_v14 = vld [vmem:[#allocation9 + $0x308] sm:$0xff] }
0x1c82   :  { %13131 = vpow2.f32 %v9906_v63  ;;  %v9579_v63 = vld [vmem:[#allocation9 + $0x238] sm:$0xff] }
0x1c83   :  { %13133 = vtanh.f32 %v12470_v32  ;;  %v9572_v32 = vld [vmem:[#allocation9 + $0x200] sm:$0xff] }
0x1c8a   :  { %v13128_v3 = vpop.eup %13127 }
0x1c8b   :  { %v13130_v6 = vpop.eup %13129  ;;  %v9068_v29 = vadd.f32 1.0, %v13128_v3  ;;  %v9576_v3 = vld [vmem:[#allocation9 + $0x220] sm:$0xff] }
0x1c8c   :  { %v9074_v48 = vadd.f32 1.0, %v13130_v6  ;;  %v13132_v52 = vpop.eup %13131  ;;  %v12320_v6 = vpack.c.bf16 %v9579_v63, %v9575_v26  ;;  %v9609_v26 = vld [vmem:[#allocation9 + $0x328] sm:$0xff]  ;;  %v9604_v63 = vld [vmem:[#allocation9 + $0x300] sm:$0xff] }
0x1c8d   :  { %13135 = vrcp.f32 %v9068_v29  ;;  %v13134_v25 = vpop.eup %13133  ;;  %v9081_v36 = vadd.f32 1.0, %v13132_v52  ;;  %v12290_v29 = vpack.c.bf16 %v9576_v3, %v9572_v32  ;;  %v9578_v52 = vld [vmem:[#allocation9 + $0x230] sm:$0xff]  ;;  %v9608_v32 = vld [vmem:[#allocation9 + $0x320] sm:$0xff] }
0x1c8e   :  { %13137 = vrcp.f32 %v9074_v48  ;;  %v9574_v48 = vld [vmem:[#allocation9 + $0x210] sm:$0xff] }
0x1c8f   :  { %13139 = vrcp.f32 %v9081_v36  ;;  %v9587_v36 = vld [vmem:[#allocation9 + $0x278] sm:$0xff]  ;;  %v9606_v3 = vld [vmem:[#allocation9 + $0x310] sm:$0xff] }
0x1c97   :  { %v13136_v17 = vpop.eup %13135 }
0x1c98   :  { %v13138_v0 = vpop.eup %13137  ;;  %v9085_v9 = vmul.f32 %v13136_v17, %v13134_v25  ;;  %v12322_v25 = vpack.c.bf16 %v9578_v52, %v9574_v48  ;;  %v9581_v17 = vld [vmem:[#allocation9 + $0x248] sm:$0xff]  ;;  %v9612_v52 = vld [vmem:[#allocation9 + $0x340] sm:$0xff] }
0x1c99   :  { %v9084_v55 = vmul.f32 %v13138_v0, %v15466_v58  ;;  %v13140_v42 = vpop.eup %13139  ;;  %v9585_v0 = vld [vmem:[#allocation9 + $0x268] sm:$0xff] }
0x1c9b   :  { %v15511_v50 = vadd.f32 %v9085_v9, %v9084_v55  ;;  %v9583_v9 = vld [vmem:[#allocation9 + $0x258] sm:$0xff]  ;;  %v9580_v55 = vld [vmem:[#allocation9 + $0x240] sm:$0xff] }
0x1c9d   :  { %13141 = vtanh.f32 %v15511_v50 }
0x1ca7   :  { %v13142_v57 = vpop.eup %13141 }
0x1ca8   :  { %v9088_v49 = vmul.f32 %v13142_v57, %v13140_v42  ;;  %v12324_v42 = vpack.c.bf16 %v9587_v36, %v9583_v9 }
0x1caa   :  { %9907 = vst [vmem:[%s15596_s7 + $0x58] sm:$0xff] %v9088_v49  ;;  %9223 = vmatmul.mubr.f32.vlgmr.msra.gmra.mrb[52].mxu0 %v9088_v49  ;;  %9294 = vmatmul.mubr.f32.vlgmr.msra.gmra.mrb[52].mxu1 %v9088_v49  ;;  %v9582_v49 = vld [vmem:[#allocation9 + $0x250] sm:$0xff] }
0x1cab   :  { %12227 = vmatpush1.bf16.msra.mxu0 %v15322_v15  ;;  %12259 = vmatpush1.bf16.msra.mxu1 %v15325_v61 }
0x1cac   :  { %12229 = vmatprep.subr.bf16.mxu0 %v15330_v34  ;;  %12261 = vmatprep.subr.bf16.mxu1 %v15332_v27 }
0x1cad   :  { %9461 = vmatprep.mubr.f32.mxu0 %v15629_v31  ;;  %9532 = vmatprep.mubr.f32.mxu1 %v15629_v31 }
0x1caf   :  { %12231 = vmatpush1.bf16.msra.mxu0 %v15334_v2  ;;  %12263 = vmatpush1.bf16.msra.mxu1 %v15337_v11 }
0x1cb0   :  { %12233 = vmatprep.subr.bf16.mxu0 %v15342_v7  ;;  %12265 = vmatprep.subr.bf16.mxu1 %v15344_v46 }
0x1cb3   :  { %12235 = vmatpush1.bf16.msra.mxu0 %v15346_v33  ;;  %12267 = vmatpush1.bf16.msra.mxu1 %v15349_v47 }
0x1cb4   :  { %12237 = vmatprep.subr.bf16.mxu0 %v15354_v12  ;;  %12269 = vmatprep.subr.bf16.mxu1 %v15356_v43 }
0x1cb7   :  { %12239 = vmatpush1.bf16.msra.mxu0 %v15358_v35  ;;  %12271 = vmatpush1.bf16.msra.mxu1 %v15361_v19 }
0x1cb8   :  { %12241 = vmatprep.subr.bf16.mxu0 %v15366_v10  ;;  %12273 = vmatprep.subr.bf16.mxu1 %v15421_v8 }
0x1cbb   :  { %12243 = vmatpush1.bf16.msra.mxu0 %v15369_v59  ;;  %12275 = vmatpush1.bf16.msra.mxu1 %v15372_v20 }
0x1cbc   :  { %12245 = vmatprep.subr.bf16.mxu0 %v15425_v53  ;;  %12277 = vmatprep.subr.bf16.mxu1 %v15427_v60 }
0x1cbf   :  { %12247 = vmatpush1.bf16.msra.mxu0 %v15375_v56  ;;  %12279 = vmatpush1.bf16.msra.mxu1 %v15429_v62 }
0x1cc0   :  { %12249 = vmatprep.subr.bf16.mxu0 %v15432_v40  ;;  %12281 = vmatprep.subr.bf16.mxu1 %v15436_v38 }
0x1cc3   :  { %12251 = vmatpush1.bf16.msra.mxu0 %v15438_v41  ;;  %12283 = vmatpush1.bf16.msra.mxu1 %v15442_v51 }
0x1cc4   :  { %12253 = vmatprep.subr.bf16.mxu0 %v15445_v28  ;;  %12285 = vmatprep.subr.bf16.mxu1 %v15447_v39 }
0x1cc7   :  { %12255 = vmatpush1.bf16.msra.mxu0 %v15450_v13  ;;  %12287 = vmatpush1.bf16.msra.mxu1 %v15454_v23 }
0x1cc8   :  { %12289 = vmatprep.subr.bf16.mxu0 %v12288_v18  ;;  %12321 = vmatprep.subr.bf16.mxu1 %v12320_v6  ;;  %v12304_v18 = vpack.c.bf16 %v9609_v26, %v9605_v14  ;;  %v12306_v6 = vpack.c.bf16 %v9608_v32, %v9604_v63 }
0x1d7d   :  { %v9224_v15 = vpop.f32.mrb[52].mxu0  ;;  %v9295_v61 = vpop.f32.mrb[52].mxu1 }
0x1d7e   :  { %v12452_v34 = vadd.f32 %v9224_v15, %v15252_v16  ;;  %v9226_v27 = vpop.f32.mrb[53].mxu0  ;;  %v9297_v2 = vpop.f32.mrb[53].mxu1  ;;  %v12468_v12 = vadd.f32 %v9295_v61, %v15264_v24  ;;  %v9586_v15 = vld [vmem:[#allocation9 + $0x270] sm:$0xff] }
0x1d7f   :  { %v12453_v11 = vadd.f32 %v9226_v27, %v15255_v1  ;;  %v12469_v33 = vadd.f32 %v9297_v2, %v15260_v30  ;;  %v12326_v61 = vpack.c.bf16 %v9586_v15, %v9582_v49  ;;  %v9593_v27 = vld [vmem:[#allocation9 + $0x2a8] sm:$0xff]  ;;  %v9591_v2 = vld [vmem:[#allocation9 + $0x298] sm:$0xff] }
0x1d80   :  { %v9908_v7 = vmul.f32 -1.442695, %v12452_v34  ;;  %v9589_v34 = vld [vmem:[#allocation9 + $0x288] sm:$0xff] }
0x1d81   :  { %v9909_v46 = vmul.f32 -1.442695, %v12453_v11  ;;  %v9910_v47 = vmul.f32 -1.442695, %v12469_v33  ;;  %v12296_v11 = vpack.c.bf16 %v9593_v27, %v9589_v34  ;;  %v9592_v33 = vld [vmem:[#allocation9 + $0x2a0] sm:$0xff] }
0x1d82   :  { %13143 = vpow2.f32 %v9908_v7  ;;  %v9595_v7 = vld [vmem:[#allocation9 + $0x2b8] sm:$0xff] }
0x1d83   :  { %13145 = vpow2.f32 %v9909_v46  ;;  %v9588_v46 = vld [vmem:[#allocation9 + $0x280] sm:$0xff] }
0x1d84   :  { %13147 = vpow2.f32 %v9910_v47  ;;  %v12328_v47 = vpack.c.bf16 %v9595_v7, %v9591_v2 }
0x1d85   :  { %13149 = vtanh.f32 %v12468_v12  ;;  %v12298_v12 = vpack.c.bf16 %v9592_v33, %v9588_v46 }
0x1d8c   :  { %v13144_v43 = vpop.eup %13143 }
0x1d8d   :  { %v13146_v35 = vpop.eup %13145  ;;  %v9307_v19 = vadd.f32 1.0, %v13144_v43  ;;  %v9590_v43 = vld [vmem:[#allocation9 + $0x290] sm:$0xff] }
0x1d8e   :  { %v9313_v10 = vadd.f32 1.0, %v13146_v35  ;;  %v13148_v59 = vpop.eup %13147  ;;  %v9594_v35 = vld [vmem:[#allocation9 + $0x2b0] sm:$0xff] }
0x1d8f   :  { %13151 = vrcp.f32 %v9307_v19  ;;  %v13150_v20 = vpop.eup %13149  ;;  %v9320_v54 = vadd.f32 1.0, %v13148_v59  ;;  %v12330_v19 = vpack.c.bf16 %v9594_v35, %v9590_v43  ;;  %v9601_v59 = vld [vmem:[#allocation9 + $0x2e8] sm:$0xff] }
0x1d90   :  { %13153 = vrcp.f32 %v9313_v10  ;;  %v9597_v10 = vld [vmem:[#allocation9 + $0x2c8] sm:$0xff] }
0x1d91   :  { %13155 = vrcp.f32 %v9320_v54  ;;  %v9600_v54 = vld [vmem:[#allocation9 + $0x2e0] sm:$0xff] }
0x1d99   :  { %v13152_v56 = vpop.eup %13151 }
0x1d9a   :  { %v13154_v58 = vpop.eup %13153  ;;  %v9324_v21 = vmul.f32 %v13152_v56, %v13150_v20  ;;  %v9599_v20 = vld [vmem:[#allocation9 + $0x2d8] sm:$0xff]  ;;  %v12300_v56 = vpack.c.bf16 %v9601_v59, %v9597_v10 }
0x1d9b   :  { %v9323_v4 = vmul.f32 %v13154_v58, %v15511_v50  ;;  %v13156_v22 = vpop.eup %13155  ;;  %v9584_v50 = vld [vmem:[#allocation9 + $0x260] sm:$0xff]  ;;  %v9603_v58 = vld [vmem:[#allocation9 + $0x2f8] sm:$0xff] }
0x1d9c   :  { %v12294_v57 = vpack.c.bf16 %v9584_v50, %v9580_v55 }
0x1d9d   :  { %v15554_v5 = vadd.f32 %v9324_v21, %v9323_v4  ;;  %v9596_v21 = vld [vmem:[#allocation9 + $0x2c0] sm:$0xff]  ;;  %v12332_v4 = vpack.c.bf16 %v9603_v58, %v9599_v20 }
0x1d9f   :  { %13157 = vtanh.f32 %v15554_v5 }
0x1da9   :  { %v13158_v44 = vpop.eup %13157 }
0x1daa   :  { %v9327_v45 = vmul.f32 %v13158_v44, %v13156_v22  ;;  %v12302_v22 = vpack.c.bf16 %v9600_v54, %v9596_v21  ;;  %v9598_v44 = vld [vmem:[#allocation9 + $0x2d0] sm:$0xff] }
0x1dac   :  { %9911 = vst [vmem:[%s15596_s7 + $0x50] sm:$0xff] %v9327_v45  ;;  %9462 = vmatmul.mubr.f32.vlgmr.msra.gmra.mrb[50].mxu0 %v9327_v45  ;;  %9533 = vmatmul.mubr.f32.vlgmr.msra.gmra.mrb[50].mxu1 %v9327_v45  ;;  %v9602_v45 = vld [vmem:[#allocation9 + $0x2f0] sm:$0xff] }
0x1dad   :  { %9700 = vmatprep.mubr.f32.mxu0 %v15629_v31  ;;  %9771 = vmatprep.mubr.f32.mxu1 %v15629_v31  ;;  %v12292_v31 = vpack.c.bf16 %v9585_v0, %v9581_v17  ;;  %v12334_v37 = vpack.c.bf16 %v9602_v45, %v9598_v44 }
0x1dae   :  { %12291 = vmatpush1.bf16.msra.mxu0 %v12290_v29  ;;  %12323 = vmatpush1.bf16.msra.mxu1 %v12322_v25  ;;  %v9610_v29 = vld [vmem:[#allocation9 + $0x330] sm:$0xff]  ;;  %v9616_v25 = vld [vmem:[#allocation9 + $0x360] sm:$0xff] }
0x1daf   :  { %12293 = vmatprep.subr.bf16.mxu0 %v12292_v31  ;;  %12325 = vmatprep.subr.bf16.mxu1 %v12324_v42  ;;  %v12338_v48 = vpack.c.bf16 %v9610_v29, %v9606_v3  ;;  %v12310_v17 = vpack.c.bf16 %v9616_v25, %v9612_v52 }
0x1db2   :  { %12295 = vmatpush1.bf16.msra.mxu0 %v12294_v57  ;;  %12327 = vmatpush1.bf16.msra.mxu1 %v12326_v61 }
0x1db3   :  { %12297 = vmatprep.subr.bf16.mxu0 %v12296_v11  ;;  %12329 = vmatprep.subr.bf16.mxu1 %v12328_v47 }
0x1db6   :  { %12299 = vmatpush1.bf16.msra.mxu0 %v12298_v12  ;;  %12331 = vmatpush1.bf16.msra.mxu1 %v12330_v19 }
0x1db7   :  { %12301 = vmatprep.subr.bf16.mxu0 %v12300_v56  ;;  %12333 = vmatprep.subr.bf16.mxu1 %v12332_v4 }
0x1dba   :  { %12303 = vmatpush1.bf16.msra.mxu0 %v12302_v22  ;;  %12335 = vmatpush1.bf16.msra.mxu1 %v12334_v37 }
0x1dbb   :  { %12337 = vmatprep.subr.bf16.mxu1 %v15421_v8  ;;  %12305 = vmatprep.subr.bf16.mxu0 %v12304_v18 }
0x1dbe   :  { %12307 = vmatpush1.bf16.msra.mxu0 %v12306_v6  ;;  %12339 = vmatpush1.bf16.msra.mxu1 %v12338_v48 }
0x1dbf   :  { %12309 = vmatprep.subr.bf16.mxu0 %v15425_v53  ;;  %12341 = vmatprep.subr.bf16.mxu1 %v15427_v60 }
0x1dc2   :  { %12311 = vmatpush1.bf16.msra.mxu0 %v12310_v17  ;;  %12343 = vmatpush1.bf16.msra.mxu1 %v15429_v62 }
0x1dc3   :  { %12313 = vmatprep.subr.bf16.mxu0 %v15432_v40  ;;  %12345 = vmatprep.subr.bf16.mxu1 %v15436_v38 }
0x1dc6   :  { %12315 = vmatpush1.bf16.msra.mxu0 %v15438_v41  ;;  %12347 = vmatpush1.bf16.msra.mxu1 %v15442_v51 }
0x1dc7   :  { %12317 = vmatprep.subr.bf16.mxu0 %v15445_v28  ;;  %12349 = vmatprep.subr.bf16.mxu1 %v15447_v39 }
0x1dca   :  { %12319 = vmatpush1.bf16.msra.mxu0 %v15450_v13  ;;  %12351 = vmatpush1.bf16.msra.mxu1 %v15454_v23 }
0x1e7f   :  { %v9463_v8 = vpop.f32.mrb[50].mxu0  ;;  %v9534_v53 = vpop.f32.mrb[50].mxu1 }
0x1e80   :  { %v12450_v60 = vadd.f32 %v9463_v8, %v15252_v16  ;;  %v9465_v62 = vpop.f32.mrb[51].mxu0  ;;  %v9536_v40 = vpop.f32.mrb[51].mxu1  ;;  %v12466_v39 = vadd.f32 %v9534_v53, %v15264_v24 }
0x1e81   :  { %v12451_v38 = vadd.f32 %v9465_v62, %v15255_v1  ;;  %v12467_v51 = vadd.f32 %v9536_v40, %v15260_v30 }
0x1e82   :  { %v9912_v0 = vmul.f32 -1.442695, %v12450_v60 }
0x1e83   :  { %v9913_v41 = vmul.f32 -1.442695, %v12451_v38  ;;  %v9914_v28 = vmul.f32 -1.442695, %v12467_v51 }
0x1e84   :  { %13159 = vpow2.f32 %v9912_v0 }
0x1e85   :  { %13161 = vpow2.f32 %v9913_v41 }
0x1e86   :  { %13163 = vpow2.f32 %v9914_v28 }
0x1e87   :  { %13165 = vtanh.f32 %v12466_v39 }
0x1e8e   :  { %v13160_v13 = vpop.eup %13159 }
0x1e8f   :  { %v13162_v9 = vpop.eup %13161  ;;  %v9546_v23 = vadd.f32 1.0, %v13160_v13 }
0x1e90   :  { %v9552_v31 = vadd.f32 1.0, %v13162_v9  ;;  %v13164_v36 = vpop.eup %13163 }
0x1e91   :  { %13167 = vrcp.f32 %v9546_v23  ;;  %v13166_v55 = vpop.eup %13165  ;;  %v9559_v49 = vadd.f32 1.0, %v13164_v36 }
0x1e92   :  { %13169 = vrcp.f32 %v9552_v31 }
0x1e93   :  { %13171 = vrcp.f32 %v9559_v49 }
0x1e9b   :  { %v13168_v50 = vpop.eup %13167 }
0x1e9c   :  { %v13170_v42 = vpop.eup %13169  ;;  %v9563_v57 = vmul.f32 %v13168_v50, %v13166_v55 }
0x1e9d   :  { %v9562_v15 = vmul.f32 %v13170_v42, %v15554_v5  ;;  %v13172_v34 = vpop.eup %13171 }
0x1e9f   :  { %v9564_v61 = vadd.f32 %v9563_v57, %v9562_v15 }
0x1ea1   :  { %13173 = vtanh.f32 %v9564_v61 }
0x1eab   :  { %v13174_v27 = vpop.eup %13173 }
0x1eac   :  { %v9566_v2 = vmul.f32 %v13174_v27, %v13172_v34 }
0x1eae   :  { %9915 = vst [vmem:[%s15596_s7 + $0x48] sm:$0xff] %v9566_v2  ;;  %9701 = vmatmul.mubr.f32.vlgmr.msra.gmra.mrb[48].mxu0 %v9566_v2  ;;  %9772 = vmatmul.mubr.f32.vlgmr.msra.gmra.mrb[48].mxu1 %v9566_v2 }
0x1f81   :  { %v9702_v11 = vpop.f32.mrb[48].mxu0  ;;  %v9773_v7 = vpop.f32.mrb[48].mxu1 }
0x1f82   :  { %v12448_v46 = vadd.f32 %v9702_v11, %v15252_v16  ;;  %v9704_v33 = vpop.f32.mrb[49].mxu0  ;;  %v9775_v47 = vpop.f32.mrb[49].mxu1  ;;  %v12464_v10 = vadd.f32 %v9773_v7, %v15264_v24 }
0x1f83   :  { %v12449_v5 = vadd.f32 %v9704_v33, %v15255_v1  ;;  %v12465_v35 = vadd.f32 %v9775_v47, %v15260_v30 }
0x1f84   :  { %v9916_v12 = vmul.f32 -1.442695, %v12448_v46 }
0x1f85   :  { %v9917_v43 = vmul.f32 -1.442695, %v12449_v5  ;;  %v9918_v19 = vmul.f32 -1.442695, %v12465_v35 }
0x1f86   :  { %13175 = vpow2.f32 %v9916_v12 }
0x1f87   :  { %13177 = vpow2.f32 %v9917_v43 }
0x1f88   :  { %13179 = vpow2.f32 %v9918_v19 }
0x1f89   :  { %13181 = vtanh.f32 %v12464_v10 }
0x1f90   :  { %v13176_v59 = vpop.eup %13175 }
0x1f91   :  { %v13178_v20 = vpop.eup %13177  ;;  %v9785_v56 = vadd.f32 1.0, %v13176_v59 }
0x1f92   :  { %v9791_v58 = vadd.f32 1.0, %v13178_v20  ;;  %v13180_v16 = vpop.eup %13179 }
0x1f93   :  { %13183 = vrcp.f32 %v9785_v56  ;;  %v13182_v21 = vpop.eup %13181  ;;  %v9798_v22 = vadd.f32 1.0, %v13180_v16 }
0x1f94   :  { %13185 = vrcp.f32 %v9791_v58 }
0x1f95   :  { %13187 = vrcp.f32 %v9798_v22 }
0x1f9d   :  { %v13184_v1 = vpop.eup %13183 }
0x1f9e   :  { %v13186_v54 = vpop.eup %13185  ;;  %v9802_v4 = vmul.f32 %v13184_v1, %v13182_v21 }
0x1f9f   :  { %v9801_v44 = vmul.f32 %v13186_v54, %v9564_v61  ;;  %v13188_v30 = vpop.eup %13187 }
0x1fa1   :  { %v9803_v45 = vadd.f32 %v9802_v4, %v9801_v44 }
0x1fa3   :  { %13189 = vtanh.f32 %v9803_v45 }
0x1fad   :  { %v13190_v24 = vpop.eup %13189 }
0x1fae   :  { %v9805_v37 = vmul.f32 %v13190_v24, %v13188_v30 }
0x1fb0   :  { %9919 = vst [vmem:[%s15596_s7 + $0x40] sm:$0xff] %v9805_v37 }
0x1fb1   :  { %9811 = vsyncpa [#allocation5], 1 }
0x1fb2   :  { %9812 = vsyncpa [#allocation7], 1 }
0x1fb3   :  { %9813 = vsyncpa [#allocation10], 1 }

</bundles_post_ra>
